<compile_context>
chip_gen: v5e
topology: v5e:2x2
jax: 0.10.0
libtpu: 0.0.40
codegen_flags: <defaults>
</compile_context>

<pallas_src>
import jax
import jax.numpy as jnp
from jax.experimental import pallas as pl
from jax.experimental.pallas import tpu as pltpu

POOL_K = 5
POOL_S = 3
OUT_HW = 4            # (14 - 5) // 3 + 1
CONV_OUT = 128
FC1_IN = 2048         # 128 * 4 * 4
FC1_OUT = 1024
DROP_P = 0.7
_DROP_THRESH = int(round(DROP_P * (1 << 32)))   # keep iff u32 bits >= this
_KEEP_SCALE = 1.0 / (1.0 - DROP_P)


def side_branch_kernel(x_ref, w1t_ref, b1_ref, wfc1_ref, bfc1_ref,
                       wfc2t_ref, bfc2_ref, bits_ref, out_ref):
    tb = x_ref.shape[0]
    inv_win = jnp.float32(1.0 / (POOL_K * POOL_K))

    x = x_ref[...]                                   # (tb, 14, 14, C) f32

    # --- AvgPool2d(5, stride=3), f32, separable (rows then cols) ----------
    row_sums = [jnp.sum(x[:, POOL_S * oh:POOL_S * oh + POOL_K, :, :], axis=1)
                for oh in range(OUT_HW)]             # each (tb, 14, C)
    pooled_blocks = []                               # s-major, s = oh*4 + ow
    for oh in range(OUT_HW):
        for ow in range(OUT_HW):
            win = row_sums[oh][:, POOL_S * ow:POOL_S * ow + POOL_K, :]
            pooled_blocks.append(jnp.sum(win, axis=1) * inv_win)   # (tb, C)
    pooled = jnp.concatenate(pooled_blocks, axis=0)  # (16*tb, C), s-major rows

    # --- 1x1 conv as one matmul over all 16 pooled positions, + bias, ReLU -
    y = jnp.dot(pooled.astype(jnp.bfloat16), w1t_ref[...],
                preferred_element_type=jnp.float32)  # (16*tb, 128)
    y = jnp.maximum(y + b1_ref[...], 0.0)

    # --- flatten in PyTorch order: feat[b, s*128 + k] -----------------------
    feat = jnp.concatenate(
        [y[s * tb:(s + 1) * tb, :] for s in range(OUT_HW * OUT_HW)],
        axis=-1)                                     # (tb, 2048)

    # --- fc_1: single K=2048 matmul (weight re-blocked in wrapper) ---------
    h1 = jnp.dot(feat.astype(jnp.bfloat16), wfc1_ref[...],
                 preferred_element_type=jnp.float32) # (tb, 1024)
    h1 = jnp.maximum(h1 + bfc1_ref[...], 0.0)

    # --- dropout(p=0.7, train=True), inverted scaling ------------------------
    keep = bits_ref[...] >= jnp.uint32(_DROP_THRESH)
    h1 = jnp.where(keep, h1 * jnp.float32(_KEEP_SCALE), 0.0)

    # --- fc_2 (output padded to 128 lanes; wrapper slices to num_classes) ---
    out = jnp.dot(h1.astype(jnp.bfloat16), wfc2t_ref[...],
                  preferred_element_type=jnp.float32)
    out_ref[...] = (out + bfc2_ref[...]).astype(out_ref.dtype)


def side_branch(x_nchw, params, key):
    B, C, H, W = x_nchw.shape
    assert (H - POOL_K) // POOL_S + 1 == OUT_HW
    assert (W - POOL_K) // POOL_S + 1 == OUT_HW
    num_classes = params["wfc2"].shape[0]
    out_pad = ((num_classes + 127) // 128) * 128

    # Batch tile: whole batch if small, otherwise MXU-friendly 256-row tiles.
    tb = B if B <= 256 else 256
    assert B % tb == 0, "batch must divide evenly into batch tiles"
    grid = (B // tb,)

    # NHWC, kept f32: the pool runs in f32 (like torch); matmul casts to bf16.
    x_nhwc = jnp.transpose(x_nchw, (0, 2, 3, 1)).astype(jnp.float32)

    # Conv2d(C, 128, 1) weight (128, C, 1, 1) -> (C, 128), bf16 for the MXU.
    w1t = jnp.transpose(params["w1"].reshape(CONV_OUT, C)).astype(jnp.bfloat16)
    b1 = params["b1"].reshape(1, CONV_OUT).astype(jnp.float32)

    # fc_1 weight (1024, 2048); PyTorch flatten index j = c*16 + s (s = oh*4+ow).
    # Kernel concatenation order is i = s*128 + c, so re-block:
    #   wfc1_k[s*128 + c, m] = wfc1[m, c*16 + s]
    wfc1_k = jnp.transpose(
        params["wfc1"].reshape(FC1_OUT, CONV_OUT, OUT_HW * OUT_HW),
        (2, 1, 0)).reshape(FC1_IN, FC1_OUT).astype(jnp.bfloat16)
    bfc1 = params["bfc1"].reshape(1, FC1_OUT).astype(jnp.float32)

    # fc_2: transpose + zero-pad the class dim to a full 128-lane store.
    wfc2t = jnp.zeros((FC1_OUT, out_pad), jnp.float32).at[:, :num_classes].set(
        jnp.transpose(params["wfc2"])).astype(jnp.bfloat16)
    bfc2 = jnp.zeros((1, out_pad), jnp.float32).at[:, :num_classes].set(
        params["bfc2"].reshape(1, num_classes))

    # Counter-based dropout randomness generated outside the kernel.
    # TODO(synk): RNG stream differs from torch's; p/scaling semantics match.
    bits = jax.random.bits(key, (B, FC1_OUT), dtype=jnp.uint32)

    def const_spec(shape):
        return pl.BlockSpec(shape, lambda i, _s=shape: tuple(0 for _ in _s))

    out = pl.pallas_call(
        side_branch_kernel,
        out_shape=jax.ShapeDtypeStruct((B, out_pad), jnp.float32),
        grid=grid,
        in_specs=[
            pl.BlockSpec((tb, H, W, C), lambda i: (i, 0, 0, 0)),   # x tile
            const_spec((C, CONV_OUT)),                              # w1t
            const_spec((1, CONV_OUT)),                              # b1
            const_spec((FC1_IN, FC1_OUT)),                          # wfc1_k
            const_spec((1, FC1_OUT)),                               # bfc1
            const_spec((FC1_OUT, out_pad)),                         # wfc2t
            const_spec((1, out_pad)),                               # bfc2
            pl.BlockSpec((tb, FC1_OUT), lambda i: (i, 0)),          # dropout bits
        ],
        out_specs=pl.BlockSpec((tb, out_pad), lambda i: (i, 0)),
        compiler_params=pltpu.CompilerParams(
            dimension_semantics=("parallel",),
            vmem_limit_bytes=24 << 20),
    )(x_nhwc, w1t, b1, wfc1_k, bfc1, wfc2t, bfc2, bits)
    return out[:, :num_classes]


def init_params(key, in_channels, num_classes):
    ks = jax.random.split(key, 6)

    def u(k, shape, fan_in):
        bound = 1.0 / jnp.sqrt(fan_in)
        return jax.random.uniform(k, shape, jnp.float32, -bound, bound)

    return {
        "w1":   u(ks[0], (CONV_OUT, in_channels, 1, 1), in_channels),
        "b1":   u(ks[1], (CONV_OUT,), in_channels),
        "wfc1": u(ks[2], (FC1_OUT, FC1_IN), FC1_IN),
        "bfc1": u(ks[3], (FC1_OUT,), FC1_IN),
        "wfc2": u(ks[4], (num_classes, FC1_OUT), FC1_OUT),
        "bfc2": u(ks[5], (num_classes,), FC1_OUT),
    }


if __name__ == "__main__":
    key = jax.random.PRNGKey(0)
    k_x, k_p, k_drop = jax.random.split(key, 3)

    B, C, H, W = 2, 16, 14, 14        # H=W=14 required by fc_1 in_features=2048
    num_classes = 10

    x = jax.random.normal(k_x, (B, C, H, W), dtype=jnp.float32)
    params = init_params(k_p, C, num_classes)

    out = side_branch(x, params, k_drop)
    out = jax.block_until_ready(out)
    assert out.shape == (B, num_classes) and bool(jnp.all(jnp.isfinite(out)))
    print("KERNEL_OK")
</pallas_src>

<mosaic_0001>
module attributes {stable_mosaic.version = 11 : i64} {
  func.func @side_branch_kernel(%arg0: i32, %arg1: memref<2x14x14x16xf32, #tpu.memory_space<vmem>>, %arg2: memref<16x128xbf16, #tpu.memory_space<vmem>>, %arg3: memref<1x128xf32, #tpu.memory_space<vmem>>, %arg4: memref<2048x1024xbf16, #tpu.memory_space<vmem>>, %arg5: memref<1x1024xf32, #tpu.memory_space<vmem>>, %arg6: memref<1024x128xbf16, #tpu.memory_space<vmem>>, %arg7: memref<1x128xf32, #tpu.memory_space<vmem>>, %arg8: memref<2x1024xi32, #tpu.memory_space<vmem>>, %arg9: memref<2x128xf32, #tpu.memory_space<vmem>>) attributes {dimension_semantics = [#tpu.dimension_semantics<parallel>], iteration_bounds = array<i64: 1>, scalar_prefetch = 0 : i64, scratch_operands = 0 : i64, tpu.core_type = #tpu.core_type<tc>, window_params = [{transform_indices = @transform_0, window_bounds = array<i64: 2, 14, 14, 16>}, {pipeline_mode = #tpu.pipeline_mode<synchronous>, transform_indices = @transform_1, window_bounds = array<i64: 16, 128>}, {pipeline_mode = #tpu.pipeline_mode<synchronous>, transform_indices = @transform_2, window_bounds = array<i64: 1, 128>}, {pipeline_mode = #tpu.pipeline_mode<synchronous>, transform_indices = @transform_3, window_bounds = array<i64: 2048, 1024>}, {pipeline_mode = #tpu.pipeline_mode<synchronous>, transform_indices = @transform_4, window_bounds = array<i64: 1, 1024>}, {pipeline_mode = #tpu.pipeline_mode<synchronous>, transform_indices = @transform_5, window_bounds = array<i64: 1024, 128>}, {pipeline_mode = #tpu.pipeline_mode<synchronous>, transform_indices = @transform_6, window_bounds = array<i64: 1, 128>}, {transform_indices = @transform_7, window_bounds = array<i64: 2, 1024>}, {transform_indices = @transform_8, window_bounds = array<i64: 2, 128>}]} {
    %c0 = arith.constant 0 : index
    %c0_0 = arith.constant 0 : index
    %c0_1 = arith.constant 0 : index
    %c0_2 = arith.constant 0 : index
    %0 = vector.load %arg1[%c0, %c0_0, %c0_1, %c0_2] : memref<2x14x14x16xf32, #tpu.memory_space<vmem>>, vector<2x14x14x16xf32>
    %1 = vector.extract_strided_slice %0 {offsets = [0, 0, 0, 0], sizes = [2, 5, 14, 16], strides = [1, 1, 1, 1]} : vector<2x14x14x16xf32> to vector<2x5x14x16xf32>
    %cst = arith.constant dense<0.000000e+00> : vector<2x14x16xf32>
    %2 = vector.multi_reduction <add>, %1, %cst [1] : vector<2x5x14x16xf32> to vector<2x14x16xf32>
    %3 = vector.extract_strided_slice %0 {offsets = [0, 3, 0, 0], sizes = [2, 5, 14, 16], strides = [1, 1, 1, 1]} : vector<2x14x14x16xf32> to vector<2x5x14x16xf32>
    %cst_3 = arith.constant dense<0.000000e+00> : vector<2x14x16xf32>
    %4 = vector.multi_reduction <add>, %3, %cst_3 [1] : vector<2x5x14x16xf32> to vector<2x14x16xf32>
    %5 = vector.extract_strided_slice %0 {offsets = [0, 6, 0, 0], sizes = [2, 5, 14, 16], strides = [1, 1, 1, 1]} : vector<2x14x14x16xf32> to vector<2x5x14x16xf32>
    %cst_4 = arith.constant dense<0.000000e+00> : vector<2x14x16xf32>
    %6 = vector.multi_reduction <add>, %5, %cst_4 [1] : vector<2x5x14x16xf32> to vector<2x14x16xf32>
    %7 = vector.extract_strided_slice %0 {offsets = [0, 9, 0, 0], sizes = [2, 5, 14, 16], strides = [1, 1, 1, 1]} : vector<2x14x14x16xf32> to vector<2x5x14x16xf32>
    %cst_5 = arith.constant dense<0.000000e+00> : vector<2x14x16xf32>
    %8 = vector.multi_reduction <add>, %7, %cst_5 [1] : vector<2x5x14x16xf32> to vector<2x14x16xf32>
    %9 = vector.extract_strided_slice %2 {offsets = [0, 0, 0], sizes = [2, 5, 16], strides = [1, 1, 1]} : vector<2x14x16xf32> to vector<2x5x16xf32>
    %cst_6 = arith.constant dense<0.000000e+00> : vector<2x16xf32>
    %10 = vector.multi_reduction <add>, %9, %cst_6 [1] : vector<2x5x16xf32> to vector<2x16xf32>
    %cst_7 = arith.constant 4.000000e-02 : f32
    %11 = vector.broadcast %cst_7 : f32 to vector<2x16xf32>
    %12 = arith.mulf %10, %11 : vector<2x16xf32>
    %13 = vector.extract_strided_slice %2 {offsets = [0, 3, 0], sizes = [2, 5, 16], strides = [1, 1, 1]} : vector<2x14x16xf32> to vector<2x5x16xf32>
    %cst_8 = arith.constant dense<0.000000e+00> : vector<2x16xf32>
    %14 = vector.multi_reduction <add>, %13, %cst_8 [1] : vector<2x5x16xf32> to vector<2x16xf32>
    %cst_9 = arith.constant 4.000000e-02 : f32
    %15 = vector.broadcast %cst_9 : f32 to vector<2x16xf32>
    %16 = arith.mulf %14, %15 : vector<2x16xf32>
    %17 = vector.extract_strided_slice %2 {offsets = [0, 6, 0], sizes = [2, 5, 16], strides = [1, 1, 1]} : vector<2x14x16xf32> to vector<2x5x16xf32>
    %cst_10 = arith.constant dense<0.000000e+00> : vector<2x16xf32>
    %18 = vector.multi_reduction <add>, %17, %cst_10 [1] : vector<2x5x16xf32> to vector<2x16xf32>
    %cst_11 = arith.constant 4.000000e-02 : f32
    %19 = vector.broadcast %cst_11 : f32 to vector<2x16xf32>
    %20 = arith.mulf %18, %19 : vector<2x16xf32>
    %21 = vector.extract_strided_slice %2 {offsets = [0, 9, 0], sizes = [2, 5, 16], strides = [1, 1, 1]} : vector<2x14x16xf32> to vector<2x5x16xf32>
    %cst_12 = arith.constant dense<0.000000e+00> : vector<2x16xf32>
    %22 = vector.multi_reduction <add>, %21, %cst_12 [1] : vector<2x5x16xf32> to vector<2x16xf32>
    %cst_13 = arith.constant 4.000000e-02 : f32
    %23 = vector.broadcast %cst_13 : f32 to vector<2x16xf32>
    %24 = arith.mulf %22, %23 : vector<2x16xf32>
    %25 = vector.extract_strided_slice %4 {offsets = [0, 0, 0], sizes = [2, 5, 16], strides = [1, 1, 1]} : vector<2x14x16xf32> to vector<2x5x16xf32>
    %cst_14 = arith.constant dense<0.000000e+00> : vector<2x16xf32>
    %26 = vector.multi_reduction <add>, %25, %cst_14 [1] : vector<2x5x16xf32> to vector<2x16xf32>
    %cst_15 = arith.constant 4.000000e-02 : f32
    %27 = vector.broadcast %cst_15 : f32 to vector<2x16xf32>
    %28 = arith.mulf %26, %27 : vector<2x16xf32>
    %29 = vector.extract_strided_slice %4 {offsets = [0, 3, 0], sizes = [2, 5, 16], strides = [1, 1, 1]} : vector<2x14x16xf32> to vector<2x5x16xf32>
    %cst_16 = arith.constant dense<0.000000e+00> : vector<2x16xf32>
    %30 = vector.multi_reduction <add>, %29, %cst_16 [1] : vector<2x5x16xf32> to vector<2x16xf32>
    %cst_17 = arith.constant 4.000000e-02 : f32
    %31 = vector.broadcast %cst_17 : f32 to vector<2x16xf32>
    %32 = arith.mulf %30, %31 : vector<2x16xf32>
    %33 = vector.extract_strided_slice %4 {offsets = [0, 6, 0], sizes = [2, 5, 16], strides = [1, 1, 1]} : vector<2x14x16xf32> to vector<2x5x16xf32>
    %cst_18 = arith.constant dense<0.000000e+00> : vector<2x16xf32>
    %34 = vector.multi_reduction <add>, %33, %cst_18 [1] : vector<2x5x16xf32> to vector<2x16xf32>
    %cst_19 = arith.constant 4.000000e-02 : f32
    %35 = vector.broadcast %cst_19 : f32 to vector<2x16xf32>
    %36 = arith.mulf %34, %35 : vector<2x16xf32>
    %37 = vector.extract_strided_slice %4 {offsets = [0, 9, 0], sizes = [2, 5, 16], strides = [1, 1, 1]} : vector<2x14x16xf32> to vector<2x5x16xf32>
    %cst_20 = arith.constant dense<0.000000e+00> : vector<2x16xf32>
    %38 = vector.multi_reduction <add>, %37, %cst_20 [1] : vector<2x5x16xf32> to vector<2x16xf32>
    %cst_21 = arith.constant 4.000000e-02 : f32
    %39 = vector.broadcast %cst_21 : f32 to vector<2x16xf32>
    %40 = arith.mulf %38, %39 : vector<2x16xf32>
    %41 = vector.extract_strided_slice %6 {offsets = [0, 0, 0], sizes = [2, 5, 16], strides = [1, 1, 1]} : vector<2x14x16xf32> to vector<2x5x16xf32>
    %cst_22 = arith.constant dense<0.000000e+00> : vector<2x16xf32>
    %42 = vector.multi_reduction <add>, %41, %cst_22 [1] : vector<2x5x16xf32> to vector<2x16xf32>
    %cst_23 = arith.constant 4.000000e-02 : f32
    %43 = vector.broadcast %cst_23 : f32 to vector<2x16xf32>
    %44 = arith.mulf %42, %43 : vector<2x16xf32>
    %45 = vector.extract_strided_slice %6 {offsets = [0, 3, 0], sizes = [2, 5, 16], strides = [1, 1, 1]} : vector<2x14x16xf32> to vector<2x5x16xf32>
    %cst_24 = arith.constant dense<0.000000e+00> : vector<2x16xf32>
    %46 = vector.multi_reduction <add>, %45, %cst_24 [1] : vector<2x5x16xf32> to vector<2x16xf32>
    %cst_25 = arith.constant 4.000000e-02 : f32
    %47 = vector.broadcast %cst_25 : f32 to vector<2x16xf32>
    %48 = arith.mulf %46, %47 : vector<2x16xf32>
    %49 = vector.extract_strided_slice %6 {offsets = [0, 6, 0], sizes = [2, 5, 16], strides = [1, 1, 1]} : vector<2x14x16xf32> to vector<2x5x16xf32>
    %cst_26 = arith.constant dense<0.000000e+00> : vector<2x16xf32>
    %50 = vector.multi_reduction <add>, %49, %cst_26 [1] : vector<2x5x16xf32> to vector<2x16xf32>
    %cst_27 = arith.constant 4.000000e-02 : f32
    %51 = vector.broadcast %cst_27 : f32 to vector<2x16xf32>
    %52 = arith.mulf %50, %51 : vector<2x16xf32>
    %53 = vector.extract_strided_slice %6 {offsets = [0, 9, 0], sizes = [2, 5, 16], strides = [1, 1, 1]} : vector<2x14x16xf32> to vector<2x5x16xf32>
    %cst_28 = arith.constant dense<0.000000e+00> : vector<2x16xf32>
    %54 = vector.multi_reduction <add>, %53, %cst_28 [1] : vector<2x5x16xf32> to vector<2x16xf32>
    %cst_29 = arith.constant 4.000000e-02 : f32
    %55 = vector.broadcast %cst_29 : f32 to vector<2x16xf32>
    %56 = arith.mulf %54, %55 : vector<2x16xf32>
    %57 = vector.extract_strided_slice %8 {offsets = [0, 0, 0], sizes = [2, 5, 16], strides = [1, 1, 1]} : vector<2x14x16xf32> to vector<2x5x16xf32>
    %cst_30 = arith.constant dense<0.000000e+00> : vector<2x16xf32>
    %58 = vector.multi_reduction <add>, %57, %cst_30 [1] : vector<2x5x16xf32> to vector<2x16xf32>
    %cst_31 = arith.constant 4.000000e-02 : f32
    %59 = vector.broadcast %cst_31 : f32 to vector<2x16xf32>
    %60 = arith.mulf %58, %59 : vector<2x16xf32>
    %61 = vector.extract_strided_slice %8 {offsets = [0, 3, 0], sizes = [2, 5, 16], strides = [1, 1, 1]} : vector<2x14x16xf32> to vector<2x5x16xf32>
    %cst_32 = arith.constant dense<0.000000e+00> : vector<2x16xf32>
    %62 = vector.multi_reduction <add>, %61, %cst_32 [1] : vector<2x5x16xf32> to vector<2x16xf32>
    %cst_33 = arith.constant 4.000000e-02 : f32
    %63 = vector.broadcast %cst_33 : f32 to vector<2x16xf32>
    %64 = arith.mulf %62, %63 : vector<2x16xf32>
    %65 = vector.extract_strided_slice %8 {offsets = [0, 6, 0], sizes = [2, 5, 16], strides = [1, 1, 1]} : vector<2x14x16xf32> to vector<2x5x16xf32>
    %cst_34 = arith.constant dense<0.000000e+00> : vector<2x16xf32>
    %66 = vector.multi_reduction <add>, %65, %cst_34 [1] : vector<2x5x16xf32> to vector<2x16xf32>
    %cst_35 = arith.constant 4.000000e-02 : f32
    %67 = vector.broadcast %cst_35 : f32 to vector<2x16xf32>
    %68 = arith.mulf %66, %67 : vector<2x16xf32>
    %69 = vector.extract_strided_slice %8 {offsets = [0, 9, 0], sizes = [2, 5, 16], strides = [1, 1, 1]} : vector<2x14x16xf32> to vector<2x5x16xf32>
    %cst_36 = arith.constant dense<0.000000e+00> : vector<2x16xf32>
    %70 = vector.multi_reduction <add>, %69, %cst_36 [1] : vector<2x5x16xf32> to vector<2x16xf32>
    %cst_37 = arith.constant 4.000000e-02 : f32
    %71 = vector.broadcast %cst_37 : f32 to vector<2x16xf32>
    %72 = arith.mulf %70, %71 : vector<2x16xf32>
    %73 = tpu.concatenate %12, %16, %20, %24, %28, %32, %36, %40, %44, %48, %52, %56, %60, %64, %68, %72 in 0 : vector<2x16xf32>, vector<2x16xf32>, vector<2x16xf32>, vector<2x16xf32>, vector<2x16xf32>, vector<2x16xf32>, vector<2x16xf32>, vector<2x16xf32>, vector<2x16xf32>, vector<2x16xf32>, vector<2x16xf32>, vector<2x16xf32>, vector<2x16xf32>, vector<2x16xf32>, vector<2x16xf32>, vector<2x16xf32> -> vector<32x16xf32>
    %74 = arith.truncf %73 : vector<32x16xf32> to vector<32x16xbf16>
    %c0_38 = arith.constant 0 : index
    %c0_39 = arith.constant 0 : index
    %75 = vector.load %arg2[%c0_38, %c0_39] : memref<16x128xbf16, #tpu.memory_space<vmem>>, vector<16x128xbf16>
    %cst_40 = arith.constant dense<0.000000e+00> : vector<32x128xf32>
    %76 = tpu.matmul %74, %75, %cst_40 {dimension_numbers = #tpu.dot_dimension_numbers<[1], [0], [0], [1], [0, 0, 1, 1], [], []>} : vector<32x16xbf16>, vector<16x128xbf16>, vector<32x128xf32> -> vector<32x128xf32>
    %c0_41 = arith.constant 0 : index
    %c0_42 = arith.constant 0 : index
    %77 = vector.load %arg3[%c0_41, %c0_42] : memref<1x128xf32, #tpu.memory_space<vmem>>, vector<1x128xf32>
    %78 = vector.broadcast %77 : vector<1x128xf32> to vector<32x128xf32>
    %79 = arith.addf %76, %78 : vector<32x128xf32>
    %cst_43 = arith.constant 0.000000e+00 : f32
    %80 = vector.broadcast %cst_43 : f32 to vector<32x128xf32>
    %81 = arith.maximumf %79, %80 : vector<32x128xf32>
    %82 = vector.extract_strided_slice %81 {offsets = [0, 0], sizes = [2, 128], strides = [1, 1]} : vector<32x128xf32> to vector<2x128xf32>
    %83 = vector.extract_strided_slice %81 {offsets = [2, 0], sizes = [2, 128], strides = [1, 1]} : vector<32x128xf32> to vector<2x128xf32>
    %84 = vector.extract_strided_slice %81 {offsets = [4, 0], sizes = [2, 128], strides = [1, 1]} : vector<32x128xf32> to vector<2x128xf32>
    %85 = vector.extract_strided_slice %81 {offsets = [6, 0], sizes = [2, 128], strides = [1, 1]} : vector<32x128xf32> to vector<2x128xf32>
    %86 = vector.extract_strided_slice %81 {offsets = [8, 0], sizes = [2, 128], strides = [1, 1]} : vector<32x128xf32> to vector<2x128xf32>
    %87 = vector.extract_strided_slice %81 {offsets = [10, 0], sizes = [2, 128], strides = [1, 1]} : vector<32x128xf32> to vector<2x128xf32>
    %88 = vector.extract_strided_slice %81 {offsets = [12, 0], sizes = [2, 128], strides = [1, 1]} : vector<32x128xf32> to vector<2x128xf32>
    %89 = vector.extract_strided_slice %81 {offsets = [14, 0], sizes = [2, 128], strides = [1, 1]} : vector<32x128xf32> to vector<2x128xf32>
    %90 = vector.extract_strided_slice %81 {offsets = [16, 0], sizes = [2, 128], strides = [1, 1]} : vector<32x128xf32> to vector<2x128xf32>
    %91 = vector.extract_strided_slice %81 {offsets = [18, 0], sizes = [2, 128], strides = [1, 1]} : vector<32x128xf32> to vector<2x128xf32>
    %92 = vector.extract_strided_slice %81 {offsets = [20, 0], sizes = [2, 128], strides = [1, 1]} : vector<32x128xf32> to vector<2x128xf32>
    %93 = vector.extract_strided_slice %81 {offsets = [22, 0], sizes = [2, 128], strides = [1, 1]} : vector<32x128xf32> to vector<2x128xf32>
    %94 = vector.extract_strided_slice %81 {offsets = [24, 0], sizes = [2, 128], strides = [1, 1]} : vector<32x128xf32> to vector<2x128xf32>
    %95 = vector.extract_strided_slice %81 {offsets = [26, 0], sizes = [2, 128], strides = [1, 1]} : vector<32x128xf32> to vector<2x128xf32>
    %96 = vector.extract_strided_slice %81 {offsets = [28, 0], sizes = [2, 128], strides = [1, 1]} : vector<32x128xf32> to vector<2x128xf32>
    %97 = vector.extract_strided_slice %81 {offsets = [30, 0], sizes = [2, 128], strides = [1, 1]} : vector<32x128xf32> to vector<2x128xf32>
    %98 = tpu.concatenate %82, %83, %84, %85, %86, %87, %88, %89, %90, %91, %92, %93, %94, %95, %96, %97 in 1 : vector<2x128xf32>, vector<2x128xf32>, vector<2x128xf32>, vector<2x128xf32>, vector<2x128xf32>, vector<2x128xf32>, vector<2x128xf32>, vector<2x128xf32>, vector<2x128xf32>, vector<2x128xf32>, vector<2x128xf32>, vector<2x128xf32>, vector<2x128xf32>, vector<2x128xf32>, vector<2x128xf32>, vector<2x128xf32> -> vector<2x2048xf32>
    %99 = arith.truncf %98 : vector<2x2048xf32> to vector<2x2048xbf16>
    %c0_44 = arith.constant 0 : index
    %c0_45 = arith.constant 0 : index
    %100 = vector.load %arg4[%c0_44, %c0_45] : memref<2048x1024xbf16, #tpu.memory_space<vmem>>, vector<2048x1024xbf16>
    %cst_46 = arith.constant dense<0.000000e+00> : vector<2x1024xf32>
    %101 = tpu.matmul %99, %100, %cst_46 {dimension_numbers = #tpu.dot_dimension_numbers<[1], [0], [0], [1], [0, 0, 1, 1], [], []>} : vector<2x2048xbf16>, vector<2048x1024xbf16>, vector<2x1024xf32> -> vector<2x1024xf32>
    %c0_47 = arith.constant 0 : index
    %c0_48 = arith.constant 0 : index
    %102 = vector.load %arg5[%c0_47, %c0_48] : memref<1x1024xf32, #tpu.memory_space<vmem>>, vector<1x1024xf32>
    %103 = vector.broadcast %102 : vector<1x1024xf32> to vector<2x1024xf32>
    %104 = arith.addf %101, %103 : vector<2x1024xf32>
    %cst_49 = arith.constant 0.000000e+00 : f32
    %105 = vector.broadcast %cst_49 : f32 to vector<2x1024xf32>
    %106 = arith.maximumf %104, %105 : vector<2x1024xf32>
    %c0_50 = arith.constant 0 : index
    %c0_51 = arith.constant 0 : index
    %107 = vector.load %arg8[%c0_50, %c0_51] : memref<2x1024xi32, #tpu.memory_space<vmem>>, vector<2x1024xi32>
    %c-1288490189_i32 = arith.constant -1288490189 : i32
    %108 = vector.broadcast %c-1288490189_i32 : i32 to vector<2x1024xi32>
    %109 = arith.cmpi uge, %107, %108 : vector<2x1024xi32>
    %cst_52 = arith.constant 3.33333325 : f32
    %110 = vector.broadcast %cst_52 : f32 to vector<2x1024xf32>
    %111 = arith.mulf %106, %110 : vector<2x1024xf32>
    %cst_53 = arith.constant 0.000000e+00 : f32
    %112 = vector.broadcast %cst_53 : f32 to vector<2x1024xf32>
    %113 = arith.select %109, %111, %112 : vector<2x1024xi1>, vector<2x1024xf32>
    %114 = arith.truncf %113 : vector<2x1024xf32> to vector<2x1024xbf16>
    %c0_54 = arith.constant 0 : index
    %c0_55 = arith.constant 0 : index
    %115 = vector.load %arg6[%c0_54, %c0_55] : memref<1024x128xbf16, #tpu.memory_space<vmem>>, vector<1024x128xbf16>
    %cst_56 = arith.constant dense<0.000000e+00> : vector<2x128xf32>
    %116 = tpu.matmul %114, %115, %cst_56 {dimension_numbers = #tpu.dot_dimension_numbers<[1], [0], [0], [1], [0, 0, 1, 1], [], []>} : vector<2x1024xbf16>, vector<1024x128xbf16>, vector<2x128xf32> -> vector<2x128xf32>
    %c0_57 = arith.constant 0 : index
    %c0_58 = arith.constant 0 : index
    %117 = vector.load %arg7[%c0_57, %c0_58] : memref<1x128xf32, #tpu.memory_space<vmem>>, vector<1x128xf32>
    %118 = vector.broadcast %117 : vector<1x128xf32> to vector<2x128xf32>
    %119 = arith.addf %116, %118 : vector<2x128xf32>
    %c0_59 = arith.constant 0 : index
    %c0_60 = arith.constant 0 : index
    %120 = vector.load %arg9[%c0_59, %c0_60] : memref<2x128xf32, #tpu.memory_space<vmem>>, vector<2x128xf32>
    tpu.vector_store %arg9[%c0_59, %c0_60], %119 {strides = array<i32>} : memref<2x128xf32, #tpu.memory_space<vmem>>, vector<2x128xf32>,
    return
  }
  func.func @transform_0(%arg0: i32) -> (i32, i32, i32, i32) {
    %c0_i32 = arith.constant 0 : i32
    %c0_i32_0 = arith.constant 0 : i32
    %c0_i32_1 = arith.constant 0 : i32
    %c0_i32_2 = arith.constant 0 : i32
    return %arg0, %c0_i32, %c0_i32_0, %c0_i32_1 : i32, i32, i32, i32
  }
  func.func @transform_1(%arg0: i32) -> (i32, i32) {
    %c0_i32 = arith.constant 0 : i32
    %c0_i32_0 = arith.constant 0 : i32
    %c0_i32_1 = arith.constant 0 : i32
    return %c0_i32, %c0_i32_0 : i32, i32
  }
  func.func @transform_2(%arg0: i32) -> (i32, i32) {
    %c0_i32 = arith.constant 0 : i32
    %c0_i32_0 = arith.constant 0 : i32
    %c0_i32_1 = arith.constant 0 : i32
    return %c0_i32, %c0_i32_0 : i32, i32
  }
  func.func @transform_3(%arg0: i32) -> (i32, i32) {
    %c0_i32 = arith.constant 0 : i32
    %c0_i32_0 = arith.constant 0 : i32
    %c0_i32_1 = arith.constant 0 : i32
    return %c0_i32, %c0_i32_0 : i32, i32
  }
  func.func @transform_4(%arg0: i32) -> (i32, i32) {
    %c0_i32 = arith.constant 0 : i32
    %c0_i32_0 = arith.constant 0 : i32
    %c0_i32_1 = arith.constant 0 : i32
    return %c0_i32, %c0_i32_0 : i32, i32
  }
  func.func @transform_5(%arg0: i32) -> (i32, i32) {
    %c0_i32 = arith.constant 0 : i32
    %c0_i32_0 = arith.constant 0 : i32
    %c0_i32_1 = arith.constant 0 : i32
    return %c0_i32, %c0_i32_0 : i32, i32
  }
  func.func @transform_6(%arg0: i32) -> (i32, i32) {
    %c0_i32 = arith.constant 0 : i32
    %c0_i32_0 = arith.constant 0 : i32
    %c0_i32_1 = arith.constant 0 : i32
    return %c0_i32, %c0_i32_0 : i32, i32
  }
  func.func @transform_7(%arg0: i32) -> (i32, i32) {
    %c0_i32 = arith.constant 0 : i32
    %c0_i32_0 = arith.constant 0 : i32
    return %arg0, %c0_i32 : i32, i32
  }
  func.func @transform_8(%arg0: i32) -> (i32, i32) {
    %c0_i32 = arith.constant 0 : i32
    %c0_i32_0 = arith.constant 0 : i32
    return %arg0, %c0_i32 : i32, i32
  }
}

</mosaic_0001>

<bundles_post_ra>
// kernel: tpu_custom_call.1
= control target key start
LH: loop header
LB: loop body
LE: loop exit
PB: predicated region body
PF: predicated region fallthrough
CT: control target
= control target key end

     0   :  { %13 = vsyncpa [#allocation3], 0  ;;  %s15797_s0 = inlined_call_operand.vmem [shape: f32[2,14,14,16], index: 0, kind: input, shape index: {}]   ;;  %s15798_s1 = inlined_call_operand.hbm [shape: bf16[16,128], index: 1, kind: input, shape index: {}]   ;;  %s15799_s2 = inlined_call_operand.hbm [shape: f32[1,128], index: 2, kind: input, shape index: {}]   ;;  %s15800_s3 = inlined_call_operand.hbm [shape: bf16[2048,1024], index: 3, kind: input, shape index: {}]   ;;  %s15801_s4 = inlined_call_operand.hbm [shape: f32[1,1024], index: 4, kind: input, shape index: {}]   ;;  %s15802_s5 = inlined_call_operand.hbm [shape: bf16[1024,128], index: 5, kind: input, shape index: {}]   ;;  %s15803_s6 = inlined_call_operand.hbm [shape: f32[1,128], index: 6, kind: input, shape index: {}]   ;;  %s15804_s7 = inlined_call_operand.hbm [shape: u32[2,1024], index: 7, kind: input, shape index: {}]   ;;  %s15805_s8 = inlined_call_operand.hbm [shape: f32[2,128], index: 8, kind: output, shape index: {}]  }
   0x1   :  { %14 = vsyncpa [#allocation6], 0 }
   0x2   :  { %15 = vsyncpa [#allocation9], 0 }
   0x3   :  { %16 = vsyncpa [#allocation12], 0  ;;  %s38_s29 = sshll.u32 %s15799_s2, 4  ;;  %s39_s29 = int_to_ptr.hbm [resolvable:$true] %s38_s29 }
   0x4   :  { %17 = vsyncpa [#allocation4], 0  ;;  %s15032_s30 = smov [#allocation5]   ;;  %s62_s12 = sshll.u32 %s15801_s4, 4  ;;  %s63_s12 = int_to_ptr.hbm [resolvable:$true] %s62_s12 }
   0x5   :  { %s40_s9 = sshll.u32 %s15032_s30, 4  ;;  %s15033_s13 = smov [#allocation8]   ;;  %s41_s9 = int_to_ptr.vmem [resolvable:$true] %s40_s9 }
   0x6   :  { %43 = dma.hbm_to_vmem [thread:$0]  %s39_s29, 16, %s41_s9, [#allocation6]  }
   0x7   :  { %s64_s14 = sshll.u32 %s15033_s13, 4  ;;  %s86_s17 = sshll.u32 %s15803_s6, 4  ;;  %s65_s14 = int_to_ptr.vmem [resolvable:$true] %s64_s14  ;;  %s87_s17 = int_to_ptr.hbm [resolvable:$true] %s86_s17 }
   0x8   :  { %67 = dma.hbm_to_vmem [thread:$0]  %s63_s12, 128, %s65_s14, [#allocation9]  }
   0x9   :  { %s24_s19 = sshll.u32 %s15798_s1, 4  ;;  %s15034_s20 = smov [#allocation11]   ;;  %s25_s19 = int_to_ptr.hbm [resolvable:$true] %s24_s19 }
   0xa   :  { %s88_s21 = sshll.u32 %s15034_s20, 4  ;;  %s15035_s4 = smov [#allocation2]   ;;  %s89_s21 = int_to_ptr.vmem [resolvable:$true] %s88_s21 }
   0xb   :  { %91 = dma.hbm_to_vmem [thread:$0]  %s87_s17, 16, %s89_s21, [#allocation12]  }
   0xc   :  { %s26_s22 = sshll.u32 %s15035_s4, 4  ;;  %s15036_s23 = smov 64   ;;  %s27_s22 = int_to_ptr.vmem [resolvable:$true] %s26_s22 }
   0xd   :  { %s15037_s24 = smov 4   ;;  %s48_s26 = sshll.u32 %s15800_s3, 4  ;;  %s49_s26 = int_to_ptr.hbm [resolvable:$true] %s48_s26 }
   0xe   :  { %32 = dma.hbm_to_vmem [thread:$0]  %s25_s19, 128, %s27_s22, [#allocation3], %s15036_s23, %s15036_s23, %s15037_s24  }
   0xf   :  { %s15038_s27 = smov [#allocation7]   ;;  %s72_s30 = sshll.u32 %s15802_s5, 4  ;;  %s73_s30 = int_to_ptr.hbm [resolvable:$true] %s72_s30 }
  0x10   :  { %s50_s28 = sshll.u32 %s15038_s27, 4  ;;  %s15039_s9 = smov 512   ;;  %s51_s28 = int_to_ptr.vmem [resolvable:$true] %s50_s28 }
  0x11   :  { %s15040_s10 = smov 32   ;;  %s15041_s11 = smov [#allocation10]  }
  0x12   :  { %56 = dma.hbm_to_vmem [thread:$0]  %s49_s26, 131072, %s51_s28, [#allocation6], %s15039_s9, %s15039_s9, %s15040_s10  }
  0x13   :  { %s74_s12 = sshll.u32 %s15041_s11, 4  ;;  %s97_s15 = sshll.u32 %s15804_s7, 4  ;;  %s75_s12 = int_to_ptr.vmem [resolvable:$true] %s74_s12  ;;  %s98_s15 = int_to_ptr.hbm [resolvable:$true] %s97_s15 }
  0x14   :  { %80 = dma.hbm_to_vmem [thread:$0]  %s73_s30, 8192, %s75_s12, [#allocation9], %s15036_s23, %s15036_s23, %s15037_s24  }
  0x15   :  { %s15042_s3 = smov [#allocation13]  }
  0x16   :  { %s99_s16 = sshll.u32 %s15042_s3, 4  ;;  %s100_s16 = int_to_ptr.vmem [resolvable:$true] %s99_s16 }
  0x17   :  { %102 = dma.hbm_to_vmem [thread:$0]  %s98_s15, 256, %s100_s16, [#allocation12]  }
  0x18   :  { %15022 = dma.done.wait [#allocation3], 128  }
  0x19   :  { %15023 = vsyncadd [#allocation3], 4294967168 }
  0x1a   :  { %15024 = dma.done.wait [#allocation6], 131088  }
  0x1b   :  { %15025 = vsyncadd [#allocation6], 4294836208 }
  0x1c   :  { %15026 = dma.done.wait [#allocation9], 8320  }
  0x1d   :  { %15027 = vsyncadd [#allocation9], 4294958976 }
  0x1e   :  { %15028 = dma.done.wait [#allocation12], 272  }
  0x1f   :  { %15029 = vsyncadd [#allocation12], 4294967024  ;;  %vm188_vm0 = vcmask 130048   ;;  %v13722_v0 = vld [vmem:[#allocation2] sm:$0xff]  ;;  %v132_v1 = vld [vmem:[%s15797_s0] sm:$0xff]  ;;  %vm198_vm1 = vcmask 128000  }
  0x20   :  { %v133_v2 = vld [vmem:[%s15797_s0 + $0x8] sm:$0x3f]  ;;  %v134_v3 = vld [vmem:[%s15797_s0 + $0x10] sm:$0xff]  ;;  %v136_v4 = vld [vmem:[%s15797_s0 + $0x20] sm:$0xff]  ;;  %v189_v5 = vsel %vm188_vm0, %v132_v1, 0.0  ;;  %757 = vmatpush.bf16.msra.mxu0 %v13722_v0  ;;  %vm310_vm2 = vcmask 126976  }
  0x21   :  { %v135_v6 = vld [vmem:[%s15797_s0 + $0x18] sm:$0x3f]  ;;  %v137_v7 = vld [vmem:[%s15797_s0 + $0x28] sm:$0x3f]  ;;  %v190_v8 = vsel %vm188_vm0, %v134_v3, 0.0  ;;  %v138_v9 = vld [vmem:[%s15797_s0 + $0x30] sm:$0xff] }
  0x22   :  { %v139_v10 = vld [vmem:[%s15797_s0 + $0x38] sm:$0x3f]  ;;  %v140_v11 = vld [vmem:[%s15797_s0 + $0x40] sm:$0xff]  ;;  %v191_v12 = vadd.f32 %v190_v8, %v189_v5  ;;  %v192_v13 = vsel %vm188_vm0, %v136_v4, 0.0  ;;  %v199_v14 = vsel %vm198_vm1, %v133_v2, 0.0  ;;  %v200_v18 = vsel %vm198_vm1, %v135_v6, 0.0 }
  0x23   :  { %v141_v15 = vld [vmem:[%s15797_s0 + $0x48] sm:$0x3f]  ;;  %v160_v16 = vld [vmem:[%s15797_s0 + $0xe0] sm:$0xff]  ;;  %v202_v19 = vsel %vm198_vm1, %v137_v7, 0.0  ;;  %v162_v20 = vld [vmem:[%s15797_s0 + $0xf0] sm:$0xff]  ;;  %v194_v21 = vsel %vm188_vm0, %v138_v9, 0.0  ;;  %v201_v23 = vadd.f32 %v200_v18, %v199_v14 }
  0x24   :  { %v193_v17 = vadd.f32 %v192_v13, %v191_v12  ;;  %v196_v22 = vsel %vm188_vm0, %v140_v11, 0.0  ;;  %v204_v24 = vsel %vm198_vm1, %v139_v10, 0.0  ;;  %v161_v25 = vld [vmem:[%s15797_s0 + $0xe8] sm:$0x3f]  ;;  %v164_v26 = vld [vmem:[%s15797_s0 + $0x100] sm:$0xff]  ;;  %v166_v27 = vld [vmem:[%s15797_s0 + $0x110] sm:$0xff] }
  0x25   :  { %v206_v29 = vsel %vm198_vm1, %v141_v15, 0.0  ;;  %v208_v30 = vsel %vm188_vm0, %v160_v16, 0.0  ;;  %v163_v31 = vld [vmem:[%s15797_s0 + $0xf8] sm:$0x3f]  ;;  %v165_v32 = vld [vmem:[%s15797_s0 + $0x108] sm:$0x3f]  ;;  %v203_v34 = vadd.f32 %v202_v19, %v201_v23  ;;  %v226_v42 = vadd.f32 %v196_v22, %v194_v21 }
  0x26   :  { %v195_v28 = vadd.f32 %v194_v21, %v193_v17  ;;  %v168_v33 = vld [vmem:[%s15797_s0 + $0x120] sm:$0xff]  ;;  %v209_v35 = vsel %vm188_vm0, %v162_v20, 0.0  ;;  %v142_v36 = vld [vmem:[%s15797_s0 + $0x50] sm:$0xff]  ;;  %v143_v37 = vld [vmem:[%s15797_s0 + $0x58] sm:$0x3f]  ;;  %v211_v41 = vsel %vm188_vm0, %v164_v26, 0.0  ;;  %v233_v43 = vadd.f32 %v206_v29, %v204_v24 }
  0x27   :  { %v167_v38 = vld [vmem:[%s15797_s0 + $0x118] sm:$0x3f]  ;;  %v169_v39 = vld [vmem:[%s15797_s0 + $0x128] sm:$0x3f]  ;;  %v210_v40 = vadd.f32 %v209_v35, %v208_v30  ;;  %v144_v44 = vld [vmem:[%s15797_s0 + $0x60] sm:$0xff]  ;;  %v205_v48 = vadd.f32 %v204_v24, %v203_v34  ;;  %v213_v49 = vsel %vm188_vm0, %v166_v27, 0.0 }
  0x28   :  { %v145_v45 = vld [vmem:[%s15797_s0 + $0x68] sm:$0x3f]  ;;  %v146_v46 = vld [vmem:[%s15797_s0 + $0x70] sm:$0xff]  ;;  %v15198_v47 = vadd.f32 %v196_v22, %v195_v28  ;;  %v215_v50 = vsel %vm188_vm0, %v168_v33, 0.0  ;;  %v217_v52 = vsel %vm198_vm1, %v161_v25, 0.0  ;;  %v218_v53 = vsel %vm198_vm1, %v163_v31, 0.0 }
  0x29   :  { %v212_v51 = vadd.f32 %v211_v41, %v210_v40  ;;  %v220_v54 = vsel %vm198_vm1, %v165_v32, 0.0  ;;  %v147_v55 = vld [vmem:[%s15797_s0 + $0x78] sm:$0x3f]  ;;  %v15208_v56 = vadd.f32 %v206_v29, %v205_v48  ;;  %v219_v57 = vadd.f32 %v218_v53, %v217_v52  ;;  %v170_v60 = vld [vmem:[%s15797_s0 + $0x130] sm:$0xff]  ;;  %v172_v61 = vld [vmem:[%s15797_s0 + $0x140] sm:$0xff]  ;;  %s9349_s16 = sshll.u32 %s15805_s8, 4  ;;  %s9350_s16 = int_to_ptr.hbm [resolvable:$true] %s9349_s16 }
  0x2a   :  { %v222_v58 = vsel %vm198_vm1, %v167_v38, 0.0  ;;  %v224_v59 = vsel %vm198_vm1, %v169_v39, 0.0  ;;  %v227_v63 = vsel %vm188_vm0, %v142_v36, 0.0  ;;  %v229_v0 = vsel %vm188_vm0, %v144_v44, 0.0  ;;  %v174_v2 = vld [vmem:[%s15797_s0 + $0x150] sm:$0xff] }
  0x2b   :  { %v214_v62 = vadd.f32 %v213_v49, %v212_v51  ;;  %v231_v1 = vsel %vm188_vm0, %v146_v46, 0.0  ;;  %v221_v3 = vadd.f32 %v220_v54, %v219_v57  ;;  %v228_v4 = vadd.f32 %v227_v63, %v226_v42  ;;  %v171_v7 = vld [vmem:[%s15797_s0 + $0x138] sm:$0x3f]  ;;  %v173_v8 = vld [vmem:[%s15797_s0 + $0x148] sm:$0x3f] }
  0x2c   :  { %v234_v5 = vsel %vm198_vm1, %v143_v37, 0.0  ;;  %v236_v6 = vsel %vm198_vm1, %v145_v45, 0.0  ;;  %vm351_vm3 = vcmask 1041408   ;;  %v238_v11 = vsel %vm198_vm1, %v147_v55, 0.0  ;;  %v175_v13 = vld [vmem:[%s15797_s0 + $0x158] sm:$0x3f] }
  0x2d   :  { %v216_v9 = vadd.f32 %v215_v50, %v214_v62  ;;  %v235_v10 = vadd.f32 %v234_v5, %v233_v43  ;;  %v240_v12 = vadd.f32 %v215_v50, %v213_v49  ;;  %v223_v14 = vadd.f32 %v222_v58, %v221_v3 }
  0x2e   :  { %v230_v15 = vadd.f32 %v229_v0, %v228_v4  ;;  %v241_v16 = vsel %vm188_vm0, %v170_v60, 0.0  ;;  %v243_v17 = vsel %vm188_vm0, %v172_v61, 0.0  ;;  %v245_v20 = vsel %vm188_vm0, %v174_v2, 0.0 }
  0x2f   :  { %v237_v18 = vadd.f32 %v236_v6, %v235_v10  ;;  %v242_v19 = vadd.f32 %v241_v16, %v240_v12  ;;  %v247_v21 = vadd.f32 %v224_v59, %v222_v58  ;;  %v225_v22 = vadd.f32 %v224_v59, %v223_v14 }
  0x30   :  { %v15239_v23 = vadd.f32 %v231_v1, %v230_v15  ;;  %v248_v24 = vsel %vm198_vm1, %v171_v7, 0.0  ;;  %v250_v25 = vsel %vm198_vm1, %v173_v8, 0.0  ;;  %v252_v29 = vsel %vm198_vm1, %v175_v13, 0.0 }
  0x31   :  { %v15243_v26 = vadd.f32 %v238_v11, %v237_v18  ;;  %v244_v27 = vadd.f32 %v243_v17, %v242_v19  ;;  %v249_v28 = vadd.f32 %v248_v24, %v247_v21  ;;  %v15246_v30 = vadd.f32 %v231_v1, %v229_v0 }
  0x32   :  { %v15248_v31 = vadd.f32 %v238_v11, %v236_v6  ;;  %v15250_v32 = vadd.f32 %v245_v20, %v243_v17  ;;  %v15252_v33 = vadd.f32 %v252_v29, %v250_v25  ;;  %v311_v36 = vsel %vm310_vm2, %v15198_v47, 0.0 }
  0x33   :  { %v15254_v34 = vadd.f32 %v245_v20, %v244_v27  ;;  %v251_v35 = vadd.f32 %v250_v25, %v249_v28  ;;  %v318_v37 = vsel %vm310_vm2, %v216_v9, 0.0  ;;  %v312_v38 = vrot.slane %v311_v36, 4 }
  0x34   :  { %v319_v39 = vrot.slane %v318_v37, 4  ;;  %v329_v40 = vrot.slane %v15198_v47, 3  ;;  %v330_v41 = vrot.slane %v216_v9, 3  ;;  %v352_v43 = vrot.slane %v15198_v47, 6 }
  0x35   :  { %v15260_v42 = vadd.f32 %v252_v29, %v251_v35  ;;  %v353_v44 = vrot.slane %v15208_v56, 6  ;;  %v355_v45 = vrot.slane %v216_v9, 6  ;;  %v313_v46 = vadd.f32 %v312_v38, %v311_v36 }
  0x36   :  { %v320_v48 = vadd.f32 %v319_v39, %v318_v37  ;;  %v333_v49 = vsel %vm310_vm2, %v329_v40, 0.0  ;;  %v340_v50 = vsel %vm310_vm2, %v330_v41, 0.0  ;;  %v356_v54 = vrot.slane %v225_v22, 6 }
  0x37   :  { %v334_v51 = vrot.slane %v333_v49, 4  ;;  %v341_v52 = vrot.slane %v340_v50, 4  ;;  %v354_v53 = vsel %vm351_vm3, %v352_v43, %v353_v44  ;;  %v314_v55 = vrot.slane %v313_v46, 2 }
  0x38   :  { %v321_v57 = vrot.slane %v320_v48, 2  ;;  %v360_v58 = vsel %vm310_vm2, %v354_v53, 0.0  ;;  %v376_v47 = vrot.slane %v15208_v56, 1  ;;  %v357_v61 = vsel %vm351_vm3, %v355_v45, %v356_v54 }
  0x39   :  { %v335_v59 = vadd.f32 %v334_v51, %v333_v49  ;;  %v342_v60 = vadd.f32 %v341_v52, %v340_v50  ;;  %v361_v62 = vrot.slane %v360_v58, 4  ;;  %v315_v63 = vadd.f32 %v314_v55, %v313_v46 }
  0x3a   :  { %v322_v0 = vadd.f32 %v321_v57, %v320_v48  ;;  %v367_v1 = vsel %vm310_vm2, %v357_v61, 0.0  ;;  %v377_v2 = vrot.slane %v225_v22, 1  ;;  %v380_v9 = vsel %vm310_vm2, %v376_v47, 0.0 }
  0x3b   :  { %v336_v3 = vrot.slane %v335_v59, 2  ;;  %v343_v4 = vrot.slane %v342_v60, 2  ;;  %v362_v5 = vadd.f32 %v361_v62, %v360_v58  ;;  %v368_v6 = vrot.slane %v367_v1, 4 }
  0x3c   :  { %v316_v7 = vrot.slane %v315_v63, 1  ;;  %v323_v8 = vrot.slane %v322_v0, 1  ;;  %v387_v56 = vsel %vm310_vm2, %v377_v2, 0.0  ;;  %v381_v16 = vrot.slane %v380_v9, 4 }
  0x3d   :  { %v337_v10 = vadd.f32 %v336_v3, %v335_v59  ;;  %v344_v11 = vadd.f32 %v343_v4, %v342_v60  ;;  %v363_v12 = vrot.slane %v362_v5, 2  ;;  %v369_v13 = vadd.f32 %v368_v6, %v367_v1 }
  0x3e   :  { %v317_v14 = vadd.f32 %v316_v7, %v315_v63  ;;  %v324_v15 = vadd.f32 %v323_v8, %v322_v0  ;;  %v388_v17 = vrot.slane %v387_v56, 4  ;;  %v382_v25 = vadd.f32 %v381_v16, %v380_v9 }
  0x3f   :  { %v338_v18 = vrot.slane %v337_v10, 1  ;;  %v345_v19 = vrot.slane %v344_v11, 1  ;;  %v364_v20 = vadd.f32 %v363_v12, %v362_v5  ;;  %v370_v21 = vrot.slane %v369_v13, 2 }
  0x40   :  { %v15273_v22 = vmul.f32 0.04, %v317_v14  ;;  %v15275_v24 = vmul.f32 0.04, %v324_v15  ;;  %v389_v27 = vadd.f32 %v388_v17, %v387_v56  ;;  %v383_v37 = vrot.slane %v382_v25, 2 }
  0x41   :  { %v339_v28 = vadd.f32 %v338_v18, %v337_v10  ;;  %v346_v29 = vadd.f32 %v345_v19, %v344_v11  ;;  %v365_v35 = vrot.slane %v364_v20, 1  ;;  %v371_v36 = vadd.f32 %v370_v21, %v369_v13 }
  0x42   :  { %v390_v38 = vrot.slane %v389_v27, 2  ;;  %v396_v39 = vsel %vm310_vm2, %v15239_v23, 0.0  ;;  %v403_v40 = vsel %vm310_vm2, %v15254_v34, 0.0  ;;  %v384_v46 = vadd.f32 %v383_v37, %v382_v25 }
  0x43   :  { %v15281_v41 = vmul.f32 0.04, %v339_v28  ;;  %v15283_v43 = vmul.f32 0.04, %v346_v29  ;;  %v366_v44 = vadd.f32 %v365_v35, %v364_v20  ;;  %v372_v45 = vrot.slane %v371_v36, 1 }
  0x44   :  { %v391_v48 = vadd.f32 %v390_v38, %v389_v27  ;;  %v397_v49 = vrot.slane %v396_v39, 4  ;;  %v404_v50 = vrot.slane %v403_v40, 4  ;;  %v414_v53 = vrot.slane %v15239_v23, 3 }
  0x45   :  { %v373_v51 = vadd.f32 %v372_v45, %v371_v36  ;;  %v15285_v52 = vmul.f32 0.04, %v366_v44  ;;  %v415_v54 = vrot.slane %v15254_v34, 3  ;;  %v385_v55 = vrot.slane %v384_v46, 1 }
  0x46   :  { %v392_v57 = vrot.slane %v391_v48, 1  ;;  %v398_v58 = vadd.f32 %v397_v49, %v396_v39  ;;  %v405_v47 = vadd.f32 %v404_v50, %v403_v40  ;;  %v418_v60 = vsel %vm310_vm2, %v414_v53, 0.0 }
  0x47   :  { %v15289_v59 = vmul.f32 0.04, %v373_v51  ;;  %v425_v61 = vsel %vm310_vm2, %v415_v54, 0.0  ;;  %v436_v62 = vrot.slane %v15239_v23, 6  ;;  %v386_v63 = vadd.f32 %v385_v55, %v384_v46 }
  0x48   :  { %v393_v0 = vadd.f32 %v392_v57, %v391_v48  ;;  %v399_v1 = vrot.slane %v398_v58, 2  ;;  %v406_v2 = vrot.slane %v405_v47, 2  ;;  %v419_v3 = vrot.slane %v418_v60, 4 }
  0x49   :  { %v426_v4 = vrot.slane %v425_v61, 4  ;;  %v437_v5 = vrot.slane %v15243_v26, 6  ;;  %v439_v6 = vrot.slane %v15254_v34, 6  ;;  %v394_v7 = vmul.f32 0.04, %v386_v63 }
  0x4a   :  { %v395_v8 = vmul.f32 0.04, %v393_v0  ;;  %v400_v9 = vadd.f32 %v399_v1, %v398_v58  ;;  %v407_v56 = vadd.f32 %v406_v2, %v405_v47  ;;  %v420_v10 = vadd.f32 %v419_v3, %v418_v60 }
  0x4b   :  { %v427_v11 = vadd.f32 %v426_v4, %v425_v61  ;;  %v438_v12 = vsel %vm351_vm3, %v436_v62, %v437_v5  ;;  %v440_v23 = vrot.slane %v15260_v42, 6  ;;  %v460_v16 = vrot.slane %v15243_v26, 1  ;;  %v148_v5 = vld [vmem:[%s15797_s0 + $0x80] sm:$0xff] }
  0x4c   :  { %v401_v13 = vrot.slane %v400_v9, 1  ;;  %v408_v14 = vrot.slane %v407_v56, 1  ;;  %v444_v15 = vsel %vm310_vm2, %v438_v12, 0.0  ;;  %v421_v17 = vrot.slane %v420_v10, 2  ;;  %v152_v12 = vld [vmem:[%s15797_s0 + $0xa0] sm:$0xff] }
  0x4d   :  { %v428_v18 = vrot.slane %v427_v11, 2  ;;  %v441_v34 = vsel %vm351_vm3, %v439_v6, %v440_v23  ;;  %v445_v19 = vrot.slane %v444_v15, 4  ;;  %v461_v27 = vrot.slane %v15260_v42, 1 }
  0x4e   :  { %v402_v20 = vadd.f32 %v401_v13, %v400_v9  ;;  %v409_v21 = vadd.f32 %v408_v14, %v407_v56  ;;  %v451_v25 = vsel %vm310_vm2, %v441_v34, 0.0  ;;  %v422_v28 = vadd.f32 %v421_v17, %v420_v10  ;;  %v176_v34 = vld [vmem:[%s15797_s0 + $0x160] sm:$0xff] }
  0x4f   :  { %v429_v29 = vadd.f32 %v428_v18, %v427_v11  ;;  %v446_v35 = vadd.f32 %v445_v19, %v444_v15  ;;  %v452_v36 = vrot.slane %v451_v25, 4  ;;  %v464_v39 = vsel %vm310_vm2, %v460_v16, 0.0  ;;  %v151_v11 = vld [vmem:[%s15797_s0 + $0x98] sm:$0x3f]  ;;  %v153_v18 = vld [vmem:[%s15797_s0 + $0xa8] sm:$0x3f] }
  0x50   :  { %v410_v37 = vmul.f32 0.04, %v402_v20  ;;  %v411_v38 = vmul.f32 0.04, %v409_v21  ;;  %v471_v26 = vsel %vm310_vm2, %v461_v27, 0.0  ;;  %v423_v40 = vrot.slane %v422_v28, 1 }
  0x51   :  { %v430_v44 = vrot.slane %v429_v29, 1  ;;  %v447_v45 = vrot.slane %v446_v35, 2  ;;  %v453_v46 = vadd.f32 %v452_v36, %v451_v25  ;;  %v465_v48 = vrot.slane %v464_v39, 4  ;;  %v178_v19 = vld [vmem:[%s15797_s0 + $0x170] sm:$0xff]  ;;  %v177_v27 = vld [vmem:[%s15797_s0 + $0x168] sm:$0x3f] }
  0x52   :  { %v472_v49 = vrot.slane %v471_v26, 4  ;;  %vm650_vm4 = vcmask 1041409   ;;  %vm655_vm5 = vcmask 1043459   ;;  %v424_v50 = vadd.f32 %v423_v40, %v422_v28  ;;  %v180_v28 = vld [vmem:[%s15797_s0 + $0x180] sm:$0xff]  ;;  %v181_v40 = vld [vmem:[%s15797_s0 + $0x188] sm:$0x3f] }
  0x53   :  { %v431_v42 = vadd.f32 %v430_v44, %v429_v29  ;;  %v448_v51 = vadd.f32 %v447_v45, %v446_v35  ;;  %v454_v53 = vrot.slane %v453_v46, 2  ;;  %v466_v54 = vadd.f32 %v465_v48, %v464_v39  ;;  %v179_v39 = vld [vmem:[%s15797_s0 + $0x178] sm:$0x3f] }
  0x54   :  { %v473_v55 = vadd.f32 %v472_v49, %v471_v26  ;;  %v651_v57 = vsel %vm650_vm4, %v15275_v24, %v15273_v22  ;;  %v656_v58 = vsel %vm655_vm5, %v15283_v43, %v15281_v41  ;;  %v432_v47 = vmul.f32 0.04, %v424_v50  ;;  %v154_v50 = vld [vmem:[%s15797_s0 + $0xb0] sm:$0xff] }
  0x55   :  { %v433_v60 = vmul.f32 0.04, %v431_v42  ;;  %v449_v61 = vrot.slane %v448_v51, 1  ;;  %v455_v62 = vadd.f32 %v454_v53, %v453_v46  ;;  %v467_v63 = vrot.slane %v466_v54, 2  ;;  %v156_v42 = vld [vmem:[%s15797_s0 + $0xc0] sm:$0xff] }
  0x56   :  { %v474_v0 = vrot.slane %v473_v55, 2  ;;  %vm660_vm6 = vcmask 1045509   ;;  %vm665_vm7 = vcmask 1047559   ;;  %v670_v41 = vsel %vm650_vm4, %v411_v38, %v410_v37 }
  0x57   :  { %v450_v1 = vadd.f32 %v449_v61, %v448_v51  ;;  %v456_v2 = vrot.slane %v455_v62, 1  ;;  %v661_v3 = vsel %vm660_vm6, %v15289_v59, %v15285_v52  ;;  %v666_v22 = vsel %vm665_vm7, %v395_v8, %v394_v7  ;;  %v149_v52 = vld [vmem:[%s15797_s0 + $0x88] sm:$0x3f]  ;;  %v150_v59 = vld [vmem:[%s15797_s0 + $0x90] sm:$0xff] }
  0x58   :  { %v468_v24 = vadd.f32 %v467_v63, %v466_v54  ;;  %v475_v4 = vadd.f32 %v474_v0, %v473_v55  ;;  %v674_v43 = vsel %vm655_vm5, %v433_v60, %v432_v47  ;;  %v716_v56 = vsel %vm351_vm3, %v651_v57, %v656_v58  ;;  %v155_v55 = vld [vmem:[%s15797_s0 + $0xb8] sm:$0x3f]  ;;  %v158_v57 = vld [vmem:[%s15797_s0 + $0xd0] sm:$0xff] }
  0x59   :  { %v457_v6 = vadd.f32 %v456_v2, %v455_v62  ;;  %v458_v9 = vmul.f32 0.04, %v450_v1  ;;  %vm717_vm8 = vcmask 1043456   ;;  %vm719_vm9 = vcmask 1045504   ;;  %v159_v62 = vld [vmem:[%s15797_s0 + $0xd8] sm:$0x3f] }
  0x5a   :  { %v469_v7 = vrot.slane %v468_v24, 1  ;;  %v476_v8 = vrot.slane %v475_v4, 1  ;;  %v718_v10 = vsel %vm717_vm8, %v716_v56, %v661_v3  ;;  %v721_v14 = vsel %vm351_vm3, %v670_v41, %v674_v43  ;;  %v182_v2 = vld [vmem:[%s15797_s0 + $0x190] sm:$0xff]  ;;  %v183_v41 = vld [vmem:[%s15797_s0 + $0x198] sm:$0x3f] }
  0x5b   :  { %v459_v23 = vmul.f32 0.04, %v457_v6  ;;  %v720_v13 = vsel %vm719_vm9, %v718_v10, %v666_v22  ;;  %v255_v15 = vsel %vm188_vm0, %v148_v5, 0.0  ;;  %v257_v21 = vsel %vm188_vm0, %v150_v59, 0.0  ;;  %v186_v43 = vld [vmem:[%s15797_s0 + $0x1b0] sm:$0xff] }
  0x5c   :  { %v470_v16 = vadd.f32 %v469_v7, %v468_v24  ;;  %v477_v17 = vadd.f32 %v476_v8, %v475_v4  ;;  %v256_v20 = vadd.f32 %v255_v15, %v15246_v30  ;;  %v259_v29 = vsel %vm188_vm0, %v152_v12, 0.0 }
  0x5d   :  { %v678_v25 = vsel %vm660_vm6, %v459_v23, %v458_v9  ;;  %v262_v35 = vsel %vm198_vm1, %v149_v52, 0.0  ;;  %v264_v36 = vsel %vm198_vm1, %v151_v11, 0.0  ;;  %v266_v45 = vsel %vm198_vm1, %v153_v18, 0.0  ;;  %v185_v52 = vld [vmem:[%s15797_s0 + $0x1a8] sm:$0x3f] }
  0x5e   :  { %v478_v37 = vmul.f32 0.04, %v470_v16  ;;  %v479_v30 = vmul.f32 0.04, %v477_v17  ;;  %v722_v38 = vsel %vm717_vm8, %v721_v14, %v678_v25  ;;  %v258_v26 = vadd.f32 %v257_v21, %v256_v20  ;;  %v187_v11 = vld [vmem:[%s15797_s0 + $0x1b8] sm:$0x3f] }
  0x5f   :  { %v263_v44 = vadd.f32 %v262_v35, %v15248_v31  ;;  %v269_v46 = vsel %vm188_vm0, %v176_v34, 0.0  ;;  %v271_v48 = vsel %vm188_vm0, %v178_v19, 0.0  ;;  %v273_v53 = vsel %vm188_vm0, %v180_v28, 0.0 }
  0x60   :  { %v682_v49 = vsel %vm665_vm7, %v479_v30, %v478_v37  ;;  %v15376_v51 = vadd.f32 %v259_v29, %v258_v26  ;;  %v270_v31 = vadd.f32 %v269_v46, %v15250_v32  ;;  %v276_v47 = vsel %vm198_vm1, %v177_v27, 0.0  ;;  %v157_v32 = vld [vmem:[%s15797_s0 + $0xc8] sm:$0x3f] }
  0x61   :  { %v723_v54 = vsel %vm719_vm9, %v722_v38, %v682_v49  ;;  %v265_v58 = vadd.f32 %v264_v36, %v263_v44  ;;  %v278_v60 = vsel %vm198_vm1, %v179_v39, 0.0  ;;  %v277_v0 = vadd.f32 %v276_v47, %v15252_v33  ;;  %v184_v33 = vld [vmem:[%s15797_s0 + $0x1a0] sm:$0xff]  ;;  %s15043_s0 = smov [#allocation14]  }
  0x62   :  { %v730_v61 = vpack.c.bf16 %v723_v54, %v720_v13  ;;  %v272_v63 = vadd.f32 %v271_v48, %v270_v31  ;;  %v280_v1 = vsel %vm198_vm1, %v181_v40, 0.0  ;;  %v282_v22 = vadd.f32 %v259_v29, %v257_v21  ;;  %s9347_s14 = sshll.u32 %s15043_s0, 4  ;;  %s9348_s14 = int_to_ptr.vmem [resolvable:$true] %s9347_s14 }
  0x63   :  { %v15400_v3 = vadd.f32 %v266_v45, %v265_v58  ;;  %v283_v24 = vsel %vm188_vm0, %v154_v50, 0.0  ;;  %v285_v4 = vsel %vm188_vm0, %v156_v42, 0.0  ;;  %v279_v6 = vadd.f32 %v278_v60, %v277_v0 }
  0x64   :  { %9366 = vmatmul.msk.bf16.vlgmr.msra.gmra.mxu0 %vm188_vm0, %v730_v61  ;;  %v274_v5 = vadd.f32 %v273_v53, %v272_v63  ;;  %v287_v9 = vsel %vm188_vm0, %v158_v57, 0.0  ;;  %v289_v56 = vadd.f32 %v266_v45, %v264_v36  ;;  %v284_v59 = vadd.f32 %v283_v24, %v282_v22 }
  0x65   :  { %v290_v7 = vsel %vm198_vm1, %v155_v55, 0.0  ;;  %v292_v8 = vsel %vm198_vm1, %v157_v32, 0.0  ;;  %v294_v10 = vsel %vm198_vm1, %v159_v62, 0.0  ;;  %v281_v12 = vadd.f32 %v280_v1, %v279_v6 }
  0x66   :  { %v291_v23 = vadd.f32 %v290_v7, %v289_v56  ;;  %v296_v13 = vadd.f32 %v273_v53, %v271_v48  ;;  %v297_v14 = vsel %vm188_vm0, %v182_v2, 0.0  ;;  %v286_v15 = vadd.f32 %v285_v4, %v284_v59 }
  0x67   :  { %v299_v16 = vsel %vm188_vm0, %v184_v33, 0.0  ;;  %v301_v17 = vsel %vm188_vm0, %v186_v43, 0.0  ;;  %v303_v18 = vadd.f32 %v280_v1, %v278_v60  ;;  %v304_v20 = vsel %vm198_vm1, %v183_v41, 0.0 }
  0x68   :  { %v293_v34 = vadd.f32 %v292_v8, %v291_v23  ;;  %v298_v19 = vadd.f32 %v297_v14, %v296_v13  ;;  %v306_v21 = vsel %vm198_vm1, %v185_v52, 0.0  ;;  %v15429_v25 = vadd.f32 %v287_v9, %v286_v15 }
  0x69   :  { %v305_v27 = vadd.f32 %v304_v20, %v303_v18  ;;  %v308_v28 = vsel %vm198_vm1, %v187_v11, 0.0  ;;  %v480_v29 = vsel %vm310_vm2, %v15376_v51, 0.0  ;;  %v487_v30 = vsel %vm310_vm2, %v274_v5, 0.0 }
  0x6a   :  { %v15434_v35 = vadd.f32 %v294_v10, %v293_v34  ;;  %v300_v36 = vadd.f32 %v299_v16, %v298_v19  ;;  %v481_v37 = vrot.slane %v480_v29, 4  ;;  %v488_v39 = vrot.slane %v487_v30, 4 }
  0x6b   :  { %v307_v38 = vadd.f32 %v306_v21, %v305_v27  ;;  %v498_v26 = vrot.slane %v15376_v51, 3  ;;  %v499_v40 = vrot.slane %v274_v5, 3  ;;  %v520_v46 = vrot.slane %v15376_v51, 6 }
  0x6c   :  { %v15438_v44 = vadd.f32 %v301_v17, %v300_v36  ;;  %v482_v45 = vadd.f32 %v481_v37, %v480_v29  ;;  %v521_v48 = vrot.slane %v15400_v3, 6  ;;  %v489_v50 = vadd.f32 %v488_v39, %v487_v30 }
  0x6d   :  { %v15442_v49 = vadd.f32 %v308_v28, %v307_v38  ;;  %v502_v42 = vsel %vm310_vm2, %v498_v26, 0.0  ;;  %v509_v31 = vsel %vm310_vm2, %v499_v40, 0.0  ;;  %v523_v47 = vrot.slane %v274_v5, 6 }
  0x6e   :  { %v483_v53 = vrot.slane %v482_v45, 2  ;;  %v503_v54 = vrot.slane %v502_v42, 4  ;;  %v510_v55 = vrot.slane %v509_v31, 4  ;;  %v522_v57 = vsel %vm351_vm3, %v520_v46, %v521_v48 }
  0x6f   :  { %v490_v58 = vrot.slane %v489_v50, 2  ;;  %v524_v60 = vrot.slane %v281_v12, 6  ;;  %v528_v61 = vsel %vm310_vm2, %v522_v57, 0.0  ;;  %v544_v2 = vrot.slane %v15400_v3, 1 }
  0x70   :  { %v484_v51 = vadd.f32 %v483_v53, %v482_v45  ;;  %v504_v32 = vadd.f32 %v503_v54, %v502_v42  ;;  %v511_v62 = vadd.f32 %v510_v55, %v509_v31  ;;  %v529_v63 = vrot.slane %v528_v61, 4 }
  0x71   :  { %v491_v0 = vadd.f32 %v490_v58, %v489_v50  ;;  %v525_v1 = vsel %vm351_vm3, %v523_v47, %v524_v60  ;;  %v545_v22 = vrot.slane %v281_v12, 1  ;;  %v548_v6 = vsel %vm310_vm2, %v544_v2, 0.0 }
  0x72   :  { %v485_v24 = vrot.slane %v484_v51, 1  ;;  %v505_v4 = vrot.slane %v504_v32, 2  ;;  %v512_v41 = vrot.slane %v511_v62, 2  ;;  %v530_v33 = vadd.f32 %v529_v63, %v528_v61 }
  0x73   :  { %v492_v43 = vrot.slane %v491_v0, 1  ;;  %v535_v5 = vsel %vm310_vm2, %v525_v1, 0.0  ;;  %v555_v9 = vsel %vm310_vm2, %v545_v22, 0.0  ;;  %v549_v11 = vrot.slane %v548_v6, 4 }
  0x74   :  { %v486_v56 = vadd.f32 %v485_v24, %v484_v51  ;;  %v506_v52 = vadd.f32 %v505_v4, %v504_v32  ;;  %v513_v59 = vadd.f32 %v512_v41, %v511_v62  ;;  %v531_v7 = vrot.slane %v530_v33, 2 }
  0x75   :  { %v493_v8 = vadd.f32 %v492_v43, %v491_v0  ;;  %v536_v10 = vrot.slane %v535_v5, 4  ;;  %v556_v3 = vrot.slane %v555_v9, 4  ;;  %v550_v17 = vadd.f32 %v549_v11, %v548_v6 }
  0x76   :  { %v15453_v12 = vmul.f32 0.04, %v486_v56  ;;  %v507_v23 = vrot.slane %v506_v52, 1  ;;  %v514_v13 = vrot.slane %v513_v59, 1  ;;  %v532_v14 = vadd.f32 %v531_v7, %v530_v33 }
  0x77   :  { %v15455_v15 = vmul.f32 0.04, %v493_v8  ;;  %v537_v16 = vadd.f32 %v536_v10, %v535_v5  ;;  %v557_v18 = vadd.f32 %v556_v3, %v555_v9  ;;  %v564_v21 = vsel %vm310_vm2, %v15429_v25, 0.0 }
  0x78   :  { %v508_v34 = vadd.f32 %v507_v23, %v506_v52  ;;  %v515_v19 = vadd.f32 %v514_v13, %v513_v59  ;;  %v533_v20 = vrot.slane %v532_v14, 1  ;;  %v551_v28 = vrot.slane %v550_v17, 2 }
  0x79   :  { %v538_v27 = vrot.slane %v537_v16, 2  ;;  %v558_v29 = vrot.slane %v557_v18, 2  ;;  %v565_v36 = vrot.slane %v564_v21, 4  ;;  %v571_v39 = vsel %vm310_vm2, %v15438_v44, 0.0 }
  0x7a   :  { %v15459_v37 = vmul.f32 0.04, %v508_v34  ;;  %v15461_v30 = vmul.f32 0.04, %v515_v19  ;;  %v534_v38 = vadd.f32 %v533_v20, %v532_v14  ;;  %v552_v40 = vadd.f32 %v551_v28, %v550_v17 }
  0x7b   :  { %v539_v26 = vadd.f32 %v538_v27, %v537_v16  ;;  %v559_v45 = vadd.f32 %v558_v29, %v557_v18  ;;  %v566_v46 = vadd.f32 %v565_v36, %v564_v21  ;;  %v572_v50 = vrot.slane %v571_v39, 4 }
  0x7c   :  { %v15465_v48 = vmul.f32 0.04, %v534_v38  ;;  %v582_v42 = vrot.slane %v15429_v25, 3  ;;  %v583_v31 = vrot.slane %v15438_v44, 3  ;;  %v553_v54 = vrot.slane %v552_v40, 1 }
  0x7d   :  { %v540_v53 = vrot.slane %v539_v26, 1  ;;  %v560_v55 = vrot.slane %v559_v45, 1  ;;  %v567_v57 = vrot.slane %v566_v46, 2  ;;  %v573_v58 = vadd.f32 %v572_v50, %v571_v39 }
  0x7e   :  { %v586_v47 = vsel %vm310_vm2, %v582_v42, 0.0  ;;  %v593_v60 = vsel %vm310_vm2, %v583_v31, 0.0  ;;  %v604_v61 = vrot.slane %v15429_v25, 6  ;;  %v554_v32 = vadd.f32 %v553_v54, %v552_v40  ;;  %v9850_v31 = vld [vmem:[#allocation7 + $0x3c0] sm:$0xf] }
  0x7f   :  { %v541_v51 = vadd.f32 %v540_v53, %v539_v26  ;;  %v561_v62 = vadd.f32 %v560_v55, %v559_v45  ;;  %v568_v63 = vadd.f32 %v567_v57, %v566_v46  ;;  %v574_v0 = vrot.slane %v573_v58, 2  ;;  %v13783_v45 = vld [vmem:[#allocation7 + $0x1dc] sm:$0xf0] }
  0x80   :  { %v587_v1 = vrot.slane %v586_v47, 4  ;;  %v594_v2 = vrot.slane %v593_v60, 4  ;;  %v605_v22 = vrot.slane %v15434_v35, 6  ;;  %v562_v4 = vmul.f32 0.04, %v554_v32 }
  0x81   :  { %v543_v24 = vmul.f32 0.04, %v541_v51  ;;  %v563_v41 = vmul.f32 0.04, %v561_v62  ;;  %v569_v33 = vrot.slane %v568_v63, 1  ;;  %v575_v43 = vadd.f32 %v574_v0, %v573_v58 }
  0x82   :  { %v588_v5 = vadd.f32 %v587_v1, %v586_v47  ;;  %v595_v6 = vadd.f32 %v594_v2, %v593_v60  ;;  %v606_v9 = vsel %vm351_vm3, %v604_v61, %v605_v22  ;;  %v607_v25 = vrot.slane %v15438_v44, 6  ;;  %v13847_v53 = vld [vmem:[#allocation7 + $0x3dc] sm:$0xf0] }
  0x83   :  { %v608_v56 = vrot.slane %v15442_v49, 6  ;;  %v628_v52 = vrot.slane %v15434_v35, 1  ;;  %v570_v59 = vadd.f32 %v569_v33, %v568_v63  ;;  %v576_v7 = vrot.slane %v575_v43, 1  ;;  %v10106_v54 = vld [vmem:[#allocation7 + $0x5c0] sm:$0xf] }
  0x84   :  { %v589_v8 = vrot.slane %v588_v5, 2  ;;  %v596_v10 = vrot.slane %v595_v6, 2  ;;  %v612_v3 = vsel %vm310_vm2, %v606_v9, 0.0  ;;  %v629_v23 = vrot.slane %v15442_v49, 1  ;;  %v13911_v55 = vld [vmem:[#allocation7 + $0x5dc] sm:$0xf0] }
  0x85   :  { %v609_v11 = vsel %vm351_vm3, %v607_v25, %v608_v56  ;;  %v632_v13 = vsel %vm310_vm2, %v628_v52, 0.0  ;;  %v577_v14 = vadd.f32 %v576_v7, %v575_v43  ;;  %v686_v44 = vsel %vm650_vm4, %v15455_v15, %v15453_v12  ;;  %v9594_v15 = vld [vmem:[#allocation7 + $0x1c0] sm:$0xf] }
  0x86   :  { %v590_v16 = vadd.f32 %v589_v8, %v588_v5  ;;  %v597_v17 = vadd.f32 %v596_v10, %v595_v6  ;;  %v613_v35 = vrot.slane %v612_v3, 4  ;;  %v619_v18 = vsel %vm310_vm2, %v609_v11, 0.0  ;;  %v10362_v61 = vld [vmem:[#allocation7 + $0x7c0] sm:$0xf] }
  0x87   :  { %v633_v34 = vrot.slane %v632_v13, 4  ;;  %v639_v19 = vsel %vm310_vm2, %v629_v23, 0.0  ;;  %v578_v20 = vmul.f32 0.04, %v570_v59  ;;  %v620_v28 = vrot.slane %v619_v18, 4 }
  0x88   :  { %v591_v21 = vrot.slane %v590_v16, 1  ;;  %v598_v27 = vrot.slane %v597_v17, 1  ;;  %v579_v49 = vmul.f32 0.04, %v577_v14  ;;  %v614_v29 = vadd.f32 %v613_v35, %v612_v3  ;;  %v9562_v63 = vld [vmem:[#allocation7 + $0x180] sm:$0xf] }
  0x89   :  { %v634_v36 = vadd.f32 %v633_v34, %v632_v13  ;;  %v640_v38 = vrot.slane %v639_v19, 4  ;;  %v621_v40 = vadd.f32 %v620_v28, %v619_v18  ;;  %v690_v12 = vsel %vm655_vm5, %v15461_v30, %v15459_v37  ;;  %v13975_v30 = vld [vmem:[#allocation7 + $0x7dc] sm:$0xf0] }
  0x8a   :  { %v592_v39 = vadd.f32 %v591_v21, %v590_v16  ;;  %v599_v26 = vadd.f32 %v598_v27, %v597_v17  ;;  %v615_v46 = vrot.slane %v614_v29, 2  ;;  %v694_v60 = vsel %vm660_vm6, %v543_v24, %v15465_v48  ;;  %v13775_v33 = vld [vmem:[#allocation7 + $0x19c] sm:$0xf0] }
  0x8b   :  { %v635_v50 = vrot.slane %v634_v36, 2  ;;  %v641_v42 = vadd.f32 %v640_v38, %v639_v19  ;;  %v622_v47 = vrot.slane %v621_v40, 2  ;;  %v724_v37 = vsel %vm351_vm3, %v686_v44, %v690_v12  ;;  %v9818_v43 = vld [vmem:[#allocation7 + $0x380] sm:$0xf] }
  0x8c   :  { %v600_v57 = vmul.f32 0.04, %v592_v39  ;;  %v601_v58 = vmul.f32 0.04, %v599_v26  ;;  %v616_v51 = vadd.f32 %v615_v46, %v614_v29  ;;  %v698_v1 = vsel %vm665_vm7, %v563_v41, %v562_v4  ;;  %v13839_v5 = vld [vmem:[#allocation7 + $0x39c] sm:$0xf0] }
  0x8d   :  { %v636_v32 = vadd.f32 %v635_v50, %v634_v36  ;;  %v642_v62 = vrot.slane %v641_v42, 2  ;;  %v623_v0 = vadd.f32 %v622_v47, %v621_v40  ;;  %v702_v2 = vsel %vm650_vm4, %v579_v49, %v578_v20  ;;  %v10074_v25 = vld [vmem:[#allocation7 + $0x580] sm:$0xf] }
  0x8e   :  { %v9595_v22 = vor.u32 %v13783_v45, %v9594_v15  ;;  %v617_v6 = vrot.slane %v616_v51, 1  ;;  %v706_v24 = vsel %vm655_vm5, %v601_v58, %v600_v57  ;;  %v13903_v56 = vld [vmem:[#allocation7 + $0x59c] sm:$0xf0]  ;;  %v725_v59 = vsel %vm717_vm8, %v724_v37, %v694_v60 }
  0x8f   :  { %v637_v9 = vrot.slane %v636_v32, 1  ;;  %v643_v48 = vadd.f32 %v642_v62, %v641_v42  ;;  %v624_v52 = vrot.slane %v623_v0, 1  ;;  %v9851_v7 = vor.u32 %v13847_v53, %v9850_v31  ;;  %v10330_v4 = vld [vmem:[#allocation7 + $0x780] sm:$0xf] }
  0x90   :  { %6979 = vmatpush.bf16.msra.mxu1 %v9595_v22  ;;  %v10107_v8 = vor.u32 %v13911_v55, %v10106_v54  ;;  %v13967_v41 = vld [vmem:[#allocation7 + $0x79c] sm:$0xf0]  ;;  %v618_v10 = vadd.f32 %v617_v6, %v616_v51  ;;  %v10363_v23 = vor.u32 %v13975_v30, %v10362_v61  ;;  %v9563_v17 = vor.u32 %v13775_v33, %v9562_v63 }
  0x91   :  { %v638_v11 = vadd.f32 %v637_v9, %v636_v32  ;;  %v644_v3 = vrot.slane %v643_v48, 1  ;;  %v9530_v13 = vld [vmem:[#allocation7 + $0x140] sm:$0xf]  ;;  %v625_v16 = vadd.f32 %v624_v52, %v623_v0  ;;  %6992 = vmatpush.bf16.msra.mxu2 %v9851_v7  ;;  %v9819_v44 = vor.u32 %v13839_v5, %v9818_v43 }
  0x92   :  { %v13767_v14 = vld [vmem:[#allocation7 + $0x15c] sm:$0xf0]  ;;  %7005 = vmatpush.bf16.msra.mxu3 %v10107_v8  ;;  %v626_v19 = vmul.f32 0.04, %v618_v10  ;;  %7018 = vmatpush.bf16.msrb.mxu0 %v10363_v23  ;;  %v10075_v27 = vor.u32 %v13903_v56, %v10074_v25  ;;  %v727_v29 = vsel %vm351_vm3, %v702_v2, %v706_v24  ;;  %v10331_v36 = vor.u32 %v13967_v41, %v10330_v4 }
  0x93   :  { %v9786_v35 = vld [vmem:[#allocation7 + $0x340] sm:$0xf]  ;;  %v645_v20 = vadd.f32 %v644_v3, %v643_v48  ;;  %v646_v21 = vmul.f32 0.04, %v638_v11  ;;  %v627_v49 = vmul.f32 0.04, %v625_v16  ;;  %v9531_v38 = vor.u32 %v13767_v14, %v9530_v13 }
  0x94   :  { %v13831_v18 = vld [vmem:[#allocation7 + $0x35c] sm:$0xf0]  ;;  %6980 = vmatpush.bf16.msra.mxu1 %v9563_v17  ;;  %v726_v12 = vsel %vm719_vm9, %v725_v59, %v698_v1  ;;  %vm8682_vm10 = vcmask 1045508  }
  0x95   :  { %v10042_v34 = vld [vmem:[#allocation7 + $0x540] sm:$0xf]  ;;  %v647_v40 = vmul.f32 0.04, %v645_v20  ;;  %v710_v46 = vsel %vm660_vm6, %v627_v49, %v626_v19  ;;  %6993 = vmatpush.bf16.msra.mxu2 %v9819_v44  ;;  %v9787_v50 = vor.u32 %v13831_v18, %v9786_v35 }
  0x96   :  { %v13895_v28 = vld [vmem:[#allocation7 + $0x55c] sm:$0xf0]  ;;  %7006 = vmatpush.bf16.msra.mxu3 %v10075_v27  ;;  %v728_v54 = vsel %vm717_vm8, %v727_v29, %v710_v46  ;;  %7019 = vmatpush.bf16.msrb.mxu0 %v10331_v36 }
  0x97   :  { %v10298_v39 = vld [vmem:[#allocation7 + $0x740] sm:$0xf]  ;;  %v10043_v42 = vor.u32 %v13895_v28, %v10042_v34  ;;  %v714_v53 = vsel %vm665_vm7, %v647_v40, %v646_v21 }
  0x98   :  { %v13959_v26 = vld [vmem:[#allocation7 + $0x75c] sm:$0xf0]  ;;  %v729_v47 = vsel %vm719_vm9, %v728_v54, %v714_v53  ;;  %6981 = vmatpush.bf16.msra.mxu1 %v9531_v38 }
  0x99   :  { %v9498_v15 = vld [vmem:[#allocation7 + $0x100] sm:$0xf]  ;;  %v10299_v60 = vor.u32 %v13959_v26, %v10298_v39  ;;  %v731_v32 = vpack.c.bf16 %v729_v47, %v726_v12  ;;  %6994 = vmatpush.bf16.msra.mxu2 %v9787_v50 }
  0x9a   :  { %v13759_v45 = vld [vmem:[#allocation7 + $0x11c] sm:$0xf0]  ;;  %7007 = vmatpush.bf16.msra.mxu3 %v10043_v42 }
  0x9b   :  { %v9754_v31 = vld [vmem:[#allocation7 + $0x300] sm:$0xf]  ;;  %v9499_v61 = vor.u32 %v13759_v45, %v9498_v15  ;;  %9367 = vmatmul.msk.bf16.gmra.mxu0 %vm188_vm0, %v731_v32 }
  0x9c   :  { %v13823_v55 = vld [vmem:[#allocation7 + $0x31c] sm:$0xf0]  ;;  %7020 = vmatpush.bf16.msrb.mxu0 %v10299_v60 }
  0x9d   :  { %v10010_v57 = vld [vmem:[#allocation7 + $0x500] sm:$0xf]  ;;  %v9755_v63 = vor.u32 %v13823_v55, %v9754_v31  ;;  %6982 = vmatpush.bf16.msra.mxu1 %v9499_v61 }
  0x9e   :  { %v13887_v58 = vld [vmem:[#allocation7 + $0x51c] sm:$0xf0] }
  0x9f   :  { %v10266_v51 = vld [vmem:[#allocation7 + $0x700] sm:$0xf]  ;;  %v10011_v0 = vor.u32 %v13887_v58, %v10010_v57  ;;  %6995 = vmatpush.bf16.msra.mxu2 %v9755_v63 }
  0xa0   :  { %v13951_v62 = vld [vmem:[#allocation7 + $0x71c] sm:$0xf0] }
  0xa1   :  { %v9466_v37 = vld [vmem:[#allocation7 + $0xc0] sm:$0xf]  ;;  %v10267_v43 = vor.u32 %v13951_v62, %v10266_v51  ;;  %7008 = vmatpush.bf16.msra.mxu3 %v10011_v0 }
  0xa2   :  { %v13751_v30 = vld [vmem:[#allocation7 + $0xdc] sm:$0xf0] }
  0xa3   :  { %v9722_v1 = vld [vmem:[#allocation7 + $0x2c0] sm:$0xf]  ;;  %v9467_v5 = vor.u32 %v13751_v30, %v9466_v37  ;;  %7021 = vmatpush.bf16.msrb.mxu0 %v10267_v43 }
  0xa4   :  { %v13815_v2 = vld [vmem:[#allocation7 + $0x2dc] sm:$0xf0] }
  0xa5   :  { %v9978_v22 = vld [vmem:[#allocation7 + $0x4c0] sm:$0xf]  ;;  %v9723_v25 = vor.u32 %v13815_v2, %v9722_v1  ;;  %6983 = vmatpush.bf16.msra.mxu1 %v9467_v5 }
  0xa6   :  { %v13879_v33 = vld [vmem:[#allocation7 + $0x4dc] sm:$0xf0] }
  0xa7   :  { %v10234_v6 = vld [vmem:[#allocation7 + $0x6c0] sm:$0xf]  ;;  %v9979_v56 = vor.u32 %v13879_v33, %v9978_v22  ;;  %6996 = vmatpush.bf16.msra.mxu2 %v9723_v25 }
  0xa8   :  { %v13943_v9 = vld [vmem:[#allocation7 + $0x6dc] sm:$0xf0] }
  0xa9   :  { %v9434_v48 = vld [vmem:[#allocation7 + $0x80] sm:$0xf]  ;;  %v10235_v4 = vor.u32 %v13943_v9, %v10234_v6  ;;  %7009 = vmatpush.bf16.msra.mxu3 %v9979_v56 }
  0xaa   :  { %v13743_v24 = vld [vmem:[#allocation7 + $0x9c] sm:$0xf0] }
  0xab   :  { %v9690_v52 = vld [vmem:[#allocation7 + $0x280] sm:$0xf]  ;;  %v9435_v41 = vor.u32 %v13743_v24, %v9434_v48  ;;  %7022 = vmatpush.bf16.msrb.mxu0 %v10235_v4 }
  0xac   :  { %v13807_v59 = vld [vmem:[#allocation7 + $0x29c] sm:$0xf0] }
  0xad   :  { %v9946_v7 = vld [vmem:[#allocation7 + $0x480] sm:$0xf]  ;;  %v9691_v13 = vor.u32 %v13807_v59, %v9690_v52  ;;  %6984 = vmatpush.bf16.msra.mxu1 %v9435_v41 }
  0xae   :  { %v13871_v8 = vld [vmem:[#allocation7 + $0x49c] sm:$0xf0] }
  0xaf   :  { %v10202_v10 = vld [vmem:[#allocation7 + $0x680] sm:$0xf]  ;;  %v9947_v14 = vor.u32 %v13871_v8, %v9946_v7  ;;  %6997 = vmatpush.bf16.msra.mxu2 %v9691_v13 }
  0xb0   :  { %v13935_v11 = vld [vmem:[#allocation7 + $0x69c] sm:$0xf0] }
  0xb1   :  { %v9402_v3 = vld [vmem:[#allocation7 + $0x40] sm:$0xf]  ;;  %v10203_v18 = vor.u32 %v13935_v11, %v10202_v10  ;;  %7010 = vmatpush.bf16.msra.mxu3 %v9947_v14 }
  0xb2   :  { %v13735_v23 = vld [vmem:[#allocation7 + $0x5c] sm:$0xf0] }
  0xb3   :  { %v9658_v16 = vld [vmem:[#allocation7 + $0x240] sm:$0xf]  ;;  %v9403_v34 = vor.u32 %v13735_v23, %v9402_v3  ;;  %7023 = vmatpush.bf16.msrb.mxu0 %v10203_v18 }
  0xb4   :  { %v13799_v17 = vld [vmem:[#allocation7 + $0x25c] sm:$0xf0] }
  0xb5   :  { %v9914_v44 = vld [vmem:[#allocation7 + $0x440] sm:$0xf]  ;;  %v9659_v49 = vor.u32 %v13799_v17, %v9658_v16  ;;  %6985 = vmatpush.bf16.msra.mxu1 %v9403_v34 }
  0xb6   :  { %v13863_v35 = vld [vmem:[#allocation7 + $0x45c] sm:$0xf0] }
  0xb7   :  { %v10170_v19 = vld [vmem:[#allocation7 + $0x640] sm:$0xf]  ;;  %v9915_v29 = vor.u32 %v13863_v35, %v9914_v44  ;;  %6998 = vmatpush.bf16.msra.mxu2 %v9659_v49 }
  0xb8   :  { %v13927_v20 = vld [vmem:[#allocation7 + $0x65c] sm:$0xf0] }
  0xb9   :  { %v9370_v21 = vld [vmem:[#allocation7] sm:$0xf]  ;;  %v10171_v15 = vor.u32 %v13927_v20, %v10170_v19  ;;  %7011 = vmatpush.bf16.msra.mxu3 %v9915_v29 }
  0xba   :  { %v13727_v27 = vld [vmem:[#allocation7 + $0x1c] sm:$0xf0] }
  0xbb   :  { %v10618_v28 = vld [vmem:[#allocation7 + $0x9c0] sm:$0xf]  ;;  %v9371_v45 = vor.u32 %v13727_v27, %v9370_v21  ;;  %7024 = vmatpush.bf16.msrb.mxu0 %v10171_v15 }
  0xbc   :  { %v14039_v36 = vld [vmem:[#allocation7 + $0x9dc] sm:$0xf0] }
  0xbd   :  { %v9626_v38 = vld [vmem:[#allocation7 + $0x200] sm:$0xf]  ;;  %v10619_v31 = vor.u32 %v14039_v36, %v10618_v28  ;;  %6986 = vmatpush.bf16.msra.mxu1 %v9371_v45 }
  0xbe   :  { %v13791_v39 = vld [vmem:[#allocation7 + $0x21c] sm:$0xf0] }
  0xbf   :  { %v9882_v26 = vld [vmem:[#allocation7 + $0x400] sm:$0xf]  ;;  %v9627_v57 = vor.u32 %v13791_v39, %v9626_v38 }
  0xc0   :  { %v13855_v40 = vld [vmem:[#allocation7 + $0x41c] sm:$0xf0] }
  0xc1   :  { %v10874_v12 = vld [vmem:[#allocation7 + $0xbc0] sm:$0xf]  ;;  %v9883_v58 = vor.u32 %v13855_v40, %v9882_v26  ;;  %7031 = vmatpush.bf16.msrb.mxu1 %v10619_v31  ;;  %6999 = vmatpush.bf16.msra.mxu2 %v9627_v57 }
  0xc2   :  { %v14103_v46 = vld [vmem:[#allocation7 + $0xbdc] sm:$0xf0] }
  0xc3   :  { %v11130_v50 = vld [vmem:[#allocation7 + $0xdc0] sm:$0xf]  ;;  %v10875_v51 = vor.u32 %v14103_v46, %v10874_v12  ;;  %7012 = vmatpush.bf16.msra.mxu3 %v9883_v58 }
  0xc4   :  { %v14167_v42 = vld [vmem:[#allocation7 + $0xddc] sm:$0xf0] }
  0xc5   :  { %v10138_v53 = vld [vmem:[#allocation7 + $0x600] sm:$0xf]  ;;  %v11131_v32 = vor.u32 %v14167_v42, %v11130_v50  ;;  %7044 = vmatpush.bf16.msrb.mxu2 %v10875_v51 }
  0xc6   :  { %v13919_v54 = vld [vmem:[#allocation7 + $0x61c] sm:$0xf0] }
  0xc7   :  { %v11386_v55 = vld [vmem:[#allocation7 + $0xfc0] sm:$0xf]  ;;  %v10139_v37 = vor.u32 %v13919_v54, %v10138_v53  ;;  %7057 = vmatpush.bf16.msrb.mxu3 %v11131_v32 }
  0xc8   :  { %v14231_v47 = vld [vmem:[#allocation7 + $0xfdc] sm:$0xf0] }
  0xc9   :  { %v10586_v60 = vld [vmem:[#allocation7 + $0x980] sm:$0xf]  ;;  %v11387_v1 = vor.u32 %v14231_v47, %v11386_v55  ;;  %7025 = vmatpush.bf16.msrb.mxu0 %v10139_v37 }
  0xca   :  { %v14031_v61 = vld [vmem:[#allocation7 + $0x99c] sm:$0xf0] }
  0xcb   :  { %v10842_v62 = vld [vmem:[#allocation7 + $0xb80] sm:$0xf]  ;;  %v10587_v2 = vor.u32 %v14031_v61, %v10586_v60 }
  0xcc   :  { %v14095_v30 = vld [vmem:[#allocation7 + $0xb9c] sm:$0xf0] }
  0xcd   :  { %v11098_v63 = vld [vmem:[#allocation7 + $0xd80] sm:$0xf]  ;;  %v10843_v6 = vor.u32 %v14095_v30, %v10842_v62  ;;  %7070 = vmatpush.bf16.msra.mxu0 %v11387_v1  ;;  %7032 = vmatpush.bf16.msrb.mxu1 %v10587_v2 }
  0xce   :  { %v14159_v0 = vld [vmem:[#allocation7 + $0xd9c] sm:$0xf0] }
  0xcf   :  { %v11354_v22 = vld [vmem:[#allocation7 + $0xf80] sm:$0xf]  ;;  %v11099_v9 = vor.u32 %v14159_v0, %v11098_v63  ;;  %7045 = vmatpush.bf16.msrb.mxu2 %v10843_v6 }
  0xd0   :  { %v14223_v33 = vld [vmem:[#allocation7 + $0xf9c] sm:$0xf0] }
  0xd1   :  { %v10554_v43 = vld [vmem:[#allocation7 + $0x940] sm:$0xf]  ;;  %v11355_v52 = vor.u32 %v14223_v33, %v11354_v22  ;;  %7058 = vmatpush.bf16.msrb.mxu3 %v11099_v9 }
  0xd2   :  { %v14023_v5 = vld [vmem:[#allocation7 + $0x95c] sm:$0xf0] }
  0xd3   :  { %v10810_v48 = vld [vmem:[#allocation7 + $0xb40] sm:$0xf]  ;;  %v10555_v59 = vor.u32 %v14023_v5, %v10554_v43  ;;  %7071 = vmatpush.bf16.msra.mxu0 %v11355_v52 }
  0xd4   :  { %v14087_v24 = vld [vmem:[#allocation7 + $0xb5c] sm:$0xf0] }
  0xd5   :  { %v11066_v25 = vld [vmem:[#allocation7 + $0xd40] sm:$0xf]  ;;  %v10811_v10 = vor.u32 %v14087_v24, %v10810_v48  ;;  %7033 = vmatpush.bf16.msrb.mxu1 %v10555_v59 }
  0xd6   :  { %v14151_v56 = vld [vmem:[#allocation7 + $0xd5c] sm:$0xf0] }
  0xd7   :  { %v11322_v7 = vld [vmem:[#allocation7 + $0xf40] sm:$0xf]  ;;  %v11067_v11 = vor.u32 %v14151_v56, %v11066_v25  ;;  %7046 = vmatpush.bf16.msrb.mxu2 %v10811_v10 }
  0xd8   :  { %v14215_v8 = vld [vmem:[#allocation7 + $0xf5c] sm:$0xf0] }
  0xd9   :  { %v10522_v4 = vld [vmem:[#allocation7 + $0x900] sm:$0xf]  ;;  %v11323_v16 = vor.u32 %v14215_v8, %v11322_v7  ;;  %7059 = vmatpush.bf16.msrb.mxu3 %v11067_v11  ;;  %v15503_v8 = vld [vmem:[#allocation5] ss:$0 sm:$0xff] }
  0xda   :  { %v14015_v41 = vld [vmem:[#allocation7 + $0x91c] sm:$0xf0] }
  0xdb   :  { %v10778_v3 = vld [vmem:[#allocation7 + $0xb00] sm:$0xf]  ;;  %v10523_v17 = vor.u32 %v14015_v41, %v10522_v4  ;;  %7072 = vmatpush.bf16.msra.mxu0 %v11323_v16 }
  0xdc   :  { %v14079_v23 = vld [vmem:[#allocation7 + $0xb1c] sm:$0xf0] }
  0xdd   :  { %v11034_v13 = vld [vmem:[#allocation7 + $0xd00] sm:$0xf]  ;;  %v10779_v19 = vor.u32 %v14079_v23, %v10778_v3  ;;  %7034 = vmatpush.bf16.msrb.mxu1 %v10523_v17 }
  0xde   :  { %v14143_v14 = vld [vmem:[#allocation7 + $0xd1c] sm:$0xf0] }
  0xdf   :  { %v11290_v44 = vld [vmem:[#allocation7 + $0xf00] sm:$0xf]  ;;  %v11035_v20 = vor.u32 %v14143_v14, %v11034_v13  ;;  %7047 = vmatpush.bf16.msrb.mxu2 %v10779_v19 }
  0xe0   :  { %v14207_v35 = vld [vmem:[#allocation7 + $0xf1c] sm:$0xf0] }
  0xe1   :  { %v10490_v18 = vld [vmem:[#allocation7 + $0x8c0] sm:$0xf]  ;;  %v11291_v29 = vor.u32 %v14207_v35, %v11290_v44  ;;  %7060 = vmatpush.bf16.msrb.mxu3 %v11035_v20  ;;  %v759_v4 = vpop.f32.mrf.mxu0 }
  0xe2   :  { %v14007_v34 = vld [vmem:[#allocation7 + $0x8dc] sm:$0xf0]  ;;  %v760_v41 = vadd.f32 %v15503_v8, %v759_v4 }
  0xe3   :  { %v10746_v21 = vld [vmem:[#allocation7 + $0xac0] sm:$0xf]  ;;  %v10491_v36 = vor.u32 %v14007_v34, %v10490_v18  ;;  %7073 = vmatpush.bf16.msra.mxu0 %v11291_v29 }
  0xe4   :  { %v14071_v27 = vld [vmem:[#allocation7 + $0xadc] sm:$0xf0]  ;;  %v769_v13 = vmax.f32 %v760_v41, 0.0 }
  0xe5   :  { %v11002_v28 = vld [vmem:[#allocation7 + $0xcc0] sm:$0xf]  ;;  %v10747_v12 = vor.u32 %v14071_v27, %v10746_v21  ;;  %7035 = vmatpush.bf16.msrb.mxu1 %v10491_v36 }
  0xe6   :  { %v14135_v49 = vld [vmem:[#allocation7 + $0xcdc] sm:$0xf0]  ;;  %v774_v34 = vrot.slane %v769_v13, 2  ;;  %v776_v19 = vrot.slane %v769_v13, 4  ;;  %v778_v20 = vrot.slane %v769_v13, 6  ;;  %v15506_v21 = vpack.c.bf16 %v769_v13, %v769_v13 }
  0xe7   :  { %v11258_v38 = vld [vmem:[#allocation7 + $0xec0] sm:$0xf]  ;;  %v11003_v15 = vor.u32 %v14135_v49, %v11002_v28  ;;  %7048 = vmatpush.bf16.msrb.mxu2 %v10747_v12 }
  0xe8   :  { %v14199_v39 = vld [vmem:[#allocation7 + $0xedc] sm:$0xf0]  ;;  %v15508_v29 = vpack.c.bf16 %v774_v34, %v774_v34  ;;  %v15510_v36 = vpack.c.bf16 %v776_v19, %v776_v19  ;;  %6987 = vmatmul.bf16.vlgmr.msra.gmra.mxu1 %v15506_v21 }
  0xe9   :  { %v10458_v26 = vld [vmem:[#allocation7 + $0x880] sm:$0xf]  ;;  %v11259_v45 = vor.u32 %v14199_v39, %v11258_v38  ;;  %7061 = vmatpush.bf16.msrb.mxu3 %v11003_v15  ;;  %v15512_v38 = vpack.c.bf16 %v778_v20, %v778_v20  ;;  %v761_v15 = vpop.f32.mrf.mxu0 }
  0xea   :  { %v13999_v40 = vld [vmem:[#allocation7 + $0x89c] sm:$0xf0]  ;;  %7000 = vmatmul.bf16.vlgmr.msra.gmra.mxu2 %v15508_v29  ;;  %7013 = vmatmul.bf16.vlgmr.msra.gmra.mxu3 %v15510_v36 }
  0xeb   :  { %v10459_v46 = vor.u32 %v13999_v40, %v10458_v26  ;;  %7074 = vmatpush.bf16.msra.mxu0 %v11259_v45  ;;  %v10714_v50 = vld [vmem:[#allocation7 + $0xa80] sm:$0xf] }
  0xec   :  { %v14063_v42 = vld [vmem:[#allocation7 + $0xa9c] sm:$0xf0]  ;;  %7026 = vmatmul.bf16.vlgmr.msrb.gmra.mxu0 %v15512_v38 }
  0xed   :  { %7036 = vmatpush.bf16.msrb.mxu1 %v10459_v46  ;;  %v10970_v31 = vld [vmem:[#allocation7 + $0xc80] sm:$0xf]  ;;  %v10715_v53 = vor.u32 %v14063_v42, %v10714_v50 }
  0xee   :  { %v14127_v54 = vld [vmem:[#allocation7 + $0xc9c] sm:$0xf0] }
  0xef   :  { %v11226_v55 = vld [vmem:[#allocation7 + $0xe80] sm:$0xf]  ;;  %v10971_v58 = vor.u32 %v14127_v54, %v10970_v31  ;;  %7049 = vmatpush.bf16.msrb.mxu2 %v10715_v53 }
  0xf0   :  { %v14191_v57 = vld [vmem:[#allocation7 + $0xe9c] sm:$0xf0] }
  0xf1   :  { %v11227_v47 = vor.u32 %v14191_v57, %v11226_v55  ;;  %v10426_v60 = vld [vmem:[#allocation7 + $0x840] sm:$0xf]  ;;  %7062 = vmatpush.bf16.msrb.mxu3 %v10971_v58  ;;  %v762_v55 = vadd.f32 %v15503_v8, %v761_v15 }
  0xf2   :  { %v13991_v61 = vld [vmem:[#allocation7 + $0x85c] sm:$0xf0] }
  0xf3   :  { %v10682_v51 = vld [vmem:[#allocation7 + $0xa40] sm:$0xf]  ;;  %v10427_v32 = vor.u32 %v13991_v61, %v10426_v60  ;;  %7075 = vmatpush.bf16.msra.mxu0 %v11227_v47 }
  0xf4   :  { %v14055_v62 = vld [vmem:[#allocation7 + $0xa5c] sm:$0xf0] }
  0xf5   :  { %v10938_v37 = vld [vmem:[#allocation7 + $0xc40] sm:$0xf]  ;;  %v10683_v63 = vor.u32 %v14055_v62, %v10682_v51  ;;  %7037 = vmatpush.bf16.msrb.mxu1 %v10427_v32 }
  0xf6   :  { %v14119_v30 = vld [vmem:[#allocation7 + $0xc5c] sm:$0xf0] }
  0xf7   :  { %v10939_v0 = vor.u32 %v14119_v30, %v10938_v37  ;;  %v11194_v1 = vld [vmem:[#allocation7 + $0xe40] sm:$0xf]  ;;  %7050 = vmatpush.bf16.msrb.mxu2 %v10683_v63 }
  0xf8   :  { %v14183_v2 = vld [vmem:[#allocation7 + $0xe5c] sm:$0xf0] }
  0xf9   :  { %v10394_v22 = vld [vmem:[#allocation7 + $0x800] sm:$0xf]  ;;  %v11195_v33 = vor.u32 %v14183_v2, %v11194_v1  ;;  %7063 = vmatpush.bf16.msrb.mxu3 %v10939_v0  ;;  %v770_v2 = vmax.f32 %v762_v55, 0.0 }
  0xfa   :  { %v13983_v43 = vld [vmem:[#allocation7 + $0x81c] sm:$0xf0] }
  0xfb   :  { %v10395_v5 = vor.u32 %v13983_v43, %v10394_v22  ;;  %7076 = vmatpush.bf16.msra.mxu0 %v11195_v33  ;;  %v10650_v6 = vld [vmem:[#allocation7 + $0xa00] sm:$0xf] }
  0xfc   :  { %v14047_v9 = vld [vmem:[#allocation7 + $0xa1c] sm:$0xf0] }
  0xfd   :  { %v10906_v48 = vld [vmem:[#allocation7 + $0xc00] sm:$0xf]  ;;  %7038 = vmatpush.bf16.msrb.mxu1 %v10395_v5  ;;  %v10651_v24 = vor.u32 %v14047_v9, %v10650_v6 }
  0xfe   :  { %v14111_v25 = vld [vmem:[#allocation7 + $0xc1c] sm:$0xf0] }
  0xff   :  { %v11162_v56 = vld [vmem:[#allocation7 + $0xe00] sm:$0xf]  ;;  %v10907_v59 = vor.u32 %v14111_v25, %v10906_v48  ;;  %7051 = vmatpush.bf16.msrb.mxu2 %v10651_v24 }
 0x100   :  { %v14175_v52 = vld [vmem:[#allocation7 + $0xe1c] sm:$0xf0] }
 0x101   :  { %v11163_v7 = vor.u32 %v14175_v52, %v11162_v56  ;;  %7064 = vmatpush.bf16.msrb.mxu3 %v10907_v59  ;;  %v11642_v10 = vld [vmem:[#allocation7 + $0x11c0] sm:$0xf]  ;;  %v781_v59 = vrot.slane %v770_v2, 2 }
 0x102   :  { %v14295_v11 = vld [vmem:[#allocation7 + $0x11dc] sm:$0xf0] }
 0x103   :  { %7077 = vmatpush.bf16.msra.mxu0 %v11163_v7  ;;  %v11898_v3 = vld [vmem:[#allocation7 + $0x13c0] sm:$0xf]  ;;  %v11643_v17 = vor.u32 %v14295_v11, %v11642_v10  ;;  %v783_v11 = vrot.slane %v770_v2, 4  ;;  %v15521_v34 = vpack.c.bf16 %v781_v59, %v781_v59 }
 0x104   :  { %v14359_v23 = vld [vmem:[#allocation7 + $0x13dc] sm:$0xf0] }
 0x105   :  { %v12154_v14 = vld [vmem:[#allocation7 + $0x15c0] sm:$0xf]  ;;  %v11899_v28 = vor.u32 %v14359_v23, %v11898_v3  ;;  %7083 = vmatpush.bf16.msra.mxu1 %v11643_v17  ;;  %v785_v3 = vrot.slane %v770_v2, 6  ;;  %7052 = vmatmul.bf16.vlgmr.msrb.gmra.mxu2 %v15521_v34 }
 0x106   :  { %v14423_v16 = vld [vmem:[#allocation7 + $0x15dc] sm:$0xf0] }
 0x107   :  { %v12410_v44 = vld [vmem:[#allocation7 + $0x17c0] sm:$0xf]  ;;  %v12155_v49 = vor.u32 %v14423_v16, %v12154_v14  ;;  %7096 = vmatpush.bf16.msra.mxu2 %v11899_v28  ;;  %v15523_v28 = vpack.c.bf16 %v783_v11, %v783_v11 }
 0x108   :  { %v14487_v35 = vld [vmem:[#allocation7 + $0x17dc] sm:$0xf0] }
 0x109   :  { %v11610_v18 = vld [vmem:[#allocation7 + $0x1180] sm:$0xf]  ;;  %v12411_v39 = vor.u32 %v14487_v35, %v12410_v44  ;;  %7109 = vmatpush.bf16.msra.mxu3 %v12155_v49  ;;  %v15519_v44 = vpack.c.bf16 %v770_v2, %v770_v2  ;;  %v15525_v49 = vpack.c.bf16 %v785_v3, %v785_v3 }
 0x10a   :  { %v14287_v27 = vld [vmem:[#allocation7 + $0x119c] sm:$0xf0]  ;;  %7065 = vmatmul.bf16.vlgmr.msrb.gmra.mxu3 %v15523_v28 }
 0x10b   :  { %v11866_v26 = vld [vmem:[#allocation7 + $0x1380] sm:$0xf]  ;;  %v11611_v45 = vor.u32 %v14287_v27, %v11610_v18  ;;  %7122 = vmatpush.bf16.msrb.mxu0 %v12411_v39  ;;  %7039 = vmatmul.bf16.vlgmr.msrb.gmra.mxu1 %v15519_v44 }
 0x10c   :  { %v14351_v40 = vld [vmem:[#allocation7 + $0x139c] sm:$0xf0]  ;;  %7078 = vmatmul.bf16.vlgmr.msra.gmra.mxu0 %v15525_v49 }
 0x10d   :  { %v12122_v12 = vld [vmem:[#allocation7 + $0x1580] sm:$0xf]  ;;  %v11867_v54 = vor.u32 %v14351_v40, %v11866_v26  ;;  %7084 = vmatpush.bf16.msra.mxu1 %v11611_v45 }
 0x10e   :  { %v14415_v46 = vld [vmem:[#allocation7 + $0x159c] sm:$0xf0] }
 0x10f   :  { %v12378_v50 = vld [vmem:[#allocation7 + $0x1780] sm:$0xf]  ;;  %v12123_v57 = vor.u32 %v14415_v46, %v12122_v12  ;;  %7097 = vmatpush.bf16.msra.mxu2 %v11867_v54 }
 0x110   :  { %v14479_v42 = vld [vmem:[#allocation7 + $0x179c] sm:$0xf0] }
 0x111   :  { %v11578_v31 = vld [vmem:[#allocation7 + $0x1140] sm:$0xf]  ;;  %v12379_v58 = vor.u32 %v14479_v42, %v12378_v50  ;;  %7110 = vmatpush.bf16.msra.mxu3 %v12123_v57 }
 0x112   :  { %v14279_v53 = vld [vmem:[#allocation7 + $0x115c] sm:$0xf0] }
 0x113   :  { %v11834_v47 = vld [vmem:[#allocation7 + $0x1340] sm:$0xf]  ;;  %v11579_v51 = vor.u32 %v14279_v53, %v11578_v31  ;;  %7123 = vmatpush.bf16.msrb.mxu0 %v12379_v58 }
 0x114   :  { %v14343_v60 = vld [vmem:[#allocation7 + $0x135c] sm:$0xf0] }
 0x115   :  { %v12090_v61 = vld [vmem:[#allocation7 + $0x1540] sm:$0xf]  ;;  %v11835_v0 = vor.u32 %v14343_v60, %v11834_v47  ;;  %7085 = vmatpush.bf16.msra.mxu1 %v11579_v51 }
 0x116   :  { %v14407_v32 = vld [vmem:[#allocation7 + $0x155c] sm:$0xf0] }
 0x117   :  { %v12346_v62 = vld [vmem:[#allocation7 + $0x1740] sm:$0xf]  ;;  %v12091_v22 = vor.u32 %v14407_v32, %v12090_v61  ;;  %7098 = vmatpush.bf16.msra.mxu2 %v11835_v0 }
 0x118   :  { %v14471_v37 = vld [vmem:[#allocation7 + $0x175c] sm:$0xf0] }
 0x119   :  { %v11546_v30 = vld [vmem:[#allocation7 + $0x1100] sm:$0xf]  ;;  %v12347_v33 = vor.u32 %v14471_v37, %v12346_v62  ;;  %7111 = vmatpush.bf16.msra.mxu3 %v12091_v22 }
 0x11a   :  { %v14271_v63 = vld [vmem:[#allocation7 + $0x111c] sm:$0xf0] }
 0x11b   :  { %v11802_v1 = vld [vmem:[#allocation7 + $0x1300] sm:$0xf]  ;;  %v11547_v6 = vor.u32 %v14271_v63, %v11546_v30  ;;  %7124 = vmatpush.bf16.msrb.mxu0 %v12347_v33 }
 0x11c   :  { %v14335_v43 = vld [vmem:[#allocation7 + $0x131c] sm:$0xf0] }
 0x11d   :  { %v12058_v5 = vld [vmem:[#allocation7 + $0x1500] sm:$0xf]  ;;  %v11803_v25 = vor.u32 %v14335_v43, %v11802_v1  ;;  %7086 = vmatpush.bf16.msra.mxu1 %v11547_v6 }
 0x11e   :  { %v14399_v9 = vld [vmem:[#allocation7 + $0x151c] sm:$0xf0] }
 0x11f   :  { %v12314_v48 = vld [vmem:[#allocation7 + $0x1700] sm:$0xf]  ;;  %v12059_v7 = vor.u32 %v14399_v9, %v12058_v5  ;;  %7099 = vmatpush.bf16.msra.mxu2 %v11803_v25 }
 0x120   :  { %v14463_v24 = vld [vmem:[#allocation7 + $0x171c] sm:$0xf0] }
 0x121   :  { %v11514_v56 = vld [vmem:[#allocation7 + $0x10c0] sm:$0xf]  ;;  %v12315_v4 = vor.u32 %v14463_v24, %v12314_v48  ;;  %7112 = vmatpush.bf16.msra.mxu3 %v12059_v7 }
 0x122   :  { %v14263_v52 = vld [vmem:[#allocation7 + $0x10dc] sm:$0xf0] }
 0x123   :  { %v11770_v41 = vld [vmem:[#allocation7 + $0x12c0] sm:$0xf]  ;;  %v11515_v14 = vor.u32 %v14263_v52, %v11514_v56  ;;  %7125 = vmatpush.bf16.msrb.mxu0 %v12315_v4 }
 0x124   :  { %v14327_v10 = vld [vmem:[#allocation7 + $0x12dc] sm:$0xf0] }
 0x125   :  { %v12026_v23 = vld [vmem:[#allocation7 + $0x14c0] sm:$0xf]  ;;  %v11771_v19 = vor.u32 %v14327_v10, %v11770_v41  ;;  %7087 = vmatpush.bf16.msra.mxu1 %v11515_v14 }
 0x126   :  { %v14391_v13 = vld [vmem:[#allocation7 + $0x14dc] sm:$0xf0] }
 0x127   :  { %v12282_v16 = vld [vmem:[#allocation7 + $0x16c0] sm:$0xf]  ;;  %v12027_v20 = vor.u32 %v14391_v13, %v12026_v23  ;;  %7100 = vmatpush.bf16.msra.mxu2 %v11771_v19 }
 0x128   :  { %v14455_v17 = vld [vmem:[#allocation7 + $0x16dc] sm:$0xf0] }
 0x129   :  { %v11482_v35 = vld [vmem:[#allocation7 + $0x1080] sm:$0xf]  ;;  %v12283_v39 = vor.u32 %v14455_v17, %v12282_v16  ;;  %7113 = vmatpush.bf16.msra.mxu3 %v12027_v20 }
 0x12a   :  { %v14255_v18 = vld [vmem:[#allocation7 + $0x109c] sm:$0xf0] }
 0x12b   :  { %v11738_v27 = vld [vmem:[#allocation7 + $0x1280] sm:$0xf]  ;;  %v11483_v15 = vor.u32 %v14255_v18, %v11482_v35  ;;  %7126 = vmatpush.bf16.msrb.mxu0 %v12283_v39 }
 0x12c   :  { %v14319_v26 = vld [vmem:[#allocation7 + $0x129c] sm:$0xf0] }
 0x12d   :  { %v11994_v40 = vld [vmem:[#allocation7 + $0x1480] sm:$0xf]  ;;  %v11739_v31 = vor.u32 %v14319_v26, %v11738_v27  ;;  %7088 = vmatpush.bf16.msra.mxu1 %v11483_v15 }
 0x12e   :  { %v14383_v12 = vld [vmem:[#allocation7 + $0x149c] sm:$0xf0] }
 0x12f   :  { %v12250_v45 = vld [vmem:[#allocation7 + $0x1680] sm:$0xf]  ;;  %v11995_v53 = vor.u32 %v14383_v12, %v11994_v40  ;;  %7101 = vmatpush.bf16.msra.mxu2 %v11739_v31 }
 0x130   :  { %v14447_v46 = vld [vmem:[#allocation7 + $0x169c] sm:$0xf0] }
 0x131   :  { %v11450_v50 = vld [vmem:[#allocation7 + $0x1040] sm:$0xf]  ;;  %v12251_v55 = vor.u32 %v14447_v46, %v12250_v45  ;;  %7114 = vmatpush.bf16.msra.mxu3 %v11995_v53 }
 0x132   :  { %v14247_v42 = vld [vmem:[#allocation7 + $0x105c] sm:$0xf0] }
 0x133   :  { %v11706_v54 = vld [vmem:[#allocation7 + $0x1240] sm:$0xf]  ;;  %v11451_v60 = vor.u32 %v14247_v42, %v11450_v50  ;;  %7127 = vmatpush.bf16.msrb.mxu0 %v12251_v55 }
 0x134   :  { %v14311_v57 = vld [vmem:[#allocation7 + $0x125c] sm:$0xf0] }
 0x135   :  { %v11962_v58 = vld [vmem:[#allocation7 + $0x1440] sm:$0xf]  ;;  %v11707_v63 = vor.u32 %v14311_v57, %v11706_v54  ;;  %7089 = vmatpush.bf16.msra.mxu1 %v11451_v60 }
 0x136   :  { %v14375_v47 = vld [vmem:[#allocation7 + $0x145c] sm:$0xf0] }
 0x137   :  { %v12218_v61 = vld [vmem:[#allocation7 + $0x1640] sm:$0xf]  ;;  %v11963_v0 = vor.u32 %v14375_v47, %v11962_v58  ;;  %7102 = vmatpush.bf16.msra.mxu2 %v11707_v63 }
 0x138   :  { %v14439_v51 = vld [vmem:[#allocation7 + $0x165c] sm:$0xf0] }
 0x139   :  { %v11418_v32 = vld [vmem:[#allocation7 + $0x1000] sm:$0xf]  ;;  %v12219_v33 = vor.u32 %v14439_v51, %v12218_v61  ;;  %7115 = vmatpush.bf16.msra.mxu3 %v11963_v0 }
 0x13a   :  { %v14239_v62 = vld [vmem:[#allocation7 + $0x101c] sm:$0xf0] }
 0x13b   :  { %v12666_v37 = vld [vmem:[#allocation7 + $0x19c0] sm:$0xf]  ;;  %v11419_v9 = vor.u32 %v14239_v62, %v11418_v32  ;;  %7128 = vmatpush.bf16.msrb.mxu0 %v12219_v33 }
 0x13c   :  { %v14551_v30 = vld [vmem:[#allocation7 + $0x19dc] sm:$0xf0] }
 0x13d   :  { %v11674_v1 = vld [vmem:[#allocation7 + $0x1200] sm:$0xf]  ;;  %v12667_v56 = vor.u32 %v14551_v30, %v12666_v37  ;;  %7090 = vmatpush.bf16.msra.mxu1 %v11419_v9 }
 0x13e   :  { %v14303_v2 = vld [vmem:[#allocation7 + $0x121c] sm:$0xf0] }
 0x13f   :  { %v11930_v22 = vld [vmem:[#allocation7 + $0x1400] sm:$0xf]  ;;  %v11675_v4 = vor.u32 %v14303_v2, %v11674_v1 }
 0x140   :  { %v14367_v43 = vld [vmem:[#allocation7 + $0x141c] sm:$0xf0] }
 0x141   :  { %v12186_v5 = vld [vmem:[#allocation7 + $0x1600] sm:$0xf]  ;;  %v11931_v41 = vor.u32 %v14367_v43, %v11930_v22  ;;  %7135 = vmatpush.bf16.msrb.mxu1 %v12667_v56  ;;  %7103 = vmatpush.bf16.msra.mxu2 %v11675_v4 }
 0x142   :  { %v14431_v6 = vld [vmem:[#allocation7 + $0x161c] sm:$0xf0] }
 0x143   :  { %v12922_v48 = vld [vmem:[#allocation7 + $0x1bc0] sm:$0xf]  ;;  %v12187_v3 = vor.u32 %v14431_v6, %v12186_v5  ;;  %7116 = vmatpush.bf16.msra.mxu3 %v11931_v41 }
 0x144   :  { %v14615_v24 = vld [vmem:[#allocation7 + $0x1bdc] sm:$0xf0] }
 0x145   :  { %v13178_v25 = vld [vmem:[#allocation7 + $0x1dc0] sm:$0xf]  ;;  %v12923_v23 = vor.u32 %v14615_v24, %v12922_v48  ;;  %7129 = vmatpush.bf16.msrb.mxu0 %v12187_v3 }
 0x146   :  { %v14679_v52 = vld [vmem:[#allocation7 + $0x1ddc] sm:$0xf0] }
 0x147   :  { %v13434_v59 = vld [vmem:[#allocation7 + $0x1fc0] sm:$0xf]  ;;  %v13179_v13 = vor.u32 %v14679_v52, %v13178_v25  ;;  %7148 = vmatpush.bf16.msrb.mxu2 %v12923_v23 }
 0x148   :  { %v14743_v7 = vld [vmem:[#allocation7 + $0x1fdc] sm:$0xf0] }
 0x149   :  { %v12634_v10 = vld [vmem:[#allocation7 + $0x1980] sm:$0xf]  ;;  %v13435_v14 = vor.u32 %v14743_v7, %v13434_v59  ;;  %7161 = vmatpush.bf16.msrb.mxu3 %v13179_v13 }
 0x14a   :  { %v14543_v11 = vld [vmem:[#allocation7 + $0x199c] sm:$0xf0] }
 0x14b   :  { %v12890_v16 = vld [vmem:[#allocation7 + $0x1b80] sm:$0xf]  ;;  %v12635_v18 = vor.u32 %v14543_v11, %v12634_v10  ;;  %7174 = vmatpush.bf16.msra.mxu0 %v13435_v14 }
 0x14c   :  { %v14607_v17 = vld [vmem:[#allocation7 + $0x1b9c] sm:$0xf0] }
 0x14d   :  { %v13146_v35 = vld [vmem:[#allocation7 + $0x1d80] sm:$0xf]  ;;  %v12891_v40 = vor.u32 %v14607_v17, %v12890_v16  ;;  %7136 = vmatpush.bf16.msrb.mxu1 %v12635_v18  ;;  %v764_v16 = vpop.f32.mrf.mxu0 }
 0x14e   :  { %v14671_v19 = vld [vmem:[#allocation7 + $0x1d9c] sm:$0xf0]  ;;  %v765_v17 = vadd.f32 %v15503_v8, %v764_v16 }
 0x14f   :  { %v13402_v20 = vld [vmem:[#allocation7 + $0x1f80] sm:$0xf]  ;;  %v13147_v12 = vor.u32 %v14671_v19, %v13146_v35  ;;  %7149 = vmatpush.bf16.msrb.mxu2 %v12891_v40 }
 0x150   :  { %v14735_v27 = vld [vmem:[#allocation7 + $0x1f9c] sm:$0xf0] }
 0x151   :  { %v12602_v39 = vld [vmem:[#allocation7 + $0x1940] sm:$0xf]  ;;  %v13403_v15 = vor.u32 %v14735_v27, %v13402_v20  ;;  %7162 = vmatpush.bf16.msrb.mxu3 %v13147_v12  ;;  %v771_v12 = vmax.f32 %v765_v17, 0.0  ;;  %v13899_v17 = vld [vmem:[#allocation7 + $0x584] sm:$0xf] }
 0x152   :  { %v14535_v26 = vld [vmem:[#allocation7 + $0x195c] sm:$0xf0] }
 0x153   :  { %v12858_v45 = vld [vmem:[#allocation7 + $0x1b40] sm:$0xf]  ;;  %v12603_v42 = vor.u32 %v14535_v26, %v12602_v39  ;;  %7175 = vmatpush.bf16.msra.mxu0 %v13403_v15 }
 0x154   :  { %v14599_v46 = vld [vmem:[#allocation7 + $0x1b5c] sm:$0xf0] }
 0x155   :  { %v13114_v50 = vld [vmem:[#allocation7 + $0x1d40] sm:$0xf]  ;;  %v12859_v58 = vor.u32 %v14599_v46, %v12858_v45  ;;  %7137 = vmatpush.bf16.msrb.mxu1 %v12603_v42 }
 0x156   :  { %v14663_v31 = vld [vmem:[#allocation7 + $0x1d5c] sm:$0xf0] }
 0x157   :  { %v13370_v53 = vld [vmem:[#allocation7 + $0x1f40] sm:$0xf]  ;;  %v13115_v47 = vor.u32 %v14663_v31, %v13114_v50  ;;  %7150 = vmatpush.bf16.msrb.mxu2 %v12859_v58  ;;  %v13779_v58 = vld [vmem:[#allocation7 + $0x1c4] sm:$0xf] }
 0x158   :  { %v14727_v54 = vld [vmem:[#allocation7 + $0x1f5c] sm:$0xf0] }
 0x159   :  { %v12570_v55 = vld [vmem:[#allocation7 + $0x1900] sm:$0xf]  ;;  %v13371_v60 = vor.u32 %v14727_v54, %v13370_v53  ;;  %7163 = vmatpush.bf16.msrb.mxu3 %v13115_v47  ;;  %v788_v53 = vrot.slane %v771_v12, 2  ;;  %v790_v54 = vrot.slane %v771_v12, 4 }
 0x15a   :  { %v14527_v57 = vld [vmem:[#allocation7 + $0x191c] sm:$0xf0] }
 0x15b   :  { %v12826_v61 = vld [vmem:[#allocation7 + $0x1b00] sm:$0xf]  ;;  %v12571_v62 = vor.u32 %v14527_v57, %v12570_v55  ;;  %7176 = vmatpush.bf16.msra.mxu0 %v13371_v60  ;;  %v792_v55 = vrot.slane %v771_v12, 6  ;;  %v15532_v57 = vpack.c.bf16 %v771_v12, %v771_v12 }
 0x15c   :  { %v14591_v51 = vld [vmem:[#allocation7 + $0x1b1c] sm:$0xf0] }
 0x15d   :  { %v13082_v32 = vld [vmem:[#allocation7 + $0x1d00] sm:$0xf]  ;;  %v12827_v2 = vor.u32 %v14591_v51, %v12826_v61  ;;  %7138 = vmatpush.bf16.msrb.mxu1 %v12571_v62  ;;  %v9596_v61 = vld [vmem:[#allocation7 + $0x1e0] sm:$0xf0]  ;;  %v15534_v62 = vpack.c.bf16 %v788_v53, %v788_v53 }
 0x15e   :  { %v14655_v37 = vld [vmem:[#allocation7 + $0x1d1c] sm:$0xf0]  ;;  %7091 = vmatmul.bf16.vlgmr.msra.gmra.mxu1 %v15532_v57 }
 0x15f   :  { %v13338_v30 = vld [vmem:[#allocation7 + $0x1f00] sm:$0xf]  ;;  %v13083_v22 = vor.u32 %v14655_v37, %v13082_v32  ;;  %7151 = vmatpush.bf16.msrb.mxu2 %v12827_v2  ;;  %v15536_v37 = vpack.c.bf16 %v790_v54, %v790_v54  ;;  %v13755_v54 = vld [vmem:[#allocation7 + $0x104] sm:$0xf] }
 0x160   :  { %v14719_v63 = vld [vmem:[#allocation7 + $0x1f1c] sm:$0xf0]  ;;  %7104 = vmatmul.bf16.vlgmr.msra.gmra.mxu2 %v15534_v62 }
 0x161   :  { %v12538_v0 = vld [vmem:[#allocation7 + $0x18c0] sm:$0xf]  ;;  %v13339_v33 = vor.u32 %v14719_v63, %v13338_v30  ;;  %7164 = vmatpush.bf16.msrb.mxu3 %v13083_v22  ;;  %v15538_v30 = vpack.c.bf16 %v792_v55, %v792_v55  ;;  %v766_v22 = vpop.f32.mrf.mxu0  ;;  %v9500_v55 = vld [vmem:[#allocation7 + $0x120] sm:$0xf0] }
 0x162   :  { %v14519_v1 = vld [vmem:[#allocation7 + $0x18dc] sm:$0xf0]  ;;  %7117 = vmatmul.bf16.vlgmr.msra.gmra.mxu3 %v15536_v37 }
 0x163   :  { %v12794_v43 = vld [vmem:[#allocation7 + $0x1ac0] sm:$0xf]  ;;  %v12539_v9 = vor.u32 %v14519_v1, %v12538_v0  ;;  %7177 = vmatpush.bf16.msra.mxu0 %v13339_v33 }
 0x164   :  { %v14583_v5 = vld [vmem:[#allocation7 + $0x1adc] sm:$0xf0]  ;;  %7130 = vmatmul.bf16.vlgmr.msrb.gmra.mxu0 %v15538_v30 }
 0x165   :  { %v13050_v6 = vld [vmem:[#allocation7 + $0x1cc0] sm:$0xf]  ;;  %v12795_v59 = vor.u32 %v14583_v5, %v12794_v43  ;;  %7139 = vmatpush.bf16.msrb.mxu1 %v12539_v9  ;;  %v13843_v5 = vld [vmem:[#allocation7 + $0x3c4] sm:$0xf]  ;;  %v9599_v9 = vor.u32 %v13779_v58, %v9596_v61 }
 0x166   :  { %v14647_v48 = vld [vmem:[#allocation7 + $0x1cdc] sm:$0xf0]  ;;  %v10300_v61 = vld [vmem:[#allocation7 + $0x760] sm:$0xf0] }
 0x167   :  { %v13306_v24 = vld [vmem:[#allocation7 + $0x1ec0] sm:$0xf]  ;;  %v13051_v7 = vor.u32 %v14647_v48, %v13050_v6  ;;  %7152 = vmatpush.bf16.msrb.mxu2 %v12795_v59  ;;  %v9852_v6 = vld [vmem:[#allocation7 + $0x3e0] sm:$0xf0] }
 0x168   :  { %v14711_v25 = vld [vmem:[#allocation7 + $0x1edc] sm:$0xf0]  ;;  %v13907_v48 = vld [vmem:[#allocation7 + $0x5c4] sm:$0xf] }
 0x169   :  { %v12506_v56 = vld [vmem:[#allocation7 + $0x1880] sm:$0xf]  ;;  %v13307_v4 = vor.u32 %v14711_v25, %v13306_v24  ;;  %7165 = vmatpush.bf16.msrb.mxu3 %v13051_v7  ;;  %v10108_v24 = vld [vmem:[#allocation7 + $0x5e0] sm:$0xf0] }
 0x16a   :  { %v14511_v52 = vld [vmem:[#allocation7 + $0x189c] sm:$0xf0]  ;;  %v13971_v25 = vld [vmem:[#allocation7 + $0x7c4] sm:$0xf] }
 0x16b   :  { %v12762_v41 = vld [vmem:[#allocation7 + $0x1a80] sm:$0xf]  ;;  %v12507_v3 = vor.u32 %v14511_v52, %v12506_v56  ;;  %7178 = vmatpush.bf16.msra.mxu0 %v13307_v4  ;;  %v10364_v52 = vld [vmem:[#allocation7 + $0x7e0] sm:$0xf0]  ;;  %v767_v4 = vadd.f32 %v15503_v8, %v766_v22 }
 0x16c   :  { %v14575_v10 = vld [vmem:[#allocation7 + $0x1a9c] sm:$0xf0]  ;;  %v13771_v59 = vld [vmem:[#allocation7 + $0x184] sm:$0xf] }
 0x16d   :  { %v13018_v11 = vld [vmem:[#allocation7 + $0x1c80] sm:$0xf]  ;;  %v12763_v35 = vor.u32 %v14575_v10, %v12762_v41  ;;  %7140 = vmatpush.bf16.msrb.mxu1 %v12507_v3  ;;  %v9564_v7 = vld [vmem:[#allocation7 + $0x1a0] sm:$0xf0]  ;;  %v10111_v3 = vor.u32 %v13907_v48, %v10108_v24  ;;  %v772_v8 = vmax.f32 %v767_v4, 0.0 }
 0x16e   :  { %v14639_v23 = vld [vmem:[#allocation7 + $0x1c9c] sm:$0xf0]  ;;  %v9567_v16 = vor.u32 %v13771_v59, %v9564_v7  ;;  %v9724_v59 = vld [vmem:[#allocation7 + $0x2e0] sm:$0xf0] }
 0x16f   :  { %v13274_v13 = vld [vmem:[#allocation7 + $0x1e80] sm:$0xf]  ;;  %v13019_v20 = vor.u32 %v14639_v23, %v13018_v11  ;;  %7153 = vmatpush.bf16.msrb.mxu2 %v12763_v35  ;;  %v9855_v11 = vor.u32 %v13843_v5, %v9852_v6  ;;  %v13835_v23 = vld [vmem:[#allocation7 + $0x384] sm:$0xf]  ;;  %v797_v53 = vrot.slane %v772_v8, 4  ;;  %v799_v58 = vrot.slane %v772_v8, 6 }
 0x170   :  { %v14703_v14 = vld [vmem:[#allocation7 + $0x1e9c] sm:$0xf0]  ;;  %v10076_v35 = vld [vmem:[#allocation7 + $0x5a0] sm:$0xf0] }
 0x171   :  { %v12474_v18 = vld [vmem:[#allocation7 + $0x1840] sm:$0xf]  ;;  %v13275_v27 = vor.u32 %v14703_v14, %v13274_v13  ;;  %7166 = vmatpush.bf16.msrb.mxu3 %v13019_v20  ;;  %v9820_v13 = vld [vmem:[#allocation7 + $0x3a0] sm:$0xf0]  ;;  %v10367_v14 = vor.u32 %v13971_v25, %v10364_v52 }
 0x172   :  { %v14503_v19 = vld [vmem:[#allocation7 + $0x185c] sm:$0xf0]  ;;  %v13763_v20 = vld [vmem:[#allocation7 + $0x144] sm:$0xf] }
 0x173   :  { %v12730_v39 = vld [vmem:[#allocation7 + $0x1a40] sm:$0xf]  ;;  %v12475_v46 = vor.u32 %v14503_v19, %v12474_v18  ;;  %7179 = vmatpush.bf16.msra.mxu0 %v13275_v27  ;;  %v13963_v18 = vld [vmem:[#allocation7 + $0x784] sm:$0xf] }
 0x174   :  { %v14567_v26 = vld [vmem:[#allocation7 + $0x1a5c] sm:$0xf0]  ;;  %v10332_v19 = vld [vmem:[#allocation7 + $0x7a0] sm:$0xf0] }
 0x175   :  { %v12986_v40 = vld [vmem:[#allocation7 + $0x1c40] sm:$0xf]  ;;  %v12731_v47 = vor.u32 %v14567_v26, %v12730_v39  ;;  %7141 = vmatpush.bf16.msrb.mxu1 %v12475_v46  ;;  %v9532_v27 = vld [vmem:[#allocation7 + $0x160] sm:$0xf0]  ;;  %v9823_v39 = vor.u32 %v13835_v23, %v9820_v13  ;;  %v10079_v26 = vor.u32 %v13899_v17, %v10076_v35  ;;  %v10335_v12 = vor.u32 %v13963_v18, %v10332_v19 }
 0x176   :  { %v14631_v15 = vld [vmem:[#allocation7 + $0x1c5c] sm:$0xf0]  ;;  %v13891_v46 = vld [vmem:[#allocation7 + $0x544] sm:$0xf] }
 0x177   :  { %v13242_v45 = vld [vmem:[#allocation7 + $0x1e40] sm:$0xf]  ;;  %v12987_v60 = vor.u32 %v14631_v15, %v12986_v40  ;;  %7154 = vmatpush.bf16.msrb.mxu2 %v12731_v47  ;;  %v13827_v40 = vld [vmem:[#allocation7 + $0x344] sm:$0xf]  ;;  %v9535_v15 = vor.u32 %v13763_v20, %v9532_v27 }
 0x178   :  { %v14695_v50 = vld [vmem:[#allocation7 + $0x1e5c] sm:$0xf0]  ;;  %v13747_v5 = vld [vmem:[#allocation7 + $0xc4] sm:$0xf] }
 0x179   :  { %v12442_v42 = vld [vmem:[#allocation7 + $0x1800] sm:$0xf]  ;;  %v13243_v63 = vor.u32 %v14695_v50, %v13242_v45  ;;  %7167 = vmatpush.bf16.msrb.mxu3 %v12987_v60  ;;  %v9788_v45 = vld [vmem:[#allocation7 + $0x360] sm:$0xf0] }
 0x17a   :  { %v14495_v31 = vld [vmem:[#allocation7 + $0x181c] sm:$0xf0]  ;;  %v10044_v50 = vld [vmem:[#allocation7 + $0x560] sm:$0xf0]  ;;  %v9791_v47 = vor.u32 %v13827_v40, %v9788_v45 }
 0x17b   :  { %v12698_v51 = vld [vmem:[#allocation7 + $0x1a00] sm:$0xf]  ;;  %v12443_v33 = vor.u32 %v14495_v31, %v12442_v42  ;;  %7180 = vmatpush.bf16.msra.mxu0 %v13243_v63  ;;  %v13955_v42 = vld [vmem:[#allocation7 + $0x744] sm:$0xf]  ;;  %v795_v31 = vrot.slane %v772_v8, 2  ;;  %v10047_v60 = vor.u32 %v13891_v46, %v10044_v50 }
 0x17c   :  { %v14559_v32 = vld [vmem:[#allocation7 + $0x1a1c] sm:$0xf0]  ;;  %v9756_v63 = vld [vmem:[#allocation7 + $0x320] sm:$0xf0] }
 0x17d   :  { %v12954_v0 = vld [vmem:[#allocation7 + $0x1c00] sm:$0xf]  ;;  %v12699_v56 = vor.u32 %v14559_v32, %v12698_v51  ;;  %7142 = vmatpush.bf16.msrb.mxu1 %v12443_v33  ;;  %v13819_v51 = vld [vmem:[#allocation7 + $0x304] sm:$0xf]  ;;  %v15545_v32 = vpack.c.bf16 %v772_v8, %v772_v8  ;;  %v15547_v22 = vpack.c.bf16 %v795_v31, %v795_v31  ;;  %v15549_v33 = vpack.c.bf16 %v797_v53, %v797_v53 }
 0x17e   :  { %v14623_v1 = vld [vmem:[#allocation7 + $0x1c1c] sm:$0xf0]  ;;  %v9468_v6 = vld [vmem:[#allocation7 + $0xe0] sm:$0xf0]  ;;  %v9759_v48 = vor.u32 %v13819_v51, %v9756_v63 }
 0x17f   :  { %v13210_v2 = vld [vmem:[#allocation7 + $0x1e00] sm:$0xf]  ;;  %v12955_v41 = vor.u32 %v14623_v1, %v12954_v0  ;;  %7155 = vmatpush.bf16.msrb.mxu2 %v12699_v56  ;;  %v13883_v0 = vld [vmem:[#allocation7 + $0x504] sm:$0xf] }
 0x180   :  { %v14687_v43 = vld [vmem:[#allocation7 + $0x1e1c] sm:$0xf0]  ;;  %v10012_v1 = vld [vmem:[#allocation7 + $0x520] sm:$0xf0]  ;;  %7143 = vmatmul.bf16.vlgmr.msrb.gmra.mxu1 %v15545_v32 }
 0x181   :  { %v13211_v10 = vor.u32 %v14687_v43, %v13210_v2  ;;  %7187 = vmatpush.bf16.msra.mxu1 %v9599_v9  ;;  %7168 = vmatpush.bf16.msrb.mxu3 %v12955_v41  ;;  %v9503_v2 = vor.u32 %v13755_v54, %v9500_v55  ;;  %v10303_v43 = vor.u32 %v13955_v42, %v10300_v61  ;;  %v13947_v25 = vld [vmem:[#allocation7 + $0x704] sm:$0xf] }
 0x182   :  { %v15552_v9 = vpack.c.bf16 %v799_v58, %v799_v58  ;;  %v10015_v24 = vor.u32 %v13883_v0, %v10012_v1  ;;  %v10268_v56 = vld [vmem:[#allocation7 + $0x720] sm:$0xf0]  ;;  %7156 = vmatmul.bf16.vlgmr.msrb.gmra.mxu2 %v15547_v22  ;;  %v9471_v41 = vor.u32 %v13747_v5, %v9468_v6 }
 0x183   :  { %7181 = vmatpush.bf16.msra.mxu0 %v13211_v10  ;;  %7200 = vmatpush.bf16.msra.mxu2 %v9855_v11  ;;  %v13811_v52 = vld [vmem:[#allocation7 + $0x2c4] sm:$0xf]  ;;  %v10271_v10 = vor.u32 %v13947_v25, %v10268_v56 }
 0x184   :  { %7169 = vmatmul.bf16.vlgmr.msrb.gmra.mxu3 %v15549_v33  ;;  %v13875_v7 = vld [vmem:[#allocation7 + $0x4c4] sm:$0xf]  ;;  %v9727_v23 = vor.u32 %v13811_v52, %v9724_v59 }
 0x185   :  { %7213 = vmatpush.bf16.msra.mxu3 %v10111_v3  ;;  %7188 = vmatpush.bf16.msra.mxu1 %v9567_v16  ;;  %v9980_v4 = vld [vmem:[#allocation7 + $0x4e0] sm:$0xf0] }
 0x186   :  { %7182 = vmatmul.bf16.vlgmr.msra.gmra.mxu0 %v15552_v9  ;;  %v13739_v11 = vld [vmem:[#allocation7 + $0x84] sm:$0xf]  ;;  %v9983_v13 = vor.u32 %v13875_v7, %v9980_v4 }
 0x187   :  { %7226 = vmatpush.bf16.msrb.mxu0 %v10367_v14  ;;  %7201 = vmatpush.bf16.msra.mxu2 %v9823_v39  ;;  %v9436_v3 = vld [vmem:[#allocation7 + $0xa0] sm:$0xf0] }
 0x188   :  { %v13939_v14 = vld [vmem:[#allocation7 + $0x6c4] sm:$0xf]  ;;  %v9439_v20 = vor.u32 %v13739_v11, %v9436_v3 }
 0x189   :  { %7214 = vmatpush.bf16.msra.mxu3 %v10079_v26  ;;  %7189 = vmatpush.bf16.msra.mxu1 %v9535_v15  ;;  %v10236_v16 = vld [vmem:[#allocation7 + $0x6e0] sm:$0xf0] }
 0x18a   :  { %v13803_v17 = vld [vmem:[#allocation7 + $0x284] sm:$0xf]  ;;  %v10239_v27 = vor.u32 %v13939_v14, %v10236_v16 }
 0x18b   :  { %7227 = vmatpush.bf16.msrb.mxu0 %v10335_v12  ;;  %7202 = vmatpush.bf16.msra.mxu2 %v9791_v47  ;;  %v9692_v35 = vld [vmem:[#allocation7 + $0x2a0] sm:$0xf0] }
 0x18c   :  { %v13867_v18 = vld [vmem:[#allocation7 + $0x484] sm:$0xf]  ;;  %v9695_v26 = vor.u32 %v13803_v17, %v9692_v35 }
 0x18d   :  { %7215 = vmatpush.bf16.msra.mxu3 %v10047_v60  ;;  %7190 = vmatpush.bf16.msra.mxu1 %v9503_v2  ;;  %v9948_v19 = vld [vmem:[#allocation7 + $0x4a0] sm:$0xf0] }
 0x18e   :  { %v13731_v8 = vld [vmem:[#allocation7 + $0x44] sm:$0xf]  ;;  %v9951_v40 = vor.u32 %v13867_v18, %v9948_v19 }
 0x18f   :  { %7228 = vmatpush.bf16.msrb.mxu0 %v10303_v43  ;;  %7203 = vmatpush.bf16.msra.mxu2 %v9759_v48  ;;  %v9404_v39 = vld [vmem:[#allocation7 + $0x60] sm:$0xf0] }
 0x190   :  { %v13931_v12 = vld [vmem:[#allocation7 + $0x684] sm:$0xf]  ;;  %v9407_v31 = vor.u32 %v13731_v8, %v9404_v39 }
 0x191   :  { %7216 = vmatpush.bf16.msra.mxu3 %v10015_v24  ;;  %7191 = vmatpush.bf16.msra.mxu1 %v9471_v41  ;;  %v10204_v15 = vld [vmem:[#allocation7 + $0x6a0] sm:$0xf0] }
 0x192   :  { %v13795_v45 = vld [vmem:[#allocation7 + $0x244] sm:$0xf]  ;;  %v10207_v54 = vor.u32 %v13931_v12, %v10204_v15 }
 0x193   :  { %7229 = vmatpush.bf16.msrb.mxu0 %v10271_v10  ;;  %7204 = vmatpush.bf16.msra.mxu2 %v9727_v23  ;;  %v9660_v46 = vld [vmem:[#allocation7 + $0x260] sm:$0xf0] }
 0x194   :  { %v13859_v50 = vld [vmem:[#allocation7 + $0x444] sm:$0xf]  ;;  %v9663_v60 = vor.u32 %v13795_v45, %v9660_v46 }
 0x195   :  { %7217 = vmatpush.bf16.msra.mxu3 %v9983_v13  ;;  %v9916_v42 = vld [vmem:[#allocation7 + $0x460] sm:$0xf0]  ;;  %7192 = vmatpush.bf16.msra.mxu1 %v9439_v20 }
 0x196   :  { %v13923_v53 = vld [vmem:[#allocation7 + $0x644] sm:$0xf]  ;;  %v9919_v61 = vor.u32 %v13859_v50, %v9916_v42 }
 0x197   :  { %7230 = vmatpush.bf16.msrb.mxu0 %v10239_v27  ;;  %v10172_v55 = vld [vmem:[#allocation7 + $0x660] sm:$0xf0]  ;;  %7205 = vmatpush.bf16.msra.mxu2 %v9695_v26 }
 0x198   :  { %v13723_v58 = vld [vmem:[#allocation7 + $0x4] sm:$0xf]  ;;  %v10175_v24 = vor.u32 %v13923_v53, %v10172_v55 }
 0x199   :  { %v9372_v47 = vld [vmem:[#allocation7 + $0x20] sm:$0xf0]  ;;  %7218 = vmatpush.bf16.msra.mxu3 %v9951_v40  ;;  %7193 = vmatpush.bf16.msra.mxu1 %v9407_v31 }
 0x19a   :  { %v14035_v51 = vld [vmem:[#allocation7 + $0x9c4] sm:$0xf]  ;;  %v9375_v5 = vor.u32 %v13723_v58, %v9372_v47 }
 0x19b   :  { %v10620_v63 = vld [vmem:[#allocation7 + $0x9e0] sm:$0xf0]  ;;  %7231 = vmatpush.bf16.msrb.mxu0 %v10207_v54  ;;  %7206 = vmatpush.bf16.msra.mxu2 %v9663_v60 }
 0x19c   :  { %v13787_v0 = vld [vmem:[#allocation7 + $0x204] sm:$0xf]  ;;  %v10623_v25 = vor.u32 %v14035_v51, %v10620_v63 }
 0x19d   :  { %v9628_v1 = vld [vmem:[#allocation7 + $0x220] sm:$0xf0]  ;;  %7219 = vmatpush.bf16.msra.mxu3 %v9919_v61  ;;  %7194 = vmatpush.bf16.msra.mxu1 %v9375_v5 }
 0x19e   :  { %v13851_v2 = vld [vmem:[#allocation7 + $0x404] sm:$0xf]  ;;  %v9631_v59 = vor.u32 %v13787_v0, %v9628_v1 }
 0x19f   :  { %v9884_v43 = vld [vmem:[#allocation7 + $0x420] sm:$0xf0]  ;;  %7232 = vmatpush.bf16.msrb.mxu0 %v10175_v24 }
 0x1a0   :  { %v14099_v6 = vld [vmem:[#allocation7 + $0xbc4] sm:$0xf]  ;;  %v9887_v7 = vor.u32 %v13851_v2, %v9884_v43  ;;  %7207 = vmatpush.bf16.msra.mxu2 %v9631_v59  ;;  %7195 = vmatmul.bf16.vlgmr.msra.gmra.mxu1 %v15506_v21 }
 0x1a1   :  { %v10876_v48 = vld [vmem:[#allocation7 + $0xbe0] sm:$0xf0]  ;;  %7239 = vmatpush.bf16.msrb.mxu1 %v10623_v25 }
 0x1a2   :  { %v14163_v56 = vld [vmem:[#allocation7 + $0xdc4] sm:$0xf]  ;;  %v10879_v10 = vor.u32 %v14099_v6, %v10876_v48  ;;  %7220 = vmatpush.bf16.msra.mxu3 %v9887_v7 }
 0x1a3   :  { %v11132_v52 = vld [vmem:[#allocation7 + $0xde0] sm:$0xf0]  ;;  %7208 = vmatmul.bf16.vlgmr.msra.gmra.mxu2 %v15508_v29 }
 0x1a4   :  { %v13915_v4 = vld [vmem:[#allocation7 + $0x604] sm:$0xf]  ;;  %v11135_v13 = vor.u32 %v14163_v56, %v11132_v52  ;;  %7252 = vmatpush.bf16.msrb.mxu2 %v10879_v10 }
 0x1a5   :  { %v10140_v41 = vld [vmem:[#allocation7 + $0x620] sm:$0xf0]  ;;  %7221 = vmatmul.bf16.vlgmr.msra.gmra.mxu3 %v15510_v36 }
 0x1a6   :  { %v14227_v11 = vld [vmem:[#allocation7 + $0xfc4] sm:$0xf]  ;;  %v10143_v35 = vor.u32 %v13915_v4, %v10140_v41  ;;  %7265 = vmatpush.bf16.msrb.mxu3 %v11135_v13 }
 0x1a7   :  { %v11388_v3 = vld [vmem:[#allocation7 + $0xfe0] sm:$0xf0] }
 0x1a8   :  { %v14027_v23 = vld [vmem:[#allocation7 + $0x984] sm:$0xf]  ;;  %v11391_v20 = vor.u32 %v14227_v11, %v11388_v3  ;;  %7233 = vmatpush.bf16.msrb.mxu0 %v10143_v35 }
 0x1a9   :  { %v10588_v14 = vld [vmem:[#allocation7 + $0x9a0] sm:$0xf0] }
 0x1aa   :  { %v14091_v16 = vld [vmem:[#allocation7 + $0xb84] sm:$0xf]  ;;  %v10591_v27 = vor.u32 %v14027_v23, %v10588_v14 }
 0x1ab   :  { %v10844_v17 = vld [vmem:[#allocation7 + $0xba0] sm:$0xf0]  ;;  %7234 = vmatmul.bf16.vlgmr.msrb.gmra.mxu0 %v15512_v38 }
 0x1ac   :  { %v14155_v18 = vld [vmem:[#allocation7 + $0xd84] sm:$0xf]  ;;  %v10847_v8 = vor.u32 %v14091_v16, %v10844_v17  ;;  %7278 = vmatpush.bf16.msra.mxu0 %v11391_v20  ;;  %7240 = vmatpush.bf16.msrb.mxu1 %v10591_v27 }
 0x1ad   :  { %v11100_v19 = vld [vmem:[#allocation7 + $0xda0] sm:$0xf0] }
 0x1ae   :  { %v14219_v39 = vld [vmem:[#allocation7 + $0xf84] sm:$0xf]  ;;  %v11103_v12 = vor.u32 %v14155_v18, %v11100_v19  ;;  %7253 = vmatpush.bf16.msrb.mxu2 %v10847_v8 }
 0x1af   :  { %v11356_v26 = vld [vmem:[#allocation7 + $0xfa0] sm:$0xf0] }
 0x1b0   :  { %v14019_v40 = vld [vmem:[#allocation7 + $0x944] sm:$0xf]  ;;  %v11359_v31 = vor.u32 %v14219_v39, %v11356_v26  ;;  %7266 = vmatpush.bf16.msrb.mxu3 %v11103_v12 }
 0x1b1   :  { %v10556_v15 = vld [vmem:[#allocation7 + $0x960] sm:$0xf0] }
 0x1b2   :  { %v14083_v45 = vld [vmem:[#allocation7 + $0xb44] sm:$0xf]  ;;  %v10559_v53 = vor.u32 %v14019_v40, %v10556_v15  ;;  %7279 = vmatpush.bf16.msra.mxu0 %v11359_v31 }
 0x1b3   :  { %v10812_v46 = vld [vmem:[#allocation7 + $0xb60] sm:$0xf0] }
 0x1b4   :  { %v14147_v50 = vld [vmem:[#allocation7 + $0xd44] sm:$0xf]  ;;  %v10815_v54 = vor.u32 %v14083_v45, %v10812_v46  ;;  %7241 = vmatpush.bf16.msrb.mxu1 %v10559_v53 }
 0x1b5   :  { %v11068_v42 = vld [vmem:[#allocation7 + $0xd60] sm:$0xf0] }
 0x1b6   :  { %v14211_v55 = vld [vmem:[#allocation7 + $0xf44] sm:$0xf]  ;;  %v11071_v60 = vor.u32 %v14147_v50, %v11068_v42  ;;  %7254 = vmatpush.bf16.msrb.mxu2 %v10815_v54 }
 0x1b7   :  { %v11324_v58 = vld [vmem:[#allocation7 + $0xf60] sm:$0xf0] }
 0x1b8   :  { %v14011_v47 = vld [vmem:[#allocation7 + $0x904] sm:$0xf]  ;;  %v11327_v2 = vor.u32 %v14211_v55, %v11324_v58  ;;  %7267 = vmatpush.bf16.msrb.mxu3 %v11071_v60 }
 0x1b9   :  { %v10524_v61 = vld [vmem:[#allocation7 + $0x920] sm:$0xf0] }
 0x1ba   :  { %v14075_v51 = vld [vmem:[#allocation7 + $0xb04] sm:$0xf]  ;;  %v10527_v43 = vor.u32 %v14011_v47, %v10524_v61  ;;  %7280 = vmatpush.bf16.msra.mxu0 %v11327_v2 }
 0x1bb   :  { %v10780_v63 = vld [vmem:[#allocation7 + $0xb20] sm:$0xf0] }
 0x1bc   :  { %v14139_v0 = vld [vmem:[#allocation7 + $0xd04] sm:$0xf]  ;;  %v10783_v5 = vor.u32 %v14075_v51, %v10780_v63  ;;  %7242 = vmatpush.bf16.msrb.mxu1 %v10527_v43 }
 0x1bd   :  { %v11036_v1 = vld [vmem:[#allocation7 + $0xd20] sm:$0xf0] }
 0x1be   :  { %v14203_v6 = vld [vmem:[#allocation7 + $0xf04] sm:$0xf]  ;;  %v11039_v25 = vor.u32 %v14139_v0, %v11036_v1  ;;  %7255 = vmatpush.bf16.msrb.mxu2 %v10783_v5 }
 0x1bf   :  { %v11292_v48 = vld [vmem:[#allocation7 + $0xf20] sm:$0xf0] }
 0x1c0   :  { %v14003_v24 = vld [vmem:[#allocation7 + $0x8c4] sm:$0xf]  ;;  %v11295_v41 = vor.u32 %v14203_v6, %v11292_v48  ;;  %7268 = vmatpush.bf16.msrb.mxu3 %v11039_v25 }
 0x1c1   :  { %v10492_v56 = vld [vmem:[#allocation7 + $0x8e0] sm:$0xf0] }
 0x1c2   :  { %v14067_v52 = vld [vmem:[#allocation7 + $0xac4] sm:$0xf]  ;;  %v10495_v10 = vor.u32 %v14003_v24, %v10492_v56  ;;  %7281 = vmatpush.bf16.msra.mxu0 %v11295_v41 }
 0x1c3   :  { %v10748_v59 = vld [vmem:[#allocation7 + $0xae0] sm:$0xf0] }
 0x1c4   :  { %v14131_v7 = vld [vmem:[#allocation7 + $0xcc4] sm:$0xf]  ;;  %v10751_v11 = vor.u32 %v14067_v52, %v10748_v59  ;;  %7243 = vmatpush.bf16.msrb.mxu1 %v10495_v10 }
 0x1c5   :  { %v11004_v4 = vld [vmem:[#allocation7 + $0xce0] sm:$0xf0] }
 0x1c6   :  { %v14195_v3 = vld [vmem:[#allocation7 + $0xec4] sm:$0xf]  ;;  %v11007_v14 = vor.u32 %v14131_v7, %v11004_v4  ;;  %7256 = vmatpush.bf16.msrb.mxu2 %v10751_v11 }
 0x1c7   :  { %v11260_v23 = vld [vmem:[#allocation7 + $0xee0] sm:$0xf0] }
 0x1c8   :  { %v13995_v13 = vld [vmem:[#allocation7 + $0x884] sm:$0xf]  ;;  %v11263_v20 = vor.u32 %v14195_v3, %v11260_v23  ;;  %7269 = vmatpush.bf16.msrb.mxu3 %v11007_v14 }
 0x1c9   :  { %v10460_v16 = vld [vmem:[#allocation7 + $0x8a0] sm:$0xf0] }
 0x1ca   :  { %v14059_v17 = vld [vmem:[#allocation7 + $0xa84] sm:$0xf]  ;;  %v10463_v27 = vor.u32 %v13995_v13, %v10460_v16  ;;  %7282 = vmatpush.bf16.msra.mxu0 %v11263_v20 }
 0x1cb   :  { %v10716_v35 = vld [vmem:[#allocation7 + $0xaa0] sm:$0xf0] }
 0x1cc   :  { %v14123_v18 = vld [vmem:[#allocation7 + $0xc84] sm:$0xf]  ;;  %v10719_v8 = vor.u32 %v14059_v17, %v10716_v35  ;;  %7244 = vmatpush.bf16.msrb.mxu1 %v10463_v27 }
 0x1cd   :  { %v10972_v19 = vld [vmem:[#allocation7 + $0xca0] sm:$0xf0] }
 0x1ce   :  { %v14187_v39 = vld [vmem:[#allocation7 + $0xe84] sm:$0xf]  ;;  %v10975_v12 = vor.u32 %v14123_v18, %v10972_v19  ;;  %7257 = vmatpush.bf16.msrb.mxu2 %v10719_v8 }
 0x1cf   :  { %v11228_v26 = vld [vmem:[#allocation7 + $0xea0] sm:$0xf0] }
 0x1d0   :  { %v13987_v40 = vld [vmem:[#allocation7 + $0x844] sm:$0xf]  ;;  %v11231_v31 = vor.u32 %v14187_v39, %v11228_v26  ;;  %7270 = vmatpush.bf16.msrb.mxu3 %v10975_v12 }
 0x1d1   :  { %v10428_v15 = vld [vmem:[#allocation7 + $0x860] sm:$0xf0] }
 0x1d2   :  { %v14051_v45 = vld [vmem:[#allocation7 + $0xa44] sm:$0xf]  ;;  %v10431_v55 = vor.u32 %v13987_v40, %v10428_v15  ;;  %7283 = vmatpush.bf16.msra.mxu0 %v11231_v31  ;;  %v6988_v31 = vpop.f32.mrf.mxu1 }
 0x1d3   :  { %v10684_v46 = vld [vmem:[#allocation7 + $0xa60] sm:$0xf0] }
 0x1d4   :  { %v14115_v50 = vld [vmem:[#allocation7 + $0xc44] sm:$0xf]  ;;  %v10687_v58 = vor.u32 %v14051_v45, %v10684_v46  ;;  %7245 = vmatpush.bf16.msrb.mxu1 %v10431_v55 }
 0x1d5   :  { %v10940_v42 = vld [vmem:[#allocation7 + $0xc60] sm:$0xf0] }
 0x1d6   :  { %v14179_v53 = vld [vmem:[#allocation7 + $0xe44] sm:$0xf]  ;;  %v10943_v51 = vor.u32 %v14115_v50, %v10940_v42  ;;  %7258 = vmatpush.bf16.msrb.mxu2 %v10687_v58 }
 0x1d7   :  { %v11196_v54 = vld [vmem:[#allocation7 + $0xe60] sm:$0xf0] }
 0x1d8   :  { %v13979_v47 = vld [vmem:[#allocation7 + $0x804] sm:$0xf]  ;;  %v11199_v6 = vor.u32 %v14179_v53, %v11196_v54  ;;  %7271 = vmatpush.bf16.msrb.mxu3 %v10943_v51 }
 0x1d9   :  { %v10396_v60 = vld [vmem:[#allocation7 + $0x820] sm:$0xf0] }
 0x1da   :  { %v14291_v61 = vld [vmem:[#allocation7 + $0x11c4] sm:$0xf]  ;;  %v10399_v56 = vor.u32 %v13979_v47, %v10396_v60  ;;  %7284 = vmatpush.bf16.msra.mxu0 %v11199_v6 }
 0x1db   :  { %v11644_v63 = vld [vmem:[#allocation7 + $0x11e0] sm:$0xf0] }
 0x1dc   :  { %v14043_v0 = vld [vmem:[#allocation7 + $0xa04] sm:$0xf]  ;;  %v11647_v4 = vor.u32 %v14291_v61, %v11644_v63  ;;  %7246 = vmatpush.bf16.msrb.mxu1 %v10399_v56 }
 0x1dd   :  { %v10652_v1 = vld [vmem:[#allocation7 + $0xa20] sm:$0xf0] }
 0x1de   :  { %v14107_v2 = vld [vmem:[#allocation7 + $0xc04] sm:$0xf]  ;;  %v10655_v52 = vor.u32 %v14043_v0, %v10652_v1  ;;  %v7027_v1 = vpop.f32.mrf.mxu0 }
 0x1df   :  { %v10908_v43 = vld [vmem:[#allocation7 + $0xc20] sm:$0xf0]  ;;  %7247 = vmatmul.bf16.vlgmr.msrb.gmra.mxu1 %v15519_v44 }
 0x1e0   :  { %v14355_v5 = vld [vmem:[#allocation7 + $0x13c4] sm:$0xf]  ;;  %v10911_v41 = vor.u32 %v14107_v2, %v10908_v43  ;;  %7259 = vmatpush.bf16.msrb.mxu2 %v10655_v52  ;;  %7291 = vmatpush.bf16.msra.mxu1 %v11647_v4 }
 0x1e1   :  { %v11900_v48 = vld [vmem:[#allocation7 + $0x13e0] sm:$0xf0] }
 0x1e2   :  { %v14419_v24 = vld [vmem:[#allocation7 + $0x15c4] sm:$0xf]  ;;  %v11903_v3 = vor.u32 %v14355_v5, %v11900_v48  ;;  %7272 = vmatpush.bf16.msrb.mxu3 %v10911_v41 }
 0x1e3   :  { %v12156_v25 = vld [vmem:[#allocation7 + $0x15e0] sm:$0xf0]  ;;  %7260 = vmatmul.bf16.vlgmr.msrb.gmra.mxu2 %v15521_v34 }
 0x1e4   :  { %v14171_v59 = vld [vmem:[#allocation7 + $0xe04] sm:$0xf]  ;;  %v12159_v23 = vor.u32 %v14419_v24, %v12156_v25  ;;  %7304 = vmatpush.bf16.msra.mxu2 %v11903_v3 }
 0x1e5   :  { %v11164_v7 = vld [vmem:[#allocation7 + $0xe20] sm:$0xf0]  ;;  %7273 = vmatmul.bf16.vlgmr.msrb.gmra.mxu3 %v15523_v28 }
 0x1e6   :  { %v14483_v10 = vld [vmem:[#allocation7 + $0x17c4] sm:$0xf]  ;;  %v11167_v16 = vor.u32 %v14171_v59, %v11164_v7  ;;  %7317 = vmatpush.bf16.msra.mxu3 %v12159_v23  ;;  %v6990_v23 = vpop.f32.mrf.mxu1 }
 0x1e7   :  { %v12412_v11 = vld [vmem:[#allocation7 + $0x17e0] sm:$0xf0] }
 0x1e8   :  { %v14283_v13 = vld [vmem:[#allocation7 + $0x1184] sm:$0xf]  ;;  %v12415_v18 = vor.u32 %v14483_v10, %v12412_v11  ;;  %7285 = vmatpush.bf16.msra.mxu0 %v11167_v16 }
 0x1e9   :  { %v11612_v14 = vld [vmem:[#allocation7 + $0x11a0] sm:$0xf0] }
 0x1ea   :  { %v14347_v17 = vld [vmem:[#allocation7 + $0x1384] sm:$0xf]  ;;  %v11615_v27 = vor.u32 %v14283_v13, %v11612_v14  ;;  %v7001_v13 = vpop.f32.mrf.mxu2 }
 0x1eb   :  { %v11868_v35 = vld [vmem:[#allocation7 + $0x13a0] sm:$0xf0]  ;;  %7286 = vmatmul.bf16.vlgmr.msra.gmra.mxu0 %v15525_v49 }
 0x1ec   :  { %v14411_v19 = vld [vmem:[#allocation7 + $0x1584] sm:$0xf]  ;;  %v11871_v26 = vor.u32 %v14347_v17, %v11868_v35  ;;  %7330 = vmatpush.bf16.msrb.mxu0 %v12415_v18  ;;  %7292 = vmatpush.bf16.msra.mxu1 %v11615_v27  ;;  %v7014_v18 = vpop.f32.mrf.mxu3 }
 0x1ed   :  { %v12124_v20 = vld [vmem:[#allocation7 + $0x15a0] sm:$0xf0] }
 0x1ee   :  { %v14475_v8 = vld [vmem:[#allocation7 + $0x1784] sm:$0xf]  ;;  %v12127_v15 = vor.u32 %v14411_v19, %v12124_v20  ;;  %7305 = vmatpush.bf16.msra.mxu2 %v11871_v26 }
 0x1ef   :  { %v12380_v39 = vld [vmem:[#allocation7 + $0x17a0] sm:$0xf0] }
 0x1f0   :  { %v14275_v40 = vld [vmem:[#allocation7 + $0x1144] sm:$0xf]  ;;  %v12383_v50 = vor.u32 %v14475_v8, %v12380_v39  ;;  %7318 = vmatpush.bf16.msra.mxu3 %v12127_v15 }
 0x1f1   :  { %v11580_v12 = vld [vmem:[#allocation7 + $0x1160] sm:$0xf0] }
 0x1f2   :  { %v14339_v45 = vld [vmem:[#allocation7 + $0x1344] sm:$0xf]  ;;  %v11583_v55 = vor.u32 %v14275_v40, %v11580_v12  ;;  %7331 = vmatpush.bf16.msrb.mxu0 %v12383_v50  ;;  %v7029_v12 = vpop.f32.mrf.mxu0 }
 0x1f3   :  { %v11836_v46 = vld [vmem:[#allocation7 + $0x1360] sm:$0xf0] }
 0x1f4   :  { %v15563_v42 = vld [vmem:[#allocation8] sm:$0xff]  ;;  %v11839_v60 = vor.u32 %v14339_v45, %v11836_v46  ;;  %7293 = vmatpush.bf16.msra.mxu1 %v11583_v55 }
 0x1f5   :  { %v14403_v53 = vld [vmem:[#allocation7 + $0x1544] sm:$0xf]  ;;  %v1843_v63 = vperm.slane %v15563_v42, 0 }
 0x1f6   :  { %v12092_v54 = vld [vmem:[#allocation7 + $0x1560] sm:$0xf0]  ;;  %7306 = vmatpush.bf16.msra.mxu2 %v11839_v60 }
 0x1f7   :  { %v14467_v58 = vld [vmem:[#allocation7 + $0x1744] sm:$0xf]  ;;  %v12095_v0 = vor.u32 %v14403_v53, %v12092_v54  ;;  %v6989_v4 = vadd.f32 %v6988_v31, %v1843_v63 }
 0x1f8   :  { %v12348_v47 = vld [vmem:[#allocation7 + $0x1760] sm:$0xf0] }
 0x1f9   :  { %v14267_v61 = vld [vmem:[#allocation7 + $0x1104] sm:$0xf]  ;;  %v12351_v5 = vor.u32 %v14467_v58, %v12348_v47  ;;  %7319 = vmatpush.bf16.msra.mxu3 %v12095_v0  ;;  %v7002_v35 = vadd.f32 %v7001_v13, %v6989_v4 }
 0x1fa   :  { %v11548_v51 = vld [vmem:[#allocation7 + $0x1120] sm:$0xf0] }
 0x1fb   :  { %v14331_v2 = vld [vmem:[#allocation7 + $0x1304] sm:$0xf]  ;;  %v11551_v24 = vor.u32 %v14267_v61, %v11548_v51  ;;  %7332 = vmatpush.bf16.msrb.mxu0 %v12351_v5  ;;  %v7015_v26 = vadd.f32 %v7014_v18, %v7002_v35 }
 0x1fc   :  { %v11804_v43 = vld [vmem:[#allocation7 + $0x1320] sm:$0xf0] }
 0x1fd   :  { %v14395_v6 = vld [vmem:[#allocation7 + $0x1504] sm:$0xf]  ;;  %v11807_v52 = vor.u32 %v14331_v2, %v11804_v43  ;;  %7294 = vmatpush.bf16.msra.mxu1 %v11551_v24  ;;  %v7028_v58 = vadd.f32 %v7027_v1, %v7015_v26  ;;  %v7003_v43 = vpop.f32.mrf.mxu2  ;;  %v7016_v24 = vpop.f32.mrf.mxu3 }
 0x1fe   :  { %v12060_v48 = vld [vmem:[#allocation7 + $0x1520] sm:$0xf0] }
 0x1ff   :  { %v14459_v25 = vld [vmem:[#allocation7 + $0x1704] sm:$0xf]  ;;  %v12063_v41 = vor.u32 %v14395_v6, %v12060_v48  ;;  %7307 = vmatpush.bf16.msra.mxu2 %v11807_v52 }
 0x200   :  { %v12316_v56 = vld [vmem:[#allocation7 + $0x1720] sm:$0xf0] }
 0x201   :  { %v14259_v59 = vld [vmem:[#allocation7 + $0x10c4] sm:$0xf]  ;;  %v12319_v3 = vor.u32 %v14459_v25, %v12316_v56  ;;  %7320 = vmatpush.bf16.msra.mxu3 %v12063_v41  ;;  %v7040_v25 = vpop.f32.mrf.mxu1 }
 0x202   :  { %v11516_v7 = vld [vmem:[#allocation7 + $0x10e0] sm:$0xf0] }
 0x203   :  { %v14323_v10 = vld [vmem:[#allocation7 + $0x12c4] sm:$0xf]  ;;  %v11519_v17 = vor.u32 %v14259_v59, %v11516_v7  ;;  %7333 = vmatpush.bf16.msrb.mxu0 %v12319_v3  ;;  %v7041_v59 = vadd.f32 %v7040_v25, %v7028_v58  ;;  %v7079_v3 = vpop.f32.mrf.mxu0 }
 0x204   :  { %v11772_v11 = vld [vmem:[#allocation7 + $0x12e0] sm:$0xf0] }
 0x205   :  { %v14387_v14 = vld [vmem:[#allocation7 + $0x14c4] sm:$0xf]  ;;  %v11775_v27 = vor.u32 %v14323_v10, %v11772_v11  ;;  %7295 = vmatpush.bf16.msra.mxu1 %v11519_v17 }
 0x206   :  { %v12028_v16 = vld [vmem:[#allocation7 + $0x14e0] sm:$0xf0] }
 0x207   :  { %v14451_v19 = vld [vmem:[#allocation7 + $0x16c4] sm:$0xf]  ;;  %v12031_v40 = vor.u32 %v14387_v14, %v12028_v16  ;;  %7308 = vmatpush.bf16.msra.mxu2 %v11775_v27 }
 0x208   :  { %v12284_v20 = vld [vmem:[#allocation7 + $0x16e0] sm:$0xf0] }
 0x209   :  { %v14251_v8 = vld [vmem:[#allocation7 + $0x1084] sm:$0xf]  ;;  %v12287_v46 = vor.u32 %v14451_v19, %v12284_v20  ;;  %7321 = vmatpush.bf16.msra.mxu3 %v12031_v40 }
 0x20a   :  { %v11484_v39 = vld [vmem:[#allocation7 + $0x10a0] sm:$0xf0] }
 0x20b   :  { %v14315_v15 = vld [vmem:[#allocation7 + $0x1284] sm:$0xf]  ;;  %v11487_v53 = vor.u32 %v14251_v8, %v11484_v39  ;;  %7334 = vmatpush.bf16.msrb.mxu0 %v12287_v46  ;;  %v7081_v24 = vpop.f32.mrf.mxu0 }
 0x20c   :  { %v11740_v45 = vld [vmem:[#allocation7 + $0x12a0] sm:$0xf0] }
 0x20d   :  { %v14379_v50 = vld [vmem:[#allocation7 + $0x1484] sm:$0xf]  ;;  %v11743_v47 = vor.u32 %v14315_v15, %v11740_v45  ;;  %7296 = vmatpush.bf16.msra.mxu1 %v11487_v53 }
 0x20e   :  { %v11996_v31 = vld [vmem:[#allocation7 + $0x14a0] sm:$0xf0] }
 0x20f   :  { %v14443_v54 = vld [vmem:[#allocation7 + $0x1684] sm:$0xf]  ;;  %v11999_v51 = vor.u32 %v14379_v50, %v11996_v31  ;;  %7309 = vmatpush.bf16.msra.mxu2 %v11743_v47  ;;  %v7053_v31 = vpop.f32.mrf.mxu2  ;;  %v7042_v47 = vpop.f32.mrf.mxu1 }
 0x210   :  { %v12252_v55 = vld [vmem:[#allocation7 + $0x16a0] sm:$0xf0] }
 0x211   :  { %v14243_v60 = vld [vmem:[#allocation7 + $0x1044] sm:$0xf]  ;;  %v12255_v2 = vor.u32 %v14443_v54, %v12252_v55  ;;  %7322 = vmatpush.bf16.msra.mxu3 %v11999_v51 }
 0x212   :  { %v11452_v61 = vld [vmem:[#allocation7 + $0x1060] sm:$0xf0] }
 0x213   :  { %v14307_v63 = vld [vmem:[#allocation7 + $0x1244] sm:$0xf]  ;;  %v11455_v48 = vor.u32 %v14243_v60, %v11452_v61  ;;  %7335 = vmatpush.bf16.msrb.mxu0 %v12255_v2  ;;  %v7054_v60 = vadd.f32 %v7053_v31, %v7041_v59  ;;  %v7066_v61 = vpop.f32.mrf.mxu3 }
 0x214   :  { %v11708_v0 = vld [vmem:[#allocation7 + $0x1260] sm:$0xf0] }
 0x215   :  { %v14371_v5 = vld [vmem:[#allocation7 + $0x1444] sm:$0xf]  ;;  %v11711_v7 = vor.u32 %v14307_v63, %v11708_v0  ;;  %7297 = vmatpush.bf16.msra.mxu1 %v11455_v48 }
 0x216   :  { %v11964_v6 = vld [vmem:[#allocation7 + $0x1460] sm:$0xf0] }
 0x217   :  { %v14435_v56 = vld [vmem:[#allocation7 + $0x1644] sm:$0xf]  ;;  %v11967_v11 = vor.u32 %v14371_v5, %v11964_v6  ;;  %7310 = vmatpush.bf16.msra.mxu2 %v11711_v7  ;;  %v7067_v6 = vadd.f32 %v7066_v61, %v7054_v60 }
 0x218   :  { %v12220_v52 = vld [vmem:[#allocation7 + $0x1660] sm:$0xf0] }
 0x219   :  { %v14235_v1 = vld [vmem:[#allocation7 + $0x1004] sm:$0xf]  ;;  %v12223_v16 = vor.u32 %v14435_v56, %v12220_v52  ;;  %7323 = vmatpush.bf16.msra.mxu3 %v11967_v11 }
 0x21a   :  { %v11420_v4 = vld [vmem:[#allocation7 + $0x1020] sm:$0xf0] }
 0x21b   :  { %v14547_v41 = vld [vmem:[#allocation7 + $0x19c4] sm:$0xf]  ;;  %v11423_v19 = vor.u32 %v14235_v1, %v11420_v4  ;;  %7336 = vmatpush.bf16.msrb.mxu0 %v12223_v16 }
 0x21c   :  { %v12668_v10 = vld [vmem:[#allocation7 + $0x19e0] sm:$0xf0] }
 0x21d   :  { %v14299_v23 = vld [vmem:[#allocation7 + $0x1204] sm:$0xf]  ;;  %v12671_v39 = vor.u32 %v14547_v41, %v12668_v10  ;;  %7298 = vmatpush.bf16.msra.mxu1 %v11423_v19  ;;  %v15569_v10 = vadd.f32 %v7079_v3, %v7067_v6 }
 0x21e   :  { %v11676_v13 = vld [vmem:[#allocation7 + $0x1220] sm:$0xf0] }
 0x21f   :  { %v14363_v14 = vld [vmem:[#allocation7 + $0x1404] sm:$0xf]  ;;  %v11679_v26 = vor.u32 %v14299_v23, %v11676_v13 }
 0x220   :  { %v11932_v17 = vld [vmem:[#allocation7 + $0x1420] sm:$0xf0]  ;;  %7299 = vmatmul.bf16.vlgmr.msra.gmra.mxu1 %v15532_v57 }
 0x221   :  { %v14611_v35 = vld [vmem:[#allocation7 + $0x1bc4] sm:$0xf]  ;;  %v11935_v45 = vor.u32 %v14363_v14, %v11932_v17  ;;  %7343 = vmatpush.bf16.msrb.mxu1 %v12671_v39  ;;  %7311 = vmatpush.bf16.msra.mxu2 %v11679_v26  ;;  %v7055_v17 = vpop.f32.mrf.mxu2 }
 0x222   :  { %v12924_v18 = vld [vmem:[#allocation7 + $0x1be0] sm:$0xf0] }
 0x223   :  { %v14427_v20 = vld [vmem:[#allocation7 + $0x1604] sm:$0xf]  ;;  %v12927_v46 = vor.u32 %v14611_v35, %v12924_v18  ;;  %7324 = vmatpush.bf16.msra.mxu3 %v11935_v45 }
 0x224   :  { %v12188_v27 = vld [vmem:[#allocation7 + $0x1620] sm:$0xf0]  ;;  %7312 = vmatmul.bf16.vlgmr.msra.gmra.mxu2 %v15534_v62 }
 0x225   :  { %v14675_v8 = vld [vmem:[#allocation7 + $0x1dc4] sm:$0xf]  ;;  %v12191_v50 = vor.u32 %v14427_v20, %v12188_v27  ;;  %7356 = vmatpush.bf16.msrb.mxu2 %v12927_v46  ;;  %v7068_v20 = vpop.f32.mrf.mxu3 }
 0x226   :  { %v13180_v40 = vld [vmem:[#allocation7 + $0x1de0] sm:$0xf0]  ;;  %7325 = vmatmul.bf16.vlgmr.msra.gmra.mxu3 %v15536_v37 }
 0x227   :  { %v14739_v12 = vld [vmem:[#allocation7 + $0x1fc4] sm:$0xf]  ;;  %v13183_v55 = vor.u32 %v14675_v8, %v13180_v40  ;;  %7337 = vmatpush.bf16.msrb.mxu0 %v12191_v50 }
 0x228   :  { %v13436_v15 = vld [vmem:[#allocation7 + $0x1fe0] sm:$0xf0] }
 0x229   :  { %v14539_v53 = vld [vmem:[#allocation7 + $0x1984] sm:$0xf]  ;;  %v13439_v58 = vor.u32 %v14739_v12, %v13436_v15  ;;  %7369 = vmatpush.bf16.msrb.mxu3 %v13183_v55 }
 0x22a   :  { %v12636_v54 = vld [vmem:[#allocation7 + $0x19a0] sm:$0xf0]  ;;  %7338 = vmatmul.bf16.vlgmr.msrb.gmra.mxu0 %v15538_v30 }
 0x22b   :  { %v14603_v51 = vld [vmem:[#allocation7 + $0x1b84] sm:$0xf]  ;;  %v12639_v48 = vor.u32 %v14539_v53, %v12636_v54  ;;  %7382 = vmatpush.bf16.msra.mxu0 %v13439_v58 }
 0x22c   :  { %v12892_v63 = vld [vmem:[#allocation7 + $0x1ba0] sm:$0xf0] }
 0x22d   :  { %v14667_v0 = vld [vmem:[#allocation7 + $0x1d84] sm:$0xf]  ;;  %v12895_v25 = vor.u32 %v14603_v51, %v12892_v63  ;;  %7344 = vmatpush.bf16.msrb.mxu1 %v12639_v48 }
 0x22e   :  { %v13148_v2 = vld [vmem:[#allocation7 + $0x1da0] sm:$0xf0] }
 0x22f   :  { %v14731_v43 = vld [vmem:[#allocation7 + $0x1f84] sm:$0xf]  ;;  %v13151_v1 = vor.u32 %v14667_v0, %v13148_v2  ;;  %7357 = vmatpush.bf16.msrb.mxu2 %v12895_v25 }
 0x230   :  { %v13404_v5 = vld [vmem:[#allocation7 + $0x1fa0] sm:$0xf0] }
 0x231   :  { %v14531_v56 = vld [vmem:[#allocation7 + $0x1944] sm:$0xf]  ;;  %v13407_v59 = vor.u32 %v14731_v43, %v13404_v5  ;;  %7370 = vmatpush.bf16.msrb.mxu3 %v13151_v1 }
 0x232   :  { %v12604_v52 = vld [vmem:[#allocation7 + $0x1960] sm:$0xf0] }
 0x233   :  { %v14595_v7 = vld [vmem:[#allocation7 + $0x1b44] sm:$0xf]  ;;  %v12607_v14 = vor.u32 %v14531_v56, %v12604_v52  ;;  %7383 = vmatpush.bf16.msra.mxu0 %v13407_v59 }
 0x234   :  { %v12860_v4 = vld [vmem:[#allocation7 + $0x1b60] sm:$0xf0] }
 0x235   :  { %v14659_v41 = vld [vmem:[#allocation7 + $0x1d44] sm:$0xf]  ;;  %v12863_v16 = vor.u32 %v14595_v7, %v12860_v4  ;;  %7345 = vmatpush.bf16.msrb.mxu1 %v12607_v14 }
 0x236   :  { %v13116_v11 = vld [vmem:[#allocation7 + $0x1d60] sm:$0xf0] }
 0x237   :  { %v14723_v23 = vld [vmem:[#allocation7 + $0x1f44] sm:$0xf]  ;;  %v13119_v3 = vor.u32 %v14659_v41, %v13116_v11  ;;  %7358 = vmatpush.bf16.msrb.mxu2 %v12863_v16 }
 0x238   :  { %v13372_v13 = vld [vmem:[#allocation7 + $0x1f60] sm:$0xf0] }
 0x239   :  { %v14523_v35 = vld [vmem:[#allocation7 + $0x1904] sm:$0xf]  ;;  %v13375_v19 = vor.u32 %v14723_v23, %v13372_v13  ;;  %7371 = vmatpush.bf16.msrb.mxu3 %v13119_v3 }
 0x23a   :  { %v12572_v18 = vld [vmem:[#allocation7 + $0x1920] sm:$0xf0] }
 0x23b   :  { %v14587_v27 = vld [vmem:[#allocation7 + $0x1b04] sm:$0xf]  ;;  %v12575_v15 = vor.u32 %v14523_v35, %v12572_v18  ;;  %7384 = vmatpush.bf16.msra.mxu0 %v13375_v19 }
 0x23c   :  { %v12828_v8 = vld [vmem:[#allocation7 + $0x1b20] sm:$0xf0] }
 0x23d   :  { %v14651_v39 = vld [vmem:[#allocation7 + $0x1d04] sm:$0xf]  ;;  %v12831_v45 = vor.u32 %v14587_v27, %v12828_v8  ;;  %7346 = vmatpush.bf16.msrb.mxu1 %v12575_v15  ;;  %v9602_v27 = vld [vmem:[#allocation7 + $0x1c8] sm:$0xf] }
 0x23e   :  { %v13084_v26 = vld [vmem:[#allocation7 + $0x1d20] sm:$0xf0]  ;;  %v13784_v8 = vld [vmem:[#allocation7 + $0x1e4] sm:$0xf0] }
 0x23f   :  { %v14715_v40 = vld [vmem:[#allocation7 + $0x1f04] sm:$0xf]  ;;  %v13087_v31 = vor.u32 %v14651_v39, %v13084_v26  ;;  %7359 = vmatpush.bf16.msrb.mxu2 %v12831_v45 }
 0x240   :  { %v13340_v12 = vld [vmem:[#allocation7 + $0x1f20] sm:$0xf0] }
 0x241   :  { %v14515_v46 = vld [vmem:[#allocation7 + $0x18c4] sm:$0xf]  ;;  %v13343_v53 = vor.u32 %v14715_v40, %v13340_v12  ;;  %7372 = vmatpush.bf16.msrb.mxu3 %v13087_v31 }
 0x242   :  { %v12540_v50 = vld [vmem:[#allocation7 + $0x18e0] sm:$0xf0] }
 0x243   :  { %v14579_v54 = vld [vmem:[#allocation7 + $0x1ac4] sm:$0xf]  ;;  %v12543_v51 = vor.u32 %v14515_v46, %v12540_v50  ;;  %7385 = vmatpush.bf16.msra.mxu0 %v13343_v53  ;;  %v9858_v53 = vld [vmem:[#allocation7 + $0x3c8] sm:$0xf] }
 0x244   :  { %v12796_v55 = vld [vmem:[#allocation7 + $0x1ae0] sm:$0xf0] }
 0x245   :  { %v14643_v58 = vld [vmem:[#allocation7 + $0x1cc4] sm:$0xf]  ;;  %v12799_v63 = vor.u32 %v14579_v54, %v12796_v55  ;;  %7347 = vmatpush.bf16.msrb.mxu1 %v12543_v51  ;;  %v13848_v54 = vld [vmem:[#allocation7 + $0x3e4] sm:$0xf0] }
 0x246   :  { %v13052_v47 = vld [vmem:[#allocation7 + $0x1ce0] sm:$0xf0]  ;;  %v10114_v55 = vld [vmem:[#allocation7 + $0x5c8] sm:$0xf] }
 0x247   :  { %v14707_v60 = vld [vmem:[#allocation7 + $0x1ec4] sm:$0xf]  ;;  %v13055_v43 = vor.u32 %v14643_v58, %v13052_v47  ;;  %7360 = vmatpush.bf16.msrb.mxu2 %v12799_v63  ;;  %v9603_v58 = vor.u32 %v13784_v8, %v9602_v27  ;;  %v13976_v51 = vld [vmem:[#allocation7 + $0x7e4] sm:$0xf0] }
 0x248   :  { %v13308_v61 = vld [vmem:[#allocation7 + $0x1ee0] sm:$0xf0] }
 0x249   :  { %v14507_v0 = vld [vmem:[#allocation7 + $0x1884] sm:$0xf]  ;;  %v13311_v5 = vor.u32 %v14707_v60, %v13308_v61  ;;  %7373 = vmatpush.bf16.msrb.mxu3 %v13055_v43  ;;  %v13912_v60 = vld [vmem:[#allocation7 + $0x5e4] sm:$0xf0] }
 0x24a   :  { %v12508_v2 = vld [vmem:[#allocation7 + $0x18a0] sm:$0xf0]  ;;  %v10370_v61 = vld [vmem:[#allocation7 + $0x7c8] sm:$0xf] }
 0x24b   :  { %v14571_v6 = vld [vmem:[#allocation7 + $0x1a84] sm:$0xf]  ;;  %v12511_v1 = vor.u32 %v14507_v0, %v12508_v2  ;;  %7386 = vmatpush.bf16.msra.mxu0 %v13311_v5  ;;  %v9859_v2 = vor.u32 %v13848_v54, %v9858_v53  ;;  %v9570_v43 = vld [vmem:[#allocation7 + $0x188] sm:$0xf] }
 0x24c   :  { %v12764_v48 = vld [vmem:[#allocation7 + $0x1aa0] sm:$0xf0]  ;;  %v13776_v5 = vld [vmem:[#allocation7 + $0x1a4] sm:$0xf0] }
 0x24d   :  { %v14635_v24 = vld [vmem:[#allocation7 + $0x1c84] sm:$0xf]  ;;  %v12767_v59 = vor.u32 %v14571_v6, %v12764_v48  ;;  %7348 = vmatpush.bf16.msrb.mxu1 %v12511_v1  ;;  %v7092_v6 = vpop.f32.mrf.mxu1  ;;  %v10115_v48 = vor.u32 %v13912_v60, %v10114_v55  ;;  %v13888_v55 = vld [vmem:[#allocation7 + $0x524] sm:$0xf0] }
 0x24e   :  { %v13020_v25 = vld [vmem:[#allocation7 + $0x1ca0] sm:$0xf0]  ;;  %v7093_v1 = vadd.f32 %v7092_v6, %v15569_v10  ;;  %v9794_v10 = vld [vmem:[#allocation7 + $0x348] sm:$0xf] }
 0x24f   :  { %v14699_v56 = vld [vmem:[#allocation7 + $0x1e84] sm:$0xf]  ;;  %v13023_v41 = vor.u32 %v14635_v24, %v13020_v25  ;;  %7361 = vmatpush.bf16.msrb.mxu2 %v12767_v59  ;;  %v10371_v24 = vor.u32 %v13976_v51, %v10370_v61  ;;  %v9826_v25 = vld [vmem:[#allocation7 + $0x388] sm:$0xf] }
 0x250   :  { %v13276_v52 = vld [vmem:[#allocation7 + $0x1ea0] sm:$0xf0]  ;;  %v13904_v59 = vld [vmem:[#allocation7 + $0x5a4] sm:$0xf0] }
 0x251   :  { %v14499_v7 = vld [vmem:[#allocation7 + $0x1844] sm:$0xf]  ;;  %v13279_v11 = vor.u32 %v14699_v56, %v13276_v52  ;;  %7374 = vmatpush.bf16.msrb.mxu3 %v13023_v41  ;;  %v13840_v56 = vld [vmem:[#allocation7 + $0x3a4] sm:$0xf0]  ;;  %v9571_v41 = vor.u32 %v13776_v5, %v9570_v43 }
 0x252   :  { %v12476_v4 = vld [vmem:[#allocation7 + $0x1860] sm:$0xf0]  ;;  %v10082_v52 = vld [vmem:[#allocation7 + $0x588] sm:$0xf] }
 0x253   :  { %v14563_v23 = vld [vmem:[#allocation7 + $0x1a44] sm:$0xf]  ;;  %v12479_v18 = vor.u32 %v14499_v7, %v12476_v4  ;;  %7387 = vmatpush.bf16.msra.mxu0 %v13279_v11  ;;  %v10338_v7 = vld [vmem:[#allocation7 + $0x788] sm:$0xf]  ;;  %v7131_v11 = vpop.f32.mrf.mxu0 }
 0x254   :  { %v12732_v13 = vld [vmem:[#allocation7 + $0x1a60] sm:$0xf0]  ;;  %v13968_v4 = vld [vmem:[#allocation7 + $0x7a4] sm:$0xf0] }
 0x255   :  { %v14627_v14 = vld [vmem:[#allocation7 + $0x1c44] sm:$0xf]  ;;  %v12735_v19 = vor.u32 %v14563_v23, %v12732_v13  ;;  %7349 = vmatpush.bf16.msrb.mxu1 %v12479_v18  ;;  %v9827_v23 = vor.u32 %v13840_v56, %v9826_v25  ;;  %v9538_v13 = vld [vmem:[#allocation7 + $0x148] sm:$0xf]  ;;  %v7094_v54 = vpop.f32.mrf.mxu1 }
 0x256   :  { %v12988_v16 = vld [vmem:[#allocation7 + $0x1c60] sm:$0xf0]  ;;  %v10050_v18 = vld [vmem:[#allocation7 + $0x548] sm:$0xf] }
 0x257   :  { %v14691_v17 = vld [vmem:[#allocation7 + $0x1e44] sm:$0xf]  ;;  %v12991_v39 = vor.u32 %v14627_v14, %v12988_v16  ;;  %7362 = vmatpush.bf16.msrb.mxu2 %v12735_v19  ;;  %v13768_v14 = vld [vmem:[#allocation7 + $0x164] sm:$0xf0]  ;;  %v10083_v16 = vor.u32 %v13904_v59, %v10082_v52 }
 0x258   :  { %v13244_v35 = vld [vmem:[#allocation7 + $0x1e60] sm:$0xf0]  ;;  %v10306_v19 = vld [vmem:[#allocation7 + $0x748] sm:$0xf]  ;;  %v9539_v27 = vor.u32 %v13768_v14, %v9538_v13 }
 0x259   :  { %v14491_v3 = vld [vmem:[#allocation7 + $0x1804] sm:$0xf]  ;;  %v13247_v26 = vor.u32 %v14691_v17, %v13244_v35  ;;  %7375 = vmatpush.bf16.msrb.mxu3 %v12991_v39  ;;  %v10339_v17 = vor.u32 %v13968_v4, %v10338_v7  ;;  %v13832_v35 = vld [vmem:[#allocation7 + $0x364] sm:$0xf0] }
 0x25a   :  { %v12444_v20 = vld [vmem:[#allocation7 + $0x1820] sm:$0xf0]  ;;  %v9795_v8 = vor.u32 %v13832_v35, %v9794_v10  ;;  %v9506_v39 = vld [vmem:[#allocation7 + $0x108] sm:$0xf] }
 0x25b   :  { %v14555_v40 = vld [vmem:[#allocation7 + $0x1a04] sm:$0xf]  ;;  %v12447_v31 = vor.u32 %v14491_v3, %v12444_v20  ;;  %7388 = vmatpush.bf16.msra.mxu0 %v13247_v26  ;;  %v13896_v3 = vld [vmem:[#allocation7 + $0x564] sm:$0xf0]  ;;  %v7133_v51 = vpop.f32.mrf.mxu0 }
 0x25c   :  { %v12700_v12 = vld [vmem:[#allocation7 + $0x1a20] sm:$0xf0]  ;;  %v13960_v20 = vld [vmem:[#allocation7 + $0x764] sm:$0xf0] }
 0x25d   :  { %v14619_v15 = vld [vmem:[#allocation7 + $0x1c04] sm:$0xf]  ;;  %v12703_v47 = vor.u32 %v14555_v40, %v12700_v12  ;;  %7350 = vmatpush.bf16.msrb.mxu1 %v12447_v31  ;;  %v13760_v26 = vld [vmem:[#allocation7 + $0x124] sm:$0xf0]  ;;  %v7105_v40 = vpop.f32.mrf.mxu2  ;;  %v7118_v12 = vpop.f32.mrf.mxu3 }
 0x25e   :  { %v12956_v45 = vld [vmem:[#allocation7 + $0x1c20] sm:$0xf0]  ;;  %v10018_v31 = vld [vmem:[#allocation7 + $0x508] sm:$0xf]  ;;  %v7106_v53 = vadd.f32 %v7105_v40, %v7093_v1  ;;  %v9507_v60 = vor.u32 %v13760_v26, %v9506_v39 }
 0x25f   :  { %v14683_v46 = vld [vmem:[#allocation7 + $0x1e04] sm:$0xf]  ;;  %v12959_v63 = vor.u32 %v14619_v15, %v12956_v45  ;;  %7363 = vmatpush.bf16.msrb.mxu2 %v12703_v47  ;;  %v10051_v15 = vor.u32 %v13896_v3, %v10050_v18  ;;  %v10307_v45 = vor.u32 %v13960_v20, %v10306_v19  ;;  %v13952_v47 = vld [vmem:[#allocation7 + $0x724] sm:$0xf0]  ;;  %v10019_v43 = vor.u32 %v13888_v55, %v10018_v31  ;;  %v7144_v18 = vpop.f32.mrf.mxu1 }
 0x260   :  { %v13212_v50 = vld [vmem:[#allocation7 + $0x1e20] sm:$0xf0]  ;;  %7351 = vmatmul.bf16.vlgmr.msrb.gmra.mxu1 %v15545_v32  ;;  %v7119_v61 = vadd.f32 %v7118_v12, %v7106_v53  ;;  %v9730_v6 = vld [vmem:[#allocation7 + $0x2c8] sm:$0xf] }
 0x261   :  { %v13215_v0 = vor.u32 %v14683_v46, %v13212_v50  ;;  %7395 = vmatpush.bf16.msra.mxu1 %v9603_v58  ;;  %7376 = vmatpush.bf16.msrb.mxu3 %v12959_v63  ;;  %v9762_v46 = vld [vmem:[#allocation7 + $0x308] sm:$0xf] }
 0x262   :  { %7364 = vmatmul.bf16.vlgmr.msrb.gmra.mxu2 %v15547_v22  ;;  %v13824_v50 = vld [vmem:[#allocation7 + $0x324] sm:$0xf0]  ;;  %v7132_v25 = vadd.f32 %v7131_v11, %v7119_v61 }
 0x263   :  { %7389 = vmatpush.bf16.msra.mxu0 %v13215_v0  ;;  %7408 = vmatpush.bf16.msra.mxu2 %v9859_v2  ;;  %v10274_v58 = vld [vmem:[#allocation7 + $0x708] sm:$0xf]  ;;  %v9763_v63 = vor.u32 %v13824_v50, %v9762_v46 }
 0x264   :  { %7377 = vmatmul.bf16.vlgmr.msrb.gmra.mxu3 %v15549_v33  ;;  %v9474_v0 = vld [vmem:[#allocation7 + $0xc8] sm:$0xf]  ;;  %v10275_v5 = vor.u32 %v13952_v47, %v10274_v58  ;;  %v7145_v20 = vadd.f32 %v7144_v18, %v7132_v25 }
 0x265   :  { %7421 = vmatpush.bf16.msra.mxu3 %v10115_v48  ;;  %7396 = vmatpush.bf16.msra.mxu1 %v9571_v41  ;;  %v13752_v2 = vld [vmem:[#allocation7 + $0xe4] sm:$0xf0]  ;;  %v7120_v13 = vpop.f32.mrf.mxu3 }
 0x266   :  { %7390 = vmatmul.bf16.vlgmr.msra.gmra.mxu0 %v15552_v9  ;;  %v13816_v48 = vld [vmem:[#allocation7 + $0x2e4] sm:$0xf0]  ;;  %v9475_v59 = vor.u32 %v13752_v2, %v9474_v0 }
 0x267   :  { %7434 = vmatpush.bf16.msrb.mxu0 %v10371_v24  ;;  %7409 = vmatpush.bf16.msra.mxu2 %v9827_v23  ;;  %v9986_v24 = vld [vmem:[#allocation7 + $0x4c8] sm:$0xf]  ;;  %v9731_v7 = vor.u32 %v13816_v48, %v9730_v6  ;;  %v7107_v23 = vpop.f32.mrf.mxu2 }
 0x268   :  { %v13880_v56 = vld [vmem:[#allocation7 + $0x4e4] sm:$0xf0] }
 0x269   :  { %7422 = vmatpush.bf16.msra.mxu3 %v10083_v16  ;;  %7397 = vmatpush.bf16.msra.mxu1 %v9539_v27  ;;  %v10242_v52 = vld [vmem:[#allocation7 + $0x6c8] sm:$0xf]  ;;  %v9987_v14 = vor.u32 %v13880_v56, %v9986_v24  ;;  %v7146_v24 = vpop.f32.mrf.mxu1 }
 0x26a   :  { %v13944_v1 = vld [vmem:[#allocation7 + $0x6e4] sm:$0xf0] }
 0x26b   :  { %7435 = vmatpush.bf16.msrb.mxu0 %v10339_v17  ;;  %7410 = vmatpush.bf16.msra.mxu2 %v9795_v8  ;;  %v9442_v4 = vld [vmem:[#allocation7 + $0x88] sm:$0xf]  ;;  %v10243_v16 = vor.u32 %v13944_v1, %v10242_v52  ;;  %v7183_v8 = vpop.f32.mrf.mxu0 }
 0x26c   :  { %v13744_v41 = vld [vmem:[#allocation7 + $0xa4] sm:$0xf0] }
 0x26d   :  { %7423 = vmatpush.bf16.msra.mxu3 %v10051_v15  ;;  %7398 = vmatpush.bf16.msra.mxu1 %v9507_v60  ;;  %v9698_v17 = vld [vmem:[#allocation7 + $0x288] sm:$0xf]  ;;  %v9443_v27 = vor.u32 %v13744_v41, %v9442_v4  ;;  %v7170_v0 = vpop.f32.mrf.mxu3 }
 0x26e   :  { %v13808_v10 = vld [vmem:[#allocation7 + $0x2a4] sm:$0xf0] }
 0x26f   :  { %7436 = vmatpush.bf16.msrb.mxu0 %v10307_v45  ;;  %7411 = vmatpush.bf16.msra.mxu2 %v9763_v63  ;;  %v9954_v35 = vld [vmem:[#allocation7 + $0x488] sm:$0xf]  ;;  %v9699_v39 = vor.u32 %v13808_v10, %v9698_v17  ;;  %v7157_v63 = vpop.f32.mrf.mxu2 }
 0x270   :  { %v13872_v11 = vld [vmem:[#allocation7 + $0x4a4] sm:$0xf0]  ;;  %v7158_v25 = vadd.f32 %v7157_v63, %v7145_v20 }
 0x271   :  { %7424 = vmatpush.bf16.msra.mxu3 %v10019_v43  ;;  %v10210_v3 = vld [vmem:[#allocation7 + $0x688] sm:$0xf]  ;;  %7399 = vmatpush.bf16.msra.mxu1 %v9475_v59  ;;  %v9955_v12 = vor.u32 %v13872_v11, %v9954_v35 }
 0x272   :  { %v13936_v19 = vld [vmem:[#allocation7 + $0x6a4] sm:$0xf0]  ;;  %v7171_v23 = vadd.f32 %v7170_v0, %v7158_v25 }
 0x273   :  { %7437 = vmatpush.bf16.msrb.mxu0 %v10275_v5  ;;  %7412 = vmatpush.bf16.msra.mxu2 %v9731_v7  ;;  %v9410_v26 = vld [vmem:[#allocation7 + $0x48] sm:$0xf]  ;;  %v10211_v15 = vor.u32 %v13936_v19, %v10210_v3  ;;  %v7185_v13 = vpop.f32.mrf.mxu0 }
 0x274   :  { %v13736_v40 = vld [vmem:[#allocation7 + $0x64] sm:$0xf0]  ;;  %v15579_v3 = vadd.f32 %v7183_v8, %v7171_v23 }
 0x275   :  { %7425 = vmatpush.bf16.msra.mxu3 %v9987_v14  ;;  %v9666_v45 = vld [vmem:[#allocation7 + $0x248] sm:$0xf]  ;;  %7400 = vmatpush.bf16.msra.mxu1 %v9443_v27  ;;  %v9411_v55 = vor.u32 %v13736_v40, %v9410_v26 }
 0x276   :  { %v13800_v46 = vld [vmem:[#allocation7 + $0x264] sm:$0xf0] }
 0x277   :  { %7438 = vmatpush.bf16.msrb.mxu0 %v10243_v16  ;;  %v9922_v50 = vld [vmem:[#allocation7 + $0x448] sm:$0xf]  ;;  %7413 = vmatpush.bf16.msra.mxu2 %v9699_v39  ;;  %v9667_v47 = vor.u32 %v13800_v46, %v9666_v45 }
 0x278   :  { %v13864_v31 = vld [vmem:[#allocation7 + $0x464] sm:$0xf0] }
 0x279   :  { %v10178_v53 = vld [vmem:[#allocation7 + $0x648] sm:$0xf]  ;;  %7426 = vmatpush.bf16.msra.mxu3 %v9955_v12  ;;  %v9923_v2 = vor.u32 %v13864_v31, %v9922_v50  ;;  %7401 = vmatpush.bf16.msra.mxu1 %v9411_v55  ;;  %v7159_v31 = vpop.f32.mrf.mxu2 }
 0x27a   :  { %v13928_v54 = vld [vmem:[#allocation7 + $0x664] sm:$0xf0] }
 0x27b   :  { %v9378_v58 = vld [vmem:[#allocation7 + $0x8] sm:$0xf]  ;;  %7439 = vmatpush.bf16.msrb.mxu0 %v10211_v15  ;;  %v10179_v43 = vor.u32 %v13928_v54, %v10178_v53  ;;  %7414 = vmatpush.bf16.msra.mxu2 %v9667_v47  ;;  %v7172_v53 = vpop.f32.mrf.mxu3 }
 0x27c   :  { %v13728_v60 = vld [vmem:[#allocation7 + $0x24] sm:$0xf0] }
 0x27d   :  { %v10626_v61 = vld [vmem:[#allocation7 + $0x9c8] sm:$0xf]  ;;  %v9379_v59 = vor.u32 %v13728_v60, %v9378_v58  ;;  %7427 = vmatpush.bf16.msra.mxu3 %v9923_v2 }
 0x27e   :  { %v14040_v51 = vld [vmem:[#allocation7 + $0x9e4] sm:$0xf0] }
 0x27f   :  { %v9634_v5 = vld [vmem:[#allocation7 + $0x208] sm:$0xf]  ;;  %v10627_v14 = vor.u32 %v14040_v51, %v10626_v61  ;;  %7440 = vmatpush.bf16.msrb.mxu0 %v10179_v43  ;;  %7402 = vmatpush.bf16.msra.mxu1 %v9379_v59 }
 0x280   :  { %v13792_v6 = vld [vmem:[#allocation7 + $0x224] sm:$0xf0] }
 0x281   :  { %v9890_v48 = vld [vmem:[#allocation7 + $0x408] sm:$0xf]  ;;  %v9635_v16 = vor.u32 %v13792_v6, %v9634_v5 }
 0x282   :  { %v13856_v56 = vld [vmem:[#allocation7 + $0x424] sm:$0xf0]  ;;  %7403 = vmatmul.bf16.vlgmr.msra.gmra.mxu1 %v15506_v21 }
 0x283   :  { %v10146_v52 = vld [vmem:[#allocation7 + $0x608] sm:$0xf]  ;;  %v9891_v18 = vor.u32 %v13856_v56, %v9890_v48  ;;  %7447 = vmatpush.bf16.msrb.mxu1 %v10627_v14  ;;  %7415 = vmatpush.bf16.msra.mxu2 %v9635_v16  ;;  %v1844_v14 = vperm.slane %v15563_v42, 1 }
 0x284   :  { %v13920_v1 = vld [vmem:[#allocation7 + $0x624] sm:$0xf0] }
 0x285   :  { %v10882_v7 = vld [vmem:[#allocation7 + $0xbc8] sm:$0xf]  ;;  %v10147_v11 = vor.u32 %v13920_v1, %v10146_v52  ;;  %7428 = vmatpush.bf16.msra.mxu3 %v9891_v18  ;;  %v7196_v52 = vpop.f32.mrf.mxu1 }
 0x286   :  { %v14104_v4 = vld [vmem:[#allocation7 + $0xbe4] sm:$0xf0]  ;;  %7416 = vmatmul.bf16.vlgmr.msra.gmra.mxu2 %v15508_v29 }
 0x287   :  { %v11138_v41 = vld [vmem:[#allocation7 + $0xdc8] sm:$0xf]  ;;  %v10883_v19 = vor.u32 %v14104_v4, %v10882_v7  ;;  %7441 = vmatpush.bf16.msrb.mxu0 %v10147_v11 }
 0x288   :  { %v14168_v17 = vld [vmem:[#allocation7 + $0xde4] sm:$0xf0]  ;;  %7429 = vmatmul.bf16.vlgmr.msra.gmra.mxu3 %v15510_v36 }
 0x289   :  { %v11394_v10 = vld [vmem:[#allocation7 + $0xfc8] sm:$0xf]  ;;  %v11139_v39 = vor.u32 %v14168_v17, %v11138_v41  ;;  %7460 = vmatpush.bf16.msrb.mxu2 %v10883_v19 }
 0x28a   :  { %v14232_v35 = vld [vmem:[#allocation7 + $0xfe4] sm:$0xf0]  ;;  %7442 = vmatmul.bf16.vlgmr.msrb.gmra.mxu0 %v15512_v38 }
 0x28b   :  { %v10594_v20 = vld [vmem:[#allocation7 + $0x988] sm:$0xf]  ;;  %v11395_v26 = vor.u32 %v14232_v35, %v11394_v10  ;;  %7473 = vmatpush.bf16.msrb.mxu3 %v11139_v39 }
 0x28c   :  { %v14032_v27 = vld [vmem:[#allocation7 + $0x9a4] sm:$0xf0] }
 0x28d   :  { %v10850_v40 = vld [vmem:[#allocation7 + $0xb88] sm:$0xf]  ;;  %v10595_v8 = vor.u32 %v14032_v27, %v10594_v20  ;;  %7486 = vmatpush.bf16.msra.mxu0 %v11395_v26  ;;  %v7235_v27 = vpop.f32.mrf.mxu0  ;;  %v7198_v53 = vpop.f32.mrf.mxu1 }
 0x28e   :  { %v14096_v12 = vld [vmem:[#allocation7 + $0xba4] sm:$0xf0] }
 0x28f   :  { %v11106_v15 = vld [vmem:[#allocation7 + $0xd88] sm:$0xf]  ;;  %v10851_v54 = vor.u32 %v14096_v12, %v10850_v40  ;;  %7448 = vmatpush.bf16.msrb.mxu1 %v10595_v8  ;;  %v7209_v8 = vpop.f32.mrf.mxu2 }
 0x290   :  { %v14160_v45 = vld [vmem:[#allocation7 + $0xda4] sm:$0xf0] }
 0x291   :  { %v11362_v46 = vld [vmem:[#allocation7 + $0xf88] sm:$0xf]  ;;  %v11107_v47 = vor.u32 %v14160_v45, %v11106_v15  ;;  %7461 = vmatpush.bf16.msrb.mxu2 %v10851_v54  ;;  %v7197_v15 = vadd.f32 %v7196_v52, %v1844_v14 }
 0x292   :  { %v14224_v50 = vld [vmem:[#allocation7 + $0xfa4] sm:$0xf0] }
 0x293   :  { %v10562_v55 = vld [vmem:[#allocation7 + $0x948] sm:$0xf]  ;;  %v11363_v60 = vor.u32 %v14224_v50, %v11362_v46  ;;  %7474 = vmatpush.bf16.msrb.mxu3 %v11107_v47  ;;  %v7210_v47 = vadd.f32 %v7209_v8, %v7197_v15 }
 0x294   :  { %v14024_v58 = vld [vmem:[#allocation7 + $0x964] sm:$0xf0] }
 0x295   :  { %v10818_v61 = vld [vmem:[#allocation7 + $0xb48] sm:$0xf]  ;;  %v10563_v5 = vor.u32 %v14024_v58, %v10562_v55  ;;  %7487 = vmatpush.bf16.msra.mxu0 %v11363_v60  ;;  %v7222_v60 = vpop.f32.mrf.mxu3 }
 0x296   :  { %v14088_v51 = vld [vmem:[#allocation7 + $0xb64] sm:$0xf0] }
 0x297   :  { %v11074_v63 = vld [vmem:[#allocation7 + $0xd48] sm:$0xf]  ;;  %v10819_v6 = vor.u32 %v14088_v51, %v10818_v61  ;;  %7449 = vmatpush.bf16.msrb.mxu1 %v10563_v5 }
 0x298   :  { %v14152_v0 = vld [vmem:[#allocation7 + $0xd64] sm:$0xf0] }
 0x299   :  { %v11330_v2 = vld [vmem:[#allocation7 + $0xf48] sm:$0xf]  ;;  %v11075_v25 = vor.u32 %v14152_v0, %v11074_v63  ;;  %7462 = vmatpush.bf16.msrb.mxu2 %v10819_v6 }
 0x29a   :  { %v14216_v43 = vld [vmem:[#allocation7 + $0xf64] sm:$0xf0] }
 0x29b   :  { %v10530_v48 = vld [vmem:[#allocation7 + $0x908] sm:$0xf]  ;;  %v11331_v56 = vor.u32 %v14216_v43, %v11330_v2  ;;  %7475 = vmatpush.bf16.msrb.mxu3 %v11075_v25  ;;  %v7223_v2 = vadd.f32 %v7222_v60, %v7210_v47 }
 0x29c   :  { %v14016_v24 = vld [vmem:[#allocation7 + $0x924] sm:$0xf0] }
 0x29d   :  { %v10786_v1 = vld [vmem:[#allocation7 + $0xb08] sm:$0xf]  ;;  %v10531_v13 = vor.u32 %v14016_v24, %v10530_v48  ;;  %7488 = vmatpush.bf16.msra.mxu0 %v11331_v56 }
 0x29e   :  { %v14080_v59 = vld [vmem:[#allocation7 + $0xb24] sm:$0xf0] }
 0x29f   :  { %v11042_v7 = vld [vmem:[#allocation7 + $0xd08] sm:$0xf]  ;;  %v10787_v16 = vor.u32 %v14080_v59, %v10786_v1  ;;  %7450 = vmatpush.bf16.msrb.mxu1 %v10531_v13  ;;  %v7237_v1 = vpop.f32.mrf.mxu0 }
 0x2a0   :  { %v14144_v4 = vld [vmem:[#allocation7 + $0xd24] sm:$0xf0] }
 0x2a1   :  { %v11298_v41 = vld [vmem:[#allocation7 + $0xf08] sm:$0xf]  ;;  %v11043_v35 = vor.u32 %v14144_v4, %v11042_v7  ;;  %7463 = vmatpush.bf16.msrb.mxu2 %v10787_v16 }
 0x2a2   :  { %v14208_v23 = vld [vmem:[#allocation7 + $0xf24] sm:$0xf0] }
 0x2a3   :  { %v10498_v17 = vld [vmem:[#allocation7 + $0x8c8] sm:$0xf]  ;;  %v11299_v18 = vor.u32 %v14208_v23, %v11298_v41  ;;  %7476 = vmatpush.bf16.msrb.mxu3 %v11043_v35  ;;  %v15586_v41 = vadd.f32 %v7235_v27, %v7223_v2 }
 0x2a4   :  { %v14008_v10 = vld [vmem:[#allocation7 + $0x8e4] sm:$0xf0] }
 0x2a5   :  { %v10754_v11 = vld [vmem:[#allocation7 + $0xac8] sm:$0xf]  ;;  %v10499_v12 = vor.u32 %v14008_v10, %v10498_v17  ;;  %7489 = vmatpush.bf16.msra.mxu0 %v11299_v18 }
 0x2a6   :  { %v14072_v19 = vld [vmem:[#allocation7 + $0xae4] sm:$0xf0] }
 0x2a7   :  { %v11010_v20 = vld [vmem:[#allocation7 + $0xcc8] sm:$0xf]  ;;  %v10755_v45 = vor.u32 %v14072_v19, %v10754_v11  ;;  %7451 = vmatpush.bf16.msrb.mxu1 %v10499_v12  ;;  %v7211_v11 = vpop.f32.mrf.mxu2 }
 0x2a8   :  { %v14136_v39 = vld [vmem:[#allocation7 + $0xce4] sm:$0xf0] }
 0x2a9   :  { %v11266_v26 = vld [vmem:[#allocation7 + $0xec8] sm:$0xf]  ;;  %v11011_v50 = vor.u32 %v14136_v39, %v11010_v20  ;;  %7464 = vmatpush.bf16.msrb.mxu2 %v10755_v45 }
 0x2aa   :  { %v14200_v40 = vld [vmem:[#allocation7 + $0xee4] sm:$0xf0] }
 0x2ab   :  { %v10466_v42 = vld [vmem:[#allocation7 + $0x888] sm:$0xf]  ;;  %v11267_v31 = vor.u32 %v14200_v40, %v11266_v26  ;;  %7477 = vmatpush.bf16.msrb.mxu3 %v11011_v50  ;;  %v7224_v26 = vpop.f32.mrf.mxu3 }
 0x2ac   :  { %v14000_v46 = vld [vmem:[#allocation7 + $0x8a4] sm:$0xf0] }
 0x2ad   :  { %v10722_v54 = vld [vmem:[#allocation7 + $0xa88] sm:$0xf]  ;;  %v10467_v0 = vor.u32 %v14000_v46, %v10466_v42  ;;  %7490 = vmatpush.bf16.msra.mxu0 %v11267_v31 }
 0x2ae   :  { %v14064_v55 = vld [vmem:[#allocation7 + $0xaa4] sm:$0xf0] }
 0x2af   :  { %v10978_v58 = vld [vmem:[#allocation7 + $0xc88] sm:$0xf]  ;;  %v10723_v43 = vor.u32 %v14064_v55, %v10722_v54  ;;  %7452 = vmatpush.bf16.msrb.mxu1 %v10467_v0 }
 0x2b0   :  { %v14128_v61 = vld [vmem:[#allocation7 + $0xca4] sm:$0xf0] }
 0x2b1   :  { %v11234_v51 = vld [vmem:[#allocation7 + $0xe88] sm:$0xf]  ;;  %v10979_v48 = vor.u32 %v14128_v61, %v10978_v58  ;;  %7465 = vmatpush.bf16.msrb.mxu2 %v10723_v43 }
 0x2b2   :  { %v14192_v63 = vld [vmem:[#allocation7 + $0xea4] sm:$0xf0] }
 0x2b3   :  { %v10434_v5 = vld [vmem:[#allocation7 + $0x848] sm:$0xf]  ;;  %v11235_v24 = vor.u32 %v14192_v63, %v11234_v51  ;;  %7478 = vmatpush.bf16.msrb.mxu3 %v10979_v48 }
 0x2b4   :  { %v13992_v6 = vld [vmem:[#allocation7 + $0x864] sm:$0xf0] }
 0x2b5   :  { %v10690_v25 = vld [vmem:[#allocation7 + $0xa48] sm:$0xf]  ;;  %v10435_v23 = vor.u32 %v13992_v6, %v10434_v5  ;;  %7491 = vmatpush.bf16.msra.mxu0 %v11235_v24 }
 0x2b6   :  { %v14056_v56 = vld [vmem:[#allocation7 + $0xa64] sm:$0xf0] }
 0x2b7   :  { %v10946_v52 = vld [vmem:[#allocation7 + $0xc48] sm:$0xf]  ;;  %v10691_v14 = vor.u32 %v14056_v56, %v10690_v25  ;;  %7453 = vmatpush.bf16.msrb.mxu1 %v10435_v23 }
 0x2b8   :  { %v14120_v59 = vld [vmem:[#allocation7 + $0xc64] sm:$0xf0] }
 0x2b9   :  { %v11202_v7 = vld [vmem:[#allocation7 + $0xe48] sm:$0xf]  ;;  %v10947_v35 = vor.u32 %v14120_v59, %v10946_v52  ;;  %7466 = vmatpush.bf16.msrb.mxu2 %v10691_v14 }
 0x2ba   :  { %v14184_v4 = vld [vmem:[#allocation7 + $0xe64] sm:$0xf0] }
 0x2bb   :  { %v10402_v13 = vld [vmem:[#allocation7 + $0x808] sm:$0xf]  ;;  %v11203_v18 = vor.u32 %v14184_v4, %v11202_v7  ;;  %7479 = vmatpush.bf16.msrb.mxu3 %v10947_v35 }
 0x2bc   :  { %v13984_v16 = vld [vmem:[#allocation7 + $0x824] sm:$0xf0] }
 0x2bd   :  { %v11650_v17 = vld [vmem:[#allocation7 + $0x11c8] sm:$0xf]  ;;  %v10403_v15 = vor.u32 %v13984_v16, %v10402_v13  ;;  %7492 = vmatpush.bf16.msra.mxu0 %v11203_v18 }
 0x2be   :  { %v14296_v10 = vld [vmem:[#allocation7 + $0x11e4] sm:$0xf0] }
 0x2bf   :  { %v10658_v19 = vld [vmem:[#allocation7 + $0xa08] sm:$0xf]  ;;  %v11651_v50 = vor.u32 %v14296_v10, %v11650_v17  ;;  %7454 = vmatpush.bf16.msrb.mxu1 %v10403_v15 }
 0x2c0   :  { %v14048_v20 = vld [vmem:[#allocation7 + $0xa24] sm:$0xf0] }
 0x2c1   :  { %v10914_v39 = vld [vmem:[#allocation7 + $0xc08] sm:$0xf]  ;;  %v10659_v31 = vor.u32 %v14048_v20, %v10658_v19 }
 0x2c2   :  { %v14112_v40 = vld [vmem:[#allocation7 + $0xc24] sm:$0xf0]  ;;  %7455 = vmatmul.bf16.vlgmr.msrb.gmra.mxu1 %v15519_v44 }
 0x2c3   :  { %v11170_v27 = vld [vmem:[#allocation7 + $0xe08] sm:$0xf]  ;;  %v10915_v55 = vor.u32 %v14112_v40, %v10914_v39  ;;  %7499 = vmatpush.bf16.msra.mxu1 %v11651_v50  ;;  %7467 = vmatpush.bf16.msrb.mxu2 %v10659_v31  ;;  %v7248_v40 = vpop.f32.mrf.mxu1 }
 0x2c4   :  { %v14176_v12 = vld [vmem:[#allocation7 + $0xe24] sm:$0xf0] }
 0x2c5   :  { %v11906_v45 = vld [vmem:[#allocation7 + $0x13c8] sm:$0xf]  ;;  %v11171_v58 = vor.u32 %v14176_v12, %v11170_v27  ;;  %7480 = vmatpush.bf16.msrb.mxu3 %v10915_v55 }
 0x2c6   :  { %v14360_v42 = vld [vmem:[#allocation7 + $0x13e4] sm:$0xf0]  ;;  %7468 = vmatmul.bf16.vlgmr.msrb.gmra.mxu2 %v15521_v34 }
 0x2c7   :  { %v12162_v46 = vld [vmem:[#allocation7 + $0x15c8] sm:$0xf]  ;;  %v11907_v47 = vor.u32 %v14360_v42, %v11906_v45  ;;  %7493 = vmatpush.bf16.msra.mxu0 %v11171_v58  ;;  %v7249_v45 = vadd.f32 %v7248_v40, %v15586_v41 }
 0x2c8   :  { %v14424_v53 = vld [vmem:[#allocation7 + $0x15e4] sm:$0xf0]  ;;  %7481 = vmatmul.bf16.vlgmr.msrb.gmra.mxu3 %v15523_v28 }
 0x2c9   :  { %v12418_v8 = vld [vmem:[#allocation7 + $0x17c8] sm:$0xf]  ;;  %v12163_v51 = vor.u32 %v14424_v53, %v12162_v46  ;;  %7512 = vmatpush.bf16.msra.mxu2 %v11907_v47  ;;  %v7287_v53 = vpop.f32.mrf.mxu0 }
 0x2ca   :  { %v14488_v54 = vld [vmem:[#allocation7 + $0x17e4] sm:$0xf0]  ;;  %7494 = vmatmul.bf16.vlgmr.msra.gmra.mxu0 %v15525_v49 }
 0x2cb   :  { %v11618_v60 = vld [vmem:[#allocation7 + $0x1188] sm:$0xf]  ;;  %v12419_v63 = vor.u32 %v14488_v54, %v12418_v8  ;;  %7525 = vmatpush.bf16.msra.mxu3 %v12163_v51 }
 0x2cc   :  { %v14288_v61 = vld [vmem:[#allocation7 + $0x11a4] sm:$0xf0] }
 0x2cd   :  { %v11874_v0 = vld [vmem:[#allocation7 + $0x1388] sm:$0xf]  ;;  %v11619_v24 = vor.u32 %v14288_v61, %v11618_v60  ;;  %7538 = vmatpush.bf16.msrb.mxu0 %v12419_v63 }
 0x2ce   :  { %v14352_v2 = vld [vmem:[#allocation7 + $0x13a4] sm:$0xf0] }
 0x2cf   :  { %v12130_v43 = vld [vmem:[#allocation7 + $0x1588] sm:$0xf]  ;;  %v11875_v25 = vor.u32 %v14352_v2, %v11874_v0  ;;  %7500 = vmatpush.bf16.msra.mxu1 %v11619_v24 }
 0x2d0   :  { %v14416_v5 = vld [vmem:[#allocation7 + $0x15a4] sm:$0xf0] }
 0x2d1   :  { %v12386_v6 = vld [vmem:[#allocation7 + $0x1788] sm:$0xf]  ;;  %v12131_v1 = vor.u32 %v14416_v5, %v12130_v43  ;;  %7513 = vmatpush.bf16.msra.mxu2 %v11875_v25 }
 0x2d2   :  { %v14480_v48 = vld [vmem:[#allocation7 + $0x17a4] sm:$0xf0] }
 0x2d3   :  { %v11586_v56 = vld [vmem:[#allocation7 + $0x1148] sm:$0xf]  ;;  %v12387_v59 = vor.u32 %v14480_v48, %v12386_v6  ;;  %7526 = vmatpush.bf16.msra.mxu3 %v12131_v1  ;;  %v7261_v6 = vpop.f32.mrf.mxu2  ;;  %v7274_v1 = vpop.f32.mrf.mxu3 }
 0x2d4   :  { %v14280_v52 = vld [vmem:[#allocation7 + $0x1164] sm:$0xf0] }
 0x2d5   :  { %v11842_v7 = vld [vmem:[#allocation7 + $0x1348] sm:$0xf]  ;;  %v11587_v17 = vor.u32 %v14280_v52, %v11586_v56  ;;  %7539 = vmatpush.bf16.msrb.mxu0 %v12387_v59  ;;  %v7250_v56 = vpop.f32.mrf.mxu1  ;;  %v7262_v52 = vadd.f32 %v7261_v6, %v7249_v45 }
 0x2d6   :  { %v14344_v4 = vld [vmem:[#allocation7 + $0x1364] sm:$0xf0] }
 0x2d7   :  { %v12098_v23 = vld [vmem:[#allocation7 + $0x1548] sm:$0xf]  ;;  %v11843_v10 = vor.u32 %v14344_v4, %v11842_v7  ;;  %7501 = vmatpush.bf16.msra.mxu1 %v11587_v17 }
 0x2d8   :  { %v14408_v13 = vld [vmem:[#allocation7 + $0x1564] sm:$0xf0] }
 0x2d9   :  { %v12354_v14 = vld [vmem:[#allocation7 + $0x1748] sm:$0xf]  ;;  %v12099_v11 = vor.u32 %v14408_v13, %v12098_v23  ;;  %7514 = vmatpush.bf16.msra.mxu2 %v11843_v10  ;;  %v7275_v13 = vadd.f32 %v7274_v1, %v7262_v52  ;;  %v7289_v10 = vpop.f32.mrf.mxu0 }
 0x2da   :  { %v14472_v16 = vld [vmem:[#allocation7 + $0x1764] sm:$0xf0] }
 0x2db   :  { %v11554_v35 = vld [vmem:[#allocation7 + $0x1108] sm:$0xf]  ;;  %v12355_v19 = vor.u32 %v14472_v16, %v12354_v14  ;;  %7527 = vmatpush.bf16.msra.mxu3 %v12099_v11 }
 0x2dc   :  { %v14272_v18 = vld [vmem:[#allocation7 + $0x1124] sm:$0xf0] }
 0x2dd   :  { %v11810_v20 = vld [vmem:[#allocation7 + $0x1308] sm:$0xf]  ;;  %v11555_v42 = vor.u32 %v14272_v18, %v11554_v35  ;;  %7540 = vmatpush.bf16.msrb.mxu0 %v12355_v19 }
 0x2de   :  { %v14336_v39 = vld [vmem:[#allocation7 + $0x1324] sm:$0xf0] }
 0x2df   :  { %v12066_v26 = vld [vmem:[#allocation7 + $0x1508] sm:$0xf]  ;;  %v11811_v46 = vor.u32 %v14336_v39, %v11810_v20  ;;  %7502 = vmatpush.bf16.msra.mxu1 %v11555_v42 }
 0x2e0   :  { %v14400_v27 = vld [vmem:[#allocation7 + $0x1524] sm:$0xf0] }
 0x2e1   :  { %v12322_v12 = vld [vmem:[#allocation7 + $0x1708] sm:$0xf]  ;;  %v12067_v8 = vor.u32 %v14400_v27, %v12066_v26  ;;  %7515 = vmatpush.bf16.msra.mxu2 %v11811_v46  ;;  %v15593_v27 = vadd.f32 %v7287_v53, %v7275_v13 }
 0x2e2   :  { %v14464_v15 = vld [vmem:[#allocation7 + $0x1724] sm:$0xf0] }
 0x2e3   :  { %v11522_v50 = vld [vmem:[#allocation7 + $0x10c8] sm:$0xf]  ;;  %v12323_v54 = vor.u32 %v14464_v15, %v12322_v12  ;;  %7528 = vmatpush.bf16.msra.mxu3 %v12067_v8 }
 0x2e4   :  { %v14264_v31 = vld [vmem:[#allocation7 + $0x10e4] sm:$0xf0] }
 0x2e5   :  { %v11778_v55 = vld [vmem:[#allocation7 + $0x12c8] sm:$0xf]  ;;  %v11523_v63 = vor.u32 %v14264_v31, %v11522_v50  ;;  %7541 = vmatpush.bf16.msrb.mxu0 %v12323_v54  ;;  %v7263_v54 = vpop.f32.mrf.mxu2 }
 0x2e6   :  { %v14328_v58 = vld [vmem:[#allocation7 + $0x12e4] sm:$0xf0] }
 0x2e7   :  { %v12034_v47 = vld [vmem:[#allocation7 + $0x14c8] sm:$0xf]  ;;  %v11779_v41 = vor.u32 %v14328_v58, %v11778_v55  ;;  %7503 = vmatpush.bf16.msra.mxu1 %v11523_v63 }
 0x2e8   :  { %v14392_v60 = vld [vmem:[#allocation7 + $0x14e4] sm:$0xf0] }
 0x2e9   :  { %v12290_v61 = vld [vmem:[#allocation7 + $0x16c8] sm:$0xf]  ;;  %v12035_v43 = vor.u32 %v14392_v60, %v12034_v47  ;;  %7516 = vmatpush.bf16.msra.mxu2 %v11779_v41  ;;  %v7276_v60 = vpop.f32.mrf.mxu3 }
 0x2ea   :  { %v14456_v51 = vld [vmem:[#allocation7 + $0x16e4] sm:$0xf0] }
 0x2eb   :  { %v11490_v0 = vld [vmem:[#allocation7 + $0x1088] sm:$0xf]  ;;  %v12291_v5 = vor.u32 %v14456_v51, %v12290_v61  ;;  %7529 = vmatpush.bf16.msra.mxu3 %v12035_v43 }
 0x2ec   :  { %v14256_v2 = vld [vmem:[#allocation7 + $0x10a4] sm:$0xf0] }
 0x2ed   :  { %v11746_v48 = vld [vmem:[#allocation7 + $0x1288] sm:$0xf]  ;;  %v11491_v23 = vor.u32 %v14256_v2, %v11490_v0  ;;  %7542 = vmatpush.bf16.msrb.mxu0 %v12291_v5 }
 0x2ee   :  { %v14320_v24 = vld [vmem:[#allocation7 + $0x12a4] sm:$0xf0] }
 0x2ef   :  { %v12002_v25 = vld [vmem:[#allocation7 + $0x1488] sm:$0xf]  ;;  %v11747_v14 = vor.u32 %v14320_v24, %v11746_v48  ;;  %7504 = vmatpush.bf16.msra.mxu1 %v11491_v23 }
 0x2f0   :  { %v14384_v59 = vld [vmem:[#allocation7 + $0x14a4] sm:$0xf0] }
 0x2f1   :  { %v12258_v7 = vld [vmem:[#allocation7 + $0x1688] sm:$0xf]  ;;  %v12003_v35 = vor.u32 %v14384_v59, %v12002_v25  ;;  %7517 = vmatpush.bf16.msra.mxu2 %v11747_v14 }
 0x2f2   :  { %v14448_v4 = vld [vmem:[#allocation7 + $0x16a4] sm:$0xf0] }
 0x2f3   :  { %v11458_v16 = vld [vmem:[#allocation7 + $0x1048] sm:$0xf]  ;;  %v12259_v18 = vor.u32 %v14448_v4, %v12258_v7  ;;  %7530 = vmatpush.bf16.msra.mxu3 %v12003_v35 }
 0x2f4   :  { %v14248_v17 = vld [vmem:[#allocation7 + $0x1064] sm:$0xf0] }
 0x2f5   :  { %v11714_v11 = vld [vmem:[#allocation7 + $0x1248] sm:$0xf]  ;;  %v11459_v12 = vor.u32 %v14248_v17, %v11458_v16  ;;  %7543 = vmatpush.bf16.msrb.mxu0 %v12259_v18 }
 0x2f6   :  { %v14312_v19 = vld [vmem:[#allocation7 + $0x1264] sm:$0xf0] }
 0x2f7   :  { %v11970_v20 = vld [vmem:[#allocation7 + $0x1448] sm:$0xf]  ;;  %v11715_v45 = vor.u32 %v14312_v19, %v11714_v11  ;;  %7505 = vmatpush.bf16.msra.mxu1 %v11459_v12 }
 0x2f8   :  { %v14376_v39 = vld [vmem:[#allocation7 + $0x1464] sm:$0xf0] }
 0x2f9   :  { %v12226_v26 = vld [vmem:[#allocation7 + $0x1648] sm:$0xf]  ;;  %v11971_v31 = vor.u32 %v14376_v39, %v11970_v20  ;;  %7518 = vmatpush.bf16.msra.mxu2 %v11715_v45 }
 0x2fa   :  { %v14440_v40 = vld [vmem:[#allocation7 + $0x1664] sm:$0xf0] }
 0x2fb   :  { %v11426_v15 = vld [vmem:[#allocation7 + $0x1008] sm:$0xf]  ;;  %v12227_v8 = vor.u32 %v14440_v40, %v12226_v26  ;;  %7531 = vmatpush.bf16.msra.mxu3 %v11971_v31 }
 0x2fc   :  { %v14240_v42 = vld [vmem:[#allocation7 + $0x1024] sm:$0xf0] }
 0x2fd   :  { %v12674_v46 = vld [vmem:[#allocation7 + $0x19c8] sm:$0xf]  ;;  %v11427_v63 = vor.u32 %v14240_v42, %v11426_v15  ;;  %7544 = vmatpush.bf16.msrb.mxu0 %v12227_v8 }
 0x2fe   :  { %v14552_v50 = vld [vmem:[#allocation7 + $0x19e4] sm:$0xf0] }
 0x2ff   :  { %v11682_v55 = vld [vmem:[#allocation7 + $0x1208] sm:$0xf]  ;;  %v12675_v43 = vor.u32 %v14552_v50, %v12674_v46  ;;  %7506 = vmatpush.bf16.msra.mxu1 %v11427_v63 }
 0x300   :  { %v14304_v58 = vld [vmem:[#allocation7 + $0x1224] sm:$0xf0] }
 0x301   :  { %v11938_v47 = vld [vmem:[#allocation7 + $0x1408] sm:$0xf]  ;;  %v11683_v5 = vor.u32 %v14304_v58, %v11682_v55  ;;  %v7300_v58 = vpop.f32.mrf.mxu1 }
 0x302   :  { %v14368_v61 = vld [vmem:[#allocation7 + $0x1424] sm:$0xf0]  ;;  %7507 = vmatmul.bf16.vlgmr.msra.gmra.mxu1 %v15532_v57 }
 0x303   :  { %v12194_v53 = vld [vmem:[#allocation7 + $0x1608] sm:$0xf]  ;;  %v11939_v25 = vor.u32 %v14368_v61, %v11938_v47  ;;  %7551 = vmatpush.bf16.msrb.mxu1 %v12675_v43  ;;  %7519 = vmatpush.bf16.msra.mxu2 %v11683_v5 }
 0x304   :  { %v14432_v51 = vld [vmem:[#allocation7 + $0x1624] sm:$0xf0] }
 0x305   :  { %v12930_v41 = vld [vmem:[#allocation7 + $0x1bc8] sm:$0xf]  ;;  %v12195_v56 = vor.u32 %v14432_v51, %v12194_v53  ;;  %7532 = vmatpush.bf16.msra.mxu3 %v11939_v25  ;;  %v7301_v53 = vadd.f32 %v7300_v58, %v15593_v27 }
 0x306   :  { %v14616_v0 = vld [vmem:[#allocation7 + $0x1be4] sm:$0xf0]  ;;  %7520 = vmatmul.bf16.vlgmr.msra.gmra.mxu2 %v15534_v62 }
 0x307   :  { %v13186_v2 = vld [vmem:[#allocation7 + $0x1dc8] sm:$0xf]  ;;  %v12931_v52 = vor.u32 %v14616_v0, %v12930_v41  ;;  %7545 = vmatpush.bf16.msrb.mxu0 %v12195_v56 }
 0x308   :  { %v14680_v6 = vld [vmem:[#allocation7 + $0x1de4] sm:$0xf0]  ;;  %7533 = vmatmul.bf16.vlgmr.msra.gmra.mxu3 %v15536_v37 }
 0x309   :  { %v13442_v48 = vld [vmem:[#allocation7 + $0x1fc8] sm:$0xf]  ;;  %v13187_v7 = vor.u32 %v14680_v6, %v13186_v2  ;;  %7564 = vmatpush.bf16.msrb.mxu2 %v12931_v52  ;;  %v7339_v2 = vpop.f32.mrf.mxu0 }
 0x30a   :  { %v14744_v24 = vld [vmem:[#allocation7 + $0x1fe4] sm:$0xf0]  ;;  %7546 = vmatmul.bf16.vlgmr.msrb.gmra.mxu0 %v15538_v30 }
 0x30b   :  { %v12642_v1 = vld [vmem:[#allocation7 + $0x1988] sm:$0xf]  ;;  %v13443_v4 = vor.u32 %v14744_v24, %v13442_v48  ;;  %7577 = vmatpush.bf16.msrb.mxu3 %v13187_v7 }
 0x30c   :  { %v14544_v59 = vld [vmem:[#allocation7 + $0x19a4] sm:$0xf0] }
 0x30d   :  { %v12898_v23 = vld [vmem:[#allocation7 + $0x1b88] sm:$0xf]  ;;  %v12643_v35 = vor.u32 %v14544_v59, %v12642_v1  ;;  %7590 = vmatpush.bf16.msra.mxu0 %v13443_v4 }
 0x30e   :  { %v14608_v13 = vld [vmem:[#allocation7 + $0x1ba4] sm:$0xf0] }
 0x30f   :  { %v13154_v14 = vld [vmem:[#allocation7 + $0x1d88] sm:$0xf]  ;;  %v12899_v18 = vor.u32 %v14608_v13, %v12898_v23  ;;  %7552 = vmatpush.bf16.msrb.mxu1 %v12643_v35 }
 0x310   :  { %v14672_v16 = vld [vmem:[#allocation7 + $0x1da4] sm:$0xf0] }
 0x311   :  { %v13410_v17 = vld [vmem:[#allocation7 + $0x1f88] sm:$0xf]  ;;  %v13155_v20 = vor.u32 %v14672_v16, %v13154_v14  ;;  %7565 = vmatpush.bf16.msrb.mxu2 %v12899_v18 }
 0x312   :  { %v14736_v10 = vld [vmem:[#allocation7 + $0x1fa4] sm:$0xf0] }
 0x313   :  { %v12610_v11 = vld [vmem:[#allocation7 + $0x1948] sm:$0xf]  ;;  %v13411_v39 = vor.u32 %v14736_v10, %v13410_v17  ;;  %7578 = vmatpush.bf16.msrb.mxu3 %v13155_v20  ;;  %v7302_v17 = vpop.f32.mrf.mxu1  ;;  %v7313_v10 = vpop.f32.mrf.mxu2 }
 0x314   :  { %v14536_v19 = vld [vmem:[#allocation7 + $0x1964] sm:$0xf0]  ;;  %v7326_v20 = vpop.f32.mrf.mxu3  ;;  %v10116_v17 = vld [vmem:[#allocation7 + $0x5e8] sm:$0xf0] }
 0x315   :  { %v12866_v26 = vld [vmem:[#allocation7 + $0x1b48] sm:$0xf]  ;;  %v12611_v46 = vor.u32 %v14536_v19, %v12610_v11  ;;  %7591 = vmatpush.bf16.msra.mxu0 %v13411_v39  ;;  %v7314_v19 = vadd.f32 %v7313_v10, %v7301_v53  ;;  %v13972_v10 = vld [vmem:[#allocation7 + $0x7cc] sm:$0xf] }
 0x316   :  { %v14600_v40 = vld [vmem:[#allocation7 + $0x1b64] sm:$0xf0] }
 0x317   :  { %v13122_v12 = vld [vmem:[#allocation7 + $0x1d48] sm:$0xf]  ;;  %v12867_v50 = vor.u32 %v14600_v40, %v12866_v26  ;;  %7553 = vmatpush.bf16.msrb.mxu1 %v12611_v46 }
 0x318   :  { %v14664_v15 = vld [vmem:[#allocation7 + $0x1d64] sm:$0xf0] }
 0x319   :  { %v13378_v45 = vld [vmem:[#allocation7 + $0x1f48] sm:$0xf]  ;;  %v13123_v54 = vor.u32 %v14664_v15, %v13122_v12  ;;  %7566 = vmatpush.bf16.msrb.mxu2 %v12867_v50  ;;  %v7327_v15 = vadd.f32 %v7326_v20, %v7314_v19  ;;  %v13772_v20 = vld [vmem:[#allocation7 + $0x18c] sm:$0xf] }
 0x31a   :  { %v14728_v42 = vld [vmem:[#allocation7 + $0x1f64] sm:$0xf0] }
 0x31b   :  { %v12578_v31 = vld [vmem:[#allocation7 + $0x1908] sm:$0xf]  ;;  %v13379_v55 = vor.u32 %v14728_v42, %v13378_v45  ;;  %7579 = vmatpush.bf16.msrb.mxu3 %v13123_v54  ;;  %v7341_v45 = vpop.f32.mrf.mxu0  ;;  %v15600_v53 = vadd.f32 %v7339_v2, %v7327_v15  ;;  %v9828_v15 = vld [vmem:[#allocation7 + $0x3a8] sm:$0xf0] }
 0x31c   :  { %v14528_v8 = vld [vmem:[#allocation7 + $0x1924] sm:$0xf0]  ;;  %v13900_v45 = vld [vmem:[#allocation7 + $0x58c] sm:$0xf] }
 0x31d   :  { %v12834_v47 = vld [vmem:[#allocation7 + $0x1b08] sm:$0xf]  ;;  %v12579_v0 = vor.u32 %v14528_v8, %v12578_v31  ;;  %7592 = vmatpush.bf16.msra.mxu0 %v13379_v55 }
 0x31e   :  { %v14592_v60 = vld [vmem:[#allocation7 + $0x1b24] sm:$0xf0] }
 0x31f   :  { %v13090_v61 = vld [vmem:[#allocation7 + $0x1d08] sm:$0xf]  ;;  %v12835_v43 = vor.u32 %v14592_v60, %v12834_v47  ;;  %7554 = vmatpush.bf16.msrb.mxu1 %v12579_v0 }
 0x320   :  { %v14656_v51 = vld [vmem:[#allocation7 + $0x1d24] sm:$0xf0] }
 0x321   :  { %v13346_v63 = vld [vmem:[#allocation7 + $0x1f08] sm:$0xf]  ;;  %v13091_v48 = vor.u32 %v14656_v51, %v13090_v61  ;;  %7567 = vmatpush.bf16.msrb.mxu2 %v12835_v43  ;;  %v13780_v43 = vld [vmem:[#allocation7 + $0x1cc] sm:$0xf] }
 0x322   :  { %v14720_v41 = vld [vmem:[#allocation7 + $0x1f24] sm:$0xf0] }
 0x323   :  { %v12546_v5 = vld [vmem:[#allocation7 + $0x18c8] sm:$0xf]  ;;  %v13347_v24 = vor.u32 %v14720_v41, %v13346_v63  ;;  %7580 = vmatpush.bf16.msrb.mxu3 %v13091_v48 }
 0x324   :  { %v14520_v6 = vld [vmem:[#allocation7 + $0x18e4] sm:$0xf0] }
 0x325   :  { %v12802_v25 = vld [vmem:[#allocation7 + $0x1ac8] sm:$0xf]  ;;  %v12547_v7 = vor.u32 %v14520_v6, %v12546_v5  ;;  %7593 = vmatpush.bf16.msra.mxu0 %v13347_v24  ;;  %v9604_v5 = vld [vmem:[#allocation7 + $0x1e8] sm:$0xf0]  ;;  %v7315_v24 = vpop.f32.mrf.mxu2 }
 0x326   :  { %v14584_v56 = vld [vmem:[#allocation7 + $0x1ae4] sm:$0xf0] }
 0x327   :  { %v13058_v52 = vld [vmem:[#allocation7 + $0x1cc8] sm:$0xf]  ;;  %v12803_v4 = vor.u32 %v14584_v56, %v12802_v25  ;;  %7555 = vmatpush.bf16.msrb.mxu1 %v12547_v7 }
 0x328   :  { %v14648_v1 = vld [vmem:[#allocation7 + $0x1ce4] sm:$0xf0] }
 0x329   :  { %v13314_v59 = vld [vmem:[#allocation7 + $0x1ec8] sm:$0xf]  ;;  %v13059_v14 = vor.u32 %v14648_v1, %v13058_v52  ;;  %7568 = vmatpush.bf16.msrb.mxu2 %v12803_v4  ;;  %v7328_v1 = vpop.f32.mrf.mxu3  ;;  %v13844_v4 = vld [vmem:[#allocation7 + $0x3cc] sm:$0xf] }
 0x32a   :  { %v14712_v27 = vld [vmem:[#allocation7 + $0x1ee4] sm:$0xf0]  ;;  %v9764_v1 = vld [vmem:[#allocation7 + $0x328] sm:$0xf0] }
 0x32b   :  { %v12514_v23 = vld [vmem:[#allocation7 + $0x1888] sm:$0xf]  ;;  %v13315_v16 = vor.u32 %v14712_v27, %v13314_v59  ;;  %7581 = vmatpush.bf16.msrb.mxu3 %v13059_v14  ;;  %v9607_v14 = vor.u32 %v13780_v43, %v9604_v5 }
 0x32c   :  { %v14512_v13 = vld [vmem:[#allocation7 + $0x18a4] sm:$0xf0] }
 0x32d   :  { %v12770_v35 = vld [vmem:[#allocation7 + $0x1a88] sm:$0xf]  ;;  %v12515_v12 = vor.u32 %v14512_v13, %v12514_v23  ;;  %7594 = vmatpush.bf16.msra.mxu0 %v13315_v16  ;;  %v9860_v23 = vld [vmem:[#allocation7 + $0x3e8] sm:$0xf0] }
 0x32e   :  { %v14576_v18 = vld [vmem:[#allocation7 + $0x1aa4] sm:$0xf0]  ;;  %v13908_v13 = vld [vmem:[#allocation7 + $0x5cc] sm:$0xf]  ;;  %v9863_v19 = vor.u32 %v13844_v4, %v9860_v23 }
 0x32f   :  { %v13026_v11 = vld [vmem:[#allocation7 + $0x1c88] sm:$0xf]  ;;  %v12771_v42 = vor.u32 %v14576_v18, %v12770_v35  ;;  %7556 = vmatpush.bf16.msrb.mxu1 %v12515_v12  ;;  %v10372_v35 = vld [vmem:[#allocation7 + $0x7e8] sm:$0xf0] }
 0x330   :  { %v14640_v39 = vld [vmem:[#allocation7 + $0x1ca4] sm:$0xf0]  ;;  %v13836_v12 = vld [vmem:[#allocation7 + $0x38c] sm:$0xf] }
 0x331   :  { %v13282_v26 = vld [vmem:[#allocation7 + $0x1e88] sm:$0xf]  ;;  %v13027_v31 = vor.u32 %v14640_v39, %v13026_v11  ;;  %7569 = vmatpush.bf16.msrb.mxu2 %v12771_v42  ;;  %v9572_v39 = vld [vmem:[#allocation7 + $0x1a8] sm:$0xf0] }
 0x332   :  { %v14704_v40 = vld [vmem:[#allocation7 + $0x1ea4] sm:$0xf0]  ;;  %v10084_v42 = vld [vmem:[#allocation7 + $0x5a8] sm:$0xf0] }
 0x333   :  { %v12482_v46 = vld [vmem:[#allocation7 + $0x1848] sm:$0xf]  ;;  %v13283_v8 = vor.u32 %v14704_v40, %v13282_v26  ;;  %7582 = vmatpush.bf16.msrb.mxu3 %v13027_v31  ;;  %v10119_v26 = vor.u32 %v13908_v13, %v10116_v17  ;;  %v10375_v40 = vor.u32 %v13972_v10, %v10372_v35  ;;  %v9575_v31 = vor.u32 %v13772_v20, %v9572_v39  ;;  %v10276_v4 = vld [vmem:[#allocation7 + $0x728] sm:$0xf0]  ;;  %v7391_v13 = vpop.f32.mrf.mxu0 }
 0x334   :  { %v14504_v50 = vld [vmem:[#allocation7 + $0x1864] sm:$0xf0]  ;;  %v9476_v17 = vld [vmem:[#allocation7 + $0xe8] sm:$0xf0] }
 0x335   :  { %v12738_v54 = vld [vmem:[#allocation7 + $0x1a48] sm:$0xf]  ;;  %v12483_v51 = vor.u32 %v14504_v50, %v12482_v46  ;;  %7595 = vmatpush.bf16.msra.mxu0 %v13283_v8  ;;  %v13964_v46 = vld [vmem:[#allocation7 + $0x78c] sm:$0xf]  ;;  %v9831_v8 = vor.u32 %v13836_v12, %v9828_v15 }
 0x336   :  { %v14568_v55 = vld [vmem:[#allocation7 + $0x1a64] sm:$0xf0]  ;;  %v10340_v50 = vld [vmem:[#allocation7 + $0x7a8] sm:$0xf0] }
 0x337   :  { %v12994_v58 = vld [vmem:[#allocation7 + $0x1c48] sm:$0xf]  ;;  %v12739_v41 = vor.u32 %v14568_v55, %v12738_v54  ;;  %7557 = vmatpush.bf16.msrb.mxu1 %v12483_v51  ;;  %v13764_v54 = vld [vmem:[#allocation7 + $0x14c] sm:$0xf] }
 0x338   :  { %v14632_v47 = vld [vmem:[#allocation7 + $0x1c64] sm:$0xf0]  ;;  %v9540_v55 = vld [vmem:[#allocation7 + $0x168] sm:$0xf0] }
 0x339   :  { %v13250_v60 = vld [vmem:[#allocation7 + $0x1e48] sm:$0xf]  ;;  %v12995_v6 = vor.u32 %v14632_v47, %v12994_v58  ;;  %7570 = vmatpush.bf16.msrb.mxu2 %v12739_v41  ;;  %v10087_v58 = vor.u32 %v13900_v45, %v10084_v42  ;;  %v10343_v47 = vor.u32 %v13964_v46, %v10340_v50  ;;  %v13892_v51 = vld [vmem:[#allocation7 + $0x54c] sm:$0xf]  ;;  %v9543_v43 = vor.u32 %v13764_v54, %v9540_v55 }
 0x33a   :  { %v14696_v61 = vld [vmem:[#allocation7 + $0x1e64] sm:$0xf0]  ;;  %v13956_v41 = vld [vmem:[#allocation7 + $0x74c] sm:$0xf] }
 0x33b   :  { %v12450_v63 = vld [vmem:[#allocation7 + $0x1808] sm:$0xf]  ;;  %v13251_v48 = vor.u32 %v14696_v61, %v13250_v60  ;;  %7583 = vmatpush.bf16.msrb.mxu3 %v12995_v6  ;;  %v13828_v60 = vld [vmem:[#allocation7 + $0x34c] sm:$0xf] }
 0x33c   :  { %v14496_v0 = vld [vmem:[#allocation7 + $0x1824] sm:$0xf0]  ;;  %v9796_v61 = vld [vmem:[#allocation7 + $0x368] sm:$0xf0] }
 0x33d   :  { %v12706_v25 = vld [vmem:[#allocation7 + $0x1a08] sm:$0xf]  ;;  %v12451_v7 = vor.u32 %v14496_v0, %v12450_v63  ;;  %7596 = vmatpush.bf16.msra.mxu0 %v13251_v48  ;;  %v10052_v63 = vld [vmem:[#allocation7 + $0x568] sm:$0xf0]  ;;  %v9799_v5 = vor.u32 %v13828_v60, %v9796_v61 }
 0x33e   :  { %v14560_v56 = vld [vmem:[#allocation7 + $0x1a24] sm:$0xf0]  ;;  %v10308_v0 = vld [vmem:[#allocation7 + $0x768] sm:$0xf0]  ;;  %v10055_v24 = vor.u32 %v13892_v51, %v10052_v63 }
 0x33f   :  { %v12962_v52 = vld [vmem:[#allocation7 + $0x1c08] sm:$0xf]  ;;  %v12707_v16 = vor.u32 %v14560_v56, %v12706_v25  ;;  %7558 = vmatpush.bf16.msrb.mxu1 %v12451_v7  ;;  %v13756_v6 = vld [vmem:[#allocation7 + $0x10c] sm:$0xf]  ;;  %v10311_v25 = vor.u32 %v13956_v41, %v10308_v0  ;;  %v7352_v56 = vpop.f32.mrf.mxu1  ;;  %v7393_v0 = vpop.f32.mrf.mxu0 }
 0x340   :  { %v14624_v59 = vld [vmem:[#allocation7 + $0x1c24] sm:$0xf0]  ;;  %v9508_v48 = vld [vmem:[#allocation7 + $0x128] sm:$0xf0] }
 0x341   :  { %v13218_v2 = vld [vmem:[#allocation7 + $0x1e08] sm:$0xf]  ;;  %v12963_v18 = vor.u32 %v14624_v59, %v12962_v52  ;;  %7571 = vmatpush.bf16.msrb.mxu2 %v12707_v16  ;;  %v13820_v52 = vld [vmem:[#allocation7 + $0x30c] sm:$0xf]  ;;  %v9511_v23 = vor.u32 %v13756_v6, %v9508_v48 }
 0x342   :  { %v14688_v27 = vld [vmem:[#allocation7 + $0x1e24] sm:$0xf0]  ;;  %7559 = vmatmul.bf16.vlgmr.msrb.gmra.mxu1 %v15545_v32  ;;  %v13884_v59 = vld [vmem:[#allocation7 + $0x50c] sm:$0xf] }
 0x343   :  { %v13219_v11 = vor.u32 %v14688_v27, %v13218_v2  ;;  %7603 = vmatpush.bf16.msra.mxu1 %v9607_v14  ;;  %7584 = vmatpush.bf16.msrb.mxu3 %v12963_v18  ;;  %v7353_v2 = vadd.f32 %v7352_v56, %v15600_v53  ;;  %v10020_v27 = vld [vmem:[#allocation7 + $0x528] sm:$0xf0]  ;;  %v9767_v14 = vor.u32 %v13820_v52, %v9764_v1 }
 0x344   :  { %7572 = vmatmul.bf16.vlgmr.msrb.gmra.mxu2 %v15547_v22  ;;  %v13948_v7 = vld [vmem:[#allocation7 + $0x70c] sm:$0xf]  ;;  %v10023_v10 = vor.u32 %v13884_v59, %v10020_v27 }
 0x345   :  { %7597 = vmatpush.bf16.msra.mxu0 %v13219_v11  ;;  %7616 = vmatpush.bf16.msra.mxu2 %v9863_v19  ;;  %v13748_v16 = vld [vmem:[#allocation7 + $0xcc] sm:$0xf]  ;;  %v10279_v35 = vor.u32 %v13948_v7, %v10276_v4 }
 0x346   :  { %7585 = vmatmul.bf16.vlgmr.msrb.gmra.mxu3 %v15549_v33  ;;  %v13812_v18 = vld [vmem:[#allocation7 + $0x2cc] sm:$0xf] }
 0x347   :  { %7629 = vmatpush.bf16.msra.mxu3 %v10119_v26  ;;  %7604 = vmatpush.bf16.msra.mxu1 %v9575_v31  ;;  %v9732_v11 = vld [vmem:[#allocation7 + $0x2e8] sm:$0xf0]  ;;  %v8643_v26 = vmax.f32 %v15579_v3, 0.0  ;;  %v7354_v50 = vpop.f32.mrf.mxu1  ;;  %v7365_v31 = vpop.f32.mrf.mxu2 }
 0x348   :  { %7598 = vmatmul.bf16.vlgmr.msra.gmra.mxu0 %v15552_v9  ;;  %v13876_v19 = vld [vmem:[#allocation7 + $0x4cc] sm:$0xf]  ;;  %v9735_v12 = vor.u32 %v13812_v18, %v9732_v11 }
 0x349   :  { %7642 = vmatpush.bf16.msrb.mxu0 %v10375_v40  ;;  %7617 = vmatpush.bf16.msra.mxu2 %v9831_v8  ;;  %v9988_v20 = vld [vmem:[#allocation7 + $0x4e8] sm:$0xf0]  ;;  %v9479_v40 = vor.u32 %v13748_v16, %v9476_v17  ;;  %v8659_v51 = vmul.f32 3.3333333, %v8643_v26 }
 0x34a   :  { %v13940_v39 = vld [vmem:[#allocation7 + $0x6cc] sm:$0xf]  ;;  %v9991_v42 = vor.u32 %v13876_v19, %v9988_v20 }
 0x34b   :  { %7630 = vmatpush.bf16.msra.mxu3 %v10087_v58  ;;  %7605 = vmatpush.bf16.msra.mxu1 %v9543_v43  ;;  %v10244_v53 = vld [vmem:[#allocation7 + $0x6e8] sm:$0xf0]  ;;  %v7366_v58 = vadd.f32 %v7365_v31, %v7353_v2 }
 0x34c   :  { %v13740_v15 = vld [vmem:[#allocation7 + $0x8c] sm:$0xf]  ;;  %v10247_v46 = vor.u32 %v13940_v39, %v10244_v53 }
 0x34d   :  { %7643 = vmatpush.bf16.msrb.mxu0 %v10343_v47  ;;  %7618 = vmatpush.bf16.msra.mxu2 %v9799_v5  ;;  %v9444_v45 = vld [vmem:[#allocation7 + $0xa8] sm:$0xf0]  ;;  %v7378_v47 = vpop.f32.mrf.mxu3 }
 0x34e   :  { %v13804_v8 = vld [vmem:[#allocation7 + $0x28c] sm:$0xf]  ;;  %v9447_v63 = vor.u32 %v13740_v15, %v9444_v45  ;;  %v7379_v41 = vadd.f32 %v7378_v47, %v7366_v58 }
 0x34f   :  { %7631 = vmatpush.bf16.msra.mxu3 %v10055_v24  ;;  %7606 = vmatpush.bf16.msra.mxu1 %v9511_v23  ;;  %v9700_v54 = vld [vmem:[#allocation7 + $0x2a8] sm:$0xf0]  ;;  %v7367_v20 = vpop.f32.mrf.mxu2 }
 0x350   :  { %v13868_v55 = vld [vmem:[#allocation7 + $0x48c] sm:$0xf]  ;;  %v9703_v43 = vor.u32 %v13804_v8, %v9700_v54  ;;  %v7392_v59 = vadd.f32 %v7391_v13, %v7379_v41 }
 0x351   :  { %7644 = vmatpush.bf16.msrb.mxu0 %v10311_v25  ;;  %7619 = vmatpush.bf16.msra.mxu2 %v9767_v14  ;;  %v9956_v60 = vld [vmem:[#allocation7 + $0x4a8] sm:$0xf0] }
 0x352   :  { %v13932_v61 = vld [vmem:[#allocation7 + $0x68c] sm:$0xf]  ;;  %v9959_v24 = vor.u32 %v13868_v55, %v9956_v60  ;;  %v8644_v17 = vmax.f32 %v7392_v59, 0.0 }
 0x353   :  { %7632 = vmatpush.bf16.msra.mxu3 %v10023_v10  ;;  %v10212_v3 = vld [vmem:[#allocation7 + $0x6a8] sm:$0xf0]  ;;  %7607 = vmatpush.bf16.msra.mxu1 %v9479_v40 }
 0x354   :  { %v13732_v5 = vld [vmem:[#allocation7 + $0x4c] sm:$0xf]  ;;  %v10215_v25 = vor.u32 %v13932_v61, %v10212_v3  ;;  %v8660_v26 = vmul.f32 3.3333333, %v8644_v17 }
 0x355   :  { %7645 = vmatpush.bf16.msrb.mxu0 %v10279_v35  ;;  %7620 = vmatpush.bf16.msra.mxu2 %v9735_v12  ;;  %v9412_v6 = vld [vmem:[#allocation7 + $0x68] sm:$0xf0]  ;;  %v7380_v40 = vpop.f32.mrf.mxu3 }
 0x356   :  { %v13796_v48 = vld [vmem:[#allocation7 + $0x24c] sm:$0xf]  ;;  %v9415_v4 = vor.u32 %v13732_v5, %v9412_v6  ;;  %v8675_v31 = vrot.slane %v8660_v26, 6 }
 0x357   :  { %7633 = vmatpush.bf16.msra.mxu3 %v9991_v42  ;;  %v9668_v56 = vld [vmem:[#allocation7 + $0x268] sm:$0xf0]  ;;  %7608 = vmatpush.bf16.msra.mxu1 %v9447_v63 }
 0x358   :  { %v13860_v52 = vld [vmem:[#allocation7 + $0x44c] sm:$0xf]  ;;  %v9671_v10 = vor.u32 %v13796_v48, %v9668_v56  ;;  %v15609_v61 = vsel %vm351_vm3, %v8659_v51, %v8675_v31 }
 0x359   :  { %7646 = vmatpush.bf16.msrb.mxu0 %v10247_v46  ;;  %v9924_v1 = vld [vmem:[#allocation7 + $0x468] sm:$0xf0]  ;;  %7621 = vmatpush.bf16.msra.mxu2 %v9703_v43 }
 0x35a   :  { %v13924_v2 = vld [vmem:[#allocation7 + $0x64c] sm:$0xf]  ;;  %v9927_v11 = vor.u32 %v13860_v52, %v9924_v1 }
 0x35b   :  { %v10180_v27 = vld [vmem:[#allocation7 + $0x668] sm:$0xf0]  ;;  %7634 = vmatpush.bf16.msra.mxu3 %v9959_v24  ;;  %7609 = vmatpush.bf16.msra.mxu1 %v9415_v4 }
 0x35c   :  { %v13724_v7 = vld [vmem:[#allocation7 + $0xc] sm:$0xf]  ;;  %v10183_v19 = vor.u32 %v13924_v2, %v10180_v27 }
 0x35d   :  { %v9380_v23 = vld [vmem:[#allocation7 + $0x28] sm:$0xf0]  ;;  %7647 = vmatpush.bf16.msrb.mxu0 %v10215_v25  ;;  %7622 = vmatpush.bf16.msra.mxu2 %v9671_v10 }
 0x35e   :  { %v14036_v14 = vld [vmem:[#allocation7 + $0x9cc] sm:$0xf]  ;;  %v9383_v45 = vor.u32 %v13724_v7, %v9380_v23 }
 0x35f   :  { %v10628_v16 = vld [vmem:[#allocation7 + $0x9e8] sm:$0xf0]  ;;  %7635 = vmatpush.bf16.msra.mxu3 %v9927_v11 }
 0x360   :  { %v13788_v35 = vld [vmem:[#allocation7 + $0x20c] sm:$0xf]  ;;  %v10631_v8 = vor.u32 %v14036_v14, %v10628_v16  ;;  %7610 = vmatpush.bf16.msra.mxu1 %v9383_v45 }
 0x361   :  { %v9636_v18 = vld [vmem:[#allocation7 + $0x228] sm:$0xf0]  ;;  %7648 = vmatpush.bf16.msrb.mxu0 %v10183_v19 }
 0x362   :  { %v13852_v39 = vld [vmem:[#allocation7 + $0x40c] sm:$0xf]  ;;  %v9639_v54 = vor.u32 %v13788_v35, %v9636_v18 }
 0x363   :  { %v9892_v13 = vld [vmem:[#allocation7 + $0x428] sm:$0xf0]  ;;  %7611 = vmatmul.bf16.vlgmr.msra.gmra.mxu1 %v15506_v21 }
 0x364   :  { %v13916_v53 = vld [vmem:[#allocation7 + $0x60c] sm:$0xf]  ;;  %v9895_v47 = vor.u32 %v13852_v39, %v9892_v13  ;;  %7655 = vmatpush.bf16.msrb.mxu1 %v10631_v8  ;;  %7623 = vmatpush.bf16.msra.mxu2 %v9639_v54  ;;  %v7404_v39 = vpop.f32.mrf.mxu1 }
 0x365   :  { %v10148_v12 = vld [vmem:[#allocation7 + $0x628] sm:$0xf0] }
 0x366   :  { %v14100_v15 = vld [vmem:[#allocation7 + $0xbcc] sm:$0xf]  ;;  %v10151_v60 = vor.u32 %v13916_v53, %v10148_v12  ;;  %7636 = vmatpush.bf16.msra.mxu3 %v9895_v47 }
 0x367   :  { %v10884_v42 = vld [vmem:[#allocation7 + $0xbe8] sm:$0xf0]  ;;  %7624 = vmatmul.bf16.vlgmr.msra.gmra.mxu2 %v15508_v29 }
 0x368   :  { %v14164_v46 = vld [vmem:[#allocation7 + $0xdcc] sm:$0xf]  ;;  %v10887_v3 = vor.u32 %v14100_v15, %v10884_v42  ;;  %7649 = vmatpush.bf16.msrb.mxu0 %v10151_v60  ;;  %v14825_v42 = vld [vmem:[#allocation8] sm:$0xff] }
 0x369   :  { %v11140_v50 = vld [vmem:[#allocation7 + $0xde8] sm:$0xf0]  ;;  %7637 = vmatmul.bf16.vlgmr.msra.gmra.mxu3 %v15510_v36 }
 0x36a   :  { %v14228_v55 = vld [vmem:[#allocation7 + $0xfcc] sm:$0xf]  ;;  %v11143_v0 = vor.u32 %v14164_v46, %v11140_v50  ;;  %7668 = vmatpush.bf16.msrb.mxu2 %v10887_v3  ;;  %v1845_v46 = vperm.slane %v14825_v42, 2  ;;  %v7443_v50 = vpop.f32.mrf.mxu0 }
 0x36b   :  { %v11396_v58 = vld [vmem:[#allocation7 + $0xfe8] sm:$0xf0]  ;;  %7650 = vmatmul.bf16.vlgmr.msrb.gmra.mxu0 %v15512_v38 }
 0x36c   :  { %v14028_v63 = vld [vmem:[#allocation7 + $0x98c] sm:$0xf]  ;;  %v11399_v43 = vor.u32 %v14228_v55, %v11396_v58  ;;  %7681 = vmatpush.bf16.msrb.mxu3 %v11143_v0 }
 0x36d   :  { %v10596_v41 = vld [vmem:[#allocation7 + $0x9a8] sm:$0xf0] }
 0x36e   :  { %v14092_v5 = vld [vmem:[#allocation7 + $0xb8c] sm:$0xf]  ;;  %v10599_v52 = vor.u32 %v14028_v63, %v10596_v41  ;;  %7694 = vmatpush.bf16.msra.mxu0 %v11399_v43 }
 0x36f   :  { %v10852_v6 = vld [vmem:[#allocation7 + $0xba8] sm:$0xf0] }
 0x370   :  { %v14156_v48 = vld [vmem:[#allocation7 + $0xd8c] sm:$0xf]  ;;  %v10855_v51 = vor.u32 %v14092_v5, %v10852_v6  ;;  %7656 = vmatpush.bf16.msrb.mxu1 %v10599_v52  ;;  %v7405_v5 = vadd.f32 %v7404_v39, %v1845_v46  ;;  %v7406_v52 = vpop.f32.mrf.mxu1 }
 0x371   :  { %v11108_v24 = vld [vmem:[#allocation7 + $0xda8] sm:$0xf0] }
 0x372   :  { %v14220_v25 = vld [vmem:[#allocation7 + $0xf8c] sm:$0xf]  ;;  %v11111_v2 = vor.u32 %v14156_v48, %v11108_v24  ;;  %7669 = vmatpush.bf16.msrb.mxu2 %v10855_v51  ;;  %v7417_v51 = vpop.f32.mrf.mxu2 }
 0x373   :  { %v11364_v56 = vld [vmem:[#allocation7 + $0xfa8] sm:$0xf0] }
 0x374   :  { %v14020_v1 = vld [vmem:[#allocation7 + $0x94c] sm:$0xf]  ;;  %v11367_v27 = vor.u32 %v14220_v25, %v11364_v56  ;;  %7682 = vmatpush.bf16.msrb.mxu3 %v11111_v2 }
 0x375   :  { %v10564_v59 = vld [vmem:[#allocation7 + $0x968] sm:$0xf0] }
 0x376   :  { %v14084_v7 = vld [vmem:[#allocation7 + $0xb4c] sm:$0xf]  ;;  %v10567_v10 = vor.u32 %v14020_v1, %v10564_v59  ;;  %7695 = vmatpush.bf16.msra.mxu0 %v11367_v27  ;;  %v7418_v27 = vadd.f32 %v7417_v51, %v7405_v5 }
 0x377   :  { %v10820_v4 = vld [vmem:[#allocation7 + $0xb68] sm:$0xf0] }
 0x378   :  { %v14148_v23 = vld [vmem:[#allocation7 + $0xd4c] sm:$0xf]  ;;  %v10823_v35 = vor.u32 %v14084_v7, %v10820_v4  ;;  %7657 = vmatpush.bf16.msrb.mxu1 %v10567_v10  ;;  %v7430_v7 = vpop.f32.mrf.mxu3  ;;  %v7445_v10 = vpop.f32.mrf.mxu0 }
 0x379   :  { %v11076_v14 = vld [vmem:[#allocation7 + $0xd68] sm:$0xf0] }
 0x37a   :  { %v14212_v16 = vld [vmem:[#allocation7 + $0xf4c] sm:$0xf]  ;;  %v11079_v19 = vor.u32 %v14148_v23, %v11076_v14  ;;  %7670 = vmatpush.bf16.msrb.mxu2 %v10823_v35 }
 0x37b   :  { %v11332_v17 = vld [vmem:[#allocation7 + $0xf68] sm:$0xf0] }
 0x37c   :  { %v14012_v18 = vld [vmem:[#allocation7 + $0x90c] sm:$0xf]  ;;  %v11335_v20 = vor.u32 %v14212_v16, %v11332_v17  ;;  %7683 = vmatpush.bf16.msrb.mxu3 %v11079_v19  ;;  %v7431_v17 = vadd.f32 %v7430_v7, %v7418_v27 }
 0x37d   :  { %v10532_v11 = vld [vmem:[#allocation7 + $0x928] sm:$0xf0] }
 0x37e   :  { %v14076_v13 = vld [vmem:[#allocation7 + $0xb0c] sm:$0xf]  ;;  %v10535_v45 = vor.u32 %v14012_v18, %v10532_v11  ;;  %7696 = vmatpush.bf16.msra.mxu0 %v11335_v20 }
 0x37f   :  { %v10788_v53 = vld [vmem:[#allocation7 + $0xb28] sm:$0xf0] }
 0x380   :  { %v14140_v26 = vld [vmem:[#allocation7 + $0xd0c] sm:$0xf]  ;;  %v10791_v31 = vor.u32 %v14076_v13, %v10788_v53  ;;  %7658 = vmatpush.bf16.msrb.mxu1 %v10535_v45 }
 0x381   :  { %v11044_v40 = vld [vmem:[#allocation7 + $0xd28] sm:$0xf0] }
 0x382   :  { %v14204_v12 = vld [vmem:[#allocation7 + $0xf0c] sm:$0xf]  ;;  %v11047_v55 = vor.u32 %v14140_v26, %v11044_v40  ;;  %7671 = vmatpush.bf16.msrb.mxu2 %v10791_v31 }
 0x383   :  { %v11300_v15 = vld [vmem:[#allocation7 + $0xf28] sm:$0xf0] }
 0x384   :  { %v14004_v8 = vld [vmem:[#allocation7 + $0x8cc] sm:$0xf]  ;;  %v11303_v58 = vor.u32 %v14204_v12, %v11300_v15  ;;  %7684 = vmatpush.bf16.msrb.mxu3 %v11047_v55  ;;  %v15615_v15 = vadd.f32 %v7443_v50, %v7431_v17 }
 0x385   :  { %v10500_v54 = vld [vmem:[#allocation7 + $0x8e8] sm:$0xf0] }
 0x386   :  { %v14068_v47 = vld [vmem:[#allocation7 + $0xacc] sm:$0xf]  ;;  %v10503_v43 = vor.u32 %v14004_v8, %v10500_v54  ;;  %7697 = vmatpush.bf16.msra.mxu0 %v11303_v58 }
 0x387   :  { %v10756_v60 = vld [vmem:[#allocation7 + $0xae8] sm:$0xf0] }
 0x388   :  { %v14132_v3 = vld [vmem:[#allocation7 + $0xccc] sm:$0xf]  ;;  %v10759_v6 = vor.u32 %v14068_v47, %v10756_v60  ;;  %7659 = vmatpush.bf16.msrb.mxu1 %v10503_v43  ;;  %v7419_v47 = vpop.f32.mrf.mxu2 }
 0x389   :  { %v11012_v63 = vld [vmem:[#allocation7 + $0xce8] sm:$0xf0] }
 0x38a   :  { %v14196_v41 = vld [vmem:[#allocation7 + $0xecc] sm:$0xf]  ;;  %v11015_v25 = vor.u32 %v14132_v3, %v11012_v63  ;;  %7672 = vmatpush.bf16.msrb.mxu2 %v10759_v6 }
 0x38b   :  { %v11268_v0 = vld [vmem:[#allocation7 + $0xee8] sm:$0xf0] }
 0x38c   :  { %v13996_v48 = vld [vmem:[#allocation7 + $0x88c] sm:$0xf]  ;;  %v11271_v56 = vor.u32 %v14196_v41, %v11268_v0  ;;  %7685 = vmatpush.bf16.msrb.mxu3 %v11015_v25  ;;  %v7432_v41 = vpop.f32.mrf.mxu3 }
 0x38d   :  { %v10468_v24 = vld [vmem:[#allocation7 + $0x8a8] sm:$0xf0] }
 0x38e   :  { %v14060_v1 = vld [vmem:[#allocation7 + $0xa8c] sm:$0xf]  ;;  %v10471_v16 = vor.u32 %v13996_v48, %v10468_v24  ;;  %7698 = vmatpush.bf16.msra.mxu0 %v11271_v56 }
 0x38f   :  { %v10724_v59 = vld [vmem:[#allocation7 + $0xaa8] sm:$0xf0] }
 0x390   :  { %v14124_v2 = vld [vmem:[#allocation7 + $0xc8c] sm:$0xf]  ;;  %v10727_v35 = vor.u32 %v14060_v1, %v10724_v59  ;;  %7660 = vmatpush.bf16.msrb.mxu1 %v10471_v16 }
 0x391   :  { %v10980_v4 = vld [vmem:[#allocation7 + $0xca8] sm:$0xf0] }
 0x392   :  { %v14188_v23 = vld [vmem:[#allocation7 + $0xe8c] sm:$0xf]  ;;  %v10983_v19 = vor.u32 %v14124_v2, %v10980_v4  ;;  %7673 = vmatpush.bf16.msrb.mxu2 %v10727_v35 }
 0x393   :  { %v11236_v14 = vld [vmem:[#allocation7 + $0xea8] sm:$0xf0] }
 0x394   :  { %v13988_v18 = vld [vmem:[#allocation7 + $0x84c] sm:$0xf]  ;;  %v11239_v20 = vor.u32 %v14188_v23, %v11236_v14  ;;  %7686 = vmatpush.bf16.msrb.mxu3 %v10983_v19 }
 0x395   :  { %v10436_v11 = vld [vmem:[#allocation7 + $0x868] sm:$0xf0] }
 0x396   :  { %v14052_v39 = vld [vmem:[#allocation7 + $0xa4c] sm:$0xf]  ;;  %v10439_v45 = vor.u32 %v13988_v18, %v10436_v11  ;;  %7699 = vmatpush.bf16.msra.mxu0 %v11239_v20 }
 0x397   :  { %v10692_v13 = vld [vmem:[#allocation7 + $0xa68] sm:$0xf0] }
 0x398   :  { %v14116_v53 = vld [vmem:[#allocation7 + $0xc4c] sm:$0xf]  ;;  %v10695_v46 = vor.u32 %v14052_v39, %v10692_v13  ;;  %7661 = vmatpush.bf16.msrb.mxu1 %v10439_v45 }
 0x399   :  { %v10948_v26 = vld [vmem:[#allocation7 + $0xc68] sm:$0xf0] }
 0x39a   :  { %v14180_v40 = vld [vmem:[#allocation7 + $0xe4c] sm:$0xf]  ;;  %v10951_v55 = vor.u32 %v14116_v53, %v10948_v26  ;;  %7674 = vmatpush.bf16.msrb.mxu2 %v10695_v46 }
 0x39b   :  { %v11204_v12 = vld [vmem:[#allocation7 + $0xe68] sm:$0xf0] }
 0x39c   :  { %v13980_v42 = vld [vmem:[#allocation7 + $0x80c] sm:$0xf]  ;;  %v11207_v58 = vor.u32 %v14180_v40, %v11204_v12  ;;  %7687 = vmatpush.bf16.msrb.mxu3 %v10951_v55 }
 0x39d   :  { %v10404_v31 = vld [vmem:[#allocation7 + $0x828] sm:$0xf0] }
 0x39e   :  { %v14292_v8 = vld [vmem:[#allocation7 + $0x11cc] sm:$0xf]  ;;  %v10407_v5 = vor.u32 %v13980_v42, %v10404_v31  ;;  %7700 = vmatpush.bf16.msra.mxu0 %v11207_v58 }
 0x39f   :  { %v11652_v54 = vld [vmem:[#allocation7 + $0x11e8] sm:$0xf0] }
 0x3a0   :  { %v14044_v60 = vld [vmem:[#allocation7 + $0xa0c] sm:$0xf]  ;;  %v11655_v25 = vor.u32 %v14292_v8, %v11652_v54  ;;  %7662 = vmatpush.bf16.msrb.mxu1 %v10407_v5 }
 0x3a1   :  { %v10660_v3 = vld [vmem:[#allocation7 + $0xa28] sm:$0xf0] }
 0x3a2   :  { %v14108_v63 = vld [vmem:[#allocation7 + $0xc0c] sm:$0xf]  ;;  %v10663_v56 = vor.u32 %v14044_v60, %v10660_v3  ;;  %v7456_v3 = vpop.f32.mrf.mxu1 }
 0x3a3   :  { %v10916_v0 = vld [vmem:[#allocation7 + $0xc28] sm:$0xf0]  ;;  %7663 = vmatmul.bf16.vlgmr.msrb.gmra.mxu1 %v15519_v44 }
 0x3a4   :  { %v14172_v50 = vld [vmem:[#allocation7 + $0xe0c] sm:$0xf]  ;;  %v10919_v59 = vor.u32 %v14108_v63, %v10916_v0  ;;  %7707 = vmatpush.bf16.msra.mxu1 %v11655_v25  ;;  %7675 = vmatpush.bf16.msrb.mxu2 %v10663_v56 }
 0x3a5   :  { %v11172_v43 = vld [vmem:[#allocation7 + $0xe28] sm:$0xf0] }
 0x3a6   :  { %v14356_v6 = vld [vmem:[#allocation7 + $0x13cc] sm:$0xf]  ;;  %v11175_v2 = vor.u32 %v14172_v50, %v11172_v43  ;;  %7688 = vmatpush.bf16.msrb.mxu3 %v10919_v59  ;;  %v7457_v50 = vadd.f32 %v7456_v3, %v15615_v15 }
 0x3a7   :  { %v11908_v48 = vld [vmem:[#allocation7 + $0x13e8] sm:$0xf0]  ;;  %7676 = vmatmul.bf16.vlgmr.msrb.gmra.mxu2 %v15521_v34 }
 0x3a8   :  { %v14420_v24 = vld [vmem:[#allocation7 + $0x15cc] sm:$0xf]  ;;  %v11911_v27 = vor.u32 %v14356_v6, %v11908_v48  ;;  %7701 = vmatpush.bf16.msra.mxu0 %v11175_v2 }
 0x3a9   :  { %v12164_v52 = vld [vmem:[#allocation7 + $0x15e8] sm:$0xf0]  ;;  %7689 = vmatmul.bf16.vlgmr.msrb.gmra.mxu3 %v15523_v28 }
 0x3aa   :  { %v14484_v51 = vld [vmem:[#allocation7 + $0x17cc] sm:$0xf]  ;;  %v12167_v23 = vor.u32 %v14420_v24, %v12164_v52  ;;  %7720 = vmatpush.bf16.msra.mxu2 %v11911_v27  ;;  %v7495_v24 = vpop.f32.mrf.mxu0 }
 0x3ab   :  { %v12420_v1 = vld [vmem:[#allocation7 + $0x17e8] sm:$0xf0]  ;;  %7702 = vmatmul.bf16.vlgmr.msra.gmra.mxu0 %v15525_v49 }
 0x3ac   :  { %v14284_v7 = vld [vmem:[#allocation7 + $0x118c] sm:$0xf]  ;;  %v12423_v14 = vor.u32 %v14484_v51, %v12420_v1  ;;  %7733 = vmatpush.bf16.msra.mxu3 %v12167_v23 }
 0x3ad   :  { %v11620_v4 = vld [vmem:[#allocation7 + $0x11a8] sm:$0xf0] }
 0x3ae   :  { %v14348_v16 = vld [vmem:[#allocation7 + $0x138c] sm:$0xf]  ;;  %v11623_v19 = vor.u32 %v14284_v7, %v11620_v4  ;;  %7746 = vmatpush.bf16.msrb.mxu0 %v12423_v14 }
 0x3af   :  { %v11876_v17 = vld [vmem:[#allocation7 + $0x13a8] sm:$0xf0] }
 0x3b0   :  { %v14412_v10 = vld [vmem:[#allocation7 + $0x158c] sm:$0xf]  ;;  %v11879_v20 = vor.u32 %v14348_v16, %v11876_v17  ;;  %7708 = vmatpush.bf16.msra.mxu1 %v11623_v19 }
 0x3b1   :  { %v12132_v35 = vld [vmem:[#allocation7 + $0x15a8] sm:$0xf0] }
 0x3b2   :  { %v14476_v18 = vld [vmem:[#allocation7 + $0x178c] sm:$0xf]  ;;  %v12135_v53 = vor.u32 %v14412_v10, %v12132_v35  ;;  %7721 = vmatpush.bf16.msra.mxu2 %v11879_v20 }
 0x3b3   :  { %v12388_v11 = vld [vmem:[#allocation7 + $0x17a8] sm:$0xf0] }
 0x3b4   :  { %v14276_v39 = vld [vmem:[#allocation7 + $0x114c] sm:$0xf]  ;;  %v12391_v26 = vor.u32 %v14476_v18, %v12388_v11  ;;  %7734 = vmatpush.bf16.msra.mxu3 %v12135_v53  ;;  %v7458_v18 = vpop.f32.mrf.mxu1  ;;  %v7469_v11 = vpop.f32.mrf.mxu2 }
 0x3b5   :  { %v11588_v13 = vld [vmem:[#allocation7 + $0x1168] sm:$0xf0]  ;;  %v7482_v53 = vpop.f32.mrf.mxu3 }
 0x3b6   :  { %v14340_v40 = vld [vmem:[#allocation7 + $0x134c] sm:$0xf]  ;;  %v11591_v8 = vor.u32 %v14276_v39, %v11588_v13  ;;  %7747 = vmatpush.bf16.msrb.mxu0 %v12391_v26  ;;  %v7470_v13 = vadd.f32 %v7469_v11, %v7457_v50 }
 0x3b7   :  { %v11844_v12 = vld [vmem:[#allocation7 + $0x1368] sm:$0xf0] }
 0x3b8   :  { %v14404_v45 = vld [vmem:[#allocation7 + $0x154c] sm:$0xf]  ;;  %v11847_v54 = vor.u32 %v14340_v40, %v11844_v12  ;;  %7709 = vmatpush.bf16.msra.mxu1 %v11591_v8 }
 0x3b9   :  { %v12100_v42 = vld [vmem:[#allocation7 + $0x1568] sm:$0xf0] }
 0x3ba   :  { %v14468_v46 = vld [vmem:[#allocation7 + $0x174c] sm:$0xf]  ;;  %v12103_v47 = vor.u32 %v14404_v45, %v12100_v42  ;;  %7722 = vmatpush.bf16.msra.mxu2 %v11847_v54  ;;  %v7483_v42 = vadd.f32 %v7482_v53, %v7470_v13 }
 0x3bb   :  { %v12356_v31 = vld [vmem:[#allocation7 + $0x1768] sm:$0xf0] }
 0x3bc   :  { %v14268_v55 = vld [vmem:[#allocation7 + $0x110c] sm:$0xf]  ;;  %v12359_v60 = vor.u32 %v14468_v46, %v12356_v31  ;;  %7735 = vmatpush.bf16.msra.mxu3 %v12103_v47  ;;  %v7497_v46 = vpop.f32.mrf.mxu0  ;;  %v15622_v50 = vadd.f32 %v7495_v24, %v7483_v42 }
 0x3bd   :  { %v11556_v58 = vld [vmem:[#allocation7 + $0x1128] sm:$0xf0] }
 0x3be   :  { %v14332_v63 = vld [vmem:[#allocation7 + $0x130c] sm:$0xf]  ;;  %v11559_v48 = vor.u32 %v14268_v55, %v11556_v58  ;;  %7748 = vmatpush.bf16.msrb.mxu0 %v12359_v60 }
 0x3bf   :  { %v11812_v41 = vld [vmem:[#allocation7 + $0x1328] sm:$0xf0] }
 0x3c0   :  { %v14396_v0 = vld [vmem:[#allocation7 + $0x150c] sm:$0xf]  ;;  %v11815_v25 = vor.u32 %v14332_v63, %v11812_v41  ;;  %7710 = vmatpush.bf16.msra.mxu1 %v11559_v48 }
 0x3c1   :  { %v12068_v43 = vld [vmem:[#allocation7 + $0x1528] sm:$0xf0] }
 0x3c2   :  { %v14460_v5 = vld [vmem:[#allocation7 + $0x170c] sm:$0xf]  ;;  %v12071_v51 = vor.u32 %v14396_v0, %v12068_v43  ;;  %7723 = vmatpush.bf16.msra.mxu2 %v11815_v25 }
 0x3c3   :  { %v12324_v6 = vld [vmem:[#allocation7 + $0x1728] sm:$0xf0] }
 0x3c4   :  { %v14260_v56 = vld [vmem:[#allocation7 + $0x10cc] sm:$0xf]  ;;  %v12327_v1 = vor.u32 %v14460_v5, %v12324_v6  ;;  %7736 = vmatpush.bf16.msra.mxu3 %v12071_v51 }
 0x3c5   :  { %v11524_v52 = vld [vmem:[#allocation7 + $0x10e8] sm:$0xf0] }
 0x3c6   :  { %v14324_v59 = vld [vmem:[#allocation7 + $0x12cc] sm:$0xf]  ;;  %v11527_v23 = vor.u32 %v14260_v56, %v11524_v52  ;;  %7749 = vmatpush.bf16.msrb.mxu0 %v12327_v1  ;;  %v7471_v1 = vpop.f32.mrf.mxu2 }
 0x3c7   :  { %v11780_v2 = vld [vmem:[#allocation7 + $0x12e8] sm:$0xf0] }
 0x3c8   :  { %v14388_v27 = vld [vmem:[#allocation7 + $0x14cc] sm:$0xf]  ;;  %v11783_v14 = vor.u32 %v14324_v59, %v11780_v2  ;;  %7711 = vmatpush.bf16.msra.mxu1 %v11527_v23 }
 0x3c9   :  { %v12036_v7 = vld [vmem:[#allocation7 + $0x14e8] sm:$0xf0] }
 0x3ca   :  { %v14452_v4 = vld [vmem:[#allocation7 + $0x16cc] sm:$0xf]  ;;  %v12039_v10 = vor.u32 %v14388_v27, %v12036_v7  ;;  %7724 = vmatpush.bf16.msra.mxu2 %v11783_v14  ;;  %v7484_v7 = vpop.f32.mrf.mxu3 }
 0x3cb   :  { %v12292_v15 = vld [vmem:[#allocation7 + $0x16e8] sm:$0xf0] }
 0x3cc   :  { %v14252_v16 = vld [vmem:[#allocation7 + $0x108c] sm:$0xf]  ;;  %v12295_v35 = vor.u32 %v14452_v4, %v12292_v15  ;;  %7737 = vmatpush.bf16.msra.mxu3 %v12039_v10 }
 0x3cd   :  { %v11492_v17 = vld [vmem:[#allocation7 + $0x10a8] sm:$0xf0] }
 0x3ce   :  { %v14316_v19 = vld [vmem:[#allocation7 + $0x128c] sm:$0xf]  ;;  %v11495_v45 = vor.u32 %v14252_v16, %v11492_v17  ;;  %7750 = vmatpush.bf16.msrb.mxu0 %v12295_v35 }
 0x3cf   :  { %v11748_v20 = vld [vmem:[#allocation7 + $0x12a8] sm:$0xf0] }
 0x3d0   :  { %v14380_v39 = vld [vmem:[#allocation7 + $0x148c] sm:$0xf]  ;;  %v11751_v31 = vor.u32 %v14316_v19, %v11748_v20  ;;  %7712 = vmatpush.bf16.msra.mxu1 %v11495_v45 }
 0x3d1   :  { %v12004_v26 = vld [vmem:[#allocation7 + $0x14a8] sm:$0xf0] }
 0x3d2   :  { %v14444_v40 = vld [vmem:[#allocation7 + $0x168c] sm:$0xf]  ;;  %v12007_v55 = vor.u32 %v14380_v39, %v12004_v26  ;;  %7725 = vmatpush.bf16.msra.mxu2 %v11751_v31 }
 0x3d3   :  { %v12260_v12 = vld [vmem:[#allocation7 + $0x16a8] sm:$0xf0] }
 0x3d4   :  { %v14244_v8 = vld [vmem:[#allocation7 + $0x104c] sm:$0xf]  ;;  %v12263_v58 = vor.u32 %v14444_v40, %v12260_v12  ;;  %7738 = vmatpush.bf16.msra.mxu3 %v12007_v55 }
 0x3d5   :  { %v11460_v54 = vld [vmem:[#allocation7 + $0x1068] sm:$0xf0] }
 0x3d6   :  { %v14308_v47 = vld [vmem:[#allocation7 + $0x124c] sm:$0xf]  ;;  %v11463_v43 = vor.u32 %v14244_v8, %v11460_v54  ;;  %7751 = vmatpush.bf16.msrb.mxu0 %v12263_v58 }
 0x3d7   :  { %v11716_v60 = vld [vmem:[#allocation7 + $0x1268] sm:$0xf0] }
 0x3d8   :  { %v14372_v3 = vld [vmem:[#allocation7 + $0x144c] sm:$0xf]  ;;  %v11719_v6 = vor.u32 %v14308_v47, %v11716_v60  ;;  %7713 = vmatpush.bf16.msra.mxu1 %v11463_v43 }
 0x3d9   :  { %v11972_v63 = vld [vmem:[#allocation7 + $0x1468] sm:$0xf0] }
 0x3da   :  { %v14436_v41 = vld [vmem:[#allocation7 + $0x164c] sm:$0xf]  ;;  %v11975_v52 = vor.u32 %v14372_v3, %v11972_v63  ;;  %7726 = vmatpush.bf16.msra.mxu2 %v11719_v6 }
 0x3db   :  { %v12228_v0 = vld [vmem:[#allocation7 + $0x1668] sm:$0xf0] }
 0x3dc   :  { %v14236_v5 = vld [vmem:[#allocation7 + $0x100c] sm:$0xf]  ;;  %v12231_v51 = vor.u32 %v14436_v41, %v12228_v0  ;;  %7739 = vmatpush.bf16.msra.mxu3 %v11975_v52 }
 0x3dd   :  { %v11428_v48 = vld [vmem:[#allocation7 + $0x1028] sm:$0xf0] }
 0x3de   :  { %v14548_v25 = vld [vmem:[#allocation7 + $0x19cc] sm:$0xf]  ;;  %v11431_v23 = vor.u32 %v14236_v5, %v11428_v48  ;;  %7752 = vmatpush.bf16.msrb.mxu0 %v12231_v51 }
 0x3df   :  { %v12676_v56 = vld [vmem:[#allocation7 + $0x19e8] sm:$0xf0] }
 0x3e0   :  { %v14300_v59 = vld [vmem:[#allocation7 + $0x120c] sm:$0xf]  ;;  %v12679_v10 = vor.u32 %v14548_v25, %v12676_v56  ;;  %7714 = vmatpush.bf16.msra.mxu1 %v11431_v23 }
 0x3e1   :  { %v11684_v2 = vld [vmem:[#allocation7 + $0x1228] sm:$0xf0] }
 0x3e2   :  { %v14364_v27 = vld [vmem:[#allocation7 + $0x140c] sm:$0xf]  ;;  %v11687_v35 = vor.u32 %v14300_v59, %v11684_v2  ;;  %v7508_v2 = vpop.f32.mrf.mxu1 }
 0x3e3   :  { %v11940_v4 = vld [vmem:[#allocation7 + $0x1428] sm:$0xf0]  ;;  %7715 = vmatmul.bf16.vlgmr.msra.gmra.mxu1 %v15532_v57 }
 0x3e4   :  { %v14428_v24 = vld [vmem:[#allocation7 + $0x160c] sm:$0xf]  ;;  %v11943_v20 = vor.u32 %v14364_v27, %v11940_v4  ;;  %7759 = vmatpush.bf16.msrb.mxu1 %v12679_v10  ;;  %7727 = vmatpush.bf16.msra.mxu2 %v11687_v35 }
 0x3e5   :  { %v12196_v15 = vld [vmem:[#allocation7 + $0x1628] sm:$0xf0] }
 0x3e6   :  { %v14612_v14 = vld [vmem:[#allocation7 + $0x1bcc] sm:$0xf]  ;;  %v12199_v39 = vor.u32 %v14428_v24, %v12196_v15  ;;  %7740 = vmatpush.bf16.msra.mxu3 %v11943_v20  ;;  %v7509_v24 = vadd.f32 %v7508_v2, %v15622_v50 }
 0x3e7   :  { %v12932_v16 = vld [vmem:[#allocation7 + $0x1be8] sm:$0xf0]  ;;  %7728 = vmatmul.bf16.vlgmr.msra.gmra.mxu2 %v15534_v62 }
 0x3e8   :  { %v14676_v17 = vld [vmem:[#allocation7 + $0x1dcc] sm:$0xf]  ;;  %v12935_v13 = vor.u32 %v14612_v14, %v12932_v16  ;;  %7753 = vmatpush.bf16.msrb.mxu0 %v12199_v39 }
 0x3e9   :  { %v13188_v18 = vld [vmem:[#allocation7 + $0x1de8] sm:$0xf0]  ;;  %7741 = vmatmul.bf16.vlgmr.msra.gmra.mxu3 %v15536_v37 }
 0x3ea   :  { %v14740_v11 = vld [vmem:[#allocation7 + $0x1fcc] sm:$0xf]  ;;  %v13191_v40 = vor.u32 %v14676_v17, %v13188_v18  ;;  %7772 = vmatpush.bf16.msrb.mxu2 %v12935_v13  ;;  %v7547_v17 = vpop.f32.mrf.mxu0 }
 0x3eb   :  { %v13444_v19 = vld [vmem:[#allocation7 + $0x1fe8] sm:$0xf0]  ;;  %7754 = vmatmul.bf16.vlgmr.msrb.gmra.mxu0 %v15538_v30 }
 0x3ec   :  { %v14540_v53 = vld [vmem:[#allocation7 + $0x198c] sm:$0xf]  ;;  %v13447_v12 = vor.u32 %v14740_v11, %v13444_v19  ;;  %7785 = vmatpush.bf16.msrb.mxu3 %v13191_v40 }
 0x3ed   :  { %v12644_v26 = vld [vmem:[#allocation7 + $0x19a8] sm:$0xf0] }
 0x3ee   :  { %v14604_v45 = vld [vmem:[#allocation7 + $0x1b8c] sm:$0xf]  ;;  %v12647_v55 = vor.u32 %v14540_v53, %v12644_v26  ;;  %7798 = vmatpush.bf16.msra.mxu0 %v13447_v12 }
 0x3ef   :  { %v12900_v42 = vld [vmem:[#allocation7 + $0x1ba8] sm:$0xf0] }
 0x3f0   :  { %v14668_v46 = vld [vmem:[#allocation7 + $0x1d8c] sm:$0xf]  ;;  %v12903_v58 = vor.u32 %v14604_v45, %v12900_v42  ;;  %7760 = vmatpush.bf16.msrb.mxu1 %v12647_v55 }
 0x3f1   :  { %v13156_v31 = vld [vmem:[#allocation7 + $0x1da8] sm:$0xf0] }
 0x3f2   :  { %v14732_v8 = vld [vmem:[#allocation7 + $0x1f8c] sm:$0xf]  ;;  %v13159_v3 = vor.u32 %v14668_v46, %v13156_v31  ;;  %7773 = vmatpush.bf16.msrb.mxu2 %v12903_v58 }
 0x3f3   :  { %v13412_v54 = vld [vmem:[#allocation7 + $0x1fa8] sm:$0xf0] }
 0x3f4   :  { %v14532_v47 = vld [vmem:[#allocation7 + $0x194c] sm:$0xf]  ;;  %v13415_v63 = vor.u32 %v14732_v8, %v13412_v54  ;;  %7786 = vmatpush.bf16.msrb.mxu3 %v13159_v3  ;;  %v7510_v8 = vpop.f32.mrf.mxu1  ;;  %v7521_v54 = vpop.f32.mrf.mxu2 }
 0x3f5   :  { %v12612_v60 = vld [vmem:[#allocation7 + $0x1968] sm:$0xf0]  ;;  %v7534_v3 = vpop.f32.mrf.mxu3  ;;  %v13913_v8 = vld [vmem:[#allocation7 + $0x5ec] sm:$0xf0] }
 0x3f6   :  { %v14596_v41 = vld [vmem:[#allocation7 + $0x1b4c] sm:$0xf]  ;;  %v12615_v25 = vor.u32 %v14532_v47, %v12612_v60  ;;  %7799 = vmatpush.bf16.msra.mxu0 %v13415_v63  ;;  %v7522_v60 = vadd.f32 %v7521_v54, %v7509_v24  ;;  %v10378_v54 = vld [vmem:[#allocation7 + $0x7d0] sm:$0xf] }
 0x3f7   :  { %v12868_v0 = vld [vmem:[#allocation7 + $0x1b68] sm:$0xf0] }
 0x3f8   :  { %v14660_v43 = vld [vmem:[#allocation7 + $0x1d4c] sm:$0xf]  ;;  %v12871_v56 = vor.u32 %v14596_v41, %v12868_v0  ;;  %7761 = vmatpush.bf16.msrb.mxu1 %v12615_v25 }
 0x3f9   :  { %v13124_v5 = vld [vmem:[#allocation7 + $0x1d68] sm:$0xf0] }
 0x3fa   :  { %v14724_v6 = vld [vmem:[#allocation7 + $0x1f4c] sm:$0xf]  ;;  %v13127_v1 = vor.u32 %v14660_v43, %v13124_v5  ;;  %7774 = vmatpush.bf16.msrb.mxu2 %v12871_v56  ;;  %v7535_v5 = vadd.f32 %v7534_v3, %v7522_v60  ;;  %v9578_v3 = vld [vmem:[#allocation7 + $0x190] sm:$0xf] }
 0x3fb   :  { %v13380_v48 = vld [vmem:[#allocation7 + $0x1f68] sm:$0xf0] }
 0x3fc   :  { %v14524_v52 = vld [vmem:[#allocation7 + $0x190c] sm:$0xf]  ;;  %v13383_v59 = vor.u32 %v14724_v6, %v13380_v48  ;;  %7787 = vmatpush.bf16.msrb.mxu3 %v13127_v1  ;;  %v7549_v6 = vpop.f32.mrf.mxu0  ;;  %v15629_v24 = vadd.f32 %v7547_v17, %v7535_v5  ;;  %v13841_v5 = vld [vmem:[#allocation7 + $0x3ac] sm:$0xf0] }
 0x3fd   :  { %v12580_v51 = vld [vmem:[#allocation7 + $0x1928] sm:$0xf0]  ;;  %v10090_v6 = vld [vmem:[#allocation7 + $0x590] sm:$0xf] }
 0x3fe   :  { %v14588_v27 = vld [vmem:[#allocation7 + $0x1b0c] sm:$0xf]  ;;  %v12583_v16 = vor.u32 %v14524_v52, %v12580_v51  ;;  %7800 = vmatpush.bf16.msra.mxu0 %v13383_v59 }
 0x3ff   :  { %v12836_v7 = vld [vmem:[#allocation7 + $0x1b28] sm:$0xf0] }
 0x400   :  { %v14652_v4 = vld [vmem:[#allocation7 + $0x1d0c] sm:$0xf]  ;;  %v12839_v10 = vor.u32 %v14588_v27, %v12836_v7  ;;  %7762 = vmatpush.bf16.msrb.mxu1 %v12583_v16 }
 0x401   :  { %v13092_v15 = vld [vmem:[#allocation7 + $0x1d28] sm:$0xf0] }
 0x402   :  { %v14716_v23 = vld [vmem:[#allocation7 + $0x1f0c] sm:$0xf]  ;;  %v13095_v11 = vor.u32 %v14652_v4, %v13092_v15  ;;  %7775 = vmatpush.bf16.msrb.mxu2 %v12839_v10  ;;  %v9610_v10 = vld [vmem:[#allocation7 + $0x1d0] sm:$0xf] }
 0x403   :  { %v13348_v14 = vld [vmem:[#allocation7 + $0x1f28] sm:$0xf0] }
 0x404   :  { %v14516_v35 = vld [vmem:[#allocation7 + $0x18cc] sm:$0xf]  ;;  %v13351_v19 = vor.u32 %v14716_v23, %v13348_v14  ;;  %7788 = vmatpush.bf16.msrb.mxu3 %v13095_v11 }
 0x405   :  { %v12548_v18 = vld [vmem:[#allocation7 + $0x18e8] sm:$0xf0] }
 0x406   :  { %v14580_v20 = vld [vmem:[#allocation7 + $0x1acc] sm:$0xf]  ;;  %v12551_v40 = vor.u32 %v14516_v35, %v12548_v18  ;;  %7801 = vmatpush.bf16.msra.mxu0 %v13351_v19  ;;  %v13785_v35 = vld [vmem:[#allocation7 + $0x1ec] sm:$0xf0]  ;;  %v7523_v19 = vpop.f32.mrf.mxu2 }
 0x407   :  { %v12804_v39 = vld [vmem:[#allocation7 + $0x1ae8] sm:$0xf0] }
 0x408   :  { %v14644_v13 = vld [vmem:[#allocation7 + $0x1ccc] sm:$0xf]  ;;  %v12807_v12 = vor.u32 %v14580_v20, %v12804_v39  ;;  %7763 = vmatpush.bf16.msrb.mxu1 %v12551_v40 }
 0x409   :  { %v13060_v53 = vld [vmem:[#allocation7 + $0x1ce8] sm:$0xf0] }
 0x40a   :  { %v14708_v26 = vld [vmem:[#allocation7 + $0x1ecc] sm:$0xf]  ;;  %v13063_v46 = vor.u32 %v14644_v13, %v13060_v53  ;;  %7776 = vmatpush.bf16.msrb.mxu2 %v12807_v12  ;;  %v7536_v53 = vpop.f32.mrf.mxu3  ;;  %v9866_v12 = vld [vmem:[#allocation7 + $0x3d0] sm:$0xf] }
 0x40b   :  { %v13316_v50 = vld [vmem:[#allocation7 + $0x1ee8] sm:$0xf0]  ;;  %v13825_v53 = vld [vmem:[#allocation7 + $0x32c] sm:$0xf0] }
 0x40c   :  { %v14508_v45 = vld [vmem:[#allocation7 + $0x188c] sm:$0xf]  ;;  %v13319_v31 = vor.u32 %v14708_v26, %v13316_v50  ;;  %7789 = vmatpush.bf16.msrb.mxu3 %v13063_v46  ;;  %v9611_v46 = vor.u32 %v13785_v35, %v9610_v10 }
 0x40d   :  { %v12516_v42 = vld [vmem:[#allocation7 + $0x18a8] sm:$0xf0] }
 0x40e   :  { %v14572_v55 = vld [vmem:[#allocation7 + $0x1a8c] sm:$0xf]  ;;  %v12519_v43 = vor.u32 %v14508_v45, %v12516_v42  ;;  %7802 = vmatpush.bf16.msra.mxu0 %v13319_v31  ;;  %v13849_v45 = vld [vmem:[#allocation7 + $0x3ec] sm:$0xf0] }
 0x40f   :  { %v12772_v58 = vld [vmem:[#allocation7 + $0x1aa8] sm:$0xf0]  ;;  %v10122_v42 = vld [vmem:[#allocation7 + $0x5d0] sm:$0xf]  ;;  %v9867_v60 = vor.u32 %v13849_v45, %v9866_v12 }
 0x410   :  { %v14636_v47 = vld [vmem:[#allocation7 + $0x1c8c] sm:$0xf]  ;;  %v12775_v48 = vor.u32 %v14572_v55, %v12772_v58  ;;  %7764 = vmatpush.bf16.msrb.mxu1 %v12519_v43  ;;  %v13977_v55 = vld [vmem:[#allocation7 + $0x7ec] sm:$0xf0] }
 0x411   :  { %v13028_v63 = vld [vmem:[#allocation7 + $0x1ca8] sm:$0xf0]  ;;  %v9834_v43 = vld [vmem:[#allocation7 + $0x390] sm:$0xf] }
 0x412   :  { %v14700_v41 = vld [vmem:[#allocation7 + $0x1e8c] sm:$0xf]  ;;  %v13031_v52 = vor.u32 %v14636_v47, %v13028_v63  ;;  %7777 = vmatpush.bf16.msrb.mxu2 %v12775_v48  ;;  %v13777_v63 = vld [vmem:[#allocation7 + $0x1ac] sm:$0xf0] }
 0x413   :  { %v13284_v0 = vld [vmem:[#allocation7 + $0x1ea8] sm:$0xf0]  ;;  %v13905_v48 = vld [vmem:[#allocation7 + $0x5ac] sm:$0xf0] }
 0x414   :  { %v14500_v25 = vld [vmem:[#allocation7 + $0x184c] sm:$0xf]  ;;  %v13287_v51 = vor.u32 %v14700_v41, %v13284_v0  ;;  %7790 = vmatpush.bf16.msrb.mxu3 %v13031_v52  ;;  %v10123_v41 = vor.u32 %v13913_v8, %v10122_v42  ;;  %v10379_v0 = vor.u32 %v13977_v55, %v10378_v54  ;;  %v9579_v52 = vor.u32 %v13777_v63, %v9578_v3  ;;  %v13953_v12 = vld [vmem:[#allocation7 + $0x72c] sm:$0xf0]  ;;  %v7599_v42 = vpop.f32.mrf.mxu0 }
 0x415   :  { %v12484_v56 = vld [vmem:[#allocation7 + $0x1868] sm:$0xf0]  ;;  %v13753_v8 = vld [vmem:[#allocation7 + $0xec] sm:$0xf0] }
 0x416   :  { %v14564_v1 = vld [vmem:[#allocation7 + $0x1a4c] sm:$0xf]  ;;  %v12487_v15 = vor.u32 %v14500_v25, %v12484_v56  ;;  %7803 = vmatpush.bf16.msra.mxu0 %v13287_v51  ;;  %v10346_v25 = vld [vmem:[#allocation7 + $0x790] sm:$0xf]  ;;  %v9835_v51 = vor.u32 %v13841_v5, %v9834_v43 }
 0x417   :  { %v12740_v59 = vld [vmem:[#allocation7 + $0x1a68] sm:$0xf0]  ;;  %v13969_v56 = vld [vmem:[#allocation7 + $0x7ac] sm:$0xf0] }
 0x418   :  { %v14628_v2 = vld [vmem:[#allocation7 + $0x1c4c] sm:$0xf]  ;;  %v12743_v14 = vor.u32 %v14564_v1, %v12740_v59  ;;  %7765 = vmatpush.bf16.msrb.mxu1 %v12487_v15  ;;  %v9546_v1 = vld [vmem:[#allocation7 + $0x150] sm:$0xf] }
 0x419   :  { %v12996_v27 = vld [vmem:[#allocation7 + $0x1c68] sm:$0xf0]  ;;  %v13769_v59 = vld [vmem:[#allocation7 + $0x16c] sm:$0xf0] }
 0x41a   :  { %v14692_v7 = vld [vmem:[#allocation7 + $0x1e4c] sm:$0xf]  ;;  %v12999_v18 = vor.u32 %v14628_v2, %v12996_v27  ;;  %7778 = vmatpush.bf16.msrb.mxu2 %v12743_v14  ;;  %v10091_v2 = vor.u32 %v13905_v48, %v10090_v6  ;;  %v10347_v27 = vor.u32 %v13969_v56, %v10346_v25  ;;  %v10058_v15 = vld [vmem:[#allocation7 + $0x550] sm:$0xf]  ;;  %v9547_v10 = vor.u32 %v13769_v59, %v9546_v1  ;;  %v7573_v56 = vpop.f32.mrf.mxu2 }
 0x41b   :  { %v13252_v4 = vld [vmem:[#allocation7 + $0x1e68] sm:$0xf0]  ;;  %v10314_v14 = vld [vmem:[#allocation7 + $0x750] sm:$0xf] }
 0x41c   :  { %v14492_v23 = vld [vmem:[#allocation7 + $0x180c] sm:$0xf]  ;;  %v13255_v11 = vor.u32 %v14692_v7, %v13252_v4  ;;  %7791 = vmatpush.bf16.msrb.mxu3 %v12999_v18  ;;  %v9802_v7 = vld [vmem:[#allocation7 + $0x350] sm:$0xf] }
 0x41d   :  { %v12452_v16 = vld [vmem:[#allocation7 + $0x1828] sm:$0xf0]  ;;  %v13833_v4 = vld [vmem:[#allocation7 + $0x36c] sm:$0xf0] }
 0x41e   :  { %v14556_v20 = vld [vmem:[#allocation7 + $0x1a0c] sm:$0xf]  ;;  %v12455_v40 = vor.u32 %v14492_v23, %v12452_v16  ;;  %7804 = vmatpush.bf16.msra.mxu0 %v13255_v11  ;;  %v13897_v23 = vld [vmem:[#allocation7 + $0x56c] sm:$0xf0]  ;;  %v9803_v35 = vor.u32 %v13833_v4, %v9802_v7 }
 0x41f   :  { %v12708_v39 = vld [vmem:[#allocation7 + $0x1a28] sm:$0xf0]  ;;  %v13961_v16 = vld [vmem:[#allocation7 + $0x76c] sm:$0xf0]  ;;  %v10059_v19 = vor.u32 %v13897_v23, %v10058_v15 }
 0x420   :  { %v14620_v13 = vld [vmem:[#allocation7 + $0x1c0c] sm:$0xf]  ;;  %v12711_v31 = vor.u32 %v14556_v20, %v12708_v39  ;;  %7766 = vmatpush.bf16.msrb.mxu1 %v12455_v40  ;;  %v9514_v18 = vld [vmem:[#allocation7 + $0x110] sm:$0xf]  ;;  %v10315_v20 = vor.u32 %v13961_v16, %v10314_v14  ;;  %v7560_v39 = vpop.f32.mrf.mxu1  ;;  %v7601_v14 = vpop.f32.mrf.mxu0 }
 0x421   :  { %v12964_v26 = vld [vmem:[#allocation7 + $0x1c28] sm:$0xf0]  ;;  %v13761_v11 = vld [vmem:[#allocation7 + $0x12c] sm:$0xf0] }
 0x422   :  { %v14684_v17 = vld [vmem:[#allocation7 + $0x1e0c] sm:$0xf]  ;;  %v12967_v58 = vor.u32 %v14620_v13, %v12964_v26  ;;  %7779 = vmatpush.bf16.msrb.mxu2 %v12711_v31  ;;  %v9770_v13 = vld [vmem:[#allocation7 + $0x310] sm:$0xf]  ;;  %v9515_v45 = vor.u32 %v13761_v11, %v9514_v18 }
 0x423   :  { %v13220_v50 = vld [vmem:[#allocation7 + $0x1e28] sm:$0xf0]  ;;  %7767 = vmatmul.bf16.vlgmr.msrb.gmra.mxu1 %v15545_v32  ;;  %v10026_v26 = vld [vmem:[#allocation7 + $0x510] sm:$0xf] }
 0x424   :  { %v13223_v47 = vor.u32 %v14684_v17, %v13220_v50  ;;  %7811 = vmatpush.bf16.msra.mxu1 %v9611_v46  ;;  %7792 = vmatpush.bf16.msrb.mxu3 %v12967_v58  ;;  %v7561_v17 = vadd.f32 %v7560_v39, %v15629_v24  ;;  %v13889_v50 = vld [vmem:[#allocation7 + $0x52c] sm:$0xf0]  ;;  %v9771_v46 = vor.u32 %v13825_v53, %v9770_v13 }
 0x425   :  { %7780 = vmatmul.bf16.vlgmr.msrb.gmra.mxu2 %v15547_v22  ;;  %v10282_v40 = vld [vmem:[#allocation7 + $0x710] sm:$0xf]  ;;  %v10027_v54 = vor.u32 %v13889_v50, %v10026_v26 }
 0x426   :  { %7805 = vmatpush.bf16.msra.mxu0 %v13223_v47  ;;  %7824 = vmatpush.bf16.msra.mxu2 %v9867_v60  ;;  %v9482_v31 = vld [vmem:[#allocation7 + $0xd0] sm:$0xf]  ;;  %v10283_v55 = vor.u32 %v13953_v12, %v10282_v40  ;;  %v7574_v59 = vadd.f32 %v7573_v56, %v7561_v17 }
 0x427   :  { %7793 = vmatmul.bf16.vlgmr.msrb.gmra.mxu3 %v15549_v33  ;;  %v9738_v58 = vld [vmem:[#allocation7 + $0x2d0] sm:$0xf] }
 0x428   :  { %7837 = vmatpush.bf16.msra.mxu3 %v10123_v41  ;;  %7812 = vmatpush.bf16.msra.mxu1 %v9579_v52  ;;  %v13817_v47 = vld [vmem:[#allocation7 + $0x2ec] sm:$0xf0]  ;;  %v9483_v41 = vor.u32 %v13753_v8, %v9482_v31  ;;  %v7562_v25 = vpop.f32.mrf.mxu1 }
 0x429   :  { %7806 = vmatmul.bf16.vlgmr.msra.gmra.mxu0 %v15552_v9  ;;  %v9994_v60 = vld [vmem:[#allocation7 + $0x4d0] sm:$0xf] }
 0x42a   :  { %7850 = vmatpush.bf16.msrb.mxu0 %v10379_v0  ;;  %7825 = vmatpush.bf16.msra.mxu2 %v9835_v51  ;;  %v13881_v3 = vld [vmem:[#allocation7 + $0x4ec] sm:$0xf0]  ;;  %v9739_v0 = vor.u32 %v13817_v47, %v9738_v58 }
 0x42b   :  { %v10250_v63 = vld [vmem:[#allocation7 + $0x6d0] sm:$0xf]  ;;  %v9995_v6 = vor.u32 %v13881_v3, %v9994_v60 }
 0x42c   :  { %7838 = vmatpush.bf16.msra.mxu3 %v10091_v2  ;;  %7813 = vmatpush.bf16.msra.mxu1 %v9547_v10  ;;  %v13945_v24 = vld [vmem:[#allocation7 + $0x6ec] sm:$0xf0]  ;;  %v7586_v2 = vpop.f32.mrf.mxu3 }
 0x42d   :  { %v9450_v43 = vld [vmem:[#allocation7 + $0x90] sm:$0xf]  ;;  %v10251_v48 = vor.u32 %v13945_v24, %v10250_v63  ;;  %v7587_v23 = vadd.f32 %v7586_v2, %v7574_v59 }
 0x42e   :  { %7851 = vmatpush.bf16.msrb.mxu0 %v10347_v27  ;;  %7826 = vmatpush.bf16.msra.mxu2 %v9803_v35  ;;  %v13745_v5 = vld [vmem:[#allocation7 + $0xac] sm:$0xf0] }
 0x42f   :  { %v9706_v52 = vld [vmem:[#allocation7 + $0x290] sm:$0xf]  ;;  %v9451_v15 = vor.u32 %v13745_v5, %v9450_v43  ;;  %v15636_v13 = vadd.f32 %v7599_v42, %v7587_v23 }
 0x430   :  { %7839 = vmatpush.bf16.msra.mxu3 %v10059_v19  ;;  %7814 = vmatpush.bf16.msra.mxu1 %v9515_v45  ;;  %v13809_v51 = vld [vmem:[#allocation7 + $0x2ac] sm:$0xf0] }
 0x431   :  { %v9962_v1 = vld [vmem:[#allocation7 + $0x490] sm:$0xf]  ;;  %v9707_v16 = vor.u32 %v13809_v51, %v9706_v52 }
 0x432   :  { %7852 = vmatpush.bf16.msrb.mxu0 %v10315_v20  ;;  %7827 = vmatpush.bf16.msra.mxu2 %v9771_v46  ;;  %v13873_v27 = vld [vmem:[#allocation7 + $0x4ac] sm:$0xf0] }
 0x433   :  { %v10218_v7 = vld [vmem:[#allocation7 + $0x690] sm:$0xf]  ;;  %v9963_v18 = vor.u32 %v13873_v27, %v9962_v1 }
 0x434   :  { %7840 = vmatpush.bf16.msra.mxu3 %v10027_v54  ;;  %v13937_v4 = vld [vmem:[#allocation7 + $0x6ac] sm:$0xf0]  ;;  %7815 = vmatpush.bf16.msra.mxu1 %v9483_v41  ;;  %v7588_v60 = vpop.f32.mrf.mxu3 }
 0x435   :  { %v9418_v10 = vld [vmem:[#allocation7 + $0x50] sm:$0xf]  ;;  %v10219_v11 = vor.u32 %v13937_v4, %v10218_v7 }
 0x436   :  { %7853 = vmatpush.bf16.msrb.mxu0 %v10283_v55  ;;  %7828 = vmatpush.bf16.msra.mxu2 %v9739_v0  ;;  %v13737_v35 = vld [vmem:[#allocation7 + $0x6c] sm:$0xf0]  ;;  %v7575_v55 = vpop.f32.mrf.mxu2 }
 0x437   :  { %v9674_v19 = vld [vmem:[#allocation7 + $0x250] sm:$0xf]  ;;  %v9419_v50 = vor.u32 %v13737_v35, %v9418_v10 }
 0x438   :  { %7841 = vmatpush.bf16.msra.mxu3 %v9995_v6  ;;  %v13801_v20 = vld [vmem:[#allocation7 + $0x26c] sm:$0xf0]  ;;  %7816 = vmatpush.bf16.msra.mxu1 %v9451_v15 }
 0x439   :  { %v9930_v39 = vld [vmem:[#allocation7 + $0x450] sm:$0xf]  ;;  %v9675_v12 = vor.u32 %v13801_v20, %v9674_v19 }
 0x43a   :  { %7854 = vmatpush.bf16.msrb.mxu0 %v10251_v48  ;;  %v13865_v53 = vld [vmem:[#allocation7 + $0x46c] sm:$0xf0]  ;;  %7829 = vmatpush.bf16.msra.mxu2 %v9707_v16 }
 0x43b   :  { %v10186_v26 = vld [vmem:[#allocation7 + $0x650] sm:$0xf]  ;;  %v9931_v8 = vor.u32 %v13865_v53, %v9930_v39 }
 0x43c   :  { %v13929_v17 = vld [vmem:[#allocation7 + $0x66c] sm:$0xf0]  ;;  %7842 = vmatpush.bf16.msra.mxu3 %v9963_v18  ;;  %7817 = vmatpush.bf16.msra.mxu1 %v9419_v50 }
 0x43d   :  { %v9386_v40 = vld [vmem:[#allocation7 + $0x10] sm:$0xf]  ;;  %v10187_v54 = vor.u32 %v13929_v17, %v10186_v26 }
 0x43e   :  { %v13729_v45 = vld [vmem:[#allocation7 + $0x2c] sm:$0xf0]  ;;  %7855 = vmatpush.bf16.msrb.mxu0 %v10219_v11  ;;  %7830 = vmatpush.bf16.msra.mxu2 %v9675_v12 }
 0x43f   :  { %v10634_v46 = vld [vmem:[#allocation7 + $0x9d0] sm:$0xf]  ;;  %v9387_v41 = vor.u32 %v13729_v45, %v9386_v40 }
 0x440   :  { %v14041_v31 = vld [vmem:[#allocation7 + $0x9ec] sm:$0xf0]  ;;  %7843 = vmatpush.bf16.msra.mxu3 %v9931_v8 }
 0x441   :  { %v9642_v58 = vld [vmem:[#allocation7 + $0x210] sm:$0xf]  ;;  %v10635_v6 = vor.u32 %v14041_v31, %v10634_v46  ;;  %7818 = vmatpush.bf16.msra.mxu1 %v9387_v41 }
 0x442   :  { %v13793_v47 = vld [vmem:[#allocation7 + $0x22c] sm:$0xf0]  ;;  %7856 = vmatpush.bf16.msrb.mxu0 %v10187_v54 }
 0x443   :  { %v9898_v42 = vld [vmem:[#allocation7 + $0x410] sm:$0xf]  ;;  %v9643_v48 = vor.u32 %v13793_v47, %v9642_v58  ;;  %v7612_v47 = vpop.f32.mrf.mxu1 }
 0x444   :  { %v13857_v3 = vld [vmem:[#allocation7 + $0x42c] sm:$0xf0]  ;;  %7819 = vmatmul.bf16.vlgmr.msra.gmra.mxu1 %v15506_v21 }
 0x445   :  { %v10154_v63 = vld [vmem:[#allocation7 + $0x610] sm:$0xf]  ;;  %v9899_v51 = vor.u32 %v13857_v3, %v9898_v42  ;;  %7863 = vmatpush.bf16.msrb.mxu1 %v10635_v6  ;;  %7831 = vmatpush.bf16.msra.mxu2 %v9643_v48  ;;  %v7651_v6 = vpop.f32.mrf.mxu0 }
 0x446   :  { %v13921_v24 = vld [vmem:[#allocation7 + $0x62c] sm:$0xf0] }
 0x447   :  { %v10890_v0 = vld [vmem:[#allocation7 + $0xbd0] sm:$0xf]  ;;  %v10155_v1 = vor.u32 %v13921_v24, %v10154_v63  ;;  %7844 = vmatpush.bf16.msra.mxu3 %v9899_v51 }
 0x448   :  { %v14105_v43 = vld [vmem:[#allocation7 + $0xbec] sm:$0xf0]  ;;  %7832 = vmatmul.bf16.vlgmr.msra.gmra.mxu2 %v15508_v29 }
 0x449   :  { %v11146_v5 = vld [vmem:[#allocation7 + $0xdd0] sm:$0xf]  ;;  %v10891_v59 = vor.u32 %v14105_v43, %v10890_v0  ;;  %7857 = vmatpush.bf16.msrb.mxu0 %v10155_v1  ;;  %v14826_v43 = vld [vmem:[#allocation8] sm:$0xff] }
 0x44a   :  { %v14169_v25 = vld [vmem:[#allocation7 + $0xdec] sm:$0xf0]  ;;  %7845 = vmatmul.bf16.vlgmr.msra.gmra.mxu3 %v15510_v36 }
 0x44b   :  { %v11402_v56 = vld [vmem:[#allocation7 + $0xfd0] sm:$0xf]  ;;  %v11147_v7 = vor.u32 %v14169_v25, %v11146_v5  ;;  %7876 = vmatpush.bf16.msrb.mxu2 %v10891_v59  ;;  %v1846_v5 = vperm.slane %v14826_v43, 3 }
 0x44c   :  { %v14233_v52 = vld [vmem:[#allocation7 + $0xfec] sm:$0xf0]  ;;  %7858 = vmatmul.bf16.vlgmr.msrb.gmra.mxu0 %v15512_v38 }
 0x44d   :  { %v10602_v2 = vld [vmem:[#allocation7 + $0x990] sm:$0xf]  ;;  %v11403_v4 = vor.u32 %v14233_v52, %v11402_v56  ;;  %7889 = vmatpush.bf16.msrb.mxu3 %v11147_v7 }
 0x44e   :  { %v14033_v27 = vld [vmem:[#allocation7 + $0x9ac] sm:$0xf0] }
 0x44f   :  { %v10858_v15 = vld [vmem:[#allocation7 + $0xb90] sm:$0xf]  ;;  %v10603_v18 = vor.u32 %v14033_v27, %v10602_v2  ;;  %7902 = vmatpush.bf16.msra.mxu0 %v11403_v4 }
 0x450   :  { %v14097_v23 = vld [vmem:[#allocation7 + $0xbac] sm:$0xf0] }
 0x451   :  { %v11114_v14 = vld [vmem:[#allocation7 + $0xd90] sm:$0xf]  ;;  %v10859_v11 = vor.u32 %v14097_v23, %v10858_v15  ;;  %7864 = vmatpush.bf16.msrb.mxu1 %v10603_v18  ;;  %v7613_v23 = vadd.f32 %v7612_v47, %v1846_v5 }
 0x452   :  { %v14161_v16 = vld [vmem:[#allocation7 + $0xdac] sm:$0xf0] }
 0x453   :  { %v11370_v10 = vld [vmem:[#allocation7 + $0xf90] sm:$0xf]  ;;  %v11115_v39 = vor.u32 %v14161_v16, %v11114_v14  ;;  %7877 = vmatpush.bf16.msrb.mxu2 %v10859_v11  ;;  %v7614_v11 = vpop.f32.mrf.mxu1 }
 0x454   :  { %v14225_v35 = vld [vmem:[#allocation7 + $0xfac] sm:$0xf0] }
 0x455   :  { %v10570_v19 = vld [vmem:[#allocation7 + $0x950] sm:$0xf]  ;;  %v11371_v53 = vor.u32 %v14225_v35, %v11370_v10  ;;  %7890 = vmatpush.bf16.msrb.mxu3 %v11115_v39 }
 0x456   :  { %v14025_v20 = vld [vmem:[#allocation7 + $0x96c] sm:$0xf0] }
 0x457   :  { %v10826_v26 = vld [vmem:[#allocation7 + $0xb50] sm:$0xf]  ;;  %v10571_v46 = vor.u32 %v14025_v20, %v10570_v19  ;;  %7903 = vmatpush.bf16.msra.mxu0 %v11371_v53  ;;  %v7625_v19 = vpop.f32.mrf.mxu2 }
 0x458   :  { %v14089_v17 = vld [vmem:[#allocation7 + $0xb6c] sm:$0xf0] }
 0x459   :  { %v11082_v50 = vld [vmem:[#allocation7 + $0xd50] sm:$0xf]  ;;  %v10827_v31 = vor.u32 %v14089_v17, %v10826_v26  ;;  %7865 = vmatpush.bf16.msrb.mxu1 %v10571_v46  ;;  %v7626_v26 = vadd.f32 %v7625_v19, %v7613_v23  ;;  %v7638_v17 = vpop.f32.mrf.mxu3 }
 0x45a   :  { %v14153_v40 = vld [vmem:[#allocation7 + $0xd6c] sm:$0xf0] }
 0x45b   :  { %v11338_v12 = vld [vmem:[#allocation7 + $0xf50] sm:$0xf]  ;;  %v11083_v55 = vor.u32 %v14153_v40, %v11082_v50  ;;  %7878 = vmatpush.bf16.msrb.mxu2 %v10827_v31  ;;  %v7639_v46 = vadd.f32 %v7638_v17, %v7626_v26  ;;  %v7653_v31 = vpop.f32.mrf.mxu0 }
 0x45c   :  { %v14217_v45 = vld [vmem:[#allocation7 + $0xf6c] sm:$0xf0] }
 0x45d   :  { %v10538_v8 = vld [vmem:[#allocation7 + $0x910] sm:$0xf]  ;;  %v11339_v58 = vor.u32 %v14217_v45, %v11338_v12  ;;  %7891 = vmatpush.bf16.msrb.mxu3 %v11083_v55 }
 0x45e   :  { %v14017_v54 = vld [vmem:[#allocation7 + $0x92c] sm:$0xf0] }
 0x45f   :  { %v10794_v42 = vld [vmem:[#allocation7 + $0xb10] sm:$0xf]  ;;  %v10539_v0 = vor.u32 %v14017_v54, %v10538_v8  ;;  %7904 = vmatpush.bf16.msra.mxu0 %v11339_v58 }
 0x460   :  { %v14081_v60 = vld [vmem:[#allocation7 + $0xb2c] sm:$0xf0] }
 0x461   :  { %v11050_v3 = vld [vmem:[#allocation7 + $0xd10] sm:$0xf]  ;;  %v10795_v48 = vor.u32 %v14081_v60, %v10794_v42  ;;  %7866 = vmatpush.bf16.msrb.mxu1 %v10539_v0  ;;  %v15642_v0 = vadd.f32 %v7651_v6, %v7639_v46 }
 0x462   :  { %v14145_v63 = vld [vmem:[#allocation7 + $0xd2c] sm:$0xf0] }
 0x463   :  { %v11306_v24 = vld [vmem:[#allocation7 + $0xf10] sm:$0xf]  ;;  %v11051_v52 = vor.u32 %v14145_v63, %v11050_v3  ;;  %7879 = vmatpush.bf16.msrb.mxu2 %v10795_v48 }
 0x464   :  { %v14209_v41 = vld [vmem:[#allocation7 + $0xf2c] sm:$0xf0] }
 0x465   :  { %v10506_v25 = vld [vmem:[#allocation7 + $0x8d0] sm:$0xf]  ;;  %v11307_v51 = vor.u32 %v14209_v41, %v11306_v24  ;;  %7892 = vmatpush.bf16.msrb.mxu3 %v11051_v52 }
 0x466   :  { %v14009_v56 = vld [vmem:[#allocation7 + $0x8ec] sm:$0xf0] }
 0x467   :  { %v10762_v1 = vld [vmem:[#allocation7 + $0xad0] sm:$0xf]  ;;  %v10507_v15 = vor.u32 %v14009_v56, %v10506_v25  ;;  %7905 = vmatpush.bf16.msra.mxu0 %v11307_v51 }
 0x468   :  { %v14073_v59 = vld [vmem:[#allocation7 + $0xaec] sm:$0xf0] }
 0x469   :  { %v11018_v2 = vld [vmem:[#allocation7 + $0xcd0] sm:$0xf]  ;;  %v10763_v14 = vor.u32 %v14073_v59, %v10762_v1  ;;  %7867 = vmatpush.bf16.msrb.mxu1 %v10507_v15  ;;  %v7627_v59 = vpop.f32.mrf.mxu2 }
 0x46a   :  { %v14137_v27 = vld [vmem:[#allocation7 + $0xcec] sm:$0xf0] }
 0x46b   :  { %v11274_v7 = vld [vmem:[#allocation7 + $0xed0] sm:$0xf]  ;;  %v11019_v35 = vor.u32 %v14137_v27, %v11018_v2  ;;  %7880 = vmatpush.bf16.msrb.mxu2 %v10763_v14 }
 0x46c   :  { %v14201_v4 = vld [vmem:[#allocation7 + $0xeec] sm:$0xf0] }
 0x46d   :  { %v10474_v16 = vld [vmem:[#allocation7 + $0x890] sm:$0xf]  ;;  %v11275_v18 = vor.u32 %v14201_v4, %v11274_v7  ;;  %7893 = vmatpush.bf16.msrb.mxu3 %v11019_v35  ;;  %v7640_v4 = vpop.f32.mrf.mxu3 }
 0x46e   :  { %v14001_v10 = vld [vmem:[#allocation7 + $0x8ac] sm:$0xf0] }
 0x46f   :  { %v10730_v20 = vld [vmem:[#allocation7 + $0xa90] sm:$0xf]  ;;  %v10475_v45 = vor.u32 %v14001_v10, %v10474_v16  ;;  %7906 = vmatpush.bf16.msra.mxu0 %v11275_v18 }
 0x470   :  { %v14065_v39 = vld [vmem:[#allocation7 + $0xaac] sm:$0xf0] }
 0x471   :  { %v10986_v53 = vld [vmem:[#allocation7 + $0xc90] sm:$0xf]  ;;  %v10731_v8 = vor.u32 %v14065_v39, %v10730_v20  ;;  %7868 = vmatpush.bf16.msrb.mxu1 %v10475_v45 }
 0x472   :  { %v14129_v50 = vld [vmem:[#allocation7 + $0xcac] sm:$0xf0] }
 0x473   :  { %v11242_v40 = vld [vmem:[#allocation7 + $0xe90] sm:$0xf]  ;;  %v10987_v58 = vor.u32 %v14129_v50, %v10986_v53  ;;  %7881 = vmatpush.bf16.msrb.mxu2 %v10731_v8 }
 0x474   :  { %v14193_v12 = vld [vmem:[#allocation7 + $0xeac] sm:$0xf0] }
 0x475   :  { %v10442_v54 = vld [vmem:[#allocation7 + $0x850] sm:$0xf]  ;;  %v11243_v47 = vor.u32 %v14193_v12, %v11242_v40  ;;  %7894 = vmatpush.bf16.msrb.mxu3 %v10987_v58 }
 0x476   :  { %v13993_v55 = vld [vmem:[#allocation7 + $0x86c] sm:$0xf0] }
 0x477   :  { %v10698_v42 = vld [vmem:[#allocation7 + $0xa50] sm:$0xf]  ;;  %v10443_v43 = vor.u32 %v13993_v55, %v10442_v54  ;;  %7907 = vmatpush.bf16.msra.mxu0 %v11243_v47 }
 0x478   :  { %v14057_v60 = vld [vmem:[#allocation7 + $0xa6c] sm:$0xf0] }
 0x479   :  { %v10954_v3 = vld [vmem:[#allocation7 + $0xc50] sm:$0xf]  ;;  %v10699_v48 = vor.u32 %v14057_v60, %v10698_v42  ;;  %7869 = vmatpush.bf16.msrb.mxu1 %v10443_v43 }
 0x47a   :  { %v14121_v63 = vld [vmem:[#allocation7 + $0xc6c] sm:$0xf0] }
 0x47b   :  { %v11210_v24 = vld [vmem:[#allocation7 + $0xe50] sm:$0xf]  ;;  %v10955_v51 = vor.u32 %v14121_v63, %v10954_v3  ;;  %7882 = vmatpush.bf16.msrb.mxu2 %v10699_v48 }
 0x47c   :  { %v14185_v41 = vld [vmem:[#allocation7 + $0xe6c] sm:$0xf0] }
 0x47d   :  { %v10410_v5 = vld [vmem:[#allocation7 + $0x810] sm:$0xf]  ;;  %v11211_v1 = vor.u32 %v14185_v41, %v11210_v24  ;;  %7895 = vmatpush.bf16.msrb.mxu3 %v10955_v51 }
 0x47e   :  { %v13985_v25 = vld [vmem:[#allocation7 + $0x82c] sm:$0xf0] }
 0x47f   :  { %v11658_v56 = vld [vmem:[#allocation7 + $0x11d0] sm:$0xf]  ;;  %v10411_v14 = vor.u32 %v13985_v25, %v10410_v5  ;;  %7908 = vmatpush.bf16.msra.mxu0 %v11211_v1 }
 0x480   :  { %v14297_v52 = vld [vmem:[#allocation7 + $0x11ec] sm:$0xf0] }
 0x481   :  { %v10666_v2 = vld [vmem:[#allocation7 + $0xa10] sm:$0xf]  ;;  %v11659_v18 = vor.u32 %v14297_v52, %v11658_v56  ;;  %7870 = vmatpush.bf16.msrb.mxu1 %v10411_v14 }
 0x482   :  { %v14049_v27 = vld [vmem:[#allocation7 + $0xa2c] sm:$0xf0] }
 0x483   :  { %v10922_v7 = vld [vmem:[#allocation7 + $0xc10] sm:$0xf]  ;;  %v10667_v11 = vor.u32 %v14049_v27, %v10666_v2 }
 0x484   :  { %v14113_v15 = vld [vmem:[#allocation7 + $0xc2c] sm:$0xf0]  ;;  %7871 = vmatmul.bf16.vlgmr.msrb.gmra.mxu1 %v15519_v44 }
 0x485   :  { %v11178_v6 = vld [vmem:[#allocation7 + $0xe10] sm:$0xf]  ;;  %v10923_v53 = vor.u32 %v14113_v15, %v10922_v7  ;;  %7915 = vmatpush.bf16.msra.mxu1 %v11659_v18  ;;  %7883 = vmatpush.bf16.msrb.mxu2 %v10667_v11  ;;  %v15648_v7 = vpop.f32.mrf.mxu1 }
 0x486   :  { %v14177_v23 = vld [vmem:[#allocation7 + $0xe2c] sm:$0xf0] }
 0x487   :  { %v11914_v16 = vld [vmem:[#allocation7 + $0x13d0] sm:$0xf]  ;;  %v11179_v26 = vor.u32 %v14177_v23, %v11178_v6  ;;  %7896 = vmatpush.bf16.msrb.mxu3 %v10923_v53 }
 0x488   :  { %v14361_v10 = vld [vmem:[#allocation7 + $0x13ec] sm:$0xf0]  ;;  %7884 = vmatmul.bf16.vlgmr.msrb.gmra.mxu2 %v15521_v34 }
 0x489   :  { %v12170_v35 = vld [vmem:[#allocation7 + $0x15d0] sm:$0xf]  ;;  %v11915_v17 = vor.u32 %v14361_v10, %v11914_v16  ;;  %7909 = vmatpush.bf16.msra.mxu0 %v11179_v26 }
 0x48a   :  { %v14425_v19 = vld [vmem:[#allocation7 + $0x15ec] sm:$0xf0]  ;;  %7897 = vmatmul.bf16.vlgmr.msrb.gmra.mxu3 %v15523_v28 }
 0x48b   :  { %v12426_v20 = vld [vmem:[#allocation7 + $0x17d0] sm:$0xf]  ;;  %v12171_v12 = vor.u32 %v14425_v19, %v12170_v35  ;;  %7928 = vmatpush.bf16.msra.mxu2 %v11915_v17  ;;  %v15650_v35 = vpop.f32.mrf.mxu0 }
 0x48c   :  { %v14489_v39 = vld [vmem:[#allocation7 + $0x17ec] sm:$0xf0]  ;;  %7910 = vmatmul.bf16.vlgmr.msra.gmra.mxu0 %v15525_v49 }
 0x48d   :  { %v11626_v50 = vld [vmem:[#allocation7 + $0x1190] sm:$0xf]  ;;  %v12427_v45 = vor.u32 %v14489_v39, %v12426_v20  ;;  %7941 = vmatpush.bf16.msra.mxu3 %v12171_v12 }
 0x48e   :  { %v14289_v40 = vld [vmem:[#allocation7 + $0x11ac] sm:$0xf0] }
 0x48f   :  { %v11882_v46 = vld [vmem:[#allocation7 + $0x1390] sm:$0xf]  ;;  %v11627_v47 = vor.u32 %v14289_v40, %v11626_v50  ;;  %7954 = vmatpush.bf16.msrb.mxu0 %v12427_v45 }
 0x490   :  { %v14353_v31 = vld [vmem:[#allocation7 + $0x13ac] sm:$0xf0] }
 0x491   :  { %v12138_v8 = vld [vmem:[#allocation7 + $0x1590] sm:$0xf]  ;;  %v11883_v42 = vor.u32 %v14353_v31, %v11882_v46  ;;  %7916 = vmatpush.bf16.msra.mxu1 %v11627_v47  ;;  %v15652_v47 = vpop.f32.mrf.mxu2 }
 0x492   :  { %v14417_v54 = vld [vmem:[#allocation7 + $0x15ac] sm:$0xf0] }
 0x493   :  { %v12394_v55 = vld [vmem:[#allocation7 + $0x1790] sm:$0xf]  ;;  %v12139_v63 = vor.u32 %v14417_v54, %v12138_v8  ;;  %7929 = vmatpush.bf16.msra.mxu2 %v11883_v42 }
 0x494   :  { %v14481_v58 = vld [vmem:[#allocation7 + $0x17ac] sm:$0xf0] }
 0x495   :  { %v11594_v60 = vld [vmem:[#allocation7 + $0x1150] sm:$0xf]  ;;  %v12395_v24 = vor.u32 %v14481_v58, %v12394_v55  ;;  %7942 = vmatpush.bf16.msra.mxu3 %v12139_v63  ;;  %v7666_v58 = vpop.f32.mrf.mxu1  ;;  %v15654_v63 = vpop.f32.mrf.mxu3 }
 0x496   :  { %v14281_v3 = vld [vmem:[#allocation7 + $0x116c] sm:$0xf0] }
 0x497   :  { %v11850_v41 = vld [vmem:[#allocation7 + $0x1350] sm:$0xf]  ;;  %v11595_v52 = vor.u32 %v14281_v3, %v11594_v60  ;;  %7955 = vmatpush.bf16.msrb.mxu0 %v12395_v24 }
 0x498   :  { %v14345_v43 = vld [vmem:[#allocation7 + $0x136c] sm:$0xf0] }
 0x499   :  { %v12106_v5 = vld [vmem:[#allocation7 + $0x1550] sm:$0xf]  ;;  %v11851_v51 = vor.u32 %v14345_v43, %v11850_v41  ;;  %7917 = vmatpush.bf16.msra.mxu1 %v11595_v52 }
 0x49a   :  { %v14409_v48 = vld [vmem:[#allocation7 + $0x156c] sm:$0xf0] }
 0x49b   :  { %v12362_v25 = vld [vmem:[#allocation7 + $0x1750] sm:$0xf]  ;;  %v12107_v2 = vor.u32 %v14409_v48, %v12106_v5  ;;  %7930 = vmatpush.bf16.msra.mxu2 %v11851_v51  ;;  %v7705_v48 = vpop.f32.mrf.mxu0 }
 0x49c   :  { %v14473_v56 = vld [vmem:[#allocation7 + $0x176c] sm:$0xf0] }
 0x49d   :  { %v11562_v1 = vld [vmem:[#allocation7 + $0x1110] sm:$0xf]  ;;  %v12363_v27 = vor.u32 %v14473_v56, %v12362_v25  ;;  %7943 = vmatpush.bf16.msra.mxu3 %v12107_v2 }
 0x49e   :  { %v14273_v59 = vld [vmem:[#allocation7 + $0x112c] sm:$0xf0] }
 0x49f   :  { %v11818_v4 = vld [vmem:[#allocation7 + $0x1310] sm:$0xf]  ;;  %v11563_v10 = vor.u32 %v14273_v59, %v11562_v1  ;;  %7956 = vmatpush.bf16.msrb.mxu0 %v12363_v27 }
 0x4a0   :  { %v14337_v15 = vld [vmem:[#allocation7 + $0x132c] sm:$0xf0] }
 0x4a1   :  { %v12074_v6 = vld [vmem:[#allocation7 + $0x1510] sm:$0xf]  ;;  %v11819_v18 = vor.u32 %v14337_v15, %v11818_v4  ;;  %7918 = vmatpush.bf16.msra.mxu1 %v11563_v10 }
 0x4a2   :  { %v14401_v23 = vld [vmem:[#allocation7 + $0x152c] sm:$0xf0] }
 0x4a3   :  { %v12330_v14 = vld [vmem:[#allocation7 + $0x1710] sm:$0xf]  ;;  %v12075_v20 = vor.u32 %v14401_v23, %v12074_v6  ;;  %7931 = vmatpush.bf16.msra.mxu2 %v11819_v18 }
 0x4a4   :  { %v14465_v16 = vld [vmem:[#allocation7 + $0x172c] sm:$0xf0] }
 0x4a5   :  { %v11530_v11 = vld [vmem:[#allocation7 + $0x10d0] sm:$0xf]  ;;  %v12331_v39 = vor.u32 %v14465_v16, %v12330_v14  ;;  %7944 = vmatpush.bf16.msra.mxu3 %v12075_v20 }
 0x4a6   :  { %v14265_v19 = vld [vmem:[#allocation7 + $0x10ec] sm:$0xf0] }
 0x4a7   :  { %v11786_v53 = vld [vmem:[#allocation7 + $0x12d0] sm:$0xf]  ;;  %v11531_v45 = vor.u32 %v14265_v19, %v11530_v11  ;;  %7957 = vmatpush.bf16.msrb.mxu0 %v12331_v39  ;;  %v7679_v39 = vpop.f32.mrf.mxu2 }
 0x4a8   :  { %v14329_v26 = vld [vmem:[#allocation7 + $0x12ec] sm:$0xf0] }
 0x4a9   :  { %v12042_v17 = vld [vmem:[#allocation7 + $0x14d0] sm:$0xf]  ;;  %v11787_v46 = vor.u32 %v14329_v26, %v11786_v53  ;;  %7919 = vmatpush.bf16.msra.mxu1 %v11531_v45 }
 0x4aa   :  { %v14393_v50 = vld [vmem:[#allocation7 + $0x14ec] sm:$0xf0] }
 0x4ab   :  { %v12298_v40 = vld [vmem:[#allocation7 + $0x16d0] sm:$0xf]  ;;  %v12043_v54 = vor.u32 %v14393_v50, %v12042_v17  ;;  %7932 = vmatpush.bf16.msra.mxu2 %v11787_v46  ;;  %v7692_v50 = vpop.f32.mrf.mxu3 }
 0x4ac   :  { %v14457_v12 = vld [vmem:[#allocation7 + $0x16ec] sm:$0xf0] }
 0x4ad   :  { %v11498_v31 = vld [vmem:[#allocation7 + $0x1090] sm:$0xf]  ;;  %v12299_v55 = vor.u32 %v14457_v12, %v12298_v40  ;;  %7945 = vmatpush.bf16.msra.mxu3 %v12043_v54 }
 0x4ae   :  { %v14257_v8 = vld [vmem:[#allocation7 + $0x10ac] sm:$0xf0] }
 0x4af   :  { %v11754_v42 = vld [vmem:[#allocation7 + $0x1290] sm:$0xf]  ;;  %v11499_v5 = vor.u32 %v14257_v8, %v11498_v31  ;;  %7958 = vmatpush.bf16.msrb.mxu0 %v12299_v55 }
 0x4b0   :  { %v14321_v60 = vld [vmem:[#allocation7 + $0x12ac] sm:$0xf0] }
 0x4b1   :  { %v12010_v3 = vld [vmem:[#allocation7 + $0x1490] sm:$0xf]  ;;  %v11755_v25 = vor.u32 %v14321_v60, %v11754_v42  ;;  %7920 = vmatpush.bf16.msra.mxu1 %v11499_v5 }
 0x4b2   :  { %v14385_v24 = vld [vmem:[#allocation7 + $0x14ac] sm:$0xf0] }
 0x4b3   :  { %v12266_v41 = vld [vmem:[#allocation7 + $0x1690] sm:$0xf]  ;;  %v12011_v51 = vor.u32 %v14385_v24, %v12010_v3  ;;  %7933 = vmatpush.bf16.msra.mxu2 %v11755_v25 }
 0x4b4   :  { %v14449_v43 = vld [vmem:[#allocation7 + $0x16ac] sm:$0xf0] }
 0x4b5   :  { %v11466_v56 = vld [vmem:[#allocation7 + $0x1050] sm:$0xf]  ;;  %v12267_v1 = vor.u32 %v14449_v43, %v12266_v41  ;;  %7946 = vmatpush.bf16.msra.mxu3 %v12011_v51 }
 0x4b6   :  { %v14249_v52 = vld [vmem:[#allocation7 + $0x106c] sm:$0xf0] }
 0x4b7   :  { %v11722_v59 = vld [vmem:[#allocation7 + $0x1250] sm:$0xf]  ;;  %v11467_v23 = vor.u32 %v14249_v52, %v11466_v56  ;;  %7959 = vmatpush.bf16.msrb.mxu0 %v12267_v1 }
 0x4b8   :  { %v14313_v2 = vld [vmem:[#allocation7 + $0x126c] sm:$0xf0] }
 0x4b9   :  { %v11978_v27 = vld [vmem:[#allocation7 + $0x1450] sm:$0xf]  ;;  %v11723_v16 = vor.u32 %v14313_v2, %v11722_v59  ;;  %7921 = vmatpush.bf16.msra.mxu1 %v11467_v23 }
 0x4ba   :  { %v14377_v4 = vld [vmem:[#allocation7 + $0x146c] sm:$0xf0] }
 0x4bb   :  { %v12234_v15 = vld [vmem:[#allocation7 + $0x1650] sm:$0xf]  ;;  %v11979_v19 = vor.u32 %v14377_v4, %v11978_v27  ;;  %7934 = vmatpush.bf16.msra.mxu2 %v11723_v16 }
 0x4bc   :  { %v14441_v6 = vld [vmem:[#allocation7 + $0x166c] sm:$0xf0] }
 0x4bd   :  { %v11434_v14 = vld [vmem:[#allocation7 + $0x1010] sm:$0xf]  ;;  %v12235_v20 = vor.u32 %v14441_v6, %v12234_v15  ;;  %7947 = vmatpush.bf16.msra.mxu3 %v11979_v19 }
 0x4be   :  { %v14241_v10 = vld [vmem:[#allocation7 + $0x102c] sm:$0xf0] }
 0x4bf   :  { %v12682_v18 = vld [vmem:[#allocation7 + $0x19d0] sm:$0xf]  ;;  %v11435_v46 = vor.u32 %v14241_v10, %v11434_v14  ;;  %7960 = vmatpush.bf16.msrb.mxu0 %v12235_v20 }
 0x4c0   :  { %v14553_v11 = vld [vmem:[#allocation7 + $0x19ec] sm:$0xf0] }
 0x4c1   :  { %v11690_v53 = vld [vmem:[#allocation7 + $0x1210] sm:$0xf]  ;;  %v12683_v55 = vor.u32 %v14553_v11, %v12682_v18  ;;  %7922 = vmatpush.bf16.msra.mxu1 %v11435_v46 }
 0x4c2   :  { %v14305_v26 = vld [vmem:[#allocation7 + $0x122c] sm:$0xf0] }
 0x4c3   :  { %v11946_v17 = vld [vmem:[#allocation7 + $0x1410] sm:$0xf]  ;;  %v11691_v58 = vor.u32 %v14305_v26, %v11690_v53 }
 0x4c4   :  { %v14369_v40 = vld [vmem:[#allocation7 + $0x142c] sm:$0xf0]  ;;  %7923 = vmatmul.bf16.vlgmr.msra.gmra.mxu1 %v15532_v57 }
 0x4c5   :  { %v12202_v12 = vld [vmem:[#allocation7 + $0x1610] sm:$0xf]  ;;  %v11947_v24 = vor.u32 %v14369_v40, %v11946_v17  ;;  %7967 = vmatpush.bf16.msrb.mxu1 %v12683_v55  ;;  %7935 = vmatpush.bf16.msra.mxu2 %v11691_v58 }
 0x4c6   :  { %v14433_v45 = vld [vmem:[#allocation7 + $0x162c] sm:$0xf0] }
 0x4c7   :  { %v12938_v31 = vld [vmem:[#allocation7 + $0x1bd0] sm:$0xf]  ;;  %v12203_v41 = vor.u32 %v14433_v45, %v12202_v12  ;;  %7948 = vmatpush.bf16.msra.mxu3 %v11947_v24  ;;  %v15660_v45 = vpop.f32.mrf.mxu1 }
 0x4c8   :  { %v14617_v8 = vld [vmem:[#allocation7 + $0x1bec] sm:$0xf0]  ;;  %7936 = vmatmul.bf16.vlgmr.msra.gmra.mxu2 %v15534_v62 }
 0x4c9   :  { %v13194_v54 = vld [vmem:[#allocation7 + $0x1dd0] sm:$0xf]  ;;  %v12939_v43 = vor.u32 %v14617_v8, %v12938_v31  ;;  %7961 = vmatpush.bf16.msrb.mxu0 %v12203_v41 }
 0x4ca   :  { %v14681_v42 = vld [vmem:[#allocation7 + $0x1dec] sm:$0xf0]  ;;  %7949 = vmatmul.bf16.vlgmr.msra.gmra.mxu3 %v15536_v37 }
 0x4cb   :  { %v13450_v60 = vld [vmem:[#allocation7 + $0x1fd0] sm:$0xf]  ;;  %v13195_v25 = vor.u32 %v14681_v42, %v13194_v54  ;;  %7980 = vmatpush.bf16.msrb.mxu2 %v12939_v43 }
 0x4cc   :  { %v14745_v3 = vld [vmem:[#allocation7 + $0x1fec] sm:$0xf0]  ;;  %7962 = vmatmul.bf16.vlgmr.msrb.gmra.mxu0 %v15538_v30 }
 0x4cd   :  { %v12650_v5 = vld [vmem:[#allocation7 + $0x1990] sm:$0xf]  ;;  %v13451_v56 = vor.u32 %v14745_v3, %v13450_v60  ;;  %7993 = vmatpush.bf16.msrb.mxu3 %v13195_v25  ;;  %v15662_v60 = vpop.f32.mrf.mxu0 }
 0x4ce   :  { %v14545_v48 = vld [vmem:[#allocation7 + $0x19ac] sm:$0xf0] }
 0x4cf   :  { %v12906_v52 = vld [vmem:[#allocation7 + $0x1b90] sm:$0xf]  ;;  %v12651_v4 = vor.u32 %v14545_v48, %v12650_v5  ;;  %8006 = vmatpush.bf16.msra.mxu0 %v13451_v56 }
 0x4d0   :  { %v14609_v51 = vld [vmem:[#allocation7 + $0x1bac] sm:$0xf0] }
 0x4d1   :  { %v13162_v1 = vld [vmem:[#allocation7 + $0x1d90] sm:$0xf]  ;;  %v12907_v15 = vor.u32 %v14609_v51, %v12906_v52  ;;  %7968 = vmatpush.bf16.msrb.mxu1 %v12651_v4 }
 0x4d2   :  { %v14673_v59 = vld [vmem:[#allocation7 + $0x1dac] sm:$0xf0] }
 0x4d3   :  { %v13418_v2 = vld [vmem:[#allocation7 + $0x1f90] sm:$0xf]  ;;  %v13163_v14 = vor.u32 %v14673_v59, %v13162_v1  ;;  %7981 = vmatpush.bf16.msrb.mxu2 %v12907_v15 }
 0x4d4   :  { %v14737_v27 = vld [vmem:[#allocation7 + $0x1fac] sm:$0xf0] }
 0x4d5   :  { %v12618_v6 = vld [vmem:[#allocation7 + $0x1950] sm:$0xf]  ;;  %v13419_v16 = vor.u32 %v14737_v27, %v13418_v2  ;;  %7994 = vmatpush.bf16.msrb.mxu3 %v13163_v14  ;;  %v15664_v14 = vpop.f32.mrf.mxu2 }
 0x4d6   :  { %v14537_v23 = vld [vmem:[#allocation7 + $0x196c] sm:$0xf0] }
 0x4d7   :  { %v12874_v10 = vld [vmem:[#allocation7 + $0x1b50] sm:$0xf]  ;;  %v12619_v53 = vor.u32 %v14537_v23, %v12618_v6  ;;  %8007 = vmatpush.bf16.msra.mxu0 %v13419_v16  ;;  %v7718_v23 = vpop.f32.mrf.mxu1 }
 0x4d8   :  { %v14601_v18 = vld [vmem:[#allocation7 + $0x1b6c] sm:$0xf0]  ;;  %v9868_v23 = vld [vmem:[#allocation7 + $0x3f0] sm:$0xf0] }
 0x4d9   :  { %v13130_v11 = vld [vmem:[#allocation7 + $0x1d50] sm:$0xf]  ;;  %v12875_v26 = vor.u32 %v14601_v18, %v12874_v10  ;;  %7969 = vmatpush.bf16.msrb.mxu1 %v12619_v53 }
 0x4da   :  { %v14665_v19 = vld [vmem:[#allocation7 + $0x1d6c] sm:$0xf0] }
 0x4db   :  { %v13386_v20 = vld [vmem:[#allocation7 + $0x1f50] sm:$0xf]  ;;  %v13131_v40 = vor.u32 %v14665_v19, %v13130_v11  ;;  %7982 = vmatpush.bf16.msrb.mxu2 %v12875_v26  ;;  %v15666_v11 = vpop.f32.mrf.mxu3  ;;  %v7757_v26 = vpop.f32.mrf.mxu0 }
 0x4dc   :  { %v14729_v39 = vld [vmem:[#allocation7 + $0x1f6c] sm:$0xf0] }
 0x4dd   :  { %v12586_v17 = vld [vmem:[#allocation7 + $0x1910] sm:$0xf]  ;;  %v13387_v12 = vor.u32 %v14729_v39, %v13386_v20  ;;  %7995 = vmatpush.bf16.msrb.mxu3 %v13131_v40 }
 0x4de   :  { %v14529_v50 = vld [vmem:[#allocation7 + $0x192c] sm:$0xf0] }
 0x4df   :  { %v12842_v46 = vld [vmem:[#allocation7 + $0x1b10] sm:$0xf]  ;;  %v12587_v42 = vor.u32 %v14529_v50, %v12586_v17  ;;  %8008 = vmatpush.bf16.msra.mxu0 %v13387_v12 }
 0x4e0   :  { %v14593_v31 = vld [vmem:[#allocation7 + $0x1b2c] sm:$0xf0] }
 0x4e1   :  { %v13098_v8 = vld [vmem:[#allocation7 + $0x1d10] sm:$0xf]  ;;  %v12843_v3 = vor.u32 %v14593_v31, %v12842_v46  ;;  %7970 = vmatpush.bf16.msrb.mxu1 %v12587_v42 }
 0x4e2   :  { %v14657_v54 = vld [vmem:[#allocation7 + $0x1d2c] sm:$0xf0] }
 0x4e3   :  { %v13354_v55 = vld [vmem:[#allocation7 + $0x1f10] sm:$0xf]  ;;  %v13099_v43 = vor.u32 %v14657_v54, %v13098_v8  ;;  %7983 = vmatpush.bf16.msrb.mxu2 %v12843_v3 }
 0x4e4   :  { %v14721_v58 = vld [vmem:[#allocation7 + $0x1f2c] sm:$0xf0] }
 0x4e5   :  { %v12554_v24 = vld [vmem:[#allocation7 + $0x18d0] sm:$0xf]  ;;  %v13355_v5 = vor.u32 %v14721_v58, %v13354_v55  ;;  %7996 = vmatpush.bf16.msrb.mxu3 %v13099_v43  ;;  %v7665_v55 = vadd.f32 %v15648_v7, %v15642_v0 }
 0x4e6   :  { %v14521_v41 = vld [vmem:[#allocation7 + $0x18ec] sm:$0xf0] }
 0x4e7   :  { %v12810_v48 = vld [vmem:[#allocation7 + $0x1ad0] sm:$0xf]  ;;  %v12555_v59 = vor.u32 %v14521_v41, %v12554_v24  ;;  %8009 = vmatpush.bf16.msra.mxu0 %v13355_v5  ;;  %v7678_v43 = vadd.f32 %v15652_v47, %v7665_v55  ;;  %v13845_v47 = vld [vmem:[#allocation7 + $0x3d4] sm:$0xf] }
 0x4e8   :  { %v14585_v25 = vld [vmem:[#allocation7 + $0x1aec] sm:$0xf0]  ;;  %v13901_v55 = vld [vmem:[#allocation7 + $0x594] sm:$0xf] }
 0x4e9   :  { %v13066_v56 = vld [vmem:[#allocation7 + $0x1cd0] sm:$0xf]  ;;  %v12811_v2 = vor.u32 %v14585_v25, %v12810_v48  ;;  %7971 = vmatpush.bf16.msrb.mxu1 %v12555_v59  ;;  %v13781_v25 = vld [vmem:[#allocation7 + $0x1d4] sm:$0xf] }
 0x4ea   :  { %v14649_v52 = vld [vmem:[#allocation7 + $0x1cec] sm:$0xf0] }
 0x4eb   :  { %v13322_v51 = vld [vmem:[#allocation7 + $0x1ed0] sm:$0xf]  ;;  %v13067_v15 = vor.u32 %v14649_v52, %v13066_v56  ;;  %7984 = vmatpush.bf16.msrb.mxu2 %v12811_v2  ;;  %v9612_v56 = vld [vmem:[#allocation7 + $0x1f0] sm:$0xf0]  ;;  %v7744_v2 = vpop.f32.mrf.mxu3 }
 0x4ec   :  { %v14713_v1 = vld [vmem:[#allocation7 + $0x1eec] sm:$0xf0] }
 0x4ed   :  { %v12522_v27 = vld [vmem:[#allocation7 + $0x1890] sm:$0xf]  ;;  %v13323_v6 = vor.u32 %v14713_v1, %v13322_v51  ;;  %7997 = vmatpush.bf16.msrb.mxu3 %v13067_v15  ;;  %v7731_v1 = vpop.f32.mrf.mxu2 }
 0x4ee   :  { %v14513_v4 = vld [vmem:[#allocation7 + $0x18ac] sm:$0xf0] }
 0x4ef   :  { %v12778_v16 = vld [vmem:[#allocation7 + $0x1a90] sm:$0xf]  ;;  %v12523_v53 = vor.u32 %v14513_v4, %v12522_v27  ;;  %8010 = vmatpush.bf16.msra.mxu0 %v13323_v6 }
 0x4f0   :  { %v14577_v10 = vld [vmem:[#allocation7 + $0x1aac] sm:$0xf0] }
 0x4f1   :  { %v13034_v18 = vld [vmem:[#allocation7 + $0x1c90] sm:$0xf]  ;;  %v12779_v17 = vor.u32 %v14577_v10, %v12778_v16  ;;  %7972 = vmatpush.bf16.msrb.mxu1 %v12523_v53  ;;  %v13909_v16 = vld [vmem:[#allocation7 + $0x5d4] sm:$0xf]  ;;  %v7691_v10 = vadd.f32 %v15654_v63, %v7678_v43 }
 0x4f2   :  { %v14641_v19 = vld [vmem:[#allocation7 + $0x1cac] sm:$0xf0]  ;;  %v10380_v53 = vld [vmem:[#allocation7 + $0x7f0] sm:$0xf0] }
 0x4f3   :  { %v13290_v20 = vld [vmem:[#allocation7 + $0x1e90] sm:$0xf]  ;;  %v13035_v12 = vor.u32 %v14641_v19, %v13034_v18  ;;  %7985 = vmatpush.bf16.msrb.mxu2 %v12779_v17  ;;  %v9615_v18 = vor.u32 %v13781_v25, %v9612_v56  ;;  %v7704_v63 = vadd.f32 %v15650_v35, %v7691_v10  ;;  %v13829_v56 = vld [vmem:[#allocation7 + $0x354] sm:$0xf] }
 0x4f4   :  { %v14705_v39 = vld [vmem:[#allocation7 + $0x1eac] sm:$0xf0] }
 0x4f5   :  { %v12490_v50 = vld [vmem:[#allocation7 + $0x1850] sm:$0xf]  ;;  %v13291_v46 = vor.u32 %v14705_v39, %v13290_v20  ;;  %7998 = vmatpush.bf16.msrb.mxu3 %v13035_v12  ;;  %v10124_v20 = vld [vmem:[#allocation7 + $0x5f0] sm:$0xf0] }
 0x4f6   :  { %v14505_v40 = vld [vmem:[#allocation7 + $0x186c] sm:$0xf0]  ;;  %v13973_v39 = vld [vmem:[#allocation7 + $0x7d4] sm:$0xf] }
 0x4f7   :  { %v12746_v31 = vld [vmem:[#allocation7 + $0x1a50] sm:$0xf]  ;;  %v12491_v24 = vor.u32 %v14505_v40, %v12490_v50  ;;  %8011 = vmatpush.bf16.msra.mxu0 %v13291_v46  ;;  %v9871_v50 = vor.u32 %v13845_v47, %v9868_v23  ;;  %v13773_v40 = vld [vmem:[#allocation7 + $0x194] sm:$0xf]  ;;  %v10127_v46 = vor.u32 %v13909_v16, %v10124_v20 }
 0x4f8   :  { %v14569_v8 = vld [vmem:[#allocation7 + $0x1a6c] sm:$0xf0]  ;;  %v9580_v12 = vld [vmem:[#allocation7 + $0x1b0] sm:$0xf0] }
 0x4f9   :  { %v13002_v54 = vld [vmem:[#allocation7 + $0x1c50] sm:$0xf]  ;;  %v12747_v5 = vor.u32 %v14569_v8, %v12746_v31  ;;  %7973 = vmatpush.bf16.msrb.mxu1 %v12491_v24  ;;  %v10383_v31 = vor.u32 %v13973_v39, %v10380_v53  ;;  %v13837_v8 = vld [vmem:[#allocation7 + $0x394] sm:$0xf]  ;;  %v9583_v24 = vor.u32 %v13773_v40, %v9580_v12  ;;  %v7807_v53 = vpop.f32.mrf.mxu0 }
 0x4fa   :  { %v14633_v58 = vld [vmem:[#allocation7 + $0x1c6c] sm:$0xf0]  ;;  %v13821_v47 = vld [vmem:[#allocation7 + $0x314] sm:$0xf] }
 0x4fb   :  { %v13258_v42 = vld [vmem:[#allocation7 + $0x1e50] sm:$0xf]  ;;  %v13003_v52 = vor.u32 %v14633_v58, %v13002_v54  ;;  %7986 = vmatpush.bf16.msrb.mxu2 %v12747_v5  ;;  %v9836_v54 = vld [vmem:[#allocation7 + $0x3b0] sm:$0xf0] }
 0x4fc   :  { %v14697_v3 = vld [vmem:[#allocation7 + $0x1e6c] sm:$0xf0]  ;;  %v10092_v58 = vld [vmem:[#allocation7 + $0x5b0] sm:$0xf0]  ;;  %v9839_v43 = vor.u32 %v13837_v8, %v9836_v54 }
 0x4fd   :  { %v12458_v41 = vld [vmem:[#allocation7 + $0x1810] sm:$0xf]  ;;  %v13259_v51 = vor.u32 %v14697_v3, %v13258_v42  ;;  %7999 = vmatpush.bf16.msrb.mxu3 %v13003_v52  ;;  %v13965_v42 = vld [vmem:[#allocation7 + $0x794] sm:$0xf]  ;;  %v10095_v25 = vor.u32 %v13901_v55, %v10092_v58  ;;  %v8645_v58 = vmax.f32 %v15636_v13, 0.0  ;;  %v7794_v13 = vpop.f32.mrf.mxu3 }
 0x4fe   :  { %v14497_v48 = vld [vmem:[#allocation7 + $0x182c] sm:$0xf0]  ;;  %v10348_v3 = vld [vmem:[#allocation7 + $0x7b0] sm:$0xf0] }
 0x4ff   :  { %v12714_v59 = vld [vmem:[#allocation7 + $0x1a10] sm:$0xf]  ;;  %v12459_v6 = vor.u32 %v14497_v48, %v12458_v41  ;;  %8012 = vmatpush.bf16.msra.mxu0 %v13259_v51  ;;  %v7717_v41 = vadd.f32 %v15660_v45, %v7704_v63  ;;  %v13765_v5 = vld [vmem:[#allocation7 + $0x154] sm:$0xf]  ;;  %v10351_v35 = vor.u32 %v13965_v42, %v10348_v3 }
 0x500   :  { %v14561_v0 = vld [vmem:[#allocation7 + $0x1a2c] sm:$0xf0]  ;;  %v9548_v48 = vld [vmem:[#allocation7 + $0x170] sm:$0xf0] }
 0x501   :  { %v12970_v7 = vld [vmem:[#allocation7 + $0x1c10] sm:$0xf]  ;;  %v12715_v19 = vor.u32 %v14561_v0, %v12714_v59  ;;  %7974 = vmatpush.bf16.msrb.mxu1 %v12459_v6  ;;  %v9804_v52 = vld [vmem:[#allocation7 + $0x370] sm:$0xf0]  ;;  %v7730_v1 = vadd.f32 %v15664_v14, %v7717_v41  ;;  %v7768_v14 = vpop.f32.mrf.mxu1 }
 0x502   :  { %v14625_v27 = vld [vmem:[#allocation7 + $0x1c2c] sm:$0xf0]  ;;  %v13893_v51 = vld [vmem:[#allocation7 + $0x554] sm:$0xf]  ;;  %v9807_v2 = vor.u32 %v13829_v56, %v9804_v52 }
 0x503   :  { %v13226_v4 = vld [vmem:[#allocation7 + $0x1e10] sm:$0xf]  ;;  %v12971_v26 = vor.u32 %v14625_v27, %v12970_v7  ;;  %7987 = vmatpush.bf16.msrb.mxu2 %v12715_v19  ;;  %v10060_v45 = vld [vmem:[#allocation7 + $0x570] sm:$0xf0]  ;;  %v9551_v7 = vor.u32 %v13765_v5, %v9548_v48  ;;  %v7743_v10 = vadd.f32 %v15666_v11, %v7730_v1 }
 0x504   :  { %v14689_v15 = vld [vmem:[#allocation7 + $0x1e2c] sm:$0xf0]  ;;  %7975 = vmatmul.bf16.vlgmr.msrb.gmra.mxu1 %v15545_v32  ;;  %v13957_v59 = vld [vmem:[#allocation7 + $0x754] sm:$0xf] }
 0x505   :  { %v13227_v17 = vor.u32 %v14689_v15, %v13226_v4  ;;  %8019 = vmatpush.bf16.msra.mxu1 %v9615_v18  ;;  %8000 = vmatpush.bf16.msrb.mxu3 %v12971_v26  ;;  %v10316_v0 = vld [vmem:[#allocation7 + $0x770] sm:$0xf0]  ;;  %v10063_v15 = vor.u32 %v13893_v51, %v10060_v45  ;;  %v7756_v54 = vadd.f32 %v15662_v60, %v7743_v10  ;;  %v15682_v41 = vld [vmem:[#allocation13] sm:$0xff]  ;;  %v7781_v60 = vpop.f32.mrf.mxu2 }
 0x506   :  { %7988 = vmatmul.bf16.vlgmr.msrb.gmra.mxu2 %v15547_v22  ;;  %v13757_v27 = vld [vmem:[#allocation7 + $0x114] sm:$0xf]  ;;  %v10319_v6 = vor.u32 %v13957_v59, %v10316_v0 }
 0x507   :  { %8013 = vmatpush.bf16.msra.mxu0 %v13227_v17  ;;  %8032 = vmatpush.bf16.msra.mxu2 %v9871_v50  ;;  %v9516_v4 = vld [vmem:[#allocation7 + $0x130] sm:$0xf0]  ;;  %v7769_v3 = vadd.f32 %v7768_v14, %v7756_v54 }
 0x508   :  { %8001 = vmatmul.bf16.vlgmr.msrb.gmra.mxu3 %v15549_v33  ;;  %v9772_v23 = vld [vmem:[#allocation7 + $0x330] sm:$0xf0]  ;;  %v9519_v39 = vor.u32 %v13757_v27, %v9516_v4 }
 0x509   :  { %8045 = vmatpush.bf16.msra.mxu3 %v10127_v46  ;;  %8020 = vmatpush.bf16.msra.mxu1 %v9583_v24  ;;  %v13885_v16 = vld [vmem:[#allocation7 + $0x514] sm:$0xf]  ;;  %v9775_v26 = vor.u32 %v13821_v47, %v9772_v23  ;;  %v7782_v1 = vadd.f32 %v7781_v60, %v7769_v3 }
 0x50a   :  { %8014 = vmatmul.bf16.vlgmr.msra.gmra.mxu0 %v15552_v9  ;;  %v10028_v18 = vld [vmem:[#allocation7 + $0x530] sm:$0xf0] }
 0x50b   :  { %8058 = vmatpush.bf16.msrb.mxu0 %v10383_v31  ;;  %8033 = vmatpush.bf16.msra.mxu2 %v9839_v43  ;;  %v13949_v19 = vld [vmem:[#allocation7 + $0x714] sm:$0xf]  ;;  %v10031_v40 = vor.u32 %v13885_v16, %v10028_v18  ;;  %v7795_v4 = vadd.f32 %v7794_v13, %v7782_v1 }
 0x50c   :  { %v10284_v20 = vld [vmem:[#allocation7 + $0x730] sm:$0xf0] }
 0x50d   :  { %8046 = vmatpush.bf16.msra.mxu3 %v10095_v25  ;;  %8021 = vmatpush.bf16.msra.mxu1 %v9551_v7  ;;  %v13749_v17 = vld [vmem:[#allocation7 + $0xd4] sm:$0xf]  ;;  %v10287_v12 = vor.u32 %v13949_v19, %v10284_v20  ;;  %v15684_v7 = vmul.f32 3.3333333, %v8645_v58 }
 0x50e   :  { %v9484_v50 = vld [vmem:[#allocation7 + $0xf0] sm:$0xf0] }
 0x50f   :  { %8059 = vmatpush.bf16.msrb.mxu0 %v10351_v35  ;;  %8034 = vmatpush.bf16.msra.mxu2 %v9807_v2  ;;  %v13813_v46 = vld [vmem:[#allocation7 + $0x2d4] sm:$0xf]  ;;  %v9487_v42 = vor.u32 %v13749_v17, %v9484_v50  ;;  %v7770_v35 = vpop.f32.mrf.mxu1  ;;  %v13464_v2 = vxor.u32 2147483648, %v15682_v41 }
 0x510   :  { %v9740_v31 = vld [vmem:[#allocation7 + $0x2f0] sm:$0xf0] }
 0x511   :  { %8047 = vmatpush.bf16.msra.mxu3 %v10063_v15  ;;  %v13877_v8 = vld [vmem:[#allocation7 + $0x4d4] sm:$0xf]  ;;  %8022 = vmatpush.bf16.msra.mxu1 %v9519_v39  ;;  %v9743_v24 = vor.u32 %v13813_v46, %v9740_v31  ;;  %v7809_v15 = vpop.f32.mrf.mxu0  ;;  %v7808_v39 = vadd.f32 %v7807_v53, %v7795_v4  ;;  %vm15688_vm11 = vcmp.ge.s32.totalorder %v13464_v2, 858993459 }
 0x512   :  { %v9996_v11 = vld [vmem:[#allocation7 + $0x4f0] sm:$0xf0] }
 0x513   :  { %8060 = vmatpush.bf16.msrb.mxu0 %v10319_v6  ;;  %v13941_v55 = vld [vmem:[#allocation7 + $0x6d4] sm:$0xf]  ;;  %8035 = vmatpush.bf16.msra.mxu2 %v9775_v26  ;;  %v9999_v48 = vor.u32 %v13877_v8, %v9996_v11  ;;  %v8646_v8 = vmax.f32 %v7808_v39, 0.0 }
 0x514   :  { %v10252_v63 = vld [vmem:[#allocation7 + $0x6f0] sm:$0xf0] }
 0x515   :  { %v13741_v43 = vld [vmem:[#allocation7 + $0x94] sm:$0xf]  ;;  %8048 = vmatpush.bf16.msra.mxu3 %v10031_v40  ;;  %v10255_v25 = vor.u32 %v13941_v55, %v10252_v63  ;;  %8023 = vmatpush.bf16.msra.mxu1 %v9487_v42  ;;  %v7783_v42 = vpop.f32.mrf.mxu2  ;;  %v8662_v41 = vmul.f32 3.3333333, %v8646_v8 }
 0x516   :  { %v9452_v5 = vld [vmem:[#allocation7 + $0xb0] sm:$0xf0] }
 0x517   :  { %8061 = vmatpush.bf16.msrb.mxu0 %v10287_v12  ;;  %v13805_v56 = vld [vmem:[#allocation7 + $0x294] sm:$0xf]  ;;  %v9455_v27 = vor.u32 %v13741_v43, %v9452_v5  ;;  %8036 = vmatpush.bf16.msra.mxu2 %v9743_v24  ;;  %v7796_v43 = vpop.f32.mrf.mxu3 }
 0x518   :  { %v9708_v52 = vld [vmem:[#allocation7 + $0x2b0] sm:$0xf0]  ;;  %v7820_v43 = vpop.f32.mrf.mxu1 }
 0x519   :  { %v13869_v51 = vld [vmem:[#allocation7 + $0x494] sm:$0xf]  ;;  %v9711_v6 = vor.u32 %v13805_v56, %v9708_v52  ;;  %8049 = vmatpush.bf16.msra.mxu3 %v9999_v48  ;;  %8024 = vmatpush.bf16.msra.mxu1 %v9455_v27  ;;  %v8676_v52 = vrot.slane %v15684_v7, 4 }
 0x51a   :  { %v9964_v45 = vld [vmem:[#allocation7 + $0x4b0] sm:$0xf0] }
 0x51b   :  { %v13933_v59 = vld [vmem:[#allocation7 + $0x694] sm:$0xf]  ;;  %8062 = vmatpush.bf16.msrb.mxu0 %v10255_v25  ;;  %v9967_v16 = vor.u32 %v13869_v51, %v9964_v45  ;;  %8037 = vmatpush.bf16.msra.mxu2 %v9711_v6  ;;  %v8677_v51 = vrot.slane %v8662_v41, 2 }
 0x51c   :  { %v10220_v0 = vld [vmem:[#allocation7 + $0x6b0] sm:$0xf0] }
 0x51d   :  { %v13733_v14 = vld [vmem:[#allocation7 + $0x54] sm:$0xf]  ;;  %v10223_v10 = vor.u32 %v13933_v59, %v10220_v0  ;;  %8050 = vmatpush.bf16.msra.mxu3 %v9967_v16  ;;  %v8683_v15 = vsel %vm8682_vm10, %v8676_v52, %v8677_v51  ;;  %v14827_v51 = vld [vmem:[#allocation8] sm:$0xff] }
 0x51e   :  { %v9420_v47 = vld [vmem:[#allocation7 + $0x70] sm:$0xf0] }
 0x51f   :  { %v13797_v23 = vld [vmem:[#allocation7 + $0x254] sm:$0xf]  ;;  %v9423_v40 = vor.u32 %v13733_v14, %v9420_v47  ;;  %8063 = vmatpush.bf16.msrb.mxu0 %v10223_v10 }
 0x520   :  { %v9676_v18 = vld [vmem:[#allocation7 + $0x270] sm:$0xf0] }
 0x521   :  { %v13861_v19 = vld [vmem:[#allocation7 + $0x454] sm:$0xf]  ;;  %v9679_v54 = vor.u32 %v13797_v23, %v9676_v18  ;;  %8025 = vmatpush.bf16.msra.mxu1 %v9423_v40  ;;  %v8684_v23 = vsel %vm717_vm8, %v15609_v61, %v8683_v15 }
 0x522   :  { %v9932_v20 = vld [vmem:[#allocation7 + $0x470] sm:$0xf0] }
 0x523   :  { %v13925_v26 = vld [vmem:[#allocation7 + $0x654] sm:$0xf]  ;;  %v9935_v63 = vor.u32 %v13861_v19, %v9932_v20  ;;  %8038 = vmatpush.bf16.msra.mxu2 %v9679_v54  ;;  %v8690_v20 = vsel %vm15688_vm11, %v8684_v23, 0.0 }
 0x524   :  { %v10188_v17 = vld [vmem:[#allocation7 + $0x670] sm:$0xf0]  ;;  %8694 = vst [vmem:[#allocation1] ss:$4 sm:$0xff] %v8690_v20 }
 0x525   :  { %v13725_v50 = vld [vmem:[#allocation7 + $0x14] sm:$0xf]  ;;  %v10191_v58 = vor.u32 %v13925_v26, %v10188_v17  ;;  %8051 = vmatpush.bf16.msra.mxu3 %v9935_v63 }
 0x526   :  { %v9388_v12 = vld [vmem:[#allocation7 + $0x30] sm:$0xf0] }
 0x527   :  { %v14037_v46 = vld [vmem:[#allocation7 + $0x9d4] sm:$0xf]  ;;  %v9391_v25 = vor.u32 %v13725_v50, %v9388_v12  ;;  %8064 = vmatpush.bf16.msrb.mxu0 %v10191_v58 }
 0x528   :  { %v10636_v31 = vld [vmem:[#allocation7 + $0x9f0] sm:$0xf0] }
 0x529   :  { %v13789_v11 = vld [vmem:[#allocation7 + $0x214] sm:$0xf]  ;;  %v10639_v1 = vor.u32 %v14037_v46, %v10636_v31  ;;  %8026 = vmatpush.bf16.msra.mxu1 %v9391_v25 }
 0x52a   :  { %v9644_v55 = vld [vmem:[#allocation7 + $0x230] sm:$0xf0] }
 0x52b   :  { %v13853_v53 = vld [vmem:[#allocation7 + $0x414] sm:$0xf]  ;;  %v9647_v13 = vor.u32 %v13789_v11, %v9644_v55 }
 0x52c   :  { %v9900_v3 = vld [vmem:[#allocation7 + $0x430] sm:$0xf0]  ;;  %8027 = vmatmul.bf16.vlgmr.msra.gmra.mxu1 %v15506_v21 }
 0x52d   :  { %v13917_v24 = vld [vmem:[#allocation7 + $0x614] sm:$0xf]  ;;  %v9903_v27 = vor.u32 %v13853_v53, %v9900_v3  ;;  %8071 = vmatpush.bf16.msrb.mxu1 %v10639_v1  ;;  %8039 = vmatpush.bf16.msra.mxu2 %v9647_v13  ;;  %v1847_v1 = vperm.slane %v14827_v51, 4  ;;  %v7859_v13 = vpop.f32.mrf.mxu0 }
 0x52e   :  { %v10156_v5 = vld [vmem:[#allocation7 + $0x630] sm:$0xf0] }
 0x52f   :  { %v14101_v48 = vld [vmem:[#allocation7 + $0xbd4] sm:$0xf]  ;;  %v10159_v4 = vor.u32 %v13917_v24, %v10156_v5  ;;  %8052 = vmatpush.bf16.msra.mxu3 %v9903_v27 }
 0x530   :  { %v10892_v35 = vld [vmem:[#allocation7 + $0xbf0] sm:$0xf0]  ;;  %8040 = vmatmul.bf16.vlgmr.msra.gmra.mxu2 %v15508_v29 }
 0x531   :  { %v14165_v60 = vld [vmem:[#allocation7 + $0xdd4] sm:$0xf]  ;;  %v10895_v6 = vor.u32 %v14101_v48, %v10892_v35  ;;  %8065 = vmatpush.bf16.msrb.mxu0 %v10159_v4 }
 0x532   :  { %v11148_v56 = vld [vmem:[#allocation7 + $0xdf0] sm:$0xf0]  ;;  %8053 = vmatmul.bf16.vlgmr.msra.gmra.mxu3 %v15510_v36 }
 0x533   :  { %v14229_v45 = vld [vmem:[#allocation7 + $0xfd4] sm:$0xf]  ;;  %v11151_v16 = vor.u32 %v14165_v60, %v11148_v56  ;;  %8084 = vmatpush.bf16.msrb.mxu2 %v10895_v6 }
 0x534   :  { %v11404_v59 = vld [vmem:[#allocation7 + $0xff0] sm:$0xf0]  ;;  %8066 = vmatmul.bf16.vlgmr.msrb.gmra.mxu0 %v15512_v38 }
 0x535   :  { %v14029_v14 = vld [vmem:[#allocation7 + $0x994] sm:$0xf]  ;;  %v11407_v10 = vor.u32 %v14229_v45, %v11404_v59  ;;  %8097 = vmatpush.bf16.msrb.mxu3 %v11151_v16 }
 0x536   :  { %v10604_v47 = vld [vmem:[#allocation7 + $0x9b0] sm:$0xf0] }
 0x537   :  { %v14093_v7 = vld [vmem:[#allocation7 + $0xb94] sm:$0xf]  ;;  %v10607_v17 = vor.u32 %v14029_v14, %v10604_v47  ;;  %8110 = vmatpush.bf16.msra.mxu0 %v11407_v10  ;;  %v7821_v10 = vadd.f32 %v7820_v43, %v1847_v1 }
 0x538   :  { %v10860_v2 = vld [vmem:[#allocation7 + $0xbb0] sm:$0xf0] }
 0x539   :  { %v14157_v18 = vld [vmem:[#allocation7 + $0xd94] sm:$0xf]  ;;  %v10863_v61 = vor.u32 %v14093_v7, %v10860_v2  ;;  %8072 = vmatpush.bf16.msrb.mxu1 %v10607_v17  ;;  %v7833_v17 = vpop.f32.mrf.mxu2 }
 0x53a   :  { %v11116_v19 = vld [vmem:[#allocation7 + $0xdb0] sm:$0xf0] }
 0x53b   :  { %v14221_v39 = vld [vmem:[#allocation7 + $0xf94] sm:$0xf]  ;;  %v11119_v12 = vor.u32 %v14157_v18, %v11116_v19  ;;  %8085 = vmatpush.bf16.msrb.mxu2 %v10863_v61 }
 0x53c   :  { %v11372_v26 = vld [vmem:[#allocation7 + $0xfb0] sm:$0xf0] }
 0x53d   :  { %v14021_v50 = vld [vmem:[#allocation7 + $0x954] sm:$0xf]  ;;  %v11375_v46 = vor.u32 %v14221_v39, %v11372_v26  ;;  %8098 = vmatpush.bf16.msrb.mxu3 %v11119_v12  ;;  %v7822_v26 = vpop.f32.mrf.mxu1  ;;  %v7834_v12 = vadd.f32 %v7833_v17, %v7821_v10 }
 0x53e   :  { %v10572_v40 = vld [vmem:[#allocation7 + $0x970] sm:$0xf0] }
 0x53f   :  { %v14085_v31 = vld [vmem:[#allocation7 + $0xb54] sm:$0xf]  ;;  %v10575_v58 = vor.u32 %v14021_v50, %v10572_v40  ;;  %8111 = vmatpush.bf16.msra.mxu0 %v11375_v46  ;;  %v7846_v46 = vpop.f32.mrf.mxu3 }
 0x540   :  { %v10828_v8 = vld [vmem:[#allocation7 + $0xb70] sm:$0xf0] }
 0x541   :  { %v14149_v54 = vld [vmem:[#allocation7 + $0xd54] sm:$0xf]  ;;  %v10831_v42 = vor.u32 %v14085_v31, %v10828_v8  ;;  %8073 = vmatpush.bf16.msrb.mxu1 %v10575_v58 }
 0x542   :  { %v11084_v11 = vld [vmem:[#allocation7 + $0xd70] sm:$0xf0] }
 0x543   :  { %v14213_v55 = vld [vmem:[#allocation7 + $0xf54] sm:$0xf]  ;;  %v11087_v24 = vor.u32 %v14149_v54, %v11084_v11  ;;  %8086 = vmatpush.bf16.msrb.mxu2 %v10831_v42 }
 0x544   :  { %v11340_v63 = vld [vmem:[#allocation7 + $0xf70] sm:$0xf0] }
 0x545   :  { %v14013_v53 = vld [vmem:[#allocation7 + $0x914] sm:$0xf]  ;;  %v11343_v41 = vor.u32 %v14213_v55, %v11340_v63  ;;  %8099 = vmatpush.bf16.msrb.mxu3 %v11087_v24  ;;  %v7847_v55 = vadd.f32 %v7846_v46, %v7834_v12  ;;  %v7861_v63 = vpop.f32.mrf.mxu0 }
 0x546   :  { %v10540_v3 = vld [vmem:[#allocation7 + $0x930] sm:$0xf0] }
 0x547   :  { %v14077_v5 = vld [vmem:[#allocation7 + $0xb14] sm:$0xf]  ;;  %v10543_v52 = vor.u32 %v14013_v53, %v10540_v3  ;;  %8112 = vmatpush.bf16.msra.mxu0 %v11343_v41 }
 0x548   :  { %v10796_v48 = vld [vmem:[#allocation7 + $0xb30] sm:$0xf0] }
 0x549   :  { %v14141_v25 = vld [vmem:[#allocation7 + $0xd14] sm:$0xf]  ;;  %v10799_v45 = vor.u32 %v14077_v5, %v10796_v48  ;;  %8074 = vmatpush.bf16.msrb.mxu1 %v10543_v52 }
 0x54a   :  { %v11052_v35 = vld [vmem:[#allocation7 + $0xd30] sm:$0xf0] }
 0x54b   :  { %v14205_v60 = vld [vmem:[#allocation7 + $0xf14] sm:$0xf]  ;;  %v11055_v27 = vor.u32 %v14141_v25, %v11052_v35  ;;  %8087 = vmatpush.bf16.msrb.mxu2 %v10799_v45 }
 0x54c   :  { %v11308_v56 = vld [vmem:[#allocation7 + $0xf30] sm:$0xf0] }
 0x54d   :  { %v14005_v59 = vld [vmem:[#allocation7 + $0x8d4] sm:$0xf]  ;;  %v11311_v4 = vor.u32 %v14205_v60, %v11308_v56  ;;  %8100 = vmatpush.bf16.msrb.mxu3 %v11055_v27  ;;  %v15701_v60 = vadd.f32 %v7859_v13, %v7847_v55 }
 0x54e   :  { %v10508_v0 = vld [vmem:[#allocation7 + $0x8f0] sm:$0xf0] }
 0x54f   :  { %v14069_v15 = vld [vmem:[#allocation7 + $0xad4] sm:$0xf]  ;;  %v10511_v16 = vor.u32 %v14005_v59, %v10508_v0  ;;  %8113 = vmatpush.bf16.msra.mxu0 %v11311_v4  ;;  %v7835_v4 = vpop.f32.mrf.mxu2 }
 0x550   :  { %v10764_v6 = vld [vmem:[#allocation7 + $0xaf0] sm:$0xf0] }
 0x551   :  { %v14133_v14 = vld [vmem:[#allocation7 + $0xcd4] sm:$0xf]  ;;  %v10767_v2 = vor.u32 %v14069_v15, %v10764_v6  ;;  %8075 = vmatpush.bf16.msrb.mxu1 %v10511_v16 }
 0x552   :  { %v11020_v47 = vld [vmem:[#allocation7 + $0xcf0] sm:$0xf0] }
 0x553   :  { %v14197_v7 = vld [vmem:[#allocation7 + $0xed4] sm:$0xf]  ;;  %v11023_v20 = vor.u32 %v14133_v14, %v11020_v47  ;;  %8088 = vmatpush.bf16.msrb.mxu2 %v10767_v2  ;;  %v7848_v47 = vpop.f32.mrf.mxu3 }
 0x554   :  { %v11276_v23 = vld [vmem:[#allocation7 + $0xef0] sm:$0xf0] }
 0x555   :  { %v13997_v18 = vld [vmem:[#allocation7 + $0x894] sm:$0xf]  ;;  %v11279_v39 = vor.u32 %v14197_v7, %v11276_v23  ;;  %8101 = vmatpush.bf16.msrb.mxu3 %v11023_v20 }
 0x556   :  { %v10476_v19 = vld [vmem:[#allocation7 + $0x8b0] sm:$0xf0] }
 0x557   :  { %v14061_v61 = vld [vmem:[#allocation7 + $0xa94] sm:$0xf]  ;;  %v10479_v11 = vor.u32 %v13997_v18, %v10476_v19  ;;  %8114 = vmatpush.bf16.msra.mxu0 %v11279_v39 }
 0x558   :  { %v10732_v50 = vld [vmem:[#allocation7 + $0xab0] sm:$0xf0] }
 0x559   :  { %v14125_v40 = vld [vmem:[#allocation7 + $0xc94] sm:$0xf]  ;;  %v10735_v58 = vor.u32 %v14061_v61, %v10732_v50  ;;  %8076 = vmatpush.bf16.msrb.mxu1 %v10479_v11 }
 0x55a   :  { %v10988_v31 = vld [vmem:[#allocation7 + $0xcb0] sm:$0xf0] }
 0x55b   :  { %v14189_v8 = vld [vmem:[#allocation7 + $0xe94] sm:$0xf]  ;;  %v10991_v3 = vor.u32 %v14125_v40, %v10988_v31  ;;  %8089 = vmatpush.bf16.msrb.mxu2 %v10735_v58 }
 0x55c   :  { %v11244_v54 = vld [vmem:[#allocation7 + $0xeb0] sm:$0xf0] }
 0x55d   :  { %v13989_v42 = vld [vmem:[#allocation7 + $0x854] sm:$0xf]  ;;  %v11247_v24 = vor.u32 %v14189_v8, %v11244_v54  ;;  %8102 = vmatpush.bf16.msrb.mxu3 %v10991_v3 }
 0x55e   :  { %v10444_v53 = vld [vmem:[#allocation7 + $0x870] sm:$0xf0] }
 0x55f   :  { %v14053_v41 = vld [vmem:[#allocation7 + $0xa54] sm:$0xf]  ;;  %v10447_v56 = vor.u32 %v13989_v42, %v10444_v53  ;;  %8115 = vmatpush.bf16.msra.mxu0 %v11247_v24 }
 0x560   :  { %v10700_v43 = vld [vmem:[#allocation7 + $0xa70] sm:$0xf0] }
 0x561   :  { %v14117_v5 = vld [vmem:[#allocation7 + $0xc54] sm:$0xf]  ;;  %v10703_v51 = vor.u32 %v14053_v41, %v10700_v43  ;;  %8077 = vmatpush.bf16.msrb.mxu1 %v10447_v56 }
 0x562   :  { %v10956_v48 = vld [vmem:[#allocation7 + $0xc70] sm:$0xf0] }
 0x563   :  { %v14181_v25 = vld [vmem:[#allocation7 + $0xe54] sm:$0xf]  ;;  %v10959_v0 = vor.u32 %v14117_v5, %v10956_v48  ;;  %8090 = vmatpush.bf16.msrb.mxu2 %v10703_v51 }
 0x564   :  { %v11212_v35 = vld [vmem:[#allocation7 + $0xe70] sm:$0xf0] }
 0x565   :  { %v13981_v52 = vld [vmem:[#allocation7 + $0x814] sm:$0xf]  ;;  %v11215_v27 = vor.u32 %v14181_v25, %v11212_v35  ;;  %8103 = vmatpush.bf16.msrb.mxu3 %v10959_v0 }
 0x566   :  { %v10412_v1 = vld [vmem:[#allocation7 + $0x830] sm:$0xf0] }
 0x567   :  { %v14293_v45 = vld [vmem:[#allocation7 + $0x11d4] sm:$0xf]  ;;  %v10415_v16 = vor.u32 %v13981_v52, %v10412_v1  ;;  %8116 = vmatpush.bf16.msra.mxu0 %v11215_v27 }
 0x568   :  { %v11660_v59 = vld [vmem:[#allocation7 + $0x11f0] sm:$0xf0] }
 0x569   :  { %v14045_v15 = vld [vmem:[#allocation7 + $0xa14] sm:$0xf]  ;;  %v11663_v19 = vor.u32 %v14293_v45, %v11660_v59  ;;  %8078 = vmatpush.bf16.msrb.mxu1 %v10415_v16 }
 0x56a   :  { %v10668_v6 = vld [vmem:[#allocation7 + $0xa30] sm:$0xf0] }
 0x56b   :  { %v14109_v14 = vld [vmem:[#allocation7 + $0xc14] sm:$0xf]  ;;  %v10671_v20 = vor.u32 %v14045_v15, %v10668_v6  ;;  %v7872_v15 = vpop.f32.mrf.mxu1 }
 0x56c   :  { %v10924_v7 = vld [vmem:[#allocation7 + $0xc30] sm:$0xf0]  ;;  %8079 = vmatmul.bf16.vlgmr.msrb.gmra.mxu1 %v15519_v44 }
 0x56d   :  { %v14173_v13 = vld [vmem:[#allocation7 + $0xe14] sm:$0xf]  ;;  %v10927_v61 = vor.u32 %v14109_v14, %v10924_v7  ;;  %8123 = vmatpush.bf16.msra.mxu1 %v11663_v19  ;;  %8091 = vmatpush.bf16.msrb.mxu2 %v10671_v20  ;;  %v7873_v7 = vadd.f32 %v7872_v15, %v15701_v60 }
 0x56e   :  { %v11180_v23 = vld [vmem:[#allocation7 + $0xe30] sm:$0xf0] }
 0x56f   :  { %v14357_v10 = vld [vmem:[#allocation7 + $0x13d4] sm:$0xf]  ;;  %v11183_v50 = vor.u32 %v14173_v13, %v11180_v23  ;;  %8104 = vmatpush.bf16.msrb.mxu3 %v10927_v61 }
 0x570   :  { %v11916_v2 = vld [vmem:[#allocation7 + $0x13f0] sm:$0xf0]  ;;  %8092 = vmatmul.bf16.vlgmr.msrb.gmra.mxu2 %v15521_v34 }
 0x571   :  { %v14421_v18 = vld [vmem:[#allocation7 + $0x15d4] sm:$0xf]  ;;  %v11919_v40 = vor.u32 %v14357_v10, %v11916_v2  ;;  %8117 = vmatpush.bf16.msra.mxu0 %v11183_v50  ;;  %v7911_v2 = vpop.f32.mrf.mxu0 }
 0x572   :  { %v12172_v39 = vld [vmem:[#allocation7 + $0x15f0] sm:$0xf0]  ;;  %8105 = vmatmul.bf16.vlgmr.msrb.gmra.mxu3 %v15523_v28 }
 0x573   :  { %v14485_v26 = vld [vmem:[#allocation7 + $0x17d4] sm:$0xf]  ;;  %v12175_v31 = vor.u32 %v14421_v18, %v12172_v39  ;;  %8136 = vmatpush.bf16.msra.mxu2 %v11919_v40 }
 0x574   :  { %v12428_v17 = vld [vmem:[#allocation7 + $0x17f0] sm:$0xf0]  ;;  %8118 = vmatmul.bf16.vlgmr.msra.gmra.mxu0 %v15525_v49 }
 0x575   :  { %v14285_v12 = vld [vmem:[#allocation7 + $0x1194] sm:$0xf]  ;;  %v12431_v8 = vor.u32 %v14485_v26, %v12428_v17  ;;  %8149 = vmatpush.bf16.msra.mxu3 %v12175_v31 }
 0x576   :  { %v11628_v46 = vld [vmem:[#allocation7 + $0x11b0] sm:$0xf0] }
 0x577   :  { %v14349_v54 = vld [vmem:[#allocation7 + $0x1394] sm:$0xf]  ;;  %v11631_v53 = vor.u32 %v14285_v12, %v11628_v46  ;;  %8162 = vmatpush.bf16.msrb.mxu0 %v12431_v8 }
 0x578   :  { %v11884_v11 = vld [vmem:[#allocation7 + $0x13b0] sm:$0xf0] }
 0x579   :  { %v14413_v55 = vld [vmem:[#allocation7 + $0x1594] sm:$0xf]  ;;  %v11887_v3 = vor.u32 %v14349_v54, %v11884_v11  ;;  %8124 = vmatpush.bf16.msra.mxu1 %v11631_v53 }
 0x57a   :  { %v12140_v63 = vld [vmem:[#allocation7 + $0x15b0] sm:$0xf0] }
 0x57b   :  { %v14477_v58 = vld [vmem:[#allocation7 + $0x1794] sm:$0xf]  ;;  %v12143_v43 = vor.u32 %v14413_v55, %v12140_v63  ;;  %8137 = vmatpush.bf16.msra.mxu2 %v11887_v3  ;;  %v7874_v63 = vpop.f32.mrf.mxu1 }
 0x57c   :  { %v12396_v42 = vld [vmem:[#allocation7 + $0x17b0] sm:$0xf0] }
 0x57d   :  { %v14277_v24 = vld [vmem:[#allocation7 + $0x1154] sm:$0xf]  ;;  %v12399_v5 = vor.u32 %v14477_v58, %v12396_v42  ;;  %8150 = vmatpush.bf16.msra.mxu3 %v12143_v43  ;;  %v7885_v58 = vpop.f32.mrf.mxu2 }
 0x57e   :  { %v11596_v41 = vld [vmem:[#allocation7 + $0x1170] sm:$0xf0] }
 0x57f   :  { %v14341_v48 = vld [vmem:[#allocation7 + $0x1354] sm:$0xf]  ;;  %v11599_v1 = vor.u32 %v14277_v24, %v11596_v41  ;;  %8163 = vmatpush.bf16.msrb.mxu0 %v12399_v5  ;;  %v7886_v24 = vadd.f32 %v7885_v58, %v7873_v7  ;;  %v7898_v41 = vpop.f32.mrf.mxu3 }
 0x580   :  { %v11852_v25 = vld [vmem:[#allocation7 + $0x1370] sm:$0xf0] }
 0x581   :  { %v14405_v35 = vld [vmem:[#allocation7 + $0x1554] sm:$0xf]  ;;  %v11855_v45 = vor.u32 %v14341_v48, %v11852_v25  ;;  %8125 = vmatpush.bf16.msra.mxu1 %v11599_v1 }
 0x582   :  { %v12108_v56 = vld [vmem:[#allocation7 + $0x1570] sm:$0xf0] }
 0x583   :  { %v14469_v52 = vld [vmem:[#allocation7 + $0x1754] sm:$0xf]  ;;  %v12111_v27 = vor.u32 %v14405_v35, %v12108_v56  ;;  %8138 = vmatpush.bf16.msra.mxu2 %v11855_v45  ;;  %v7899_v35 = vadd.f32 %v7898_v41, %v7886_v24  ;;  %v7913_v56 = vpop.f32.mrf.mxu0 }
 0x584   :  { %v12364_v51 = vld [vmem:[#allocation7 + $0x1770] sm:$0xf0] }
 0x585   :  { %v14269_v59 = vld [vmem:[#allocation7 + $0x1114] sm:$0xf]  ;;  %v12367_v4 = vor.u32 %v14469_v52, %v12364_v51  ;;  %8151 = vmatpush.bf16.msra.mxu3 %v12111_v27 }
 0x586   :  { %v11564_v0 = vld [vmem:[#allocation7 + $0x1130] sm:$0xf0] }
 0x587   :  { %v14333_v6 = vld [vmem:[#allocation7 + $0x1314] sm:$0xf]  ;;  %v11567_v10 = vor.u32 %v14269_v59, %v11564_v0  ;;  %8164 = vmatpush.bf16.msrb.mxu0 %v12367_v4 }
 0x588   :  { %v11820_v14 = vld [vmem:[#allocation7 + $0x1330] sm:$0xf0] }
 0x589   :  { %v14397_v47 = vld [vmem:[#allocation7 + $0x1514] sm:$0xf]  ;;  %v11823_v18 = vor.u32 %v14333_v6, %v11820_v14  ;;  %8126 = vmatpush.bf16.msra.mxu1 %v11567_v10 }
 0x58a   :  { %v12076_v13 = vld [vmem:[#allocation7 + $0x1530] sm:$0xf0] }
 0x58b   :  { %v14461_v23 = vld [vmem:[#allocation7 + $0x1714] sm:$0xf]  ;;  %v12079_v39 = vor.u32 %v14397_v47, %v12076_v13  ;;  %8139 = vmatpush.bf16.msra.mxu2 %v11823_v18  ;;  %v15708_v47 = vadd.f32 %v7911_v2, %v7899_v35 }
 0x58c   :  { %v12332_v16 = vld [vmem:[#allocation7 + $0x1730] sm:$0xf0] }
 0x58d   :  { %v14261_v19 = vld [vmem:[#allocation7 + $0x10d4] sm:$0xf]  ;;  %v12335_v26 = vor.u32 %v14461_v23, %v12332_v16  ;;  %8152 = vmatpush.bf16.msra.mxu3 %v12079_v39  ;;  %v7887_v39 = vpop.f32.mrf.mxu2 }
 0x58e   :  { %v11532_v20 = vld [vmem:[#allocation7 + $0x10f0] sm:$0xf0] }
 0x58f   :  { %v14325_v17 = vld [vmem:[#allocation7 + $0x12d4] sm:$0xf]  ;;  %v11535_v46 = vor.u32 %v14261_v19, %v11532_v20  ;;  %8165 = vmatpush.bf16.msrb.mxu0 %v12335_v26 }
 0x590   :  { %v11788_v61 = vld [vmem:[#allocation7 + $0x12f0] sm:$0xf0] }
 0x591   :  { %v14389_v50 = vld [vmem:[#allocation7 + $0x14d4] sm:$0xf]  ;;  %v11791_v31 = vor.u32 %v14325_v17, %v11788_v61  ;;  %8127 = vmatpush.bf16.msra.mxu1 %v11535_v46 }
 0x592   :  { %v12044_v40 = vld [vmem:[#allocation7 + $0x14f0] sm:$0xf0] }
 0x593   :  { %v14453_v12 = vld [vmem:[#allocation7 + $0x16d4] sm:$0xf]  ;;  %v12047_v11 = vor.u32 %v14389_v50, %v12044_v40  ;;  %8140 = vmatpush.bf16.msra.mxu2 %v11791_v31  ;;  %v7900_v50 = vpop.f32.mrf.mxu3 }
 0x594   :  { %v12300_v60 = vld [vmem:[#allocation7 + $0x16f0] sm:$0xf0] }
 0x595   :  { %v14253_v8 = vld [vmem:[#allocation7 + $0x1094] sm:$0xf]  ;;  %v12303_v55 = vor.u32 %v14453_v12, %v12300_v60  ;;  %8153 = vmatpush.bf16.msra.mxu3 %v12047_v11 }
 0x596   :  { %v11500_v54 = vld [vmem:[#allocation7 + $0x10b0] sm:$0xf0] }
 0x597   :  { %v14317_v42 = vld [vmem:[#allocation7 + $0x1294] sm:$0xf]  ;;  %v11503_v25 = vor.u32 %v14253_v8, %v11500_v54  ;;  %8166 = vmatpush.bf16.msrb.mxu0 %v12303_v55 }
 0x598   :  { %v11756_v53 = vld [vmem:[#allocation7 + $0x12b0] sm:$0xf0] }
 0x599   :  { %v14381_v3 = vld [vmem:[#allocation7 + $0x1494] sm:$0xf]  ;;  %v11759_v52 = vor.u32 %v14317_v42, %v11756_v53  ;;  %8128 = vmatpush.bf16.msra.mxu1 %v11503_v25 }
 0x59a   :  { %v12012_v43 = vld [vmem:[#allocation7 + $0x14b0] sm:$0xf0] }
 0x59b   :  { %v14445_v5 = vld [vmem:[#allocation7 + $0x1694] sm:$0xf]  ;;  %v12015_v45 = vor.u32 %v14381_v3, %v12012_v43  ;;  %8141 = vmatpush.bf16.msra.mxu2 %v11759_v52 }
 0x59c   :  { %v12268_v48 = vld [vmem:[#allocation7 + $0x16b0] sm:$0xf0] }
 0x59d   :  { %v14245_v51 = vld [vmem:[#allocation7 + $0x1054] sm:$0xf]  ;;  %v12271_v59 = vor.u32 %v14445_v5, %v12268_v48  ;;  %8154 = vmatpush.bf16.msra.mxu3 %v12015_v45 }
 0x59e   :  { %v11468_v1 = vld [vmem:[#allocation7 + $0x1070] sm:$0xf0] }
 0x59f   :  { %v14309_v0 = vld [vmem:[#allocation7 + $0x1254] sm:$0xf]  ;;  %v11471_v7 = vor.u32 %v14245_v51, %v11468_v1  ;;  %8167 = vmatpush.bf16.msrb.mxu0 %v12271_v59 }
 0x5a0   :  { %v11724_v27 = vld [vmem:[#allocation7 + $0x1270] sm:$0xf0] }
 0x5a1   :  { %v14373_v4 = vld [vmem:[#allocation7 + $0x1454] sm:$0xf]  ;;  %v11727_v23 = vor.u32 %v14309_v0, %v11724_v27  ;;  %8129 = vmatpush.bf16.msra.mxu1 %v11471_v7 }
 0x5a2   :  { %v11980_v15 = vld [vmem:[#allocation7 + $0x1470] sm:$0xf0] }
 0x5a3   :  { %v14437_v6 = vld [vmem:[#allocation7 + $0x1654] sm:$0xf]  ;;  %v11983_v19 = vor.u32 %v14373_v4, %v11980_v15  ;;  %8142 = vmatpush.bf16.msra.mxu2 %v11727_v23 }
 0x5a4   :  { %v12236_v14 = vld [vmem:[#allocation7 + $0x1670] sm:$0xf0] }
 0x5a5   :  { %v14237_v13 = vld [vmem:[#allocation7 + $0x1014] sm:$0xf]  ;;  %v12239_v20 = vor.u32 %v14437_v6, %v12236_v14  ;;  %8155 = vmatpush.bf16.msra.mxu3 %v11983_v19 }
 0x5a6   :  { %v11436_v16 = vld [vmem:[#allocation7 + $0x1030] sm:$0xf0] }
 0x5a7   :  { %v14549_v10 = vld [vmem:[#allocation7 + $0x19d4] sm:$0xf]  ;;  %v11439_v60 = vor.u32 %v14237_v13, %v11436_v16  ;;  %8168 = vmatpush.bf16.msrb.mxu0 %v12239_v20 }
 0x5a8   :  { %v12684_v18 = vld [vmem:[#allocation7 + $0x19f0] sm:$0xf0] }
 0x5a9   :  { %v14301_v26 = vld [vmem:[#allocation7 + $0x1214] sm:$0xf]  ;;  %v12687_v54 = vor.u32 %v14549_v10, %v12684_v18  ;;  %8130 = vmatpush.bf16.msra.mxu1 %v11439_v60 }
 0x5aa   :  { %v11692_v17 = vld [vmem:[#allocation7 + $0x1230] sm:$0xf0] }
 0x5ab   :  { %v14365_v61 = vld [vmem:[#allocation7 + $0x1414] sm:$0xf]  ;;  %v11695_v11 = vor.u32 %v14301_v26, %v11692_v17  ;;  %v7924_v26 = vpop.f32.mrf.mxu1 }
 0x5ac   :  { %v11948_v40 = vld [vmem:[#allocation7 + $0x1430] sm:$0xf0]  ;;  %8131 = vmatmul.bf16.vlgmr.msra.gmra.mxu1 %v15532_v57 }
 0x5ad   :  { %v14429_v2 = vld [vmem:[#allocation7 + $0x1614] sm:$0xf]  ;;  %v11951_v42 = vor.u32 %v14365_v61, %v11948_v40  ;;  %8175 = vmatpush.bf16.msrb.mxu1 %v12687_v54  ;;  %8143 = vmatpush.bf16.msra.mxu2 %v11695_v11  ;;  %v7925_v40 = vadd.f32 %v7924_v26, %v15708_v47 }
 0x5ae   :  { %v12204_v12 = vld [vmem:[#allocation7 + $0x1630] sm:$0xf0] }
 0x5af   :  { %v14613_v46 = vld [vmem:[#allocation7 + $0x1bd4] sm:$0xf]  ;;  %v12207_v53 = vor.u32 %v14429_v2, %v12204_v12  ;;  %8156 = vmatpush.bf16.msra.mxu3 %v11951_v42 }
 0x5b0   :  { %v12940_v31 = vld [vmem:[#allocation7 + $0x1bf0] sm:$0xf0]  ;;  %8144 = vmatmul.bf16.vlgmr.msra.gmra.mxu2 %v15534_v62 }
 0x5b1   :  { %v14677_v8 = vld [vmem:[#allocation7 + $0x1dd4] sm:$0xf]  ;;  %v12943_v3 = vor.u32 %v14613_v46, %v12940_v31  ;;  %8169 = vmatpush.bf16.msrb.mxu0 %v12207_v53  ;;  %v7963_v31 = vpop.f32.mrf.mxu0 }
 0x5b2   :  { %v13196_v55 = vld [vmem:[#allocation7 + $0x1df0] sm:$0xf0]  ;;  %8157 = vmatmul.bf16.vlgmr.msra.gmra.mxu3 %v15536_v37 }
 0x5b3   :  { %v14741_v63 = vld [vmem:[#allocation7 + $0x1fd4] sm:$0xf]  ;;  %v13199_v43 = vor.u32 %v14677_v8, %v13196_v55  ;;  %8188 = vmatpush.bf16.msrb.mxu2 %v12943_v3 }
 0x5b4   :  { %v13452_v58 = vld [vmem:[#allocation7 + $0x1ff0] sm:$0xf0]  ;;  %8170 = vmatmul.bf16.vlgmr.msrb.gmra.mxu0 %v15538_v30 }
 0x5b5   :  { %v14541_v24 = vld [vmem:[#allocation7 + $0x1994] sm:$0xf]  ;;  %v13455_v5 = vor.u32 %v14741_v63, %v13452_v58  ;;  %8201 = vmatpush.bf16.msrb.mxu3 %v13199_v43 }
 0x5b6   :  { %v12652_v41 = vld [vmem:[#allocation7 + $0x19b0] sm:$0xf0] }
 0x5b7   :  { %v14605_v48 = vld [vmem:[#allocation7 + $0x1b94] sm:$0xf]  ;;  %v12655_v1 = vor.u32 %v14541_v24, %v12652_v41  ;;  %8214 = vmatpush.bf16.msra.mxu0 %v13455_v5 }
 0x5b8   :  { %v12908_v25 = vld [vmem:[#allocation7 + $0x1bb0] sm:$0xf0] }
 0x5b9   :  { %v14669_v35 = vld [vmem:[#allocation7 + $0x1d94] sm:$0xf]  ;;  %v12911_v45 = vor.u32 %v14605_v48, %v12908_v25  ;;  %8176 = vmatpush.bf16.msrb.mxu1 %v12655_v1 }
 0x5ba   :  { %v13164_v56 = vld [vmem:[#allocation7 + $0x1db0] sm:$0xf0] }
 0x5bb   :  { %v14733_v52 = vld [vmem:[#allocation7 + $0x1f94] sm:$0xf]  ;;  %v13167_v27 = vor.u32 %v14669_v35, %v13164_v56  ;;  %8189 = vmatpush.bf16.msrb.mxu2 %v12911_v45  ;;  %v7926_v56 = vpop.f32.mrf.mxu1 }
 0x5bc   :  { %v13420_v51 = vld [vmem:[#allocation7 + $0x1fb0] sm:$0xf0]  ;;  %v10386_v56 = vld [vmem:[#allocation7 + $0x7d8] sm:$0xf] }
 0x5bd   :  { %v14533_v59 = vld [vmem:[#allocation7 + $0x1954] sm:$0xf]  ;;  %v13423_v4 = vor.u32 %v14733_v52, %v13420_v51  ;;  %8202 = vmatpush.bf16.msrb.mxu3 %v13167_v27  ;;  %v7937_v52 = vpop.f32.mrf.mxu2 }
 0x5be   :  { %v12620_v0 = vld [vmem:[#allocation7 + $0x1970] sm:$0xf0] }
 0x5bf   :  { %v14597_v15 = vld [vmem:[#allocation7 + $0x1b54] sm:$0xf]  ;;  %v12623_v16 = vor.u32 %v14533_v59, %v12620_v0  ;;  %8215 = vmatpush.bf16.msra.mxu0 %v13423_v4  ;;  %v7938_v59 = vadd.f32 %v7937_v52, %v7925_v40  ;;  %v7950_v0 = vpop.f32.mrf.mxu3  ;;  %v13978_v52 = vld [vmem:[#allocation7 + $0x7f4] sm:$0xf0] }
 0x5c0   :  { %v12876_v6 = vld [vmem:[#allocation7 + $0x1b70] sm:$0xf0] }
 0x5c1   :  { %v14661_v14 = vld [vmem:[#allocation7 + $0x1d54] sm:$0xf]  ;;  %v12879_v10 = vor.u32 %v14597_v15, %v12876_v6  ;;  %8177 = vmatpush.bf16.msrb.mxu1 %v12623_v16 }
 0x5c2   :  { %v13132_v7 = vld [vmem:[#allocation7 + $0x1d70] sm:$0xf0] }
 0x5c3   :  { %v14725_v13 = vld [vmem:[#allocation7 + $0x1f54] sm:$0xf]  ;;  %v13135_v20 = vor.u32 %v14661_v14, %v13132_v7  ;;  %8190 = vmatpush.bf16.msrb.mxu2 %v12879_v10  ;;  %v7951_v14 = vadd.f32 %v7950_v0, %v7938_v59  ;;  %v7965_v7 = vpop.f32.mrf.mxu0  ;;  %v9586_v59 = vld [vmem:[#allocation7 + $0x198] sm:$0xf] }
 0x5c4   :  { %v13388_v23 = vld [vmem:[#allocation7 + $0x1f70] sm:$0xf0]  ;;  %v13778_v0 = vld [vmem:[#allocation7 + $0x1b4] sm:$0xf0] }
 0x5c5   :  { %v14525_v18 = vld [vmem:[#allocation7 + $0x1914] sm:$0xf]  ;;  %v13391_v39 = vor.u32 %v14725_v13, %v13388_v23  ;;  %8203 = vmatpush.bf16.msrb.mxu3 %v13135_v20  ;;  %v13906_v7 = vld [vmem:[#allocation7 + $0x5b4] sm:$0xf0] }
 0x5c6   :  { %v12588_v19 = vld [vmem:[#allocation7 + $0x1930] sm:$0xf0] }
 0x5c7   :  { %v14589_v17 = vld [vmem:[#allocation7 + $0x1b14] sm:$0xf]  ;;  %v12591_v46 = vor.u32 %v14525_v18, %v12588_v19  ;;  %8216 = vmatpush.bf16.msra.mxu0 %v13391_v39 }
 0x5c8   :  { %v12844_v61 = vld [vmem:[#allocation7 + $0x1b30] sm:$0xf0] }
 0x5c9   :  { %v14653_v50 = vld [vmem:[#allocation7 + $0x1d14] sm:$0xf]  ;;  %v12847_v8 = vor.u32 %v14589_v17, %v12844_v61  ;;  %8178 = vmatpush.bf16.msrb.mxu1 %v12591_v46  ;;  %v9618_v46 = vld [vmem:[#allocation7 + $0x1d8] sm:$0xf] }
 0x5ca   :  { %v13100_v2 = vld [vmem:[#allocation7 + $0x1d30] sm:$0xf0] }
 0x5cb   :  { %v14717_v12 = vld [vmem:[#allocation7 + $0x1f14] sm:$0xf]  ;;  %v13103_v55 = vor.u32 %v14653_v50, %v13100_v2  ;;  %8191 = vmatpush.bf16.msrb.mxu2 %v12847_v8  ;;  %v15715_v50 = vadd.f32 %v7963_v31, %v7951_v14  ;;  %v13786_v8 = vld [vmem:[#allocation7 + $0x1f4] sm:$0xf0] }
 0x5cc   :  { %v13356_v60 = vld [vmem:[#allocation7 + $0x1f30] sm:$0xf0]  ;;  %v10098_v14 = vld [vmem:[#allocation7 + $0x598] sm:$0xf] }
 0x5cd   :  { %v14517_v54 = vld [vmem:[#allocation7 + $0x18d4] sm:$0xf]  ;;  %v13359_v63 = vor.u32 %v14717_v12, %v13356_v60  ;;  %8204 = vmatpush.bf16.msrb.mxu3 %v13103_v55  ;;  %v7939_v55 = vpop.f32.mrf.mxu2 }
 0x5ce   :  { %v12556_v11 = vld [vmem:[#allocation7 + $0x18f0] sm:$0xf0] }
 0x5cf   :  { %v14581_v58 = vld [vmem:[#allocation7 + $0x1ad4] sm:$0xf]  ;;  %v12559_v41 = vor.u32 %v14517_v54, %v12556_v11  ;;  %8217 = vmatpush.bf16.msra.mxu0 %v13359_v63 }
 0x5d0   :  { %v12812_v42 = vld [vmem:[#allocation7 + $0x1af0] sm:$0xf0] }
 0x5d1   :  { %v14645_v53 = vld [vmem:[#allocation7 + $0x1cd4] sm:$0xf]  ;;  %v12815_v43 = vor.u32 %v14581_v58, %v12812_v42  ;;  %8179 = vmatpush.bf16.msrb.mxu1 %v12559_v41  ;;  %v9874_v41 = vld [vmem:[#allocation7 + $0x3d8] sm:$0xf] }
 0x5d2   :  { %v13068_v3 = vld [vmem:[#allocation7 + $0x1cf0] sm:$0xf0] }
 0x5d3   :  { %v14709_v24 = vld [vmem:[#allocation7 + $0x1ed4] sm:$0xf]  ;;  %v13071_v25 = vor.u32 %v14645_v53, %v13068_v3  ;;  %8192 = vmatpush.bf16.msrb.mxu2 %v12815_v43  ;;  %v7952_v53 = vpop.f32.mrf.mxu3  ;;  %v13850_v43 = vld [vmem:[#allocation7 + $0x3f4] sm:$0xf0] }
 0x5d4   :  { %v13324_v47 = vld [vmem:[#allocation7 + $0x1ef0] sm:$0xf0]  ;;  %v10034_v53 = vld [vmem:[#allocation7 + $0x518] sm:$0xf] }
 0x5d5   :  { %v14509_v5 = vld [vmem:[#allocation7 + $0x1894] sm:$0xf]  ;;  %v13327_v35 = vor.u32 %v14709_v24, %v13324_v47  ;;  %8205 = vmatpush.bf16.msrb.mxu3 %v13071_v25 }
 0x5d6   :  { %v12524_v48 = vld [vmem:[#allocation7 + $0x18b0] sm:$0xf0] }
 0x5d7   :  { %v14573_v51 = vld [vmem:[#allocation7 + $0x1a94] sm:$0xf]  ;;  %v12527_v6 = vor.u32 %v14509_v5, %v12524_v48  ;;  %8218 = vmatpush.bf16.msra.mxu0 %v13327_v35  ;;  %v10130_v5 = vld [vmem:[#allocation7 + $0x5d8] sm:$0xf]  ;;  %v9619_v48 = vor.u32 %v13786_v8, %v9618_v46 }
 0x5d8   :  { %v12780_v1 = vld [vmem:[#allocation7 + $0x1ab0] sm:$0xf0]  ;;  %v13914_v35 = vld [vmem:[#allocation7 + $0x5f4] sm:$0xf0] }
 0x5d9   :  { %v14637_v45 = vld [vmem:[#allocation7 + $0x1c94] sm:$0xf]  ;;  %v12783_v13 = vor.u32 %v14573_v51, %v12780_v1  ;;  %8180 = vmatpush.bf16.msrb.mxu1 %v12527_v6  ;;  %v13842_v6 = vld [vmem:[#allocation7 + $0x3b4] sm:$0xf0] }
 0x5da   :  { %v13036_v27 = vld [vmem:[#allocation7 + $0x1cb0] sm:$0xf0]  ;;  %v9522_v8 = vld [vmem:[#allocation7 + $0x118] sm:$0xf] }
 0x5db   :  { %v14701_v4 = vld [vmem:[#allocation7 + $0x1e94] sm:$0xf]  ;;  %v13039_v10 = vor.u32 %v14637_v45, %v13036_v27  ;;  %8193 = vmatpush.bf16.msrb.mxu2 %v12783_v13  ;;  %v9875_v45 = vor.u32 %v13850_v43, %v9874_v41  ;;  %v10131_v27 = vor.u32 %v13914_v35, %v10130_v5  ;;  %v10354_v13 = vld [vmem:[#allocation7 + $0x798] sm:$0xf]  ;;  %v8015_v43 = vpop.f32.mrf.mxu0 }
 0x5dc   :  { %v13292_v15 = vld [vmem:[#allocation7 + $0x1eb0] sm:$0xf0] }
 0x5dd   :  { %v14501_v23 = vld [vmem:[#allocation7 + $0x1854] sm:$0xf]  ;;  %v13295_v18 = vor.u32 %v14701_v4, %v13292_v15  ;;  %8206 = vmatpush.bf16.msrb.mxu3 %v13039_v10  ;;  %v10387_v4 = vor.u32 %v13978_v52, %v10386_v56  ;;  %v9842_v15 = vld [vmem:[#allocation7 + $0x398] sm:$0xf] }
 0x5de   :  { %v12492_v16 = vld [vmem:[#allocation7 + $0x1870] sm:$0xf0]  ;;  %v9843_v10 = vor.u32 %v13842_v6, %v9842_v15  ;;  %v9746_v52 = vld [vmem:[#allocation7 + $0x2d8] sm:$0xf] }
 0x5df   :  { %v14565_v19 = vld [vmem:[#allocation7 + $0x1a54] sm:$0xf]  ;;  %v12495_v40 = vor.u32 %v14501_v23, %v12492_v16  ;;  %8219 = vmatpush.bf16.msra.mxu0 %v13295_v18  ;;  %v13970_v23 = vld [vmem:[#allocation7 + $0x7b4] sm:$0xf0]  ;;  %v9587_v16 = vor.u32 %v13778_v0, %v9586_v59 }
 0x5e0   :  { %v12748_v20 = vld [vmem:[#allocation7 + $0x1a70] sm:$0xf0]  ;;  %v9554_v18 = vld [vmem:[#allocation7 + $0x158] sm:$0xf] }
 0x5e1   :  { %v14629_v39 = vld [vmem:[#allocation7 + $0x1c54] sm:$0xf]  ;;  %v12751_v12 = vor.u32 %v14565_v19, %v12748_v20  ;;  %8181 = vmatpush.bf16.msrb.mxu1 %v12495_v40  ;;  %v13770_v19 = vld [vmem:[#allocation7 + $0x174] sm:$0xf0]  ;;  %v10099_v20 = vor.u32 %v13906_v7, %v10098_v14 }
 0x5e2   :  { %v13004_v26 = vld [vmem:[#allocation7 + $0x1c70] sm:$0xf0]  ;;  %v13898_v40 = vld [vmem:[#allocation7 + $0x574] sm:$0xf0] }
 0x5e3   :  { %v14693_v17 = vld [vmem:[#allocation7 + $0x1e54] sm:$0xf]  ;;  %v13007_v54 = vor.u32 %v14629_v39, %v13004_v26  ;;  %8194 = vmatpush.bf16.msrb.mxu2 %v12751_v12  ;;  %v10355_v39 = vor.u32 %v13970_v23, %v10354_v13  ;;  %v9810_v26 = vld [vmem:[#allocation7 + $0x358] sm:$0xf]  ;;  %v7989_v13 = vpop.f32.mrf.mxu2 }
 0x5e4   :  { %v13260_v61 = vld [vmem:[#allocation7 + $0x1e70] sm:$0xf0]  ;;  %v13962_v12 = vld [vmem:[#allocation7 + $0x774] sm:$0xf0] }
 0x5e5   :  { %v14493_v2 = vld [vmem:[#allocation7 + $0x1814] sm:$0xf]  ;;  %v13263_v11 = vor.u32 %v14693_v17, %v13260_v61  ;;  %8207 = vmatpush.bf16.msrb.mxu3 %v13007_v54  ;;  %v13834_v17 = vld [vmem:[#allocation7 + $0x374] sm:$0xf0] }
 0x5e6   :  { %v12460_v60 = vld [vmem:[#allocation7 + $0x1830] sm:$0xf0]  ;;  %v10066_v61 = vld [vmem:[#allocation7 + $0x558] sm:$0xf]  ;;  %v9811_v46 = vor.u32 %v13834_v17, %v9810_v26 }
 0x5e7   :  { %v14557_v63 = vld [vmem:[#allocation7 + $0x1a14] sm:$0xf]  ;;  %v12463_v47 = vor.u32 %v14493_v2, %v12460_v60  ;;  %8220 = vmatpush.bf16.msra.mxu0 %v13263_v11  ;;  %v10322_v2 = vld [vmem:[#allocation7 + $0x758] sm:$0xf]  ;;  %v9555_v60 = vor.u32 %v13770_v19, %v9554_v18  ;;  %v10067_v11 = vor.u32 %v13898_v40, %v10066_v61  ;;  %v8002_v19 = vpop.f32.mrf.mxu3  ;;  %v8017_v40 = vpop.f32.mrf.mxu0 }
 0x5e8   :  { %v12716_v58 = vld [vmem:[#allocation7 + $0x1a30] sm:$0xf0]  ;;  %v13762_v54 = vld [vmem:[#allocation7 + $0x134] sm:$0xf0]  ;;  %v10323_v55 = vor.u32 %v13962_v12, %v10322_v2 }
 0x5e9   :  { %v14621_v42 = vld [vmem:[#allocation7 + $0x1c14] sm:$0xf]  ;;  %v12719_v25 = vor.u32 %v14557_v63, %v12716_v58  ;;  %8182 = vmatpush.bf16.msrb.mxu1 %v12463_v47  ;;  %v7976_v63 = vpop.f32.mrf.mxu1  ;;  %v9778_v58 = vld [vmem:[#allocation7 + $0x318] sm:$0xf]  ;;  %v9523_v41 = vor.u32 %v13762_v54, %v9522_v8 }
 0x5ea   :  { %v12972_v3 = vld [vmem:[#allocation7 + $0x1c30] sm:$0xf0]  ;;  %v13954_v47 = vld [vmem:[#allocation7 + $0x734] sm:$0xf0] }
 0x5eb   :  { %v14685_v31 = vld [vmem:[#allocation7 + $0x1e14] sm:$0xf]  ;;  %v12975_v51 = vor.u32 %v14621_v42, %v12972_v3  ;;  %8195 = vmatpush.bf16.msrb.mxu2 %v12719_v25  ;;  %v13826_v42 = vld [vmem:[#allocation7 + $0x334] sm:$0xf0]  ;;  %v7977_v3 = vadd.f32 %v7976_v63, %v15715_v50 }
 0x5ec   :  { %v13228_v24 = vld [vmem:[#allocation7 + $0x1e30] sm:$0xf0]  ;;  %8183 = vmatmul.bf16.vlgmr.msrb.gmra.mxu1 %v15545_v32  ;;  %v9779_v5 = vor.u32 %v13826_v42, %v9778_v58  ;;  %v13754_v25 = vld [vmem:[#allocation7 + $0xf4] sm:$0xf0] }
 0x5ed   :  { %v13231_v1 = vor.u32 %v14685_v31, %v13228_v24  ;;  %8227 = vmatpush.bf16.msra.mxu1 %v9619_v48  ;;  %8208 = vmatpush.bf16.msrb.mxu3 %v12975_v51  ;;  %v13890_v31 = vld [vmem:[#allocation7 + $0x534] sm:$0xf0]  ;;  %v7990_v18 = vadd.f32 %v7989_v13, %v7977_v3 }
 0x5ee   :  { %8196 = vmatmul.bf16.vlgmr.msrb.gmra.mxu2 %v15547_v22  ;;  %v10290_v24 = vld [vmem:[#allocation7 + $0x718] sm:$0xf]  ;;  %v10035_v35 = vor.u32 %v13890_v31, %v10034_v53 }
 0x5ef   :  { %8221 = vmatpush.bf16.msra.mxu0 %v13231_v1  ;;  %8240 = vmatpush.bf16.msra.mxu2 %v9875_v45  ;;  %v9490_v48 = vld [vmem:[#allocation7 + $0xd8] sm:$0xf]  ;;  %v10291_v56 = vor.u32 %v13954_v47, %v10290_v24  ;;  %v8003_v61 = vadd.f32 %v8002_v19, %v7990_v18 }
 0x5f0   :  { %8209 = vmatmul.bf16.vlgmr.msrb.gmra.mxu3 %v15549_v33  ;;  %v13818_v51 = vld [vmem:[#allocation7 + $0x2f4] sm:$0xf0]  ;;  %v9491_v0 = vor.u32 %v13754_v25, %v9490_v48 }
 0x5f1   :  { %8253 = vmatpush.bf16.msra.mxu3 %v10131_v27  ;;  %8228 = vmatpush.bf16.msra.mxu1 %v9587_v16  ;;  %v10002_v1 = vld [vmem:[#allocation7 + $0x4d8] sm:$0xf]  ;;  %v9747_v27 = vor.u32 %v13818_v51, %v9746_v52  ;;  %v7978_v7 = vpop.f32.mrf.mxu1  ;;  %v15722_v63 = vadd.f32 %v8015_v43, %v8003_v61  ;;  %v8004_v51 = vpop.f32.mrf.mxu3 }
 0x5f2   :  { %8222 = vmatmul.bf16.vlgmr.msra.gmra.mxu0 %v15552_v9  ;;  %v13882_v45 = vld [vmem:[#allocation7 + $0x4f4] sm:$0xf0] }
 0x5f3   :  { %8266 = vmatpush.bf16.msrb.mxu0 %v10387_v4  ;;  %8241 = vmatpush.bf16.msra.mxu2 %v9843_v10  ;;  %v10258_v59 = vld [vmem:[#allocation7 + $0x6d8] sm:$0xf]  ;;  %v10003_v6 = vor.u32 %v13882_v45, %v10002_v1 }
 0x5f4   :  { %v13946_v50 = vld [vmem:[#allocation7 + $0x6f4] sm:$0xf0] }
 0x5f5   :  { %8254 = vmatpush.bf16.msra.mxu3 %v10099_v20  ;;  %8229 = vmatpush.bf16.msra.mxu1 %v9555_v60  ;;  %v9458_v4 = vld [vmem:[#allocation7 + $0x98] sm:$0xf]  ;;  %v10259_v14 = vor.u32 %v13946_v50, %v10258_v59 }
 0x5f6   :  { %v13746_v15 = vld [vmem:[#allocation7 + $0xb4] sm:$0xf0] }
 0x5f7   :  { %8267 = vmatpush.bf16.msrb.mxu0 %v10355_v39  ;;  %8242 = vmatpush.bf16.msra.mxu2 %v9811_v46  ;;  %v9714_v23 = vld [vmem:[#allocation7 + $0x298] sm:$0xf]  ;;  %v9459_v17 = vor.u32 %v13746_v15, %v9458_v4 }
 0x5f8   :  { %v13810_v16 = vld [vmem:[#allocation7 + $0x2b4] sm:$0xf0] }
 0x5f9   :  { %8255 = vmatpush.bf16.msra.mxu3 %v10067_v11  ;;  %8230 = vmatpush.bf16.msra.mxu1 %v9523_v41  ;;  %v9970_v10 = vld [vmem:[#allocation7 + $0x498] sm:$0xf]  ;;  %v9715_v2 = vor.u32 %v13810_v16, %v9714_v23 }
 0x5fa   :  { %v13874_v20 = vld [vmem:[#allocation7 + $0x4b4] sm:$0xf0] }
 0x5fb   :  { %8268 = vmatpush.bf16.msrb.mxu0 %v10323_v55  ;;  %8243 = vmatpush.bf16.msra.mxu2 %v9779_v5  ;;  %v10226_v39 = vld [vmem:[#allocation7 + $0x698] sm:$0xf]  ;;  %v9971_v46 = vor.u32 %v13874_v20, %v9970_v10 }
 0x5fc   :  { %v13938_v26 = vld [vmem:[#allocation7 + $0x6b4] sm:$0xf0] }
 0x5fd   :  { %8256 = vmatpush.bf16.msra.mxu3 %v10035_v35  ;;  %8231 = vmatpush.bf16.msra.mxu1 %v9491_v0  ;;  %v9426_v12 = vld [vmem:[#allocation7 + $0x58] sm:$0xf]  ;;  %v10227_v8 = vor.u32 %v13938_v26, %v10226_v39  ;;  %v7991_v35 = vpop.f32.mrf.mxu2 }
 0x5fe   :  { %v13738_v60 = vld [vmem:[#allocation7 + $0x74] sm:$0xf0] }
 0x5ff   :  { %8269 = vmatpush.bf16.msrb.mxu0 %v10291_v56  ;;  %8244 = vmatpush.bf16.msra.mxu2 %v9747_v27  ;;  %v9682_v54 = vld [vmem:[#allocation7 + $0x258] sm:$0xf]  ;;  %v9427_v3 = vor.u32 %v13738_v60, %v9426_v12 }
 0x600   :  { %v13802_v11 = vld [vmem:[#allocation7 + $0x274] sm:$0xf0] }
 0x601   :  { %8257 = vmatpush.bf16.msra.mxu3 %v10003_v6  ;;  %v9938_v55 = vld [vmem:[#allocation7 + $0x458] sm:$0xf]  ;;  %8232 = vmatpush.bf16.msra.mxu1 %v9459_v17  ;;  %v9683_v24 = vor.u32 %v13802_v11, %v9682_v54 }
 0x602   :  { %v13866_v58 = vld [vmem:[#allocation7 + $0x474] sm:$0xf0] }
 0x603   :  { %8270 = vmatpush.bf16.msrb.mxu0 %v10259_v14  ;;  %v10194_v42 = vld [vmem:[#allocation7 + $0x658] sm:$0xf]  ;;  %8245 = vmatpush.bf16.msra.mxu2 %v9715_v2  ;;  %v9939_v48 = vor.u32 %v13866_v58, %v9938_v55 }
 0x604   :  { %v13930_v53 = vld [vmem:[#allocation7 + $0x674] sm:$0xf0] }
 0x605   :  { %v9394_v31 = vld [vmem:[#allocation7 + $0x18] sm:$0xf]  ;;  %8258 = vmatpush.bf16.msra.mxu3 %v9971_v46  ;;  %v10195_v25 = vor.u32 %v13930_v53, %v10194_v42  ;;  %8233 = vmatpush.bf16.msra.mxu1 %v9427_v3 }
 0x606   :  { %v13730_v47 = vld [vmem:[#allocation7 + $0x34] sm:$0xf0] }
 0x607   :  { %v10642_v41 = vld [vmem:[#allocation7 + $0x9d8] sm:$0xf]  ;;  %8271 = vmatpush.bf16.msrb.mxu0 %v10227_v8  ;;  %v9395_v50 = vor.u32 %v13730_v47, %v9394_v31  ;;  %8246 = vmatpush.bf16.msra.mxu2 %v9683_v24 }
 0x608   :  { %v14042_v5 = vld [vmem:[#allocation7 + $0x9f4] sm:$0xf0] }
 0x609   :  { %v9650_v56 = vld [vmem:[#allocation7 + $0x218] sm:$0xf]  ;;  %v10643_v15 = vor.u32 %v14042_v5, %v10642_v41  ;;  %8259 = vmatpush.bf16.msra.mxu3 %v9939_v48  ;;  %8234 = vmatpush.bf16.msra.mxu1 %v9395_v50 }
 0x60a   :  { %v13794_v52 = vld [vmem:[#allocation7 + $0x234] sm:$0xf0] }
 0x60b   :  { %v9906_v43 = vld [vmem:[#allocation7 + $0x418] sm:$0xf]  ;;  %v9651_v6 = vor.u32 %v13794_v52, %v9650_v56  ;;  %8272 = vmatpush.bf16.msrb.mxu0 %v10195_v25  ;;  %v8028_v56 = vpop.f32.mrf.mxu1 }
 0x60c   :  { %v13858_v1 = vld [vmem:[#allocation7 + $0x434] sm:$0xf0]  ;;  %8235 = vmatmul.bf16.vlgmr.msra.gmra.mxu1 %v15506_v21 }
 0x60d   :  { %v10162_v45 = vld [vmem:[#allocation7 + $0x618] sm:$0xf]  ;;  %v9907_v23 = vor.u32 %v13858_v1, %v9906_v43  ;;  %8279 = vmatpush.bf16.msrb.mxu1 %v10643_v15  ;;  %8247 = vmatpush.bf16.msra.mxu2 %v9651_v6 }
 0x60e   :  { %v13922_v59 = vld [vmem:[#allocation7 + $0x634] sm:$0xf0] }
 0x60f   :  { %v10898_v0 = vld [vmem:[#allocation7 + $0xbd8] sm:$0xf]  ;;  %v10163_v16 = vor.u32 %v13922_v59, %v10162_v45  ;;  %8260 = vmatpush.bf16.msra.mxu3 %v9907_v23 }
 0x610   :  { %v14106_v27 = vld [vmem:[#allocation7 + $0xbf4] sm:$0xf0]  ;;  %8248 = vmatmul.bf16.vlgmr.msra.gmra.mxu2 %v15508_v29 }
 0x611   :  { %v11154_v4 = vld [vmem:[#allocation7 + $0xdd8] sm:$0xf]  ;;  %v10899_v10 = vor.u32 %v14106_v27, %v10898_v0  ;;  %8273 = vmatpush.bf16.msrb.mxu0 %v10163_v16  ;;  %v14828_v0 = vld [vmem:[#allocation8] sm:$0xff] }
 0x612   :  { %v14170_v14 = vld [vmem:[#allocation7 + $0xdf4] sm:$0xf0]  ;;  %8261 = vmatmul.bf16.vlgmr.msra.gmra.mxu3 %v15510_v36  ;;  %v1848_v27 = vperm.slane %v14828_v0, 5 }
 0x613   :  { %v11410_v7 = vld [vmem:[#allocation7 + $0xfd8] sm:$0xf]  ;;  %v11155_v20 = vor.u32 %v14170_v14, %v11154_v4  ;;  %8292 = vmatpush.bf16.msrb.mxu2 %v10899_v10  ;;  %v8067_v4 = vpop.f32.mrf.mxu0 }
 0x614   :  { %v14234_v13 = vld [vmem:[#allocation7 + $0xff4] sm:$0xf0]  ;;  %8274 = vmatmul.bf16.vlgmr.msrb.gmra.mxu0 %v15512_v38 }
 0x615   :  { %v10610_v18 = vld [vmem:[#allocation7 + $0x998] sm:$0xf]  ;;  %v11411_v39 = vor.u32 %v14234_v13, %v11410_v7  ;;  %8305 = vmatpush.bf16.msrb.mxu3 %v11155_v20 }
 0x616   :  { %v14034_v19 = vld [vmem:[#allocation7 + $0x9b4] sm:$0xf0] }
 0x617   :  { %v10866_v26 = vld [vmem:[#allocation7 + $0xb98] sm:$0xf]  ;;  %v10611_v60 = vor.u32 %v14034_v19, %v10610_v18  ;;  %8318 = vmatpush.bf16.msra.mxu0 %v11411_v39 }
 0x618   :  { %v14098_v17 = vld [vmem:[#allocation7 + $0xbb4] sm:$0xf0] }
 0x619   :  { %v11122_v61 = vld [vmem:[#allocation7 + $0xd98] sm:$0xf]  ;;  %v10867_v46 = vor.u32 %v14098_v17, %v10866_v26  ;;  %8280 = vmatpush.bf16.msrb.mxu1 %v10611_v60  ;;  %v8029_v26 = vadd.f32 %v8028_v56, %v1848_v27  ;;  %v8030_v60 = vpop.f32.mrf.mxu1 }
 0x61a   :  { %v14162_v40 = vld [vmem:[#allocation7 + $0xdb4] sm:$0xf0] }
 0x61b   :  { %v11378_v2 = vld [vmem:[#allocation7 + $0xf98] sm:$0xf]  ;;  %v11123_v11 = vor.u32 %v14162_v40, %v11122_v61  ;;  %8293 = vmatpush.bf16.msrb.mxu2 %v10867_v46  ;;  %v8041_v46 = vpop.f32.mrf.mxu2 }
 0x61c   :  { %v14226_v12 = vld [vmem:[#allocation7 + $0xfb4] sm:$0xf0] }
 0x61d   :  { %v10578_v8 = vld [vmem:[#allocation7 + $0x958] sm:$0xf]  ;;  %v11379_v55 = vor.u32 %v14226_v12, %v11378_v2  ;;  %8306 = vmatpush.bf16.msrb.mxu3 %v11123_v11 }
 0x61e   :  { %v14026_v54 = vld [vmem:[#allocation7 + $0x974] sm:$0xf0] }
 0x61f   :  { %v10834_v58 = vld [vmem:[#allocation7 + $0xb58] sm:$0xf]  ;;  %v10579_v47 = vor.u32 %v14026_v54, %v10578_v8  ;;  %8319 = vmatpush.bf16.msra.mxu0 %v11379_v55  ;;  %v8042_v55 = vadd.f32 %v8041_v46, %v8029_v26 }
 0x620   :  { %v14090_v42 = vld [vmem:[#allocation7 + $0xb74] sm:$0xf0] }
 0x621   :  { %v11090_v53 = vld [vmem:[#allocation7 + $0xd58] sm:$0xf]  ;;  %v10835_v41 = vor.u32 %v14090_v42, %v10834_v58  ;;  %8281 = vmatpush.bf16.msrb.mxu1 %v10579_v47  ;;  %v8054_v58 = vpop.f32.mrf.mxu3  ;;  %v8069_v47 = vpop.f32.mrf.mxu0 }
 0x622   :  { %v14154_v3 = vld [vmem:[#allocation7 + $0xd74] sm:$0xf0] }
 0x623   :  { %v11346_v31 = vld [vmem:[#allocation7 + $0xf58] sm:$0xf]  ;;  %v11091_v25 = vor.u32 %v14154_v3, %v11090_v53  ;;  %8294 = vmatpush.bf16.msrb.mxu2 %v10835_v41 }
 0x624   :  { %v14218_v24 = vld [vmem:[#allocation7 + $0xf74] sm:$0xf0] }
 0x625   :  { %v10546_v5 = vld [vmem:[#allocation7 + $0x918] sm:$0xf]  ;;  %v11347_v35 = vor.u32 %v14218_v24, %v11346_v31  ;;  %8307 = vmatpush.bf16.msrb.mxu3 %v11091_v25  ;;  %v8055_v24 = vadd.f32 %v8054_v58, %v8042_v55 }
 0x626   :  { %v14018_v48 = vld [vmem:[#allocation7 + $0x934] sm:$0xf0] }
 0x627   :  { %v10802_v52 = vld [vmem:[#allocation7 + $0xb18] sm:$0xf]  ;;  %v10547_v50 = vor.u32 %v14018_v48, %v10546_v5  ;;  %8320 = vmatpush.bf16.msra.mxu0 %v11347_v35 }
 0x628   :  { %v14082_v43 = vld [vmem:[#allocation7 + $0xb34] sm:$0xf0] }
 0x629   :  { %v11058_v51 = vld [vmem:[#allocation7 + $0xd18] sm:$0xf]  ;;  %v10803_v15 = vor.u32 %v14082_v43, %v10802_v52  ;;  %8282 = vmatpush.bf16.msrb.mxu1 %v10547_v50 }
 0x62a   :  { %v14146_v1 = vld [vmem:[#allocation7 + $0xd34] sm:$0xf0] }
 0x62b   :  { %v11314_v45 = vld [vmem:[#allocation7 + $0xf18] sm:$0xf]  ;;  %v11059_v7 = vor.u32 %v14146_v1, %v11058_v51  ;;  %8295 = vmatpush.bf16.msrb.mxu2 %v10803_v15 }
 0x62c   :  { %v14210_v59 = vld [vmem:[#allocation7 + $0xf34] sm:$0xf0] }
 0x62d   :  { %v10514_v6 = vld [vmem:[#allocation7 + $0x8d8] sm:$0xf]  ;;  %v11315_v13 = vor.u32 %v14210_v59, %v11314_v45  ;;  %8308 = vmatpush.bf16.msrb.mxu3 %v11059_v7  ;;  %v15728_v59 = vadd.f32 %v8067_v4, %v8055_v24 }
 0x62e   :  { %v14010_v14 = vld [vmem:[#allocation7 + $0x8f4] sm:$0xf0] }
 0x62f   :  { %v10770_v23 = vld [vmem:[#allocation7 + $0xad8] sm:$0xf]  ;;  %v10515_v39 = vor.u32 %v14010_v14, %v10514_v6  ;;  %8321 = vmatpush.bf16.msra.mxu0 %v11315_v13 }
 0x630   :  { %v14074_v16 = vld [vmem:[#allocation7 + $0xaf4] sm:$0xf0] }
 0x631   :  { %v11026_v10 = vld [vmem:[#allocation7 + $0xcd8] sm:$0xf]  ;;  %v10771_v17 = vor.u32 %v14074_v16, %v10770_v23  ;;  %8283 = vmatpush.bf16.msrb.mxu1 %v10515_v39  ;;  %v8043_v23 = vpop.f32.mrf.mxu2 }
 0x632   :  { %v14138_v18 = vld [vmem:[#allocation7 + $0xcf4] sm:$0xf0] }
 0x633   :  { %v11282_v19 = vld [vmem:[#allocation7 + $0xed8] sm:$0xf]  ;;  %v11027_v2 = vor.u32 %v14138_v18, %v11026_v10  ;;  %8296 = vmatpush.bf16.msrb.mxu2 %v10771_v17 }
 0x634   :  { %v14202_v20 = vld [vmem:[#allocation7 + $0xef4] sm:$0xf0] }
 0x635   :  { %v10482_v61 = vld [vmem:[#allocation7 + $0x898] sm:$0xf]  ;;  %v11283_v12 = vor.u32 %v14202_v20, %v11282_v19  ;;  %8309 = vmatpush.bf16.msrb.mxu3 %v11027_v2  ;;  %v8056_v19 = vpop.f32.mrf.mxu3 }
 0x636   :  { %v14002_v40 = vld [vmem:[#allocation7 + $0x8b4] sm:$0xf0] }
 0x637   :  { %v10738_v8 = vld [vmem:[#allocation7 + $0xa98] sm:$0xf]  ;;  %v10483_v31 = vor.u32 %v14002_v40, %v10482_v61  ;;  %8322 = vmatpush.bf16.msra.mxu0 %v11283_v12 }
 0x638   :  { %v14066_v54 = vld [vmem:[#allocation7 + $0xab4] sm:$0xf0] }
 0x639   :  { %v10994_v11 = vld [vmem:[#allocation7 + $0xc98] sm:$0xf]  ;;  %v10739_v41 = vor.u32 %v14066_v54, %v10738_v8  ;;  %8284 = vmatpush.bf16.msrb.mxu1 %v10483_v31 }
 0x63a   :  { %v14130_v42 = vld [vmem:[#allocation7 + $0xcb4] sm:$0xf0] }
 0x63b   :  { %v11250_v53 = vld [vmem:[#allocation7 + $0xe98] sm:$0xf]  ;;  %v10995_v25 = vor.u32 %v14130_v42, %v10994_v11  ;;  %8297 = vmatpush.bf16.msrb.mxu2 %v10739_v41 }
 0x63c   :  { %v14194_v3 = vld [vmem:[#allocation7 + $0xeb4] sm:$0xf0] }
 0x63d   :  { %v10450_v5 = vld [vmem:[#allocation7 + $0x858] sm:$0xf]  ;;  %v11251_v35 = vor.u32 %v14194_v3, %v11250_v53  ;;  %8310 = vmatpush.bf16.msrb.mxu3 %v10995_v25 }
 0x63e   :  { %v13994_v48 = vld [vmem:[#allocation7 + $0x874] sm:$0xf0] }
 0x63f   :  { %v10706_v56 = vld [vmem:[#allocation7 + $0xa58] sm:$0xf]  ;;  %v10451_v50 = vor.u32 %v13994_v48, %v10450_v5  ;;  %8323 = vmatpush.bf16.msra.mxu0 %v11251_v35 }
 0x640   :  { %v14058_v52 = vld [vmem:[#allocation7 + $0xa74] sm:$0xf0] }
 0x641   :  { %v10962_v43 = vld [vmem:[#allocation7 + $0xc58] sm:$0xf]  ;;  %v10707_v27 = vor.u32 %v14058_v52, %v10706_v56  ;;  %8285 = vmatpush.bf16.msrb.mxu1 %v10451_v50 }
 0x642   :  { %v14122_v51 = vld [vmem:[#allocation7 + $0xc74] sm:$0xf0] }
 0x643   :  { %v11218_v1 = vld [vmem:[#allocation7 + $0xe58] sm:$0xf]  ;;  %v10963_v7 = vor.u32 %v14122_v51, %v10962_v43  ;;  %8298 = vmatpush.bf16.msrb.mxu2 %v10707_v27 }
 0x644   :  { %v14186_v45 = vld [vmem:[#allocation7 + $0xe74] sm:$0xf0] }
 0x645   :  { %v10418_v0 = vld [vmem:[#allocation7 + $0x818] sm:$0xf]  ;;  %v11219_v13 = vor.u32 %v14186_v45, %v11218_v1  ;;  %8311 = vmatpush.bf16.msrb.mxu3 %v10963_v7 }
 0x646   :  { %v13986_v15 = vld [vmem:[#allocation7 + $0x834] sm:$0xf0] }
 0x647   :  { %v11666_v6 = vld [vmem:[#allocation7 + $0x11d8] sm:$0xf]  ;;  %v10419_v26 = vor.u32 %v13986_v15, %v10418_v0  ;;  %8324 = vmatpush.bf16.msra.mxu0 %v11219_v13 }
 0x648   :  { %v14298_v14 = vld [vmem:[#allocation7 + $0x11f4] sm:$0xf0] }
 0x649   :  { %v10674_v16 = vld [vmem:[#allocation7 + $0xa18] sm:$0xf]  ;;  %v11667_v2 = vor.u32 %v14298_v14, %v11666_v6  ;;  %8286 = vmatpush.bf16.msrb.mxu1 %v10419_v26 }
 0x64a   :  { %v14050_v10 = vld [vmem:[#allocation7 + $0xa34] sm:$0xf0] }
 0x64b   :  { %v10930_v18 = vld [vmem:[#allocation7 + $0xc18] sm:$0xf]  ;;  %v10675_v12 = vor.u32 %v14050_v10, %v10674_v16  ;;  %v8080_v10 = vpop.f32.mrf.mxu1 }
 0x64c   :  { %v14114_v20 = vld [vmem:[#allocation7 + $0xc34] sm:$0xf0]  ;;  %8287 = vmatmul.bf16.vlgmr.msrb.gmra.mxu1 %v15519_v44 }
 0x64d   :  { %v11186_v4 = vld [vmem:[#allocation7 + $0xe18] sm:$0xf]  ;;  %v10931_v54 = vor.u32 %v14114_v20, %v10930_v18  ;;  %8331 = vmatpush.bf16.msra.mxu1 %v11667_v2  ;;  %8299 = vmatpush.bf16.msrb.mxu2 %v10675_v12 }
 0x64e   :  { %v14178_v39 = vld [vmem:[#allocation7 + $0xe34] sm:$0xf0] }
 0x64f   :  { %v11922_v17 = vld [vmem:[#allocation7 + $0x13d8] sm:$0xf]  ;;  %v11187_v11 = vor.u32 %v14178_v39, %v11186_v4  ;;  %8312 = vmatpush.bf16.msrb.mxu3 %v10931_v54  ;;  %v8081_v4 = vadd.f32 %v8080_v10, %v15728_v59 }
 0x650   :  { %v14362_v61 = vld [vmem:[#allocation7 + $0x13f4] sm:$0xf0]  ;;  %8300 = vmatmul.bf16.vlgmr.msrb.gmra.mxu2 %v15521_v34 }
 0x651   :  { %v12178_v40 = vld [vmem:[#allocation7 + $0x15d8] sm:$0xf]  ;;  %v11923_v55 = vor.u32 %v14362_v61, %v11922_v17  ;;  %8325 = vmatpush.bf16.msra.mxu0 %v11187_v11 }
 0x652   :  { %v14426_v60 = vld [vmem:[#allocation7 + $0x15f4] sm:$0xf0]  ;;  %8313 = vmatmul.bf16.vlgmr.msrb.gmra.mxu3 %v15523_v28 }
 0x653   :  { %v12434_v46 = vld [vmem:[#allocation7 + $0x17d8] sm:$0xf]  ;;  %v12179_v53 = vor.u32 %v14426_v60, %v12178_v40  ;;  %8344 = vmatpush.bf16.msra.mxu2 %v11923_v55  ;;  %v8119_v40 = vpop.f32.mrf.mxu0 }
 0x654   :  { %v14490_v8 = vld [vmem:[#allocation7 + $0x17f4] sm:$0xf0]  ;;  %8326 = vmatmul.bf16.vlgmr.msra.gmra.mxu0 %v15525_v49 }
 0x655   :  { %v11634_v58 = vld [vmem:[#allocation7 + $0x1198] sm:$0xf]  ;;  %v12435_v3 = vor.u32 %v14490_v8, %v12434_v46  ;;  %8357 = vmatpush.bf16.msra.mxu3 %v12179_v53 }
 0x656   :  { %v14290_v42 = vld [vmem:[#allocation7 + $0x11b4] sm:$0xf0] }
 0x657   :  { %v11890_v31 = vld [vmem:[#allocation7 + $0x1398] sm:$0xf]  ;;  %v11635_v25 = vor.u32 %v14290_v42, %v11634_v58  ;;  %8370 = vmatpush.bf16.msrb.mxu0 %v12435_v3 }
 0x658   :  { %v14354_v24 = vld [vmem:[#allocation7 + $0x13b4] sm:$0xf0] }
 0x659   :  { %v12146_v47 = vld [vmem:[#allocation7 + $0x1598] sm:$0xf]  ;;  %v11891_v35 = vor.u32 %v14354_v24, %v11890_v31  ;;  %8332 = vmatpush.bf16.msra.mxu1 %v11635_v25 }
 0x65a   :  { %v14418_v41 = vld [vmem:[#allocation7 + $0x15b4] sm:$0xf0] }
 0x65b   :  { %v12402_v5 = vld [vmem:[#allocation7 + $0x1798] sm:$0xf]  ;;  %v12147_v43 = vor.u32 %v14418_v41, %v12146_v47  ;;  %8345 = vmatpush.bf16.msra.mxu2 %v11891_v35 }
 0x65c   :  { %v14482_v48 = vld [vmem:[#allocation7 + $0x17b4] sm:$0xf0] }
 0x65d   :  { %v11602_v56 = vld [vmem:[#allocation7 + $0x1158] sm:$0xf]  ;;  %v12403_v51 = vor.u32 %v14482_v48, %v12402_v5  ;;  %8358 = vmatpush.bf16.msra.mxu3 %v12147_v43  ;;  %v8082_v5 = vpop.f32.mrf.mxu1  ;;  %v8093_v48 = vpop.f32.mrf.mxu2 }
 0x65e   :  { %v14282_v52 = vld [vmem:[#allocation7 + $0x1174] sm:$0xf0]  ;;  %v8106_v43 = vpop.f32.mrf.mxu3 }
 0x65f   :  { %v11858_v1 = vld [vmem:[#allocation7 + $0x1358] sm:$0xf]  ;;  %v11603_v6 = vor.u32 %v14282_v52, %v11602_v56  ;;  %8371 = vmatpush.bf16.msrb.mxu0 %v12403_v51  ;;  %v8094_v52 = vadd.f32 %v8093_v48, %v8081_v4 }
 0x660   :  { %v14346_v45 = vld [vmem:[#allocation7 + $0x1374] sm:$0xf0] }
 0x661   :  { %v12114_v50 = vld [vmem:[#allocation7 + $0x1558] sm:$0xf]  ;;  %v11859_v14 = vor.u32 %v14346_v45, %v11858_v1  ;;  %8333 = vmatpush.bf16.msra.mxu1 %v11603_v6 }
 0x662   :  { %v14410_v0 = vld [vmem:[#allocation7 + $0x1574] sm:$0xf0] }
 0x663   :  { %v12370_v27 = vld [vmem:[#allocation7 + $0x1758] sm:$0xf]  ;;  %v12115_v23 = vor.u32 %v14410_v0, %v12114_v50  ;;  %8346 = vmatpush.bf16.msra.mxu2 %v11859_v14  ;;  %v8107_v0 = vadd.f32 %v8106_v43, %v8094_v52 }
 0x664   :  { %v14474_v15 = vld [vmem:[#allocation7 + $0x1774] sm:$0xf0] }
 0x665   :  { %v11570_v7 = vld [vmem:[#allocation7 + $0x1118] sm:$0xf]  ;;  %v12371_v16 = vor.u32 %v14474_v15, %v12370_v27  ;;  %8359 = vmatpush.bf16.msra.mxu3 %v12115_v23  ;;  %v8121_v27 = vpop.f32.mrf.mxu0  ;;  %v15735_v4 = vadd.f32 %v8119_v40, %v8107_v0 }
 0x666   :  { %v14274_v13 = vld [vmem:[#allocation7 + $0x1134] sm:$0xf0] }
 0x667   :  { %v11826_v18 = vld [vmem:[#allocation7 + $0x1318] sm:$0xf]  ;;  %v11571_v61 = vor.u32 %v14274_v13, %v11570_v7  ;;  %8372 = vmatpush.bf16.msrb.mxu0 %v12371_v16 }
 0x668   :  { %v14338_v19 = vld [vmem:[#allocation7 + $0x1334] sm:$0xf0] }
 0x669   :  { %v12082_v20 = vld [vmem:[#allocation7 + $0x1518] sm:$0xf]  ;;  %v11827_v2 = vor.u32 %v14338_v19, %v11826_v18  ;;  %8334 = vmatpush.bf16.msra.mxu1 %v11571_v61 }
 0x66a   :  { %v14402_v39 = vld [vmem:[#allocation7 + $0x1534] sm:$0xf0] }
 0x66b   :  { %v12338_v26 = vld [vmem:[#allocation7 + $0x1718] sm:$0xf]  ;;  %v12083_v46 = vor.u32 %v14402_v39, %v12082_v20  ;;  %8347 = vmatpush.bf16.msra.mxu2 %v11827_v2 }
 0x66c   :  { %v14466_v17 = vld [vmem:[#allocation7 + $0x1734] sm:$0xf0] }
 0x66d   :  { %v11538_v12 = vld [vmem:[#allocation7 + $0x10d8] sm:$0xf]  ;;  %v12339_v8 = vor.u32 %v14466_v17, %v12338_v26  ;;  %8360 = vmatpush.bf16.msra.mxu3 %v12083_v46 }
 0x66e   :  { %v14266_v60 = vld [vmem:[#allocation7 + $0x10f4] sm:$0xf0] }
 0x66f   :  { %v11794_v54 = vld [vmem:[#allocation7 + $0x12d8] sm:$0xf]  ;;  %v11539_v53 = vor.u32 %v14266_v60, %v11538_v12  ;;  %8373 = vmatpush.bf16.msrb.mxu0 %v12339_v8  ;;  %v8095_v8 = vpop.f32.mrf.mxu2 }
 0x670   :  { %v14330_v11 = vld [vmem:[#allocation7 + $0x12f4] sm:$0xf0] }
 0x671   :  { %v12050_v55 = vld [vmem:[#allocation7 + $0x14d8] sm:$0xf]  ;;  %v11795_v3 = vor.u32 %v14330_v11, %v11794_v54  ;;  %8335 = vmatpush.bf16.msra.mxu1 %v11539_v53 }
 0x672   :  { %v14394_v58 = vld [vmem:[#allocation7 + $0x14f4] sm:$0xf0] }
 0x673   :  { %v12306_v42 = vld [vmem:[#allocation7 + $0x16d8] sm:$0xf]  ;;  %v12051_v47 = vor.u32 %v14394_v58, %v12050_v55  ;;  %8348 = vmatpush.bf16.msra.mxu2 %v11795_v3  ;;  %v8108_v58 = vpop.f32.mrf.mxu3 }
 0x674   :  { %v14458_v59 = vld [vmem:[#allocation7 + $0x16f4] sm:$0xf0] }
 0x675   :  { %v11506_v31 = vld [vmem:[#allocation7 + $0x1098] sm:$0xf]  ;;  %v12307_v41 = vor.u32 %v14458_v59, %v12306_v42  ;;  %8361 = vmatpush.bf16.msra.mxu3 %v12051_v47 }
 0x676   :  { %v14258_v24 = vld [vmem:[#allocation7 + $0x10b4] sm:$0xf0] }
 0x677   :  { %v11762_v25 = vld [vmem:[#allocation7 + $0x1298] sm:$0xf]  ;;  %v11507_v50 = vor.u32 %v14258_v24, %v11506_v31  ;;  %8374 = vmatpush.bf16.msrb.mxu0 %v12307_v41 }
 0x678   :  { %v14322_v35 = vld [vmem:[#allocation7 + $0x12b4] sm:$0xf0] }
 0x679   :  { %v12018_v56 = vld [vmem:[#allocation7 + $0x1498] sm:$0xf]  ;;  %v11763_v15 = vor.u32 %v14322_v35, %v11762_v25  ;;  %8336 = vmatpush.bf16.msra.mxu1 %v11507_v50 }
 0x67a   :  { %v14386_v51 = vld [vmem:[#allocation7 + $0x14b4] sm:$0xf0] }
 0x67b   :  { %v12274_v1 = vld [vmem:[#allocation7 + $0x1698] sm:$0xf]  ;;  %v12019_v7 = vor.u32 %v14386_v51, %v12018_v56  ;;  %8349 = vmatpush.bf16.msra.mxu2 %v11763_v15 }
 0x67c   :  { %v14450_v45 = vld [vmem:[#allocation7 + $0x16b4] sm:$0xf0] }
 0x67d   :  { %v11474_v6 = vld [vmem:[#allocation7 + $0x1058] sm:$0xf]  ;;  %v12275_v13 = vor.u32 %v14450_v45, %v12274_v1  ;;  %8362 = vmatpush.bf16.msra.mxu3 %v12019_v7 }
 0x67e   :  { %v14250_v14 = vld [vmem:[#allocation7 + $0x1074] sm:$0xf0] }
 0x67f   :  { %v11730_v23 = vld [vmem:[#allocation7 + $0x1258] sm:$0xf]  ;;  %v11475_v39 = vor.u32 %v14250_v14, %v11474_v6  ;;  %8375 = vmatpush.bf16.msrb.mxu0 %v12275_v13 }
 0x680   :  { %v14314_v16 = vld [vmem:[#allocation7 + $0x1274] sm:$0xf0] }
 0x681   :  { %v11986_v10 = vld [vmem:[#allocation7 + $0x1458] sm:$0xf]  ;;  %v11731_v17 = vor.u32 %v14314_v16, %v11730_v23  ;;  %8337 = vmatpush.bf16.msra.mxu1 %v11475_v39 }
 0x682   :  { %v14378_v18 = vld [vmem:[#allocation7 + $0x1474] sm:$0xf0] }
 0x683   :  { %v12242_v19 = vld [vmem:[#allocation7 + $0x1658] sm:$0xf]  ;;  %v11987_v60 = vor.u32 %v14378_v18, %v11986_v10  ;;  %8350 = vmatpush.bf16.msra.mxu2 %v11731_v17 }
 0x684   :  { %v14442_v20 = vld [vmem:[#allocation7 + $0x1674] sm:$0xf0] }
 0x685   :  { %v11442_v26 = vld [vmem:[#allocation7 + $0x1018] sm:$0xf]  ;;  %v12243_v46 = vor.u32 %v14442_v20, %v12242_v19  ;;  %8363 = vmatpush.bf16.msra.mxu3 %v11987_v60 }
 0x686   :  { %v14242_v61 = vld [vmem:[#allocation7 + $0x1034] sm:$0xf0] }
 0x687   :  { %v12690_v2 = vld [vmem:[#allocation7 + $0x19d8] sm:$0xf]  ;;  %v11443_v53 = vor.u32 %v14242_v61, %v11442_v26  ;;  %8376 = vmatpush.bf16.msrb.mxu0 %v12243_v46 }
 0x688   :  { %v14554_v12 = vld [vmem:[#allocation7 + $0x19f4] sm:$0xf0] }
 0x689   :  { %v11698_v54 = vld [vmem:[#allocation7 + $0x1218] sm:$0xf]  ;;  %v12691_v47 = vor.u32 %v14554_v12, %v12690_v2  ;;  %8338 = vmatpush.bf16.msra.mxu1 %v11443_v53 }
 0x68a   :  { %v14306_v11 = vld [vmem:[#allocation7 + $0x1234] sm:$0xf0] }
 0x68b   :  { %v11954_v55 = vld [vmem:[#allocation7 + $0x1418] sm:$0xf]  ;;  %v11699_v41 = vor.u32 %v14306_v11, %v11698_v54  ;;  %v8132_v11 = vpop.f32.mrf.mxu1 }
 0x68c   :  { %v14370_v42 = vld [vmem:[#allocation7 + $0x1434] sm:$0xf0]  ;;  %8339 = vmatmul.bf16.vlgmr.msra.gmra.mxu1 %v15532_v57 }
 0x68d   :  { %v12210_v40 = vld [vmem:[#allocation7 + $0x1618] sm:$0xf]  ;;  %v11955_v35 = vor.u32 %v14370_v42, %v11954_v55  ;;  %8383 = vmatpush.bf16.msrb.mxu1 %v12691_v47  ;;  %8351 = vmatpush.bf16.msra.mxu2 %v11699_v41 }
 0x68e   :  { %v14434_v59 = vld [vmem:[#allocation7 + $0x1634] sm:$0xf0] }
 0x68f   :  { %v12946_v3 = vld [vmem:[#allocation7 + $0x1bd8] sm:$0xf]  ;;  %v12211_v56 = vor.u32 %v14434_v59, %v12210_v40  ;;  %8364 = vmatpush.bf16.msra.mxu3 %v11955_v35  ;;  %v8133_v40 = vadd.f32 %v8132_v11, %v15735_v4 }
 0x690   :  { %v14618_v31 = vld [vmem:[#allocation7 + $0x1bf4] sm:$0xf0]  ;;  %8352 = vmatmul.bf16.vlgmr.msra.gmra.mxu2 %v15534_v62 }
 0x691   :  { %v13202_v24 = vld [vmem:[#allocation7 + $0x1dd8] sm:$0xf]  ;;  %v12947_v52 = vor.u32 %v14618_v31, %v12946_v3  ;;  %8377 = vmatpush.bf16.msrb.mxu0 %v12211_v56 }
 0x692   :  { %v14682_v5 = vld [vmem:[#allocation7 + $0x1df4] sm:$0xf0]  ;;  %8365 = vmatmul.bf16.vlgmr.msra.gmra.mxu3 %v15536_v37 }
 0x693   :  { %v13458_v48 = vld [vmem:[#allocation7 + $0x1fd8] sm:$0xf]  ;;  %v13203_v1 = vor.u32 %v14682_v5, %v13202_v24  ;;  %8396 = vmatpush.bf16.msrb.mxu2 %v12947_v52  ;;  %v8171_v24 = vpop.f32.mrf.mxu0 }
 0x694   :  { %v14746_v25 = vld [vmem:[#allocation7 + $0x1ff4] sm:$0xf0]  ;;  %8378 = vmatmul.bf16.vlgmr.msrb.gmra.mxu0 %v15538_v30 }
 0x695   :  { %v12658_v43 = vld [vmem:[#allocation7 + $0x1998] sm:$0xf]  ;;  %v13459_v45 = vor.u32 %v14746_v25, %v13458_v48  ;;  %8409 = vmatpush.bf16.msrb.mxu3 %v13203_v1 }
 0x696   :  { %v14546_v51 = vld [vmem:[#allocation7 + $0x19b4] sm:$0xf0] }
 0x697   :  { %v12914_v50 = vld [vmem:[#allocation7 + $0x1b98] sm:$0xf]  ;;  %v12659_v7 = vor.u32 %v14546_v51, %v12658_v43  ;;  %8422 = vmatpush.bf16.msra.mxu0 %v13459_v45 }
 0x698   :  { %v14610_v0 = vld [vmem:[#allocation7 + $0x1bb4] sm:$0xf0] }
 0x699   :  { %v13170_v27 = vld [vmem:[#allocation7 + $0x1d98] sm:$0xf]  ;;  %v12915_v13 = vor.u32 %v14610_v0, %v12914_v50  ;;  %8384 = vmatpush.bf16.msrb.mxu1 %v12659_v7 }
 0x69a   :  { %v14674_v15 = vld [vmem:[#allocation7 + $0x1db4] sm:$0xf0] }
 0x69b   :  { %v13426_v6 = vld [vmem:[#allocation7 + $0x1f98] sm:$0xf]  ;;  %v13171_v10 = vor.u32 %v14674_v15, %v13170_v27  ;;  %8397 = vmatpush.bf16.msrb.mxu2 %v12915_v13 }
 0x69c   :  { %v14738_v14 = vld [vmem:[#allocation7 + $0x1fb4] sm:$0xf0] }
 0x69d   :  { %v12626_v23 = vld [vmem:[#allocation7 + $0x1958] sm:$0xf]  ;;  %v13427_v18 = vor.u32 %v14738_v14, %v13426_v6  ;;  %8410 = vmatpush.bf16.msrb.mxu3 %v13171_v10  ;;  %v8134_v6 = vpop.f32.mrf.mxu1  ;;  %v8145_v14 = vpop.f32.mrf.mxu2 }
 0x69e   :  { %v14538_v16 = vld [vmem:[#allocation7 + $0x1974] sm:$0xf0]  ;;  %v8158_v10 = vpop.f32.mrf.mxu3  ;;  %v10132_v6 = vld [vmem:[#allocation7 + $0x5f8] sm:$0xf0] }
 0x69f   :  { %v12882_v19 = vld [vmem:[#allocation7 + $0x1b58] sm:$0xf]  ;;  %v12627_v2 = vor.u32 %v14538_v16, %v12626_v23  ;;  %8423 = vmatpush.bf16.msra.mxu0 %v13427_v18  ;;  %v8146_v16 = vadd.f32 %v8145_v14, %v8133_v40  ;;  %v13974_v14 = vld [vmem:[#allocation7 + $0x7dc] sm:$0xf] }
 0x6a0   :  { %v14602_v20 = vld [vmem:[#allocation7 + $0x1b74] sm:$0xf0] }
 0x6a1   :  { %v13138_v39 = vld [vmem:[#allocation7 + $0x1d58] sm:$0xf]  ;;  %v12883_v12 = vor.u32 %v14602_v20, %v12882_v19  ;;  %8385 = vmatpush.bf16.msrb.mxu1 %v12627_v2 }
 0x6a2   :  { %v14666_v26 = vld [vmem:[#allocation7 + $0x1d74] sm:$0xf0] }
 0x6a3   :  { %v13394_v17 = vld [vmem:[#allocation7 + $0x1f58] sm:$0xf]  ;;  %v13139_v8 = vor.u32 %v14666_v26, %v13138_v39  ;;  %8398 = vmatpush.bf16.msrb.mxu2 %v12883_v12  ;;  %v8159_v26 = vadd.f32 %v8158_v10, %v8146_v16  ;;  %v13774_v10 = vld [vmem:[#allocation7 + $0x19c] sm:$0xf] }
 0x6a4   :  { %v14730_v61 = vld [vmem:[#allocation7 + $0x1f74] sm:$0xf0] }
 0x6a5   :  { %v12594_v60 = vld [vmem:[#allocation7 + $0x1918] sm:$0xf]  ;;  %v13395_v54 = vor.u32 %v14730_v61, %v13394_v17  ;;  %8411 = vmatpush.bf16.msrb.mxu3 %v13139_v8  ;;  %v8173_v17 = vpop.f32.mrf.mxu0  ;;  %v15742_v40 = vadd.f32 %v8171_v24, %v8159_v26  ;;  %v9844_v26 = vld [vmem:[#allocation7 + $0x3b8] sm:$0xf0] }
 0x6a6   :  { %v14530_v46 = vld [vmem:[#allocation7 + $0x1934] sm:$0xf0]  ;;  %v13902_v17 = vld [vmem:[#allocation7 + $0x59c] sm:$0xf] }
 0x6a7   :  { %v12850_v55 = vld [vmem:[#allocation7 + $0x1b18] sm:$0xf]  ;;  %v12595_v31 = vor.u32 %v14530_v46, %v12594_v60  ;;  %8424 = vmatpush.bf16.msra.mxu0 %v13395_v54 }
 0x6a8   :  { %v14594_v58 = vld [vmem:[#allocation7 + $0x1b34] sm:$0xf0] }
 0x6a9   :  { %v13106_v42 = vld [vmem:[#allocation7 + $0x1d18] sm:$0xf]  ;;  %v12851_v47 = vor.u32 %v14594_v58, %v12850_v55  ;;  %8386 = vmatpush.bf16.msrb.mxu1 %v12595_v31 }
 0x6aa   :  { %v14658_v59 = vld [vmem:[#allocation7 + $0x1d34] sm:$0xf0] }
 0x6ab   :  { %v13362_v53 = vld [vmem:[#allocation7 + $0x1f18] sm:$0xf]  ;;  %v13107_v48 = vor.u32 %v14658_v59, %v13106_v42  ;;  %8399 = vmatpush.bf16.msrb.mxu2 %v12851_v47  ;;  %v13782_v47 = vld [vmem:[#allocation7 + $0x1dc] sm:$0xf] }
 0x6ac   :  { %v14722_v3 = vld [vmem:[#allocation7 + $0x1f34] sm:$0xf0] }
 0x6ad   :  { %v12562_v41 = vld [vmem:[#allocation7 + $0x18d8] sm:$0xf]  ;;  %v13363_v25 = vor.u32 %v14722_v3, %v13362_v53  ;;  %8412 = vmatpush.bf16.msrb.mxu3 %v13107_v48 }
 0x6ae   :  { %v14522_v5 = vld [vmem:[#allocation7 + $0x18f4] sm:$0xf0] }
 0x6af   :  { %v12818_v35 = vld [vmem:[#allocation7 + $0x1ad8] sm:$0xf]  ;;  %v12563_v1 = vor.u32 %v14522_v5, %v12562_v41  ;;  %8425 = vmatpush.bf16.msra.mxu0 %v13363_v25  ;;  %v9620_v41 = vld [vmem:[#allocation7 + $0x1f8] sm:$0xf0]  ;;  %v8147_v25 = vpop.f32.mrf.mxu2 }
 0x6b0   :  { %v14586_v56 = vld [vmem:[#allocation7 + $0x1af4] sm:$0xf0] }
 0x6b1   :  { %v13074_v52 = vld [vmem:[#allocation7 + $0x1cd8] sm:$0xf]  ;;  %v12819_v45 = vor.u32 %v14586_v56, %v12818_v35  ;;  %8387 = vmatpush.bf16.msrb.mxu1 %v12563_v1 }
 0x6b2   :  { %v14650_v43 = vld [vmem:[#allocation7 + $0x1cf4] sm:$0xf0] }
 0x6b3   :  { %v13330_v51 = vld [vmem:[#allocation7 + $0x1ed8] sm:$0xf]  ;;  %v13075_v27 = vor.u32 %v14650_v43, %v13074_v52  ;;  %8400 = vmatpush.bf16.msrb.mxu2 %v12819_v45  ;;  %v8160_v43 = vpop.f32.mrf.mxu3  ;;  %v13846_v45 = vld [vmem:[#allocation7 + $0x3dc] sm:$0xf] }
 0x6b4   :  { %v14714_v4 = vld [vmem:[#allocation7 + $0x1ef4] sm:$0xf0]  ;;  %v9780_v43 = vld [vmem:[#allocation7 + $0x338] sm:$0xf0] }
 0x6b5   :  { %v12530_v50 = vld [vmem:[#allocation7 + $0x1898] sm:$0xf]  ;;  %v13331_v15 = vor.u32 %v14714_v4, %v13330_v51  ;;  %8413 = vmatpush.bf16.msrb.mxu3 %v13075_v27  ;;  %v9623_v27 = vor.u32 %v13782_v47, %v9620_v41 }
 0x6b6   :  { %v14514_v0 = vld [vmem:[#allocation7 + $0x18b4] sm:$0xf0] }
 0x6b7   :  { %v12786_v7 = vld [vmem:[#allocation7 + $0x1a98] sm:$0xf]  ;;  %v12531_v39 = vor.u32 %v14514_v0, %v12530_v50  ;;  %8426 = vmatpush.bf16.msra.mxu0 %v13331_v15  ;;  %v9876_v50 = vld [vmem:[#allocation7 + $0x3f8] sm:$0xf0] }
 0x6b8   :  { %v14578_v13 = vld [vmem:[#allocation7 + $0x1ab4] sm:$0xf0]  ;;  %v13910_v0 = vld [vmem:[#allocation7 + $0x5dc] sm:$0xf]  ;;  %v9879_v16 = vor.u32 %v13846_v45, %v9876_v50 }
 0x6b9   :  { %v13042_v23 = vld [vmem:[#allocation7 + $0x1c98] sm:$0xf]  ;;  %v12787_v61 = vor.u32 %v14578_v13, %v12786_v7  ;;  %8388 = vmatpush.bf16.msrb.mxu1 %v12531_v39  ;;  %v10388_v7 = vld [vmem:[#allocation7 + $0x7f8] sm:$0xf0] }
 0x6ba   :  { %v14642_v18 = vld [vmem:[#allocation7 + $0x1cb4] sm:$0xf0]  ;;  %v13838_v39 = vld [vmem:[#allocation7 + $0x39c] sm:$0xf] }
 0x6bb   :  { %v13298_v19 = vld [vmem:[#allocation7 + $0x1e98] sm:$0xf]  ;;  %v13043_v60 = vor.u32 %v14642_v18, %v13042_v23  ;;  %8401 = vmatpush.bf16.msrb.mxu2 %v12787_v61  ;;  %v9588_v18 = vld [vmem:[#allocation7 + $0x1b8] sm:$0xf0] }
 0x6bc   :  { %v14706_v20 = vld [vmem:[#allocation7 + $0x1eb4] sm:$0xf0]  ;;  %v10100_v61 = vld [vmem:[#allocation7 + $0x5b8] sm:$0xf0] }
 0x6bd   :  { %v12498_v2 = vld [vmem:[#allocation7 + $0x1858] sm:$0xf]  ;;  %v13299_v46 = vor.u32 %v14706_v20, %v13298_v19  ;;  %8414 = vmatpush.bf16.msrb.mxu3 %v13043_v60  ;;  %v10135_v19 = vor.u32 %v13910_v0, %v10132_v6  ;;  %v10391_v20 = vor.u32 %v13974_v14, %v10388_v7  ;;  %v9591_v60 = vor.u32 %v13774_v10, %v9588_v18  ;;  %v10292_v45 = vld [vmem:[#allocation7 + $0x738] sm:$0xf0]  ;;  %v8223_v0 = vpop.f32.mrf.mxu0 }
 0x6be   :  { %v14506_v12 = vld [vmem:[#allocation7 + $0x1874] sm:$0xf0]  ;;  %v9492_v6 = vld [vmem:[#allocation7 + $0xf8] sm:$0xf0] }
 0x6bf   :  { %v12754_v8 = vld [vmem:[#allocation7 + $0x1a58] sm:$0xf]  ;;  %v12499_v59 = vor.u32 %v14506_v12, %v12498_v2  ;;  %8427 = vmatpush.bf16.msra.mxu0 %v13299_v46  ;;  %v13966_v2 = vld [vmem:[#allocation7 + $0x79c] sm:$0xf]  ;;  %v9847_v46 = vor.u32 %v13838_v39, %v9844_v26 }
 0x6c0   :  { %v14570_v54 = vld [vmem:[#allocation7 + $0x1a74] sm:$0xf0]  ;;  %v10356_v12 = vld [vmem:[#allocation7 + $0x7b8] sm:$0xf0] }
 0x6c1   :  { %v13010_v11 = vld [vmem:[#allocation7 + $0x1c58] sm:$0xf]  ;;  %v12755_v3 = vor.u32 %v14570_v54, %v12754_v8  ;;  %8389 = vmatpush.bf16.msrb.mxu1 %v12499_v59  ;;  %v13766_v8 = vld [vmem:[#allocation7 + $0x15c] sm:$0xf] }
 0x6c2   :  { %v14634_v55 = vld [vmem:[#allocation7 + $0x1c74] sm:$0xf0]  ;;  %v9556_v54 = vld [vmem:[#allocation7 + $0x178] sm:$0xf0] }
 0x6c3   :  { %v13266_v58 = vld [vmem:[#allocation7 + $0x1e58] sm:$0xf]  ;;  %v13011_v5 = vor.u32 %v14634_v55, %v13010_v11  ;;  %8402 = vmatpush.bf16.msrb.mxu2 %v12755_v3  ;;  %v10103_v11 = vor.u32 %v13902_v17, %v10100_v61  ;;  %v10359_v55 = vor.u32 %v13966_v2, %v10356_v12  ;;  %v13894_v59 = vld [vmem:[#allocation7 + $0x55c] sm:$0xf]  ;;  %v9559_v47 = vor.u32 %v13766_v8, %v9556_v54 }
 0x6c4   :  { %v14698_v42 = vld [vmem:[#allocation7 + $0x1e74] sm:$0xf0]  ;;  %v13958_v3 = vld [vmem:[#allocation7 + $0x75c] sm:$0xf] }
 0x6c5   :  { %v12466_v53 = vld [vmem:[#allocation7 + $0x1818] sm:$0xf]  ;;  %v13267_v48 = vor.u32 %v14698_v42, %v13266_v58  ;;  %8415 = vmatpush.bf16.msrb.mxu3 %v13011_v5  ;;  %v13830_v58 = vld [vmem:[#allocation7 + $0x35c] sm:$0xf] }
 0x6c6   :  { %v14498_v31 = vld [vmem:[#allocation7 + $0x1834] sm:$0xf0]  ;;  %v9812_v42 = vld [vmem:[#allocation7 + $0x378] sm:$0xf0] }
 0x6c7   :  { %v12722_v35 = vld [vmem:[#allocation7 + $0x1a18] sm:$0xf]  ;;  %v12467_v1 = vor.u32 %v14498_v31, %v12466_v53  ;;  %8428 = vmatpush.bf16.msra.mxu0 %v13267_v48  ;;  %v10068_v53 = vld [vmem:[#allocation7 + $0x578] sm:$0xf0]  ;;  %v9815_v41 = vor.u32 %v13830_v58, %v9812_v42 }
 0x6c8   :  { %v14562_v56 = vld [vmem:[#allocation7 + $0x1a34] sm:$0xf0]  ;;  %v10324_v31 = vld [vmem:[#allocation7 + $0x778] sm:$0xf0]  ;;  %v10071_v25 = vor.u32 %v13894_v59, %v10068_v53 }
 0x6c9   :  { %v12978_v52 = vld [vmem:[#allocation7 + $0x1c18] sm:$0xf]  ;;  %v12723_v15 = vor.u32 %v14562_v56, %v12722_v35  ;;  %8390 = vmatpush.bf16.msrb.mxu1 %v12467_v1  ;;  %v13758_v5 = vld [vmem:[#allocation7 + $0x11c] sm:$0xf]  ;;  %v10327_v35 = vor.u32 %v13958_v3, %v10324_v31  ;;  %v8184_v56 = vpop.f32.mrf.mxu1  ;;  %v8225_v31 = vpop.f32.mrf.mxu0 }
 0x6ca   :  { %v14626_v51 = vld [vmem:[#allocation7 + $0x1c34] sm:$0xf0]  ;;  %v9524_v48 = vld [vmem:[#allocation7 + $0x138] sm:$0xf0] }
 0x6cb   :  { %v13234_v24 = vld [vmem:[#allocation7 + $0x1e18] sm:$0xf]  ;;  %v12979_v13 = vor.u32 %v14626_v51, %v12978_v52  ;;  %8403 = vmatpush.bf16.msrb.mxu2 %v12723_v15  ;;  %v13822_v52 = vld [vmem:[#allocation7 + $0x31c] sm:$0xf]  ;;  %v9527_v50 = vor.u32 %v13758_v5, %v9524_v48 }
 0x6cc   :  { %v14690_v4 = vld [vmem:[#allocation7 + $0x1e34] sm:$0xf0]  ;;  %8391 = vmatmul.bf16.vlgmr.msrb.gmra.mxu1 %v15545_v32  ;;  %v13886_v51 = vld [vmem:[#allocation7 + $0x51c] sm:$0xf] }
 0x6cd   :  { %v13235_v23 = vor.u32 %v14690_v4, %v13234_v24  ;;  %8435 = vmatpush.bf16.msra.mxu1 %v9623_v27  ;;  %8416 = vmatpush.bf16.msrb.mxu3 %v12979_v13  ;;  %v8185_v24 = vadd.f32 %v8184_v56, %v15742_v40  ;;  %v10036_v4 = vld [vmem:[#allocation7 + $0x538] sm:$0xf0]  ;;  %v9783_v27 = vor.u32 %v13822_v52, %v9780_v43 }
 0x6ce   :  { %8404 = vmatmul.bf16.vlgmr.msrb.gmra.mxu2 %v15547_v22  ;;  %v13950_v1 = vld [vmem:[#allocation7 + $0x71c] sm:$0xf]  ;;  %v10039_v14 = vor.u32 %v13886_v51, %v10036_v4 }
 0x6cf   :  { %8429 = vmatpush.bf16.msra.mxu0 %v13235_v23  ;;  %8448 = vmatpush.bf16.msra.mxu2 %v9879_v16  ;;  %v13750_v15 = vld [vmem:[#allocation7 + $0xdc] sm:$0xf]  ;;  %v10295_v7 = vor.u32 %v13950_v1, %v10292_v45 }
 0x6d0   :  { %8417 = vmatmul.bf16.vlgmr.msrb.gmra.mxu3 %v15549_v33  ;;  %v13814_v13 = vld [vmem:[#allocation7 + $0x2dc] sm:$0xf] }
 0x6d1   :  { %8461 = vmatpush.bf16.msra.mxu3 %v10135_v19  ;;  %8436 = vmatpush.bf16.msra.mxu1 %v9591_v60  ;;  %v9748_v23 = vld [vmem:[#allocation7 + $0x2f8] sm:$0xf0]  ;;  %v8647_v19 = vmax.f32 %v15722_v63, 0.0  ;;  %v8186_v12 = vpop.f32.mrf.mxu1  ;;  %v8197_v60 = vpop.f32.mrf.mxu2 }
 0x6d2   :  { %8430 = vmatmul.bf16.vlgmr.msra.gmra.mxu0 %v15552_v9  ;;  %v13878_v16 = vld [vmem:[#allocation7 + $0x4dc] sm:$0xf]  ;;  %v9751_v39 = vor.u32 %v13814_v13, %v9748_v23 }
 0x6d3   :  { %8474 = vmatpush.bf16.msrb.mxu0 %v10391_v20  ;;  %8449 = vmatpush.bf16.msra.mxu2 %v9847_v46  ;;  %v10004_v10 = vld [vmem:[#allocation7 + $0x4f8] sm:$0xf0]  ;;  %v9495_v20 = vor.u32 %v13750_v15, %v9492_v6  ;;  %v8663_v59 = vmul.f32 3.3333333, %v8647_v19 }
 0x6d4   :  { %v13942_v18 = vld [vmem:[#allocation7 + $0x6dc] sm:$0xf]  ;;  %v10007_v61 = vor.u32 %v13878_v16, %v10004_v10 }
 0x6d5   :  { %8462 = vmatpush.bf16.msra.mxu3 %v10103_v11  ;;  %8437 = vmatpush.bf16.msra.mxu1 %v9559_v47  ;;  %v10260_v40 = vld [vmem:[#allocation7 + $0x6f8] sm:$0xf0]  ;;  %v8198_v11 = vadd.f32 %v8197_v60, %v8185_v24 }
 0x6d6   :  { %v13742_v26 = vld [vmem:[#allocation7 + $0x9c] sm:$0xf]  ;;  %v10263_v2 = vor.u32 %v13942_v18, %v10260_v40 }
 0x6d7   :  { %8475 = vmatpush.bf16.msrb.mxu0 %v10359_v55  ;;  %8450 = vmatpush.bf16.msra.mxu2 %v9815_v41  ;;  %v9460_v17 = vld [vmem:[#allocation7 + $0xb8] sm:$0xf0]  ;;  %v8210_v55 = vpop.f32.mrf.mxu3 }
 0x6d8   :  { %v13806_v46 = vld [vmem:[#allocation7 + $0x29c] sm:$0xf]  ;;  %v9463_v53 = vor.u32 %v13742_v26, %v9460_v17  ;;  %v8211_v3 = vadd.f32 %v8210_v55, %v8198_v11 }
 0x6d9   :  { %8463 = vmatpush.bf16.msra.mxu3 %v10071_v25  ;;  %8438 = vmatpush.bf16.msra.mxu1 %v9527_v50  ;;  %v9716_v8 = vld [vmem:[#allocation7 + $0x2b8] sm:$0xf0]  ;;  %v8199_v10 = vpop.f32.mrf.mxu2 }
 0x6da   :  { %v13870_v54 = vld [vmem:[#allocation7 + $0x49c] sm:$0xf]  ;;  %v9719_v47 = vor.u32 %v13806_v46, %v9716_v8  ;;  %v8224_v51 = vadd.f32 %v8223_v0, %v8211_v3  ;;  %v8236_v10 = vpop.f32.mrf.mxu1 }
 0x6db   :  { %8476 = vmatpush.bf16.msrb.mxu0 %v10327_v35  ;;  %8451 = vmatpush.bf16.msra.mxu2 %v9783_v27  ;;  %v9972_v58 = vld [vmem:[#allocation7 + $0x4b8] sm:$0xf0] }
 0x6dc   :  { %v13934_v42 = vld [vmem:[#allocation7 + $0x69c] sm:$0xf]  ;;  %v9975_v25 = vor.u32 %v13870_v54, %v9972_v58  ;;  %v8648_v6 = vmax.f32 %v8224_v51, 0.0 }
 0x6dd   :  { %8464 = vmatpush.bf16.msra.mxu3 %v10039_v14  ;;  %v10228_v63 = vld [vmem:[#allocation7 + $0x6b8] sm:$0xf0]  ;;  %8439 = vmatpush.bf16.msra.mxu1 %v9495_v20 }
 0x6de   :  { %v13734_v41 = vld [vmem:[#allocation7 + $0x5c] sm:$0xf]  ;;  %v10231_v35 = vor.u32 %v13934_v42, %v10228_v63  ;;  %v8664_v19 = vmul.f32 3.3333333, %v8648_v6 }
 0x6df   :  { %8477 = vmatpush.bf16.msrb.mxu0 %v10295_v7  ;;  %8452 = vmatpush.bf16.msra.mxu2 %v9751_v39  ;;  %v9428_v5 = vld [vmem:[#allocation7 + $0x78] sm:$0xf0]  ;;  %v8212_v20 = vpop.f32.mrf.mxu3 }
 0x6e0   :  { %v13798_v48 = vld [vmem:[#allocation7 + $0x25c] sm:$0xf]  ;;  %v9431_v45 = vor.u32 %v13734_v41, %v9428_v5  ;;  %v8678_v60 = vrot.slane %v8664_v19, 6 }
 0x6e1   :  { %8465 = vmatpush.bf16.msra.mxu3 %v10007_v61  ;;  %v9684_v56 = vld [vmem:[#allocation7 + $0x278] sm:$0xf0]  ;;  %8440 = vmatpush.bf16.msra.mxu1 %v9463_v53 }
 0x6e2   :  { %v13862_v52 = vld [vmem:[#allocation7 + $0x45c] sm:$0xf]  ;;  %v9687_v14 = vor.u32 %v13798_v48, %v9684_v56  ;;  %v15751_v42 = vsel %vm351_vm3, %v8663_v59, %v8678_v60 }
 0x6e3   :  { %8478 = vmatpush.bf16.msrb.mxu0 %v10263_v2  ;;  %v9940_v43 = vld [vmem:[#allocation7 + $0x478] sm:$0xf0]  ;;  %8453 = vmatpush.bf16.msra.mxu2 %v9719_v47 }
 0x6e4   :  { %v13926_v24 = vld [vmem:[#allocation7 + $0x65c] sm:$0xf]  ;;  %v9943_v23 = vor.u32 %v13862_v52, %v9940_v43 }
 0x6e5   :  { %v10196_v4 = vld [vmem:[#allocation7 + $0x678] sm:$0xf0]  ;;  %8466 = vmatpush.bf16.msra.mxu3 %v9975_v25  ;;  %8441 = vmatpush.bf16.msra.mxu1 %v9431_v45 }
 0x6e6   :  { %v13726_v1 = vld [vmem:[#allocation7 + $0x1c] sm:$0xf]  ;;  %v10199_v16 = vor.u32 %v13926_v24, %v10196_v4 }
 0x6e7   :  { %v9396_v50 = vld [vmem:[#allocation7 + $0x38] sm:$0xf0]  ;;  %8479 = vmatpush.bf16.msrb.mxu0 %v10231_v35  ;;  %8454 = vmatpush.bf16.msra.mxu2 %v9687_v14 }
 0x6e8   :  { %v14038_v27 = vld [vmem:[#allocation7 + $0x9dc] sm:$0xf]  ;;  %v9399_v17 = vor.u32 %v13726_v1, %v9396_v50 }
 0x6e9   :  { %v10644_v15 = vld [vmem:[#allocation7 + $0x9f8] sm:$0xf0]  ;;  %8467 = vmatpush.bf16.msra.mxu3 %v9943_v23 }
 0x6ea   :  { %v13790_v7 = vld [vmem:[#allocation7 + $0x21c] sm:$0xf]  ;;  %v10647_v46 = vor.u32 %v14038_v27, %v10644_v15  ;;  %8442 = vmatpush.bf16.msra.mxu1 %v9399_v17 }
 0x6eb   :  { %v9652_v13 = vld [vmem:[#allocation7 + $0x238] sm:$0xf0]  ;;  %8480 = vmatpush.bf16.msrb.mxu0 %v10199_v16 }
 0x6ec   :  { %v13854_v18 = vld [vmem:[#allocation7 + $0x41c] sm:$0xf]  ;;  %v9655_v8 = vor.u32 %v13790_v7, %v9652_v13 }
 0x6ed   :  { %v9908_v0 = vld [vmem:[#allocation7 + $0x438] sm:$0xf0]  ;;  %8443 = vmatmul.bf16.vlgmr.msra.gmra.mxu1 %v15506_v21 }
 0x6ee   :  { %v13918_v40 = vld [vmem:[#allocation7 + $0x61c] sm:$0xf]  ;;  %v9911_v55 = vor.u32 %v13854_v18, %v9908_v0  ;;  %8487 = vmatpush.bf16.msrb.mxu1 %v10647_v46  ;;  %8455 = vmatpush.bf16.msra.mxu2 %v9655_v8 }
 0x6ef   :  { %v10164_v39 = vld [vmem:[#allocation7 + $0x638] sm:$0xf0] }
 0x6f0   :  { %v14102_v26 = vld [vmem:[#allocation7 + $0xbdc] sm:$0xf]  ;;  %v10167_v58 = vor.u32 %v13918_v40, %v10164_v39  ;;  %8468 = vmatpush.bf16.msra.mxu3 %v9911_v55 }
 0x6f1   :  { %v10900_v61 = vld [vmem:[#allocation7 + $0xbf8] sm:$0xf0]  ;;  %8456 = vmatmul.bf16.vlgmr.msra.gmra.mxu2 %v15508_v29 }
 0x6f2   :  { %v14166_v2 = vld [vmem:[#allocation7 + $0xddc] sm:$0xf]  ;;  %v10903_v63 = vor.u32 %v14102_v26, %v10900_v61  ;;  %8481 = vmatpush.bf16.msrb.mxu0 %v10167_v58  ;;  %v8275_v26 = vpop.f32.mrf.mxu0 }
 0x6f3   :  { %v11156_v12 = vld [vmem:[#allocation7 + $0xdf8] sm:$0xf0]  ;;  %8469 = vmatmul.bf16.vlgmr.msra.gmra.mxu3 %v15510_v36 }
 0x6f4   :  { %v14230_v54 = vld [vmem:[#allocation7 + $0xfdc] sm:$0xf]  ;;  %v11159_v31 = vor.u32 %v14166_v2, %v11156_v12  ;;  %8500 = vmatpush.bf16.msrb.mxu2 %v10903_v63 }
 0x6f5   :  { %v11412_v11 = vld [vmem:[#allocation7 + $0xff8] sm:$0xf0]  ;;  %8482 = vmatmul.bf16.vlgmr.msrb.gmra.mxu0 %v15512_v38  ;;  %v15757_v38 = vld [vmem:[#allocation8] sm:$0xff] }
 0x6f6   :  { %v14030_v53 = vld [vmem:[#allocation7 + $0x99c] sm:$0xf]  ;;  %v11415_v47 = vor.u32 %v14230_v54, %v11412_v11  ;;  %8513 = vmatpush.bf16.msrb.mxu3 %v11159_v31  ;;  %v1849_v39 = vperm.slane %v15757_v38, 6 }
 0x6f7   :  { %v10612_v3 = vld [vmem:[#allocation7 + $0x9b8] sm:$0xf0] }
 0x6f8   :  { %v14094_v41 = vld [vmem:[#allocation7 + $0xb9c] sm:$0xf]  ;;  %v10615_v52 = vor.u32 %v14030_v53, %v10612_v3  ;;  %8526 = vmatpush.bf16.msra.mxu0 %v11415_v47  ;;  %v8237_v53 = vadd.f32 %v8236_v10, %v1849_v39 }
 0x6f9   :  { %v10868_v5 = vld [vmem:[#allocation7 + $0xbb8] sm:$0xf0] }
 0x6fa   :  { %v14158_v48 = vld [vmem:[#allocation7 + $0xd9c] sm:$0xf]  ;;  %v10871_v59 = vor.u32 %v14094_v41, %v10868_v5  ;;  %8488 = vmatpush.bf16.msrb.mxu1 %v10615_v52 }
 0x6fb   :  { %v11124_v25 = vld [vmem:[#allocation7 + $0xdb8] sm:$0xf0] }
 0x6fc   :  { %v14222_v35 = vld [vmem:[#allocation7 + $0xf9c] sm:$0xf]  ;;  %v11127_v24 = vor.u32 %v14158_v48, %v11124_v25  ;;  %8501 = vmatpush.bf16.msrb.mxu2 %v10871_v59  ;;  %v8238_v48 = vpop.f32.mrf.mxu1  ;;  %v8249_v25 = vpop.f32.mrf.mxu2 }
 0x6fd   :  { %v11380_v56 = vld [vmem:[#allocation7 + $0xfb8] sm:$0xf0]  ;;  %v8250_v59 = vadd.f32 %v8249_v25, %v8237_v53 }
 0x6fe   :  { %v14022_v43 = vld [vmem:[#allocation7 + $0x95c] sm:$0xf]  ;;  %v11383_v4 = vor.u32 %v14222_v35, %v11380_v56  ;;  %8514 = vmatpush.bf16.msrb.mxu3 %v11127_v24 }
 0x6ff   :  { %v10580_v51 = vld [vmem:[#allocation7 + $0x978] sm:$0xf0] }
 0x700   :  { %v14086_v1 = vld [vmem:[#allocation7 + $0xb5c] sm:$0xf]  ;;  %v10583_v21 = vor.u32 %v14022_v43, %v10580_v51  ;;  %8527 = vmatpush.bf16.msra.mxu0 %v11383_v4  ;;  %v8262_v43 = vpop.f32.mrf.mxu3 }
 0x701   :  { %v10836_v45 = vld [vmem:[#allocation7 + $0xb78] sm:$0xf0] }
 0x702   :  { %v14150_v50 = vld [vmem:[#allocation7 + $0xd5c] sm:$0xf]  ;;  %v10839_v14 = vor.u32 %v14086_v1, %v10836_v45  ;;  %8489 = vmatpush.bf16.msrb.mxu1 %v10583_v21  ;;  %v8263_v45 = vadd.f32 %v8262_v43, %v8250_v59 }
 0x703   :  { %v11092_v27 = vld [vmem:[#allocation7 + $0xd78] sm:$0xf0] }
 0x704   :  { %v14214_v15 = vld [vmem:[#allocation7 + $0xf5c] sm:$0xf]  ;;  %v11095_v23 = vor.u32 %v14150_v50, %v11092_v27  ;;  %8502 = vmatpush.bf16.msrb.mxu2 %v10839_v14  ;;  %v8277_v50 = vpop.f32.mrf.mxu0 }
 0x705   :  { %v11348_v6 = vld [vmem:[#allocation7 + $0xf78] sm:$0xf0] }
 0x706   :  { %v14014_v7 = vld [vmem:[#allocation7 + $0x91c] sm:$0xf]  ;;  %v11351_v16 = vor.u32 %v14214_v15, %v11348_v6  ;;  %8515 = vmatpush.bf16.msrb.mxu3 %v11095_v23 }
 0x707   :  { %v10548_v13 = vld [vmem:[#allocation7 + $0x938] sm:$0xf0] }
 0x708   :  { %v14078_v18 = vld [vmem:[#allocation7 + $0xb1c] sm:$0xf]  ;;  %v10551_v20 = vor.u32 %v14014_v7, %v10548_v13  ;;  %8528 = vmatpush.bf16.msra.mxu0 %v11351_v16 }
 0x709   :  { %v10804_v29 = vld [vmem:[#allocation7 + $0xb38] sm:$0xf0] }
 0x70a   :  { %v14142_v0 = vld [vmem:[#allocation7 + $0xd1c] sm:$0xf]  ;;  %v10807_v17 = vor.u32 %v14078_v18, %v10804_v29  ;;  %8490 = vmatpush.bf16.msrb.mxu1 %v10551_v20  ;;  %v15760_v29 = vadd.f32 %v8275_v26, %v8263_v45 }
 0x70b   :  { %v11060_v36 = vld [vmem:[#allocation7 + $0xd38] sm:$0xf0] }
 0x70c   :  { %v14206_v40 = vld [vmem:[#allocation7 + $0xf1c] sm:$0xf]  ;;  %v11063_v12 = vor.u32 %v14142_v0, %v11060_v36  ;;  %8503 = vmatpush.bf16.msrb.mxu2 %v10807_v17 }
 0x70d   :  { %v11316_v19 = vld [vmem:[#allocation7 + $0xf38] sm:$0xf0] }
 0x70e   :  { %v14006_v61 = vld [vmem:[#allocation7 + $0x8dc] sm:$0xf]  ;;  %v11319_v60 = vor.u32 %v14206_v40, %v11316_v19  ;;  %8516 = vmatpush.bf16.msrb.mxu3 %v11063_v12 }
 0x70f   :  { %v10516_v2 = vld [vmem:[#allocation7 + $0x8f8] sm:$0xf0] }
 0x710   :  { %v14070_v46 = vld [vmem:[#allocation7 + $0xadc] sm:$0xf]  ;;  %v10519_v63 = vor.u32 %v14006_v61, %v10516_v2  ;;  %8529 = vmatpush.bf16.msra.mxu0 %v11319_v60  ;;  %v8251_v2 = vpop.f32.mrf.mxu2 }
 0x711   :  { %v10772_v8 = vld [vmem:[#allocation7 + $0xaf8] sm:$0xf0] }
 0x712   :  { %v14134_v54 = vld [vmem:[#allocation7 + $0xcdc] sm:$0xf]  ;;  %v10775_v3 = vor.u32 %v14070_v46, %v10772_v8  ;;  %8491 = vmatpush.bf16.msrb.mxu1 %v10519_v63  ;;  %v8264_v8 = vpop.f32.mrf.mxu3 }
 0x713   :  { %v11028_v11 = vld [vmem:[#allocation7 + $0xcf8] sm:$0xf0]  ;;  %v8327_v8 = vpop.f32.mrf.mxu0 }
 0x714   :  { %v14198_v55 = vld [vmem:[#allocation7 + $0xedc] sm:$0xf]  ;;  %v11031_v41 = vor.u32 %v14134_v54, %v11028_v11  ;;  %8504 = vmatpush.bf16.msrb.mxu2 %v10775_v3 }
 0x715   :  { %v11284_v58 = vld [vmem:[#allocation7 + $0xef8] sm:$0xf0] }
 0x716   :  { %v13998_v31 = vld [vmem:[#allocation7 + $0x89c] sm:$0xf]  ;;  %v11287_v5 = vor.u32 %v14198_v55, %v11284_v58  ;;  %8517 = vmatpush.bf16.msrb.mxu3 %v11031_v41 }
 0x717   :  { %v10484_v47 = vld [vmem:[#allocation7 + $0x8b8] sm:$0xf0] }
 0x718   :  { %v14062_v35 = vld [vmem:[#allocation7 + $0xa9c] sm:$0xf]  ;;  %v10487_v1 = vor.u32 %v13998_v31, %v10484_v47  ;;  %8530 = vmatpush.bf16.msra.mxu0 %v11287_v5 }
 0x719   :  { %v10740_v56 = vld [vmem:[#allocation7 + $0xab8] sm:$0xf0] }
 0x71a   :  { %v14126_v52 = vld [vmem:[#allocation7 + $0xc9c] sm:$0xf]  ;;  %v10743_v27 = vor.u32 %v14062_v35, %v10740_v56  ;;  %8492 = vmatpush.bf16.msrb.mxu1 %v10487_v1 }
 0x71b   :  { %v10996_v51 = vld [vmem:[#allocation7 + $0xcb8] sm:$0xf0] }
 0x71c   :  { %v14190_v24 = vld [vmem:[#allocation7 + $0xe9c] sm:$0xf]  ;;  %v10999_v21 = vor.u32 %v14126_v52, %v10996_v51  ;;  %8505 = vmatpush.bf16.msrb.mxu2 %v10743_v27 }
 0x71d   :  { %v11252_v4 = vld [vmem:[#allocation7 + $0xeb8] sm:$0xf0] }
 0x71e   :  { %v13990_v15 = vld [vmem:[#allocation7 + $0x85c] sm:$0xf]  ;;  %v11255_v14 = vor.u32 %v14190_v24, %v11252_v4  ;;  %8518 = vmatpush.bf16.msrb.mxu3 %v10999_v21 }
 0x71f   :  { %v10452_v6 = vld [vmem:[#allocation7 + $0x878] sm:$0xf0] }
 0x720   :  { %v14054_v7 = vld [vmem:[#allocation7 + $0xa5c] sm:$0xf]  ;;  %v10455_v0 = vor.u32 %v13990_v15, %v10452_v6  ;;  %8531 = vmatpush.bf16.msra.mxu0 %v11255_v14 }
 0x721   :  { %v10708_v13 = vld [vmem:[#allocation7 + $0xa78] sm:$0xf0] }
 0x722   :  { %v14118_v23 = vld [vmem:[#allocation7 + $0xc5c] sm:$0xf]  ;;  %v10711_v40 = vor.u32 %v14054_v7, %v10708_v13  ;;  %8493 = vmatpush.bf16.msrb.mxu1 %v10455_v0 }
 0x723   :  { %v10964_v16 = vld [vmem:[#allocation7 + $0xc78] sm:$0xf0] }
 0x724   :  { %v14182_v10 = vld [vmem:[#allocation7 + $0xe5c] sm:$0xf]  ;;  %v10967_v17 = vor.u32 %v14118_v23, %v10964_v16  ;;  %8506 = vmatpush.bf16.msrb.mxu2 %v10711_v40 }
 0x725   :  { %v11220_v18 = vld [vmem:[#allocation7 + $0xe78] sm:$0xf0] }
 0x726   :  { %v13982_v36 = vld [vmem:[#allocation7 + $0x81c] sm:$0xf]  ;;  %v11223_v61 = vor.u32 %v14182_v10, %v11220_v18  ;;  %8519 = vmatpush.bf16.msrb.mxu3 %v10967_v17  ;;  %v8288_v17 = vpop.f32.mrf.mxu1 }
 0x727   :  { %v10420_v19 = vld [vmem:[#allocation7 + $0x838] sm:$0xf0] }
 0x728   :  { %v14294_v20 = vld [vmem:[#allocation7 + $0x11dc] sm:$0xf]  ;;  %v10423_v55 = vor.u32 %v13982_v36, %v10420_v19  ;;  %8532 = vmatpush.bf16.msra.mxu0 %v11223_v61 }
 0x729   :  { %v11668_v39 = vld [vmem:[#allocation7 + $0x11f8] sm:$0xf0] }
 0x72a   :  { %v14046_v12 = vld [vmem:[#allocation7 + $0xa1c] sm:$0xf]  ;;  %v11671_v3 = vor.u32 %v14294_v20, %v11668_v39  ;;  %8494 = vmatpush.bf16.msrb.mxu1 %v10423_v55 }
 0x72b   :  { %v10676_v60 = vld [vmem:[#allocation7 + $0xa38] sm:$0xf0] }
 0x72c   :  { %v14110_v46 = vld [vmem:[#allocation7 + $0xc1c] sm:$0xf]  ;;  %v10679_v31 = vor.u32 %v14046_v12, %v10676_v60 }
 0x72d   :  { %v10932_v54 = vld [vmem:[#allocation7 + $0xc38] sm:$0xf0]  ;;  %8495 = vmatmul.bf16.vlgmr.msrb.gmra.mxu1 %v15519_v44 }
 0x72e   :  { %v14174_v26 = vld [vmem:[#allocation7 + $0xe1c] sm:$0xf]  ;;  %v10935_v48 = vor.u32 %v14110_v46, %v10932_v54  ;;  %8539 = vmatpush.bf16.msra.mxu1 %v11671_v3  ;;  %8507 = vmatpush.bf16.msrb.mxu2 %v10679_v31 }
 0x72f   :  { %v11188_v11 = vld [vmem:[#allocation7 + $0xe38] sm:$0xf0] }
 0x730   :  { %v14358_v58 = vld [vmem:[#allocation7 + $0x13dc] sm:$0xf]  ;;  %v11191_v25 = vor.u32 %v14174_v26, %v11188_v11  ;;  %8520 = vmatpush.bf16.msrb.mxu3 %v10935_v48 }
 0x731   :  { %v11924_v63 = vld [vmem:[#allocation7 + $0x13f8] sm:$0xf0]  ;;  %8508 = vmatmul.bf16.vlgmr.msrb.gmra.mxu2 %v15521_v34 }
 0x732   :  { %v14422_v53 = vld [vmem:[#allocation7 + $0x15dc] sm:$0xf]  ;;  %v11927_v35 = vor.u32 %v14358_v58, %v11924_v63  ;;  %8533 = vmatpush.bf16.msra.mxu0 %v11191_v25 }
 0x733   :  { %v12180_v47 = vld [vmem:[#allocation7 + $0x15f8] sm:$0xf0]  ;;  %8521 = vmatmul.bf16.vlgmr.msrb.gmra.mxu3 %v15523_v28  ;;  %v8289_v28 = vadd.f32 %v8288_v17, %v15760_v29 }
 0x734   :  { %v14486_v41 = vld [vmem:[#allocation7 + $0x17dc] sm:$0xf]  ;;  %v12183_v59 = vor.u32 %v14422_v53, %v12180_v47  ;;  %8552 = vmatpush.bf16.msra.mxu2 %v11927_v35 }
 0x735   :  { %v12436_v5 = vld [vmem:[#allocation7 + $0x17f8] sm:$0xf0]  ;;  %8534 = vmatmul.bf16.vlgmr.msra.gmra.mxu0 %v15525_v49 }
 0x736   :  { %v14286_v56 = vld [vmem:[#allocation7 + $0x119c] sm:$0xf]  ;;  %v12439_v43 = vor.u32 %v14486_v41, %v12436_v5  ;;  %8565 = vmatpush.bf16.msra.mxu3 %v12183_v59  ;;  %v8301_v59 = vpop.f32.mrf.mxu2 }
 0x737   :  { %v11636_v52 = vld [vmem:[#allocation7 + $0x11b8] sm:$0xf0] }
 0x738   :  { %v14350_v51 = vld [vmem:[#allocation7 + $0x139c] sm:$0xf]  ;;  %v11639_v27 = vor.u32 %v14286_v56, %v11636_v52  ;;  %8578 = vmatpush.bf16.msrb.mxu0 %v12439_v43  ;;  %v8290_v52 = vpop.f32.mrf.mxu1 }
 0x739   :  { %v11892_v24 = vld [vmem:[#allocation7 + $0x13b8] sm:$0xf0] }
 0x73a   :  { %v14414_v4 = vld [vmem:[#allocation7 + $0x159c] sm:$0xf]  ;;  %v11895_v15 = vor.u32 %v14350_v51, %v11892_v24  ;;  %8540 = vmatpush.bf16.msra.mxu1 %v11639_v27 }
 0x73b   :  { %v12148_v1 = vld [vmem:[#allocation7 + $0x15b8] sm:$0xf0] }
 0x73c   :  { %v14478_v45 = vld [vmem:[#allocation7 + $0x179c] sm:$0xf]  ;;  %v12151_v14 = vor.u32 %v14414_v4, %v12148_v1  ;;  %8553 = vmatpush.bf16.msra.mxu2 %v11895_v15  ;;  %v8302_v4 = vadd.f32 %v8301_v59, %v8289_v28  ;;  %v8314_v1 = vpop.f32.mrf.mxu3 }
 0x73d   :  { %v12404_v50 = vld [vmem:[#allocation7 + $0x17b8] sm:$0xf0] }
 0x73e   :  { %v14278_v6 = vld [vmem:[#allocation7 + $0x115c] sm:$0xf]  ;;  %v12407_v7 = vor.u32 %v14478_v45, %v12404_v50  ;;  %8566 = vmatpush.bf16.msra.mxu3 %v12151_v14 }
 0x73f   :  { %v11604_v21 = vld [vmem:[#allocation7 + $0x1178] sm:$0xf0] }
 0x740   :  { %v14342_v13 = vld [vmem:[#allocation7 + $0x135c] sm:$0xf]  ;;  %v11607_v44 = vor.u32 %v14278_v6, %v11604_v21  ;;  %8579 = vmatpush.bf16.msrb.mxu0 %v12407_v7  ;;  %v8315_v6 = vadd.f32 %v8314_v1, %v8302_v4  ;;  %v8329_v21 = vpop.f32.mrf.mxu0 }
 0x741   :  { %v11860_v23 = vld [vmem:[#allocation7 + $0x1378] sm:$0xf0] }
 0x742   :  { %v14406_v16 = vld [vmem:[#allocation7 + $0x155c] sm:$0xf]  ;;  %v11863_v36 = vor.u32 %v14342_v13, %v11860_v23  ;;  %8541 = vmatpush.bf16.msra.mxu1 %v11607_v44 }
 0x743   :  { %v12116_v10 = vld [vmem:[#allocation7 + $0x1578] sm:$0xf0] }
 0x744   :  { %v14470_v18 = vld [vmem:[#allocation7 + $0x175c] sm:$0xf]  ;;  %v12119_v20 = vor.u32 %v14406_v16, %v12116_v10  ;;  %8554 = vmatpush.bf16.msra.mxu2 %v11863_v36 }
 0x745   :  { %v12372_v0 = vld [vmem:[#allocation7 + $0x1778] sm:$0xf0] }
 0x746   :  { %v14270_v40 = vld [vmem:[#allocation7 + $0x111c] sm:$0xf]  ;;  %v12375_v39 = vor.u32 %v14470_v18, %v12372_v0  ;;  %8567 = vmatpush.bf16.msra.mxu3 %v12119_v20 }
 0x747   :  { %v11572_v19 = vld [vmem:[#allocation7 + $0x1138] sm:$0xf0] }
 0x748   :  { %v14334_v61 = vld [vmem:[#allocation7 + $0x131c] sm:$0xf]  ;;  %v11575_v49 = vor.u32 %v14270_v40, %v11572_v19  ;;  %8580 = vmatpush.bf16.msrb.mxu0 %v12375_v39  ;;  %v15767_v19 = vadd.f32 %v8327_v8, %v8315_v6 }
 0x749   :  { %v11828_v34 = vld [vmem:[#allocation7 + $0x1338] sm:$0xf0] }
 0x74a   :  { %v14398_v2 = vld [vmem:[#allocation7 + $0x151c] sm:$0xf]  ;;  %v11831_v54 = vor.u32 %v14334_v61, %v11828_v34  ;;  %8542 = vmatpush.bf16.msra.mxu1 %v11575_v49 }
 0x74b   :  { %v12084_v12 = vld [vmem:[#allocation7 + $0x1538] sm:$0xf0] }
 0x74c   :  { %v14462_v60 = vld [vmem:[#allocation7 + $0x171c] sm:$0xf]  ;;  %v12087_v55 = vor.u32 %v14398_v2, %v12084_v12  ;;  %8555 = vmatpush.bf16.msra.mxu2 %v11831_v54 }
 0x74d   :  { %v12340_v46 = vld [vmem:[#allocation7 + $0x1738] sm:$0xf0] }
 0x74e   :  { %v14262_v26 = vld [vmem:[#allocation7 + $0x10dc] sm:$0xf]  ;;  %v12343_v58 = vor.u32 %v14462_v60, %v12340_v46  ;;  %8568 = vmatpush.bf16.msra.mxu3 %v12087_v55  ;;  %v8303_v60 = vpop.f32.mrf.mxu2 }
 0x74f   :  { %v11540_v11 = vld [vmem:[#allocation7 + $0x10f8] sm:$0xf0]  ;;  %v8379_v60 = vpop.f32.mrf.mxu0 }
 0x750   :  { %v14326_v63 = vld [vmem:[#allocation7 + $0x12dc] sm:$0xf]  ;;  %v11543_v41 = vor.u32 %v14262_v26, %v11540_v11  ;;  %8581 = vmatpush.bf16.msrb.mxu0 %v12343_v58  ;;  %v8316_v26 = vpop.f32.mrf.mxu3 }
 0x751   :  { %v11796_v53 = vld [vmem:[#allocation7 + $0x12f8] sm:$0xf0] }
 0x752   :  { %v14390_v3 = vld [vmem:[#allocation7 + $0x14dc] sm:$0xf]  ;;  %v11799_v5 = vor.u32 %v14326_v63, %v11796_v53  ;;  %8543 = vmatpush.bf16.msra.mxu1 %v11543_v41 }
 0x753   :  { %v12052_v31 = vld [vmem:[#allocation7 + $0x14f8] sm:$0xf0] }
 0x754   :  { %v14454_v47 = vld [vmem:[#allocation7 + $0x16dc] sm:$0xf]  ;;  %v12055_v35 = vor.u32 %v14390_v3, %v12052_v31  ;;  %8556 = vmatpush.bf16.msra.mxu2 %v11799_v5 }
 0x755   :  { %v12308_v29 = vld [vmem:[#allocation7 + $0x16f8] sm:$0xf0] }
 0x756   :  { %v14254_v48 = vld [vmem:[#allocation7 + $0x109c] sm:$0xf]  ;;  %v12311_v56 = vor.u32 %v14454_v47, %v12308_v29  ;;  %8569 = vmatpush.bf16.msra.mxu3 %v12055_v35 }
 0x757   :  { %v11508_v25 = vld [vmem:[#allocation7 + $0x10b8] sm:$0xf0] }
 0x758   :  { %v14318_v43 = vld [vmem:[#allocation7 + $0x129c] sm:$0xf]  ;;  %v11511_v15 = vor.u32 %v14254_v48, %v11508_v25  ;;  %8582 = vmatpush.bf16.msrb.mxu0 %v12311_v56 }
 0x759   :  { %v11764_v51 = vld [vmem:[#allocation7 + $0x12b8] sm:$0xf0] }
 0x75a   :  { %v14382_v24 = vld [vmem:[#allocation7 + $0x149c] sm:$0xf]  ;;  %v11767_v14 = vor.u32 %v14318_v43, %v11764_v51  ;;  %8544 = vmatpush.bf16.msra.mxu1 %v11511_v15 }
 0x75b   :  { %v12020_v45 = vld [vmem:[#allocation7 + $0x14b8] sm:$0xf0] }
 0x75c   :  { %v14446_v50 = vld [vmem:[#allocation7 + $0x169c] sm:$0xf]  ;;  %v12023_v23 = vor.u32 %v14382_v24, %v12020_v45  ;;  %8557 = vmatpush.bf16.msra.mxu2 %v11767_v14 }
 0x75d   :  { %v12276_v27 = vld [vmem:[#allocation7 + $0x16b8] sm:$0xf0] }
 0x75e   :  { %v14246_v7 = vld [vmem:[#allocation7 + $0x105c] sm:$0xf]  ;;  %v12279_v16 = vor.u32 %v14446_v50, %v12276_v27  ;;  %8570 = vmatpush.bf16.msra.mxu3 %v12023_v23 }
 0x75f   :  { %v11476_v13 = vld [vmem:[#allocation7 + $0x1078] sm:$0xf0] }
 0x760   :  { %v14310_v10 = vld [vmem:[#allocation7 + $0x125c] sm:$0xf]  ;;  %v11479_v20 = vor.u32 %v14246_v7, %v11476_v13  ;;  %8583 = vmatpush.bf16.msrb.mxu0 %v12279_v16 }
 0x761   :  { %v11732_v18 = vld [vmem:[#allocation7 + $0x1278] sm:$0xf0] }
 0x762   :  { %v14374_v0 = vld [vmem:[#allocation7 + $0x145c] sm:$0xf]  ;;  %v11735_v17 = vor.u32 %v14310_v10, %v11732_v18  ;;  %8545 = vmatpush.bf16.msra.mxu1 %v11479_v20 }
 0x763   :  { %v11988_v44 = vld [vmem:[#allocation7 + $0x1478] sm:$0xf0] }
 0x764   :  { %v14438_v36 = vld [vmem:[#allocation7 + $0x165c] sm:$0xf]  ;;  %v11991_v28 = vor.u32 %v14374_v0, %v11988_v44  ;;  %8558 = vmatpush.bf16.msra.mxu2 %v11735_v17  ;;  %v8340_v17 = vpop.f32.mrf.mxu1 }
 0x765   :  { %v12244_v40 = vld [vmem:[#allocation7 + $0x1678] sm:$0xf0] }
 0x766   :  { %v14238_v39 = vld [vmem:[#allocation7 + $0x101c] sm:$0xf]  ;;  %v12247_v12 = vor.u32 %v14438_v36, %v12244_v40  ;;  %8571 = vmatpush.bf16.msra.mxu3 %v11991_v28 }
 0x767   :  { %v11444_v61 = vld [vmem:[#allocation7 + $0x1038] sm:$0xf0] }
 0x768   :  { %v14550_v34 = vld [vmem:[#allocation7 + $0x19dc] sm:$0xf]  ;;  %v11447_v58 = vor.u32 %v14238_v39, %v11444_v61  ;;  %8584 = vmatpush.bf16.msrb.mxu0 %v12247_v12 }
 0x769   :  { %v12692_v2 = vld [vmem:[#allocation7 + $0x19f8] sm:$0xf0] }
 0x76a   :  { %v14302_v46 = vld [vmem:[#allocation7 + $0x121c] sm:$0xf]  ;;  %v12695_v31 = vor.u32 %v14550_v34, %v12692_v2  ;;  %8546 = vmatpush.bf16.msra.mxu1 %v11447_v58 }
 0x76b   :  { %v11700_v49 = vld [vmem:[#allocation7 + $0x1238] sm:$0xf0] }
 0x76c   :  { %v14366_v54 = vld [vmem:[#allocation7 + $0x141c] sm:$0xf]  ;;  %v11703_v47 = vor.u32 %v14302_v46, %v11700_v49 }
 0x76d   :  { %v11956_v11 = vld [vmem:[#allocation7 + $0x1438] sm:$0xf0]  ;;  %8547 = vmatmul.bf16.vlgmr.msra.gmra.mxu1 %v15532_v57 }
 0x76e   :  { %v14430_v8 = vld [vmem:[#allocation7 + $0x161c] sm:$0xf]  ;;  %v11959_v48 = vor.u32 %v14366_v54, %v11956_v11  ;;  %8591 = vmatpush.bf16.msrb.mxu1 %v12695_v31  ;;  %8559 = vmatpush.bf16.msra.mxu2 %v11703_v47 }
 0x76f   :  { %v12212_v55 = vld [vmem:[#allocation7 + $0x1638] sm:$0xf0] }
 0x770   :  { %v14614_v63 = vld [vmem:[#allocation7 + $0x1bdc] sm:$0xf]  ;;  %v12215_v25 = vor.u32 %v14430_v8, %v12212_v55  ;;  %8572 = vmatpush.bf16.msra.mxu3 %v11959_v48  ;;  %v8342_v48 = vpop.f32.mrf.mxu1 }
 0x771   :  { %v12948_v53 = vld [vmem:[#allocation7 + $0x1bf8] sm:$0xf0]  ;;  %8560 = vmatmul.bf16.vlgmr.msra.gmra.mxu2 %v15534_v62  ;;  %v14759_v48 = vld [vmem:[#allocation10 + $0x60] sm:$0xff] }
 0x772   :  { %v14678_v3 = vld [vmem:[#allocation7 + $0x1ddc] sm:$0xf]  ;;  %v12951_v35 = vor.u32 %v14614_v63, %v12948_v53  ;;  %8585 = vmatpush.bf16.msrb.mxu0 %v12215_v25  ;;  %v8353_v25 = vpop.f32.mrf.mxu2 }
 0x773   :  { %v13204_v29 = vld [vmem:[#allocation7 + $0x1df8] sm:$0xf0]  ;;  %8573 = vmatmul.bf16.vlgmr.msra.gmra.mxu3 %v15536_v37  ;;  %v8341_v37 = vadd.f32 %v8340_v17, %v15767_v19 }
 0x774   :  { %v14742_v41 = vld [vmem:[#allocation7 + $0x1fdc] sm:$0xf]  ;;  %v13207_v59 = vor.u32 %v14678_v3, %v13204_v29  ;;  %8604 = vmatpush.bf16.msrb.mxu2 %v12951_v35 }
 0x775   :  { %v13460_v5 = vld [vmem:[#allocation7 + $0x1ff8] sm:$0xf0]  ;;  %8586 = vmatmul.bf16.vlgmr.msrb.gmra.mxu0 %v15538_v30 }
 0x776   :  { %v14542_v56 = vld [vmem:[#allocation7 + $0x199c] sm:$0xf]  ;;  %v13463_v43 = vor.u32 %v14742_v41, %v13460_v5  ;;  %8617 = vmatpush.bf16.msrb.mxu3 %v13207_v59  ;;  %v8354_v59 = vadd.f32 %v8353_v25, %v8341_v37  ;;  %v14758_v25 = vld [vmem:[#allocation10 + $0x58] sm:$0xff] }
 0x777   :  { %v12660_v52 = vld [vmem:[#allocation7 + $0x19b8] sm:$0xf0] }
 0x778   :  { %v14606_v51 = vld [vmem:[#allocation7 + $0x1b9c] sm:$0xf]  ;;  %v12663_v27 = vor.u32 %v14542_v56, %v12660_v52  ;;  %8630 = vmatpush.bf16.msra.mxu0 %v13463_v43  ;;  %v8366_v43 = vpop.f32.mrf.mxu3 }
 0x779   :  { %v12916_v24 = vld [vmem:[#allocation7 + $0x1bb8] sm:$0xf0] }
 0x77a   :  { %v14670_v4 = vld [vmem:[#allocation7 + $0x1d9c] sm:$0xf]  ;;  %v12919_v15 = vor.u32 %v14606_v51, %v12916_v24  ;;  %8592 = vmatpush.bf16.msrb.mxu1 %v12663_v27  ;;  %v8355_v17 = vpop.f32.mrf.mxu2 }
 0x77b   :  { %v13172_v1 = vld [vmem:[#allocation7 + $0x1db8] sm:$0xf0] }
 0x77c   :  { %v14734_v45 = vld [vmem:[#allocation7 + $0x1f9c] sm:$0xf]  ;;  %v13175_v14 = vor.u32 %v14670_v4, %v13172_v1  ;;  %8605 = vmatpush.bf16.msrb.mxu2 %v12919_v15 }
 0x77d   :  { %v13428_v50 = vld [vmem:[#allocation7 + $0x1fb8] sm:$0xf0] }
 0x77e   :  { %v14534_v6 = vld [vmem:[#allocation7 + $0x195c] sm:$0xf]  ;;  %v13431_v7 = vor.u32 %v14734_v45, %v13428_v50  ;;  %8618 = vmatpush.bf16.msrb.mxu3 %v13175_v14  ;;  %v8367_v45 = vadd.f32 %v8366_v43, %v8354_v59  ;;  %v8381_v50 = vpop.f32.mrf.mxu0 }
 0x77f   :  { %v12628_v21 = vld [vmem:[#allocation7 + $0x1978] sm:$0xf0] }
 0x780   :  { %v14598_v13 = vld [vmem:[#allocation7 + $0x1b5c] sm:$0xf]  ;;  %v12631_v57 = vor.u32 %v14534_v6, %v12628_v21  ;;  %8631 = vmatpush.bf16.msra.mxu0 %v13431_v7  ;;  %v8368_v37 = vpop.f32.mrf.mxu3 }
 0x781   :  { %v12884_v23 = vld [vmem:[#allocation7 + $0x1b78] sm:$0xf0] }
 0x782   :  { %v14662_v16 = vld [vmem:[#allocation7 + $0x1d5c] sm:$0xf]  ;;  %v12887_v44 = vor.u32 %v14598_v13, %v12884_v23  ;;  %8593 = vmatpush.bf16.msrb.mxu1 %v12631_v57  ;;  %v8405_v59 = vpop.f32.mrf.mxu2 }
 0x783   :  { %v13140_v10 = vld [vmem:[#allocation7 + $0x1d78] sm:$0xf0] }
 0x784   :  { %v14726_v18 = vld [vmem:[#allocation7 + $0x1f5c] sm:$0xf]  ;;  %v13143_v20 = vor.u32 %v14662_v16, %v13140_v10  ;;  %8606 = vmatpush.bf16.msrb.mxu2 %v12887_v44 }
 0x785   :  { %v13396_v0 = vld [vmem:[#allocation7 + $0x1f78] sm:$0xf0] }
 0x786   :  { %v14526_v36 = vld [vmem:[#allocation7 + $0x191c] sm:$0xf]  ;;  %v13399_v39 = vor.u32 %v14726_v18, %v13396_v0  ;;  %8619 = vmatpush.bf16.msrb.mxu3 %v13143_v20  ;;  %v8380_v0 = vadd.f32 %v8379_v60, %v8367_v45  ;;  %v14754_v60 = vld [vmem:[#allocation10 + $0x38] sm:$0xff] }
 0x787   :  { %v12596_v40 = vld [vmem:[#allocation7 + $0x1938] sm:$0xf0] }
 0x788   :  { %v14590_v61 = vld [vmem:[#allocation7 + $0x1b1c] sm:$0xf]  ;;  %v12599_v30 = vor.u32 %v14526_v36, %v12596_v40  ;;  %8632 = vmatpush.bf16.msra.mxu0 %v13399_v39 }
 0x789   :  { %v12852_v62 = vld [vmem:[#allocation7 + $0x1b38] sm:$0xf0] }
 0x78a   :  { %v14654_v34 = vld [vmem:[#allocation7 + $0x1d1c] sm:$0xf]  ;;  %v12855_v46 = vor.u32 %v14590_v61, %v12852_v62  ;;  %8594 = vmatpush.bf16.msrb.mxu1 %v12599_v30 }
 0x78b   :  { %v13108_v2 = vld [vmem:[#allocation7 + $0x1d38] sm:$0xf0] }
 0x78c   :  { %v14718_v28 = vld [vmem:[#allocation7 + $0x1f1c] sm:$0xf]  ;;  %v13111_v26 = vor.u32 %v14654_v34, %v13108_v2  ;;  %8607 = vmatpush.bf16.msrb.mxu2 %v12855_v46 }
 0x78d   :  { %v13364_v12 = vld [vmem:[#allocation7 + $0x1f38] sm:$0xf0] }
 0x78e   :  { %v14518_v49 = vld [vmem:[#allocation7 + $0x18dc] sm:$0xf]  ;;  %v13367_v11 = vor.u32 %v14718_v28, %v13364_v12  ;;  %8620 = vmatpush.bf16.msrb.mxu3 %v13111_v26  ;;  %v14762_v26 = vld [vmem:[#allocation10 + $0x78] sm:$0xff] }
 0x78f   :  { %v12564_v54 = vld [vmem:[#allocation7 + $0x18f8] sm:$0xf0] }
 0x790   :  { %v14582_v8 = vld [vmem:[#allocation7 + $0x1adc] sm:$0xf]  ;;  %v12567_v3 = vor.u32 %v14518_v49, %v12564_v54  ;;  %8633 = vmatpush.bf16.msra.mxu0 %v13367_v11  ;;  %v14770_v11 = vld [vmem:[#allocation10 + $0xb8] sm:$0xff] }
 0x791   :  { %v12820_v55 = vld [vmem:[#allocation7 + $0x1af8] sm:$0xf0] }
 0x792   :  { %v14646_v58 = vld [vmem:[#allocation7 + $0x1cdc] sm:$0xf]  ;;  %v12823_v31 = vor.u32 %v14582_v8, %v12820_v55  ;;  %8595 = vmatpush.bf16.msrb.mxu1 %v12567_v3  ;;  %v14778_v8 = vld [vmem:[#allocation10 + $0xf8] sm:$0xff]  ;;  %v14760_v3 = vld [vmem:[#allocation10 + $0x68] sm:$0xff] }
 0x793   :  { %v13076_v63 = vld [vmem:[#allocation7 + $0x1cf8] sm:$0xf0] }
 0x794   :  { %v14710_v53 = vld [vmem:[#allocation7 + $0x1edc] sm:$0xf]  ;;  %v13079_v41 = vor.u32 %v14646_v58, %v13076_v63  ;;  %8608 = vmatpush.bf16.msrb.mxu2 %v12823_v31  ;;  %v14768_v31 = vld [vmem:[#allocation10 + $0xa8] sm:$0xff] }
 0x795   :  { %v13332_v19 = vld [vmem:[#allocation7 + $0x1ef8] sm:$0xf0] }
 0x796   :  { %v14510_v47 = vld [vmem:[#allocation7 + $0x189c] sm:$0xf]  ;;  %v13335_v5 = vor.u32 %v14710_v53, %v13332_v19  ;;  %8621 = vmatpush.bf16.msrb.mxu3 %v13079_v41  ;;  %v14752_v19 = vld [vmem:[#allocation10 + $0x28] sm:$0xff]  ;;  %v14751_v41 = vld [vmem:[#allocation10 + $0x20] sm:$0xff] }
 0x797   :  { %v12532_v29 = vld [vmem:[#allocation7 + $0x18b8] sm:$0xf0] }
 0x798   :  { %v14574_v35 = vld [vmem:[#allocation7 + $0x1a9c] sm:$0xf]  ;;  %v12535_v1 = vor.u32 %v14510_v47, %v12532_v29  ;;  %8634 = vmatpush.bf16.msra.mxu0 %v13335_v5  ;;  %v8392_v47 = vpop.f32.mrf.mxu1  ;;  %v8431_v5 = vpop.f32.mrf.mxu0 }
 0x799   :  { %v12788_v56 = vld [vmem:[#allocation7 + $0x1ab8] sm:$0xf0]  ;;  %v8393_v29 = vadd.f32 %v8392_v47, %v8380_v0  ;;  %v14771_v0 = vld [vmem:[#allocation10 + $0xc0] sm:$0xff]  ;;  %v14794_v47 = vld [vmem:[#allocation10 + $0x178] sm:$0xff] }
 0x79a   :  { %v14638_v52 = vld [vmem:[#allocation7 + $0x1c9c] sm:$0xf]  ;;  %v12791_v27 = vor.u32 %v14574_v35, %v12788_v56  ;;  %8596 = vmatpush.bf16.msrb.mxu1 %v12535_v1  ;;  %v14766_v35 = vld [vmem:[#allocation10 + $0x98] sm:$0xff] }
 0x79b   :  { %v13044_v51 = vld [vmem:[#allocation7 + $0x1cb8] sm:$0xf0]  ;;  %v14774_v56 = vld [vmem:[#allocation10 + $0xd8] sm:$0xff]  ;;  %v8406_v43 = vadd.f32 %v8405_v59, %v8393_v29  ;;  %v14800_v59 = vld [vmem:[#allocation10 + $0x1a8] sm:$0xff] }
 0x79c   :  { %v14702_v24 = vld [vmem:[#allocation7 + $0x1e9c] sm:$0xf]  ;;  %v13047_v21 = vor.u32 %v14638_v52, %v13044_v51  ;;  %8609 = vmatpush.bf16.msrb.mxu2 %v12791_v27  ;;  %v8418_v51 = vpop.f32.mrf.mxu3  ;;  %v14802_v29 = vld [vmem:[#allocation10 + $0x1b8] sm:$0xff] }
 0x79d   :  { %v13300_v4 = vld [vmem:[#allocation7 + $0x1eb8] sm:$0xf0] }
 0x79e   :  { %v14502_v15 = vld [vmem:[#allocation7 + $0x185c] sm:$0xf]  ;;  %v13303_v14 = vor.u32 %v14702_v24, %v13300_v4  ;;  %8622 = vmatpush.bf16.msrb.mxu3 %v13047_v21  ;;  %v8419_v4 = vadd.f32 %v8418_v51, %v8406_v43  ;;  %v14756_v21 = vld [vmem:[#allocation10 + $0x48] sm:$0xff] }
 0x79f   :  { %v12500_v6 = vld [vmem:[#allocation7 + $0x1878] sm:$0xf0]  ;;  %v14808_v51 = vld [vmem:[#allocation10 + $0x1e8] sm:$0xff] }
 0x7a0   :  { %v14566_v7 = vld [vmem:[#allocation7 + $0x1a5c] sm:$0xf]  ;;  %v12503_v57 = vor.u32 %v14502_v15, %v12500_v6  ;;  %8635 = vmatpush.bf16.msra.mxu0 %v13303_v14  ;;  %v8394_v52 = vpop.f32.mrf.mxu1  ;;  %v8433_v1 = vpop.f32.mrf.mxu0  ;;  %v15778_v15 = vadd.f32 %v8431_v5, %v8419_v4  ;;  %v14748_v6 = vld [vmem:[#allocation10 + $0x8] sm:$0xff]  ;;  %v14783_v4 = vld [vmem:[#allocation10 + $0x120] sm:$0xff] }
 0x7a1   :  { %v12756_v13 = vld [vmem:[#allocation7 + $0x1a78] sm:$0xf0]  ;;  %v14764_v14 = vld [vmem:[#allocation10 + $0x88] sm:$0xff]  ;;  %v14791_v1 = vld [vmem:[#allocation10 + $0x160] sm:$0xff] }
 0x7a2   :  { %v14630_v23 = vld [vmem:[#allocation7 + $0x1c5c] sm:$0xf]  ;;  %v12759_v44 = vor.u32 %v14566_v7, %v12756_v13  ;;  %8597 = vmatpush.bf16.msrb.mxu1 %v12503_v57  ;;  %v14772_v7 = vld [vmem:[#allocation10 + $0xc8] sm:$0xff]  ;;  %v8407_v13 = vpop.f32.mrf.mxu2 }
 0x7a3   :  { %v13012_v16 = vld [vmem:[#allocation7 + $0x1c78] sm:$0xf0]  ;;  %v8697_v57 = vld.sshfl [vmem:[#allocation1] sm:$0xff pattern:$0x73625140]  ;;  %v14798_v13 = vld [vmem:[#allocation10 + $0x198] sm:$0xff] }
 0x7a4   :  { %v14694_v10 = vld [vmem:[#allocation7 + $0x1e5c] sm:$0xf]  ;;  %v13015_v20 = vor.u32 %v14630_v23, %v13012_v16  ;;  %8610 = vmatpush.bf16.msrb.mxu2 %v12759_v44  ;;  %v8420_v23 = vpop.f32.mrf.mxu3  ;;  %v14747_v16 = vld [vmem:[#allocation10] sm:$0xff]  ;;  %v14792_v52 = vld [vmem:[#allocation10 + $0x168] sm:$0xff] }
 0x7a5   :  { %v13268_v18 = vld [vmem:[#allocation7 + $0x1e78] sm:$0xf0] }
 0x7a6   :  { %v14494_v36 = vld [vmem:[#allocation7 + $0x181c] sm:$0xf]  ;;  %v13271_v39 = vor.u32 %v14694_v10, %v13268_v18  ;;  %8623 = vmatpush.bf16.msrb.mxu3 %v13015_v20  ;;  %v14755_v10 = vld [vmem:[#allocation10 + $0x40] sm:$0xff]  ;;  %v8713_v20 = vpack.c.bf16 %v8697_v57, %v8697_v57 }
 0x7a7   :  { %v12468_v40 = vld [vmem:[#allocation7 + $0x1838] sm:$0xf0]  ;;  %v14763_v18 = vld [vmem:[#allocation10 + $0x80] sm:$0xff] }
 0x7a8   :  { %v14558_v61 = vld [vmem:[#allocation7 + $0x1a1c] sm:$0xf]  ;;  %v12471_v30 = vor.u32 %v14494_v36, %v12468_v40  ;;  %8636 = vmatpush.bf16.msra.mxu0 %v13271_v39  ;;  %v8700_v40 = vld.sshfl [vmem:[#allocation1 + $0x18] sm:$0xff pattern:$0x73625140]  ;;  %v8483_v37 = vpop.f32.mrf.mxu0 }
 0x7a9   :  { %v12724_v62 = vld [vmem:[#allocation7 + $0x1a38] sm:$0xf0] }
 0x7aa   :  { %v14622_v34 = vld [vmem:[#allocation7 + $0x1c1c] sm:$0xf]  ;;  %v12727_v46 = vor.u32 %v14558_v61, %v12724_v62  ;;  %8598 = vmatpush.bf16.msrb.mxu1 %v12471_v30  ;;  %v8716_v61 = vpack.c.bf16 %v8700_v40, %v8700_v40  ;;  %v8444_v62 = vpop.f32.mrf.mxu1  ;;  %v14788_v40 = vld [vmem:[#allocation10 + $0x148] sm:$0xff] }
 0x7ab   :  { %v12980_v2 = vld [vmem:[#allocation7 + $0x1c38] sm:$0xf0] }
 0x7ac   :  { %v14686_v28 = vld [vmem:[#allocation7 + $0x1e1c] sm:$0xf]  ;;  %v12983_v49 = vor.u32 %v14622_v34, %v12980_v2  ;;  %8611 = vmatpush.bf16.msrb.mxu2 %v12727_v46  ;;  %v1850_v34 = vperm.slane %v15757_v38, 7 }
 0x7ad   :  { %v13236_v12 = vld [vmem:[#allocation7 + $0x1e38] sm:$0xf0]  ;;  %8599 = vmatmul.bf16.vlgmr.msrb.gmra.mxu1 %v15545_v32  ;;  %v14776_v32 = vld [vmem:[#allocation10 + $0xe8] sm:$0xff] }
 0x7ae   :  { %v13239_v54 = vor.u32 %v14686_v28, %v13236_v12  ;;  %9237 = vmatpush.bf16.msra.mxu1 %v14754_v60  ;;  %8624 = vmatpush.bf16.msrb.mxu3 %v12983_v49  ;;  %v14753_v55 = vld [vmem:[#allocation10 + $0x30] sm:$0xff]  ;;  %v8445_v2 = vadd.f32 %v8444_v62, %v1850_v34  ;;  %v8457_v12 = vpop.f32.mrf.mxu2  ;;  %v8470_v60 = vpop.f32.mrf.mxu3  ;;  %v14779_v34 = vld [vmem:[#allocation10 + $0x100] sm:$0xff] }
 0x7af   :  { %v14761_v58 = vld [vmem:[#allocation10 + $0x70] sm:$0xff]  ;;  %8612 = vmatmul.bf16.vlgmr.msrb.gmra.mxu2 %v15547_v22  ;;  %v14767_v22 = vld [vmem:[#allocation10 + $0xa0] sm:$0xff] }
 0x7b0   :  { %8637 = vmatpush.bf16.msra.mxu0 %v13239_v54  ;;  %9250 = vmatpush.bf16.msra.mxu2 %v14762_v26  ;;  %v14769_v63 = vld [vmem:[#allocation10 + $0xb0] sm:$0xff]  ;;  %v8458_v30 = vadd.f32 %v8457_v12, %v8445_v2  ;;  %v8485_v49 = vpop.f32.mrf.mxu0  ;;  %v14795_v2 = vld [vmem:[#allocation10 + $0x180] sm:$0xff] }
 0x7b1   :  { %v14777_v53 = vld [vmem:[#allocation10 + $0xf0] sm:$0xff]  ;;  %8625 = vmatmul.bf16.vlgmr.msrb.gmra.mxu3 %v15549_v33  ;;  %v14775_v33 = vld [vmem:[#allocation10 + $0xe0] sm:$0xff] }
 0x7b2   :  { %9263 = vmatpush.bf16.msra.mxu3 %v14770_v11  ;;  %9238 = vmatpush.bf16.msra.mxu1 %v14753_v55  ;;  %v14749_v24 = vld [vmem:[#allocation10 + $0x10] sm:$0xff]  ;;  %v8446_v28 = vpop.f32.mrf.mxu1  ;;  %v8471_v46 = vadd.f32 %v8470_v60, %v8458_v30 }
 0x7b3   :  { %8638 = vmatmul.bf16.vlgmr.msra.gmra.mxu0 %v15552_v9  ;;  %v14750_v9 = vld [vmem:[#allocation10 + $0x18] sm:$0xff]  ;;  %v14757_v45 = vld [vmem:[#allocation10 + $0x50] sm:$0xff]  ;;  %v14803_v28 = vld [vmem:[#allocation10 + $0x1c0] sm:$0xff] }
 0x7b4   :  { %9276 = vmatpush.bf16.msrb.mxu0 %v14778_v8  ;;  %9251 = vmatpush.bf16.msra.mxu2 %v14761_v58  ;;  %v14765_v50 = vld [vmem:[#allocation10 + $0x90] sm:$0xff]  ;;  %v8484_v54 = vadd.f32 %v8483_v37, %v8471_v46  ;;  %v14787_v37 = vld [vmem:[#allocation10 + $0x140] sm:$0xff] }
 0x7b5   :  { %v14773_v27 = vld [vmem:[#allocation10 + $0xd0] sm:$0xff] }
 0x7b6   :  { %9264 = vmatpush.bf16.msra.mxu3 %v14769_v63  ;;  %9239 = vmatpush.bf16.msra.mxu1 %v14752_v19  ;;  %v8698_v44 = vld.sshfl [vmem:[#allocation1 + $0x8] sm:$0xff pattern:$0x73625140]  ;;  %v8699_v36 = vld.sshfl [vmem:[#allocation1 + $0x10] sm:$0xff pattern:$0x73625140]  ;;  %v8459_v26 = vpop.f32.mrf.mxu2  ;;  %v8472_v11 = vpop.f32.mrf.mxu3 }
 0x7b7   :  { %v8714_v39 = vpack.c.bf16 %v8698_v44, %v8698_v44  ;;  %v8715_v17 = vpack.c.bf16 %v8699_v36, %v8699_v36  ;;  %v14785_v5 = vld [vmem:[#allocation10 + $0x130] sm:$0xff]  ;;  %v14780_v36 = vld [vmem:[#allocation10 + $0x108] sm:$0xff] }
 0x7b8   :  { %9277 = vmatpush.bf16.msrb.mxu0 %v14777_v53  ;;  %9252 = vmatpush.bf16.msra.mxu2 %v14760_v3  ;;  %v15781_v55 = vpop.f32.mrf.mxu0  ;;  %v14797_v57 = vld [vmem:[#allocation10 + $0x190] sm:$0xff] }
 0x7b9   :  { %v14805_v44 = vld [vmem:[#allocation10 + $0x1d0] sm:$0xff] }
 0x7ba   :  { %9265 = vmatpush.bf16.msra.mxu3 %v14768_v31  ;;  %9240 = vmatpush.bf16.msra.mxu1 %v14751_v41  ;;  %v8496_v8 = vpop.f32.mrf.mxu1  ;;  %v14810_v41 = vld [vmem:[#allocation10 + $0x1f8] sm:$0xff] }
 0x7bc   :  { %9278 = vmatpush.bf16.msrb.mxu0 %v14776_v32  ;;  %9253 = vmatpush.bf16.msra.mxu2 %v14759_v48  ;;  %v14786_v32 = vld [vmem:[#allocation10 + $0x138] sm:$0xff]  ;;  %v14793_v48 = vld [vmem:[#allocation10 + $0x170] sm:$0xff] }
 0x7be   :  { %9266 = vmatpush.bf16.msra.mxu3 %v14767_v22  ;;  %9241 = vmatpush.bf16.msra.mxu1 %v14750_v9  ;;  %v8509_v63 = vpop.f32.mrf.mxu2  ;;  %v8522_v53 = vpop.f32.mrf.mxu3  ;;  %v14809_v9 = vld [vmem:[#allocation10 + $0x1f0] sm:$0xff] }
 0x7c0   :  { %9279 = vmatpush.bf16.msrb.mxu0 %v14775_v33  ;;  %9254 = vmatpush.bf16.msra.mxu2 %v14758_v25  ;;  %v8537_v19 = vpop.f32.mrf.mxu0  ;;  %v14801_v33 = vld [vmem:[#allocation10 + $0x1b0] sm:$0xff] }
 0x7c1   :  { %v8652_v19 = vld [vmem:[#allocation13 + $0x8] sm:$0xff] }
 0x7c2   :  { %9267 = vmatpush.bf16.msra.mxu3 %v14766_v35  ;;  %9242 = vmatpush.bf16.msra.mxu1 %v14749_v24  ;;  %v8498_v58 = vpop.f32.mrf.mxu1 }
 0x7c4   :  { %9280 = vmatpush.bf16.msrb.mxu0 %v14774_v56  ;;  %9255 = vmatpush.bf16.msra.mxu2 %v14757_v45  ;;  %v14784_v56 = vld [vmem:[#allocation10 + $0x128] sm:$0xff]  ;;  %v14799_v45 = vld [vmem:[#allocation10 + $0x1a0] sm:$0xff] }
 0x7c6   :  { %9268 = vmatpush.bf16.msra.mxu3 %v14765_v50  ;;  %9243 = vmatpush.bf16.msra.mxu1 %v14748_v6  ;;  %v8511_v3 = vpop.f32.mrf.mxu2  ;;  %v8524_v38 = vpop.f32.mrf.mxu3  ;;  %v8497_v50 = vadd.f32 %v8496_v8, %v8484_v54 }
 0x7c8   :  { %9281 = vmatpush.bf16.msrb.mxu0 %v14773_v27  ;;  %9256 = vmatpush.bf16.msra.mxu2 %v14756_v21  ;;  %v14807_v27 = vld [vmem:[#allocation10 + $0x1e0] sm:$0xff]  ;;  %v8510_v6 = vadd.f32 %v8509_v63, %v8497_v50 }
 0x7ca   :  { %9269 = vmatpush.bf16.msra.mxu3 %v14764_v14  ;;  %9244 = vmatpush.bf16.msra.mxu1 %v14747_v16  ;;  %v14782_v14 = vld [vmem:[#allocation10 + $0x118] sm:$0xff] }
 0x7cb   :  { %v14806_v16 = vld [vmem:[#allocation10 + $0x1d8] sm:$0xff] }
 0x7cc   :  { %9282 = vmatpush.bf16.msrb.mxu0 %v14772_v7  ;;  %9257 = vmatpush.bf16.msra.mxu2 %v14755_v10  ;;  %v14790_v7 = vld [vmem:[#allocation10 + $0x158] sm:$0xff]  ;;  %v8523_v10 = vadd.f32 %v8522_v53, %v8510_v6 }
 0x7cd   :  { %9245 = vmatmul.bf16.vlgmr.msra.gmra.mxu1 %v8713_v20 }
 0x7ce   :  { %9270 = vmatpush.bf16.msra.mxu3 %v14763_v18  ;;  %9289 = vmatpush.bf16.msrb.mxu1 %v14786_v32  ;;  %v14781_v18 = vld [vmem:[#allocation10 + $0x110] sm:$0xff]  ;;  %v8536_v20 = vadd.f32 %v15781_v55, %v8523_v10  ;;  %v8649_v55 = vmax.f32 %v15778_v15, 0.0  ;;  %v14824_v15 = vld [vmem:[#allocation11] ss:$0 sm:$0xff] }
 0x7cf   :  { %9258 = vmatmul.bf16.vlgmr.msra.gmra.mxu2 %v8714_v39  ;;  %v14796_v39 = vld [vmem:[#allocation10 + $0x188] sm:$0xff] }
 0x7d0   :  { %9283 = vmatpush.bf16.msrb.mxu0 %v14771_v0  ;;  %9302 = vmatpush.bf16.msrb.mxu2 %v14794_v47  ;;  %v14789_v0 = vld [vmem:[#allocation10 + $0x150] sm:$0xff]  ;;  %v8665_v3 = vmul.f32 3.3333333, %v8649_v55 }
 0x7d1   :  { %9271 = vmatmul.bf16.vlgmr.msra.gmra.mxu3 %v8715_v17  ;;  %v14804_v17 = vld [vmem:[#allocation10 + $0x1c8] sm:$0xff] }
 0x7d2   :  { %9315 = vmatpush.bf16.msrb.mxu3 %v14802_v29  ;;  %9290 = vmatpush.bf16.msrb.mxu1 %v14785_v5 }
 0x7d3   :  { %9284 = vmatmul.bf16.vlgmr.msrb.gmra.mxu0 %v8716_v61 }
 0x7d4   :  { %9328 = vmatpush.bf16.msra.mxu0 %v14810_v41  ;;  %9303 = vmatpush.bf16.msrb.mxu2 %v14793_v48  ;;  %v8679_v41 = vrot.slane %v8665_v3, 4 }
 0x7d6   :  { %9316 = vmatpush.bf16.msrb.mxu3 %v14801_v33  ;;  %9291 = vmatpush.bf16.msrb.mxu1 %v14784_v56 }
 0x7d8   :  { %9329 = vmatpush.bf16.msra.mxu0 %v14809_v9  ;;  %9304 = vmatpush.bf16.msrb.mxu2 %v14792_v52 }
 0x7da   :  { %9317 = vmatpush.bf16.msrb.mxu3 %v14800_v59  ;;  %9292 = vmatpush.bf16.msrb.mxu1 %v14783_v4 }
 0x7dc   :  { %9330 = vmatpush.bf16.msra.mxu0 %v14808_v51  ;;  %9305 = vmatpush.bf16.msrb.mxu2 %v14791_v1 }
 0x7de   :  { %9318 = vmatpush.bf16.msrb.mxu3 %v14799_v45  ;;  %9293 = vmatpush.bf16.msrb.mxu1 %v14782_v14 }
 0x7e0   :  { %9331 = vmatpush.bf16.msra.mxu0 %v14807_v27  ;;  %9306 = vmatpush.bf16.msrb.mxu2 %v14790_v7 }
 0x7e2   :  { %9319 = vmatpush.bf16.msrb.mxu3 %v14798_v13  ;;  %9294 = vmatpush.bf16.msrb.mxu1 %v14781_v18 }
 0x7e4   :  { %9332 = vmatpush.bf16.msra.mxu0 %v14806_v16  ;;  %9307 = vmatpush.bf16.msrb.mxu2 %v14789_v0 }
 0x7e6   :  { %9320 = vmatpush.bf16.msrb.mxu3 %v14797_v57  ;;  %9295 = vmatpush.bf16.msrb.mxu1 %v14780_v36 }
 0x7e8   :  { %9333 = vmatpush.bf16.msra.mxu0 %v14805_v44  ;;  %9308 = vmatpush.bf16.msrb.mxu2 %v14788_v40 }
 0x7ea   :  { %v15783_v31 = vpop.f32.mrf.mxu1  ;;  %9321 = vmatpush.bf16.msrb.mxu3 %v14796_v39  ;;  %9296 = vmatpush.bf16.msrb.mxu1 %v14779_v34 }
 0x7eb   :  { %v8549_v61 = vadd.f32 %v15783_v31, %v8536_v20  ;;  %v13465_v31 = vxor.u32 2147483648, %v8652_v19 }
 0x7ec   :  { %9334 = vmatpush.bf16.msra.mxu0 %v14804_v17  ;;  %9309 = vmatpush.bf16.msrb.mxu2 %v14787_v37 }
 0x7ed   :  { %vm8658_vm12 = vcmp.ge.s32.totalorder %v13465_v31, 858993459 }
 0x7ee   :  { %9322 = vmatpush.bf16.msrb.mxu3 %v14795_v2 }
 0x7f0   :  { %9335 = vmatpush.bf16.msra.mxu0 %v14803_v28 }
 0x7f2   :  { %v15785_v22 = vpop.f32.mrf.mxu0  ;;  %v8550_v25 = vpop.f32.mrf.mxu1 }
 0x7f4   :  { %v8561_v35 = vpop.f32.mrf.mxu2 }
 0x7f5   :  { %v8562_v62 = vadd.f32 %v8561_v35, %v8549_v61 }
 0x7f6   :  { %v8574_v43 = vpop.f32.mrf.mxu3 }
 0x7f7   :  { %v8575_v30 = vadd.f32 %v8574_v43, %v8562_v62 }
 0x7f9   :  { %v8588_v46 = vadd.f32 %v15785_v22, %v8575_v30 }
 0x7fa   :  { %v8589_v24 = vpop.f32.mrf.mxu0 }
 0x7fc   :  { %v8563_v21 = vpop.f32.mrf.mxu2 }
 0x7fe   :  { %v8576_v23 = vpop.f32.mrf.mxu3 }
 0x82a   :  { %v8600_v12 = vpop.f32.mrf.mxu1 }
 0x82b   :  { %v8601_v49 = vadd.f32 %v8600_v12, %v8588_v46 }
 0x830   :  { %v8639_v60 = vpop.f32.mrf.mxu0 }
 0x832   :  { %v8602_v54 = vpop.f32.mrf.mxu1  ;;  %v8613_v26 = vpop.f32.mrf.mxu2 }
 0x833   :  { %v8614_v11 = vadd.f32 %v8613_v26, %v8601_v49 }
 0x834   :  { %v8626_v8 = vpop.f32.mrf.mxu3 }
 0x835   :  { %v8627_v58 = vadd.f32 %v8626_v8, %v8614_v11 }
 0x837   :  { %v8640_v53 = vadd.f32 %v8639_v60, %v8627_v58 }
 0x838   :  { %v8641_v63 = vpop.f32.mrf.mxu0 }
 0x839   :  { %v8650_v38 = vmax.f32 %v8640_v53, 0.0 }
 0x83a   :  { %v8615_v32 = vpop.f32.mrf.mxu2 }
 0x83b   :  { %v8666_v47 = vmul.f32 3.3333333, %v8650_v38 }
 0x83c   :  { %v8628_v29 = vpop.f32.mrf.mxu3 }
 0x83d   :  { %v8680_v5 = vrot.slane %v8666_v47, 2 }
 0x83f   :  { %v8686_v48 = vsel %vm8682_vm10, %v8679_v41, %v8680_v5 }
 0x840   :  { %v8687_v22 = vsel %vm717_vm8, %v15751_v42, %v8686_v48 }
 0x841   :  { %v8691_v33 = vsel %vm8658_vm12, %v8687_v22, 0.0 }
 0x842   :  { %8696 = vst [vmem:[#allocation1 + $0x20] ss:$4 sm:$0xff] %v8691_v33 }
 0x849   :  { %v8701_v25 = vld.sshfl [vmem:[#allocation1 + $0x20] sm:$0xff pattern:$0x73625140]  ;;  %v8702_v35 = vld.sshfl [vmem:[#allocation1 + $0x28] sm:$0xff pattern:$0x73625140] }
 0x84a   :  { %v9246_v9 = vpop.f32.mrf.mxu1  ;;  %v8717_v52 = vpack.c.bf16 %v8701_v25, %v8701_v25  ;;  %v8718_v59 = vpack.c.bf16 %v8702_v35, %v8702_v35  ;;  %v8703_v43 = vld.sshfl [vmem:[#allocation1 + $0x30] sm:$0xff pattern:$0x73625140]  ;;  %v8704_v51 = vld.sshfl [vmem:[#allocation1 + $0x38] sm:$0xff pattern:$0x73625140] }
 0x84b   :  { %v8719_v24 = vpack.c.bf16 %v8703_v43, %v8703_v43  ;;  %v8720_v4 = vpack.c.bf16 %v8704_v51, %v8704_v51  ;;  %v9247_v1 = vadd.f32 %v14824_v15, %v9246_v9 }
 0x84c   :  { %9297 = vmatmul.bf16.vlgmr.msrb.gmra.mxu1 %v8717_v52  ;;  %9310 = vmatmul.bf16.vlgmr.msrb.gmra.mxu2 %v8718_v59 }
 0x84d   :  { %9323 = vmatmul.bf16.vlgmr.msrb.gmra.mxu3 %v8719_v24  ;;  %9336 = vmatmul.bf16.vlgmr.msra.gmra.mxu0 %v8720_v4 }
 0x850   :  { %v9285_v56 = vpop.f32.mrf.mxu0 }
 0x852   :  { %v9259_v45 = vpop.f32.mrf.mxu2  ;;  %v9248_v42 = vpop.f32.mrf.mxu1 }
 0x853   :  { %v9260_v50 = vadd.f32 %v9259_v45, %v9247_v1 }
 0x854   :  { %v9272_v27 = vpop.f32.mrf.mxu3 }
 0x855   :  { %v9273_v6 = vadd.f32 %v9272_v27, %v9260_v50 }
 0x857   :  { %v9286_v14 = vadd.f32 %v9285_v56, %v9273_v6 }
 0x858   :  { %v9287_v21 = vpop.f32.mrf.mxu0 }
 0x85a   :  { %v9261_v7 = vpop.f32.mrf.mxu2 }
 0x85c   :  { %v9274_v13 = vpop.f32.mrf.mxu3 }
 0x8c9   :  { %v9298_v23 = vpop.f32.mrf.mxu1 }
 0x8ca   :  { %v9337_v16 = vpop.f32.mrf.mxu0  ;;  %v9299_v10 = vadd.f32 %v9298_v23, %v9286_v14 }
 0x8cf   :  { %v9311_v18 = vpop.f32.mrf.mxu2 }
 0x8d0   :  { %v9312_v0 = vadd.f32 %v9311_v18, %v9299_v10  ;;  %v9324_v57 = vpop.f32.mrf.mxu3 }
 0x8d1   :  { %v9300_v44 = vpop.f32.mrf.mxu1 }
 0x8d2   :  { %v9325_v36 = vadd.f32 %v9324_v57, %v9312_v0  ;;  %v9339_v40 = vpop.f32.mrf.mxu0 }
 0x8d4   :  { %v9338_v20 = vadd.f32 %v9337_v16, %v9325_v36 }
 0x8d6   :  { %9341 = vst [vmem:[#allocation14] sm:$0x3] %v9338_v20 }
 0x8d7   :  { %v9313_v39 = vpop.f32.mrf.mxu2  ;;  %9352 = dma.vmem_to_hbm [thread:$0]  %s9348_s14, 32, %s9350_s16, [#allocation4]  }
 0x8d8   :  { %v9326_v17 = vpop.f32.mrf.mxu3 }
 0x8d9   :  { %15030 = dma.done.wait [#allocation4], 32  }
 0x8da   :  { %15031 = vsyncadd [#allocation4], 4294967264 }
 0x8db   :  { %9357 = vsyncpa [#allocation3], 1 }
 0x8dc   :  { %9358 = vsyncpa [#allocation6], 1 }
 0x8dd   :  { %9359 = vsyncpa [#allocation9], 1 }
 0x8de   :  { %9360 = vsyncpa [#allocation12], 1 }
 0x8df   :  { %9361 = vsyncpa [#allocation4], 1 }

</bundles_post_ra>
